<compile_context>
chip_gen: v7x
topology: tpu7x:2x2x1
jax: 0.10.0
libtpu: 0.0.40
codegen_flags: <defaults>
</compile_context>

<pallas_src>
import functools

import jax
import jax.numpy as jnp
from jax.experimental import pallas as pl
from jax.experimental.pallas import tpu as pltpu

_C = 128  # on-chip channel width (conv2/conv3 channels zero-padded to 128)


# --------------------------- in-kernel helpers --------------------------------

def _bn_act(x, gamma, beta, eps, relu):
    """Training-mode BatchNorm over rows (= all B*H*W pixels), biased variance.
    Two-pass (mean, then centered var) in f32, normalization folded into a
    single FMA, ReLU fused."""
    n = x.shape[0]
    mean = jnp.sum(x, axis=0, keepdims=True) * (1.0 / n)
    d = x - mean
    var = jnp.sum(d * d, axis=0, keepdims=True) * (1.0 / n)
    a = gamma * jax.lax.rsqrt(var + eps)
    y = d * a + beta
    return jnp.maximum(y, 0.0) if relu else y


def _upsample2x(x, H, W, B):
    """Nearest-neighbour 2x upsample.
    x: (H*W*B, C) flat, pixel-major rows (y, x, b) -> (2H, 2W*B, C).
    Pure concatenate + row-major-preserving reshapes (lane dim C untouched),
    no gather matrices, no MXU work."""
    C = x.shape[-1]
    x = x.reshape(H, W, 1, B, C)
    x = jnp.concatenate([x, x], axis=2).reshape(H, 1, 2 * W, B, C)    # column dup
    x = jnp.concatenate([x, x], axis=1).reshape(2 * H, 2 * W * B, C)  # row dup
    return x


def _pad_same(x3, B):
    """Zero border of one pixel for a 3x3 'same' conv.
    x3: (H, W*B, C) pixel-major -> (H+2, (W+2)*B, C)."""
    H, WB, C = x3.shape
    zc = jnp.zeros((H, B, C), x3.dtype)
    x3 = jnp.concatenate([zc, x3, zc], axis=1)
    zr = jnp.zeros((1, WB + 2 * B, C), x3.dtype)
    return jnp.concatenate([zr, x3, zr], axis=0)


def _conv3x3(xpad, w_ref, b_ref, H, W, B):
    """3x3 'same' conv via shift-and-accumulate over the 9 taps (no im2col slab).
    xpad: (H+2, (W+2)*B, C) bf16 zero-padded input, pixel-major (y, x, b).
    w_ref: (3, 3, C, Cout) bf16 HWIO.  b_ref: (1, Cout) f32.
    Returns (H*W*B, Cout) f32."""
    acc = None
    for dy in range(3):
        for dx in range(3):
            patch = xpad[dy:dy + H, dx * B:(dx + W) * B, :].reshape(H * W * B, _C)
            part = jnp.dot(patch, w_ref[dy, dx],
                           preferred_element_type=jnp.float32)
            acc = part if acc is None else acc + part
    return acc + b_ref[...]


# ------------------------------ fused kernel ----------------------------------

def _generator_kernel(labels_ref, noise_ref, emb_ref, w1_ref, b1_ref,
                      g0_ref, be0_ref,
                      wc1_ref, bc1_ref, g1_ref, be1_ref,
                      wc2_ref, bc2_ref, g2_ref, be2_ref,
                      wc3_ref, bc3_ref,
                      out_ref, *, B, s, out_channels):
    f32 = jnp.float32
    bf16 = jnp.bfloat16
    NC = emb_ref.shape[0]

    # --- embedding lookup (one-hot matmul, exact) * noise, then Linear --------
    labels = labels_ref[...]                                        # (B, 1) int32
    onehot = jnp.where(
        jax.lax.broadcasted_iota(jnp.int32, (B, NC), 1) == labels, 1.0, 0.0)
    emb_sel = jnp.dot(onehot, emb_ref[...], preferred_element_type=f32,
                      precision=jax.lax.Precision.HIGHEST)          # (B, Z)
    gen = emb_sel * noise_ref[...]
    lin = jnp.dot(gen, w1_ref[...],
                  preferred_element_type=f32) + b1_ref[...]         # (B, s*s*C)

    # --- relayout (B, s*s*C) -> (s*s*B, C), pixel-major rows (y, x, b) --------
    # (linear weight columns are pre-permuted to (pixel, channel) order, so this
    #  is just s*s lane-aligned 128-wide slices stacked along the row axis)
    x = jnp.concatenate([lin[:, p * _C:(p + 1) * _C] for p in range(s * s)],
                        axis=0)

    # --- BN0 (eps=1e-5) --------------------------------------------------------
    x = _bn_act(x, g0_ref[...], be0_ref[...], 1e-5, relu=False)

    # --- up x2 -> conv1 (128->128) -> BN(0.8) + ReLU ----------------------------
    H1 = 2 * s
    xp = _pad_same(_upsample2x(x.astype(bf16), s, s, B), B)
    x = _conv3x3(xp, wc1_ref, bc1_ref, H1, H1, B)
    x = _bn_act(x, g1_ref[...], be1_ref[...], 0.8, relu=True)

    # --- up x2 -> conv2 (128->64, lanes padded to 128) -> BN(0.8) + ReLU --------
    H2 = 4 * s
    xp = _pad_same(_upsample2x(x.astype(bf16), H1, H1, B), B)
    x = _conv3x3(xp, wc2_ref, bc2_ref, H2, H2, B)
    x = _bn_act(x, g2_ref[...], be2_ref[...], 0.8, relu=True)       # padded ch -> 0

    # --- pad -> conv3 (64->out_channels) -> tanh on real channels only ----------
    xp = _pad_same(x.astype(bf16).reshape(H2, H2 * B, _C), B)
    x = _conv3x3(xp, wc3_ref, bc3_ref, H2, H2, B)
    out_ref[...] = jnp.tanh(x[:, :out_channels])                    # (H2*H2*B, 3)


# ------------------------ parameters & wrappers --------------------------------

def init_params(key, z_dim, n_class, img_size, out_channels):
    s = img_size // 4
    l1_out = 128 * s * s
    ks = jax.random.split(key, 10)
    f32 = jnp.float32
    return {
        "emb":     jax.random.normal(ks[0], (n_class, z_dim), f32),
        "l1_w":    jax.random.normal(ks[1], (z_dim, l1_out), f32) * 0.05,
        "l1_b":    jax.random.normal(ks[2], (1, l1_out), f32) * 0.05,
        "bn0_g":   jnp.ones((1, 128), f32),  "bn0_b": jnp.zeros((1, 128), f32),
        "conv1_w": jax.random.normal(ks[3], (3, 3, 128, 128), f32) * 0.05,
        "conv1_b": jax.random.normal(ks[4], (1, 128), f32) * 0.05,
        "bn1_g":   jnp.ones((1, 128), f32),  "bn1_b": jnp.zeros((1, 128), f32),
        "conv2_w": jax.random.normal(ks[5], (3, 3, 128, 64), f32) * 0.05,
        "conv2_b": jax.random.normal(ks[6], (1, 64), f32) * 0.05,
        "bn2_g":   jnp.ones((1, 64), f32),   "bn2_b": jnp.zeros((1, 64), f32),
        "conv3_w": jax.random.normal(ks[7], (3, 3, 64, out_channels), f32) * 0.05,
        "conv3_b": jax.random.normal(ks[8], (1, out_channels), f32) * 0.05,
    }


def prepare_params(p, *, z_dim, img_size, out_channels):
    """One-time (trace-time) weight repacking: permute the linear weights to the
    pixel-major column order, zero-pad conv2/conv3 channels to 128 lanes, and
    cast conv weights to bf16 (f32 accumulation happens in-kernel)."""
    s = img_size // 4
    bf16 = jnp.bfloat16
    c2 = p["conv2_w"].shape[-1]                                     # 64
    w1 = p["l1_w"].reshape(z_dim, _C, s * s).transpose(0, 2, 1).reshape(
        z_dim, s * s * _C)
    b1 = p["l1_b"].reshape(1, _C, s * s).transpose(0, 2, 1).reshape(
        1, s * s * _C)
    wc2 = jnp.pad(p["conv2_w"], ((0, 0), (0, 0), (0, 0), (0, _C - c2)))
    bc2 = jnp.pad(p["conv2_b"], ((0, 0), (0, _C - c2)))
    g2 = jnp.pad(p["bn2_g"], ((0, 0), (0, _C - c2)), constant_values=1.0)
    be2 = jnp.pad(p["bn2_b"], ((0, 0), (0, _C - c2)))
    wc3 = jnp.pad(p["conv3_w"],
                  ((0, 0), (0, 0), (0, _C - c2), (0, _C - out_channels)))
    bc3 = jnp.pad(p["conv3_b"], ((0, 0), (0, _C - out_channels)))
    return dict(
        emb=p["emb"],
        w1=w1, b1=b1,                          # linear kept f32 (tiny, BN0 eps=1e-5)
        g0=p["bn0_g"], be0=p["bn0_b"],
        wc1=p["conv1_w"].astype(bf16), bc1=p["conv1_b"],
        g1=p["bn1_g"], be1=p["bn1_b"],
        wc2=wc2.astype(bf16), bc2=bc2, g2=g2, be2=be2,
        wc3=wc3.astype(bf16), bc3=bc3)


def generator_forward(prepared, noise, labels, *, img_size, out_channels):
    B = noise.shape[0]
    s = img_size // 4
    labels2d = labels.reshape(B, 1).astype(jnp.int32)
    kernel = functools.partial(_generator_kernel, B=B, s=s,
                               out_channels=out_channels)
    flat = pl.pallas_call(
        kernel,
        out_shape=jax.ShapeDtypeStruct((B * img_size * img_size, out_channels),
                                       jnp.float32),
        compiler_params=pltpu.CompilerParams(
            vmem_limit_bytes=16 * 1024 * 1024),
    )(labels2d, noise,
      prepared["emb"], prepared["w1"], prepared["b1"],
      prepared["g0"], prepared["be0"],
      prepared["wc1"], prepared["bc1"], prepared["g1"], prepared["be1"],
      prepared["wc2"], prepared["bc2"], prepared["g2"], prepared["be2"],
      prepared["wc3"], prepared["bc3"])
    # rows are pixel-major (y, x, b) -> NCHW
    img = flat.reshape(img_size, img_size, B, out_channels)
    return img.transpose(2, 3, 0, 1)


# ------------------------ pure-JAX reference (sanity) --------------------------

def _ref_forward(params, noise, labels, *, img_size):
    s = img_size // 4
    B = noise.shape[0]
    emb = params["emb"][labels]
    out = (emb * noise) @ params["l1_w"] + params["l1_b"]
    x = out.reshape(B, 128, s, s).transpose(0, 2, 3, 1)

    def bn(x, g, b, eps, relu):
        m = x.mean(axis=(0, 1, 2), keepdims=True)
        v = ((x - m) ** 2).mean(axis=(0, 1, 2), keepdims=True)
        y = (x - m) / jnp.sqrt(v + eps) * g.reshape(1, 1, 1, -1) + b.reshape(1, 1, 1, -1)
        return jnp.maximum(y, 0.0) if relu else y

    def conv(x, w, b):
        y = jax.lax.conv_general_dilated(
            x, w, (1, 1), "SAME", dimension_numbers=("NHWC", "HWIO", "NHWC"))
        return y + b.reshape(1, 1, 1, -1)

    def up(x):
        return jnp.repeat(jnp.repeat(x, 2, axis=1), 2, axis=2)

    x = bn(x, params["bn0_g"], params["bn0_b"], 1e-5, False)
    x = conv(up(x), params["conv1_w"], params["conv1_b"])
    x = bn(x, params["bn1_g"], params["bn1_b"], 0.8, True)
    x = conv(up(x), params["conv2_w"], params["conv2_b"])
    x = bn(x, params["bn2_g"], params["bn2_b"], 0.8, True)
    x = jnp.tanh(conv(x, params["conv3_w"], params["conv3_b"]))
    return x.transpose(0, 3, 1, 2)


# ------------------------------------ main -------------------------------------

if __name__ == "__main__":
    z_dim, n_class, img_size, out_channels = 32, 10, 16, 3   # init_size = 4
    batch = 2

    key = jax.random.PRNGKey(0)
    k_params, k_noise, k_labels = jax.random.split(key, 3)
    params = init_params(k_params, z_dim, n_class, img_size, out_channels)
    prepared = prepare_params(params, z_dim=z_dim, img_size=img_size,
                              out_channels=out_channels)
    noise = jax.random.normal(k_noise, (batch, z_dim), jnp.float32)
    labels = jax.random.randint(k_labels, (batch,), 0, n_class)

    fwd = jax.jit(functools.partial(generator_forward,
                                    img_size=img_size, out_channels=out_channels))
    img = jax.block_until_ready(fwd(prepared, noise, labels))

    assert img.shape == (batch, out_channels, img_size, img_size), img.shape
    ref = _ref_forward(params, noise, labels, img_size=img_size)
    err = float(jnp.max(jnp.abs(img - ref)))
    assert jnp.allclose(img, ref, atol=2e-2, rtol=2e-2), err
    print("KERNEL_OK")
</pallas_src>

<mosaic_0001>
module attributes {stable_mosaic.version = 11 : i64} {
  func.func @_generator_kernel(%arg0: memref<2x1xi32, #tpu.memory_space<vmem>>, %arg1: memref<2x32xf32, #tpu.memory_space<vmem>>, %arg2: memref<10x32xf32, #tpu.memory_space<vmem>>, %arg3: memref<32x2048xf32, #tpu.memory_space<vmem>>, %arg4: memref<1x2048xf32, #tpu.memory_space<vmem>>, %arg5: memref<1x128xf32, #tpu.memory_space<vmem>>, %arg6: memref<1x128xf32, #tpu.memory_space<vmem>>, %arg7: memref<3x3x128x128xbf16, #tpu.memory_space<vmem>>, %arg8: memref<1x128xf32, #tpu.memory_space<vmem>>, %arg9: memref<1x128xf32, #tpu.memory_space<vmem>>, %arg10: memref<1x128xf32, #tpu.memory_space<vmem>>, %arg11: memref<3x3x128x128xbf16, #tpu.memory_space<vmem>>, %arg12: memref<1x128xf32, #tpu.memory_space<vmem>>, %arg13: memref<1x128xf32, #tpu.memory_space<vmem>>, %arg14: memref<1x128xf32, #tpu.memory_space<vmem>>, %arg15: memref<3x3x128x128xbf16, #tpu.memory_space<vmem>>, %arg16: memref<1x128xf32, #tpu.memory_space<vmem>>, %arg17: memref<512x3xf32, #tpu.memory_space<vmem>>) attributes {dimension_semantics = [], scalar_prefetch = 0 : i64, scratch_operands = 0 : i64, tpu.core_type = #tpu.core_type<tc>} {
    %c0 = arith.constant 0 : index
    %c0_0 = arith.constant 0 : index
    %0 = vector.load %arg0[%c0, %c0_0] : memref<2x1xi32, #tpu.memory_space<vmem>>, vector<2x1xi32>
    %1 = tpu.iota {dimensions = array<i32: 1>} : vector<2x10xi32>
    %2 = vector.broadcast %0 : vector<2x1xi32> to vector<2x10xi32>
    %3 = arith.cmpi eq, %1, %2 : vector<2x10xi32>
    %cst = arith.constant 1.000000e+00 : f32
    %cst_1 = arith.constant 0.000000e+00 : f32
    %4 = vector.broadcast %cst : f32 to vector<2x10xf32>
    %5 = vector.broadcast %cst_1 : f32 to vector<2x10xf32>
    %6 = arith.select %3, %4, %5 : vector<2x10xi1>, vector<2x10xf32>
    %c0_2 = arith.constant 0 : index
    %c0_3 = arith.constant 0 : index
    %7 = vector.load %arg2[%c0_2, %c0_3] : memref<10x32xf32, #tpu.memory_space<vmem>>, vector<10x32xf32>
    %cst_4 = arith.constant dense<0.000000e+00> : vector<2x32xf32>
    %8 = tpu.matmul %6, %7, %cst_4 {dimension_numbers = #tpu.dot_dimension_numbers<[1], [0], [0], [1], [0, 0, 1, 1], [], []>, precision = #tpu.contract_precision<fp32>} : vector<2x10xf32>, vector<10x32xf32>, vector<2x32xf32> -> vector<2x32xf32>
    %c0_5 = arith.constant 0 : index
    %c0_6 = arith.constant 0 : index
    %9 = vector.load %arg1[%c0_5, %c0_6] : memref<2x32xf32, #tpu.memory_space<vmem>>, vector<2x32xf32>
    %10 = arith.mulf %8, %9 : vector<2x32xf32>
    %c0_7 = arith.constant 0 : index
    %c0_8 = arith.constant 0 : index
    %11 = vector.load %arg3[%c0_7, %c0_8] : memref<32x2048xf32, #tpu.memory_space<vmem>>, vector<32x2048xf32>
    %cst_9 = arith.constant dense<0.000000e+00> : vector<2x2048xf32>
    %12 = tpu.matmul %10, %11, %cst_9 {dimension_numbers = #tpu.dot_dimension_numbers<[1], [0], [0], [1], [0, 0, 1, 1], [], []>} : vector<2x32xf32>, vector<32x2048xf32>, vector<2x2048xf32> -> vector<2x2048xf32>
    %c0_10 = arith.constant 0 : index
    %c0_11 = arith.constant 0 : index
    %13 = vector.load %arg4[%c0_10, %c0_11] : memref<1x2048xf32, #tpu.memory_space<vmem>>, vector<1x2048xf32>
    %14 = vector.broadcast %13 : vector<1x2048xf32> to vector<2x2048xf32>
    %15 = arith.addf %12, %14 : vector<2x2048xf32>
    %16 = vector.extract_strided_slice %15 {offsets = [0, 0], sizes = [2, 128], strides = [1, 1]} : vector<2x2048xf32> to vector<2x128xf32>
    %17 = vector.extract_strided_slice %15 {offsets = [0, 128], sizes = [2, 128], strides = [1, 1]} : vector<2x2048xf32> to vector<2x128xf32>
    %18 = vector.extract_strided_slice %15 {offsets = [0, 256], sizes = [2, 128], strides = [1, 1]} : vector<2x2048xf32> to vector<2x128xf32>
    %19 = vector.extract_strided_slice %15 {offsets = [0, 384], sizes = [2, 128], strides = [1, 1]} : vector<2x2048xf32> to vector<2x128xf32>
    %20 = vector.extract_strided_slice %15 {offsets = [0, 512], sizes = [2, 128], strides = [1, 1]} : vector<2x2048xf32> to vector<2x128xf32>
    %21 = vector.extract_strided_slice %15 {offsets = [0, 640], sizes = [2, 128], strides = [1, 1]} : vector<2x2048xf32> to vector<2x128xf32>
    %22 = vector.extract_strided_slice %15 {offsets = [0, 768], sizes = [2, 128], strides = [1, 1]} : vector<2x2048xf32> to vector<2x128xf32>
    %23 = vector.extract_strided_slice %15 {offsets = [0, 896], sizes = [2, 128], strides = [1, 1]} : vector<2x2048xf32> to vector<2x128xf32>
    %24 = vector.extract_strided_slice %15 {offsets = [0, 1024], sizes = [2, 128], strides = [1, 1]} : vector<2x2048xf32> to vector<2x128xf32>
    %25 = vector.extract_strided_slice %15 {offsets = [0, 1152], sizes = [2, 128], strides = [1, 1]} : vector<2x2048xf32> to vector<2x128xf32>
    %26 = vector.extract_strided_slice %15 {offsets = [0, 1280], sizes = [2, 128], strides = [1, 1]} : vector<2x2048xf32> to vector<2x128xf32>
    %27 = vector.extract_strided_slice %15 {offsets = [0, 1408], sizes = [2, 128], strides = [1, 1]} : vector<2x2048xf32> to vector<2x128xf32>
    %28 = vector.extract_strided_slice %15 {offsets = [0, 1536], sizes = [2, 128], strides = [1, 1]} : vector<2x2048xf32> to vector<2x128xf32>
    %29 = vector.extract_strided_slice %15 {offsets = [0, 1664], sizes = [2, 128], strides = [1, 1]} : vector<2x2048xf32> to vector<2x128xf32>
    %30 = vector.extract_strided_slice %15 {offsets = [0, 1792], sizes = [2, 128], strides = [1, 1]} : vector<2x2048xf32> to vector<2x128xf32>
    %31 = vector.extract_strided_slice %15 {offsets = [0, 1920], sizes = [2, 128], strides = [1, 1]} : vector<2x2048xf32> to vector<2x128xf32>
    %32 = tpu.concatenate %16, %17, %18, %19, %20, %21, %22, %23, %24, %25, %26, %27, %28, %29, %30, %31 in 0 : vector<2x128xf32>, vector<2x128xf32>, vector<2x128xf32>, vector<2x128xf32>, vector<2x128xf32>, vector<2x128xf32>, vector<2x128xf32>, vector<2x128xf32>, vector<2x128xf32>, vector<2x128xf32>, vector<2x128xf32>, vector<2x128xf32>, vector<2x128xf32>, vector<2x128xf32>, vector<2x128xf32>, vector<2x128xf32> -> vector<32x128xf32>
    %c0_12 = arith.constant 0 : index
    %c0_13 = arith.constant 0 : index
    %33 = vector.load %arg5[%c0_12, %c0_13] : memref<1x128xf32, #tpu.memory_space<vmem>>, vector<1x128xf32>
    %c0_14 = arith.constant 0 : index
    %c0_15 = arith.constant 0 : index
    %34 = vector.load %arg6[%c0_14, %c0_15] : memref<1x128xf32, #tpu.memory_space<vmem>>, vector<1x128xf32>
    %cst_16 = arith.constant dense<0.000000e+00> : vector<128xf32>
    %35 = vector.multi_reduction <add>, %32, %cst_16 [0] : vector<32x128xf32> to vector<128xf32>
    %36 = vector.shape_cast %35 : vector<128xf32> to vector<1x128xf32>
    %cst_17 = arith.constant 3.125000e-02 : f32
    %37 = vector.broadcast %cst_17 : f32 to vector<1x128xf32>
    %38 = arith.mulf %36, %37 : vector<1x128xf32>
    %39 = vector.broadcast %38 : vector<1x128xf32> to vector<32x128xf32>
    %40 = arith.subf %32, %39 : vector<32x128xf32>
    %41 = arith.mulf %40, %40 : vector<32x128xf32>
    %cst_18 = arith.constant dense<0.000000e+00> : vector<128xf32>
    %42 = vector.multi_reduction <add>, %41, %cst_18 [0] : vector<32x128xf32> to vector<128xf32>
    %43 = vector.shape_cast %42 : vector<128xf32> to vector<1x128xf32>
    %cst_19 = arith.constant 3.125000e-02 : f32
    %44 = vector.broadcast %cst_19 : f32 to vector<1x128xf32>
    %45 = arith.mulf %43, %44 : vector<1x128xf32>
    %cst_20 = arith.constant 9.99999974E-6 : f32
    %46 = vector.broadcast %cst_20 : f32 to vector<1x128xf32>
    %47 = arith.addf %45, %46 : vector<1x128xf32>
    %48 = math.rsqrt %47 : vector<1x128xf32>
    %49 = arith.mulf %33, %48 : vector<1x128xf32>
    %50 = vector.broadcast %49 : vector<1x128xf32> to vector<32x128xf32>
    %51 = arith.mulf %40, %50 : vector<32x128xf32>
    %52 = vector.broadcast %34 : vector<1x128xf32> to vector<32x128xf32>
    %53 = arith.addf %51, %52 : vector<32x128xf32>
    %54 = arith.truncf %53 : vector<32x128xf32> to vector<32x128xbf16>
    %55 = vector.shape_cast %54 : vector<32x128xbf16> to vector<4x4x1x2x128xbf16>
    %56 = tpu.concatenate %55, %55 in 2 : vector<4x4x1x2x128xbf16>, vector<4x4x1x2x128xbf16> -> vector<4x4x2x2x128xbf16>
    %57 = vector.shape_cast %56 : vector<4x4x2x2x128xbf16> to vector<4x1x8x2x128xbf16>
    %58 = tpu.concatenate %57, %57 in 1 : vector<4x1x8x2x128xbf16>, vector<4x1x8x2x128xbf16> -> vector<4x2x8x2x128xbf16>
    %59 = vector.shape_cast %58 : vector<4x2x8x2x128xbf16> to vector<8x16x128xbf16>
    %cst_21 = arith.constant 0.000000e+00 : bf16
    %60 = vector.broadcast %cst_21 : bf16 to vector<8x2x128xbf16>
    %61 = tpu.concatenate %60, %59, %60 in 1 : vector<8x2x128xbf16>, vector<8x16x128xbf16>, vector<8x2x128xbf16> -> vector<8x20x128xbf16>
    %cst_22 = arith.constant 0.000000e+00 : bf16
    %62 = vector.broadcast %cst_22 : bf16 to vector<1x20x128xbf16>
    %63 = tpu.concatenate %62, %61, %62 in 0 : vector<1x20x128xbf16>, vector<8x20x128xbf16>, vector<1x20x128xbf16> -> vector<10x20x128xbf16>
    %64 = vector.extract_strided_slice %63 {offsets = [0, 0, 0], sizes = [8, 16, 128], strides = [1, 1, 1]} : vector<10x20x128xbf16> to vector<8x16x128xbf16>
    %65 = vector.shape_cast %64 : vector<8x16x128xbf16> to vector<128x128xbf16>
    %c0_23 = arith.constant 0 : index
    %c0_24 = arith.constant 0 : index
    %c0_25 = arith.constant 0 : index
    %c0_26 = arith.constant 0 : index
    %66 = vector.load %arg7[%c0_23, %c0_24, %c0_25, %c0_26] : memref<3x3x128x128xbf16, #tpu.memory_space<vmem>>, vector<1x1x128x128xbf16>
    %67 = vector.shape_cast %66 : vector<1x1x128x128xbf16> to vector<128x128xbf16>
    %cst_27 = arith.constant dense<0.000000e+00> : vector<128x128xf32>
    %68 = tpu.matmul %65, %67, %cst_27 {dimension_numbers = #tpu.dot_dimension_numbers<[1], [0], [0], [1], [0, 0, 1, 1], [], []>} : vector<128x128xbf16>, vector<128x128xbf16>, vector<128x128xf32> -> vector<128x128xf32>
    %69 = vector.extract_strided_slice %63 {offsets = [0, 2, 0], sizes = [8, 16, 128], strides = [1, 1, 1]} : vector<10x20x128xbf16> to vector<8x16x128xbf16>
    %70 = vector.shape_cast %69 : vector<8x16x128xbf16> to vector<128x128xbf16>
    %c0_28 = arith.constant 0 : index
    %c1 = arith.constant 1 : index
    %c0_29 = arith.constant 0 : index
    %c0_30 = arith.constant 0 : index
    %71 = vector.load %arg7[%c0_28, %c1, %c0_29, %c0_30] : memref<3x3x128x128xbf16, #tpu.memory_space<vmem>>, vector<1x1x128x128xbf16>
    %72 = vector.shape_cast %71 : vector<1x1x128x128xbf16> to vector<128x128xbf16>
    %cst_31 = arith.constant dense<0.000000e+00> : vector<128x128xf32>
    %73 = tpu.matmul %70, %72, %cst_31 {dimension_numbers = #tpu.dot_dimension_numbers<[1], [0], [0], [1], [0, 0, 1, 1], [], []>} : vector<128x128xbf16>, vector<128x128xbf16>, vector<128x128xf32> -> vector<128x128xf32>
    %74 = arith.addf %68, %73 : vector<128x128xf32>
    %75 = vector.extract_strided_slice %63 {offsets = [0, 4, 0], sizes = [8, 16, 128], strides = [1, 1, 1]} : vector<10x20x128xbf16> to vector<8x16x128xbf16>
    %76 = vector.shape_cast %75 : vector<8x16x128xbf16> to vector<128x128xbf16>
    %c0_32 = arith.constant 0 : index
    %c2 = arith.constant 2 : index
    %c0_33 = arith.constant 0 : index
    %c0_34 = arith.constant 0 : index
    %77 = vector.load %arg7[%c0_32, %c2, %c0_33, %c0_34] : memref<3x3x128x128xbf16, #tpu.memory_space<vmem>>, vector<1x1x128x128xbf16>
    %78 = vector.shape_cast %77 : vector<1x1x128x128xbf16> to vector<128x128xbf16>
    %cst_35 = arith.constant dense<0.000000e+00> : vector<128x128xf32>
    %79 = tpu.matmul %76, %78, %cst_35 {dimension_numbers = #tpu.dot_dimension_numbers<[1], [0], [0], [1], [0, 0, 1, 1], [], []>} : vector<128x128xbf16>, vector<128x128xbf16>, vector<128x128xf32> -> vector<128x128xf32>
    %80 = arith.addf %74, %79 : vector<128x128xf32>
    %81 = vector.extract_strided_slice %63 {offsets = [1, 0, 0], sizes = [8, 16, 128], strides = [1, 1, 1]} : vector<10x20x128xbf16> to vector<8x16x128xbf16>
    %82 = vector.shape_cast %81 : vector<8x16x128xbf16> to vector<128x128xbf16>
    %c1_36 = arith.constant 1 : index
    %c0_37 = arith.constant 0 : index
    %c0_38 = arith.constant 0 : index
    %c0_39 = arith.constant 0 : index
    %83 = vector.load %arg7[%c1_36, %c0_37, %c0_38, %c0_39] : memref<3x3x128x128xbf16, #tpu.memory_space<vmem>>, vector<1x1x128x128xbf16>
    %84 = vector.shape_cast %83 : vector<1x1x128x128xbf16> to vector<128x128xbf16>
    %cst_40 = arith.constant dense<0.000000e+00> : vector<128x128xf32>
    %85 = tpu.matmul %82, %84, %cst_40 {dimension_numbers = #tpu.dot_dimension_numbers<[1], [0], [0], [1], [0, 0, 1, 1], [], []>} : vector<128x128xbf16>, vector<128x128xbf16>, vector<128x128xf32> -> vector<128x128xf32>
    %86 = arith.addf %80, %85 : vector<128x128xf32>
    %87 = vector.extract_strided_slice %63 {offsets = [1, 2, 0], sizes = [8, 16, 128], strides = [1, 1, 1]} : vector<10x20x128xbf16> to vector<8x16x128xbf16>
    %88 = vector.shape_cast %87 : vector<8x16x128xbf16> to vector<128x128xbf16>
    %c1_41 = arith.constant 1 : index
    %c1_42 = arith.constant 1 : index
    %c0_43 = arith.constant 0 : index
    %c0_44 = arith.constant 0 : index
    %89 = vector.load %arg7[%c1_41, %c1_42, %c0_43, %c0_44] : memref<3x3x128x128xbf16, #tpu.memory_space<vmem>>, vector<1x1x128x128xbf16>
    %90 = vector.shape_cast %89 : vector<1x1x128x128xbf16> to vector<128x128xbf16>
    %cst_45 = arith.constant dense<0.000000e+00> : vector<128x128xf32>
    %91 = tpu.matmul %88, %90, %cst_45 {dimension_numbers = #tpu.dot_dimension_numbers<[1], [0], [0], [1], [0, 0, 1, 1], [], []>} : vector<128x128xbf16>, vector<128x128xbf16>, vector<128x128xf32> -> vector<128x128xf32>
    %92 = arith.addf %86, %91 : vector<128x128xf32>
    %93 = vector.extract_strided_slice %63 {offsets = [1, 4, 0], sizes = [8, 16, 128], strides = [1, 1, 1]} : vector<10x20x128xbf16> to vector<8x16x128xbf16>
    %94 = vector.shape_cast %93 : vector<8x16x128xbf16> to vector<128x128xbf16>
    %c1_46 = arith.constant 1 : index
    %c2_47 = arith.constant 2 : index
    %c0_48 = arith.constant 0 : index
    %c0_49 = arith.constant 0 : index
    %95 = vector.load %arg7[%c1_46, %c2_47, %c0_48, %c0_49] : memref<3x3x128x128xbf16, #tpu.memory_space<vmem>>, vector<1x1x128x128xbf16>
    %96 = vector.shape_cast %95 : vector<1x1x128x128xbf16> to vector<128x128xbf16>
    %cst_50 = arith.constant dense<0.000000e+00> : vector<128x128xf32>
    %97 = tpu.matmul %94, %96, %cst_50 {dimension_numbers = #tpu.dot_dimension_numbers<[1], [0], [0], [1], [0, 0, 1, 1], [], []>} : vector<128x128xbf16>, vector<128x128xbf16>, vector<128x128xf32> -> vector<128x128xf32>
    %98 = arith.addf %92, %97 : vector<128x128xf32>
    %99 = vector.extract_strided_slice %63 {offsets = [2, 0, 0], sizes = [8, 16, 128], strides = [1, 1, 1]} : vector<10x20x128xbf16> to vector<8x16x128xbf16>
    %100 = vector.shape_cast %99 : vector<8x16x128xbf16> to vector<128x128xbf16>
    %c2_51 = arith.constant 2 : index
    %c0_52 = arith.constant 0 : index
    %c0_53 = arith.constant 0 : index
    %c0_54 = arith.constant 0 : index
    %101 = vector.load %arg7[%c2_51, %c0_52, %c0_53, %c0_54] : memref<3x3x128x128xbf16, #tpu.memory_space<vmem>>, vector<1x1x128x128xbf16>
    %102 = vector.shape_cast %101 : vector<1x1x128x128xbf16> to vector<128x128xbf16>
    %cst_55 = arith.constant dense<0.000000e+00> : vector<128x128xf32>
    %103 = tpu.matmul %100, %102, %cst_55 {dimension_numbers = #tpu.dot_dimension_numbers<[1], [0], [0], [1], [0, 0, 1, 1], [], []>} : vector<128x128xbf16>, vector<128x128xbf16>, vector<128x128xf32> -> vector<128x128xf32>
    %104 = arith.addf %98, %103 : vector<128x128xf32>
    %105 = vector.extract_strided_slice %63 {offsets = [2, 2, 0], sizes = [8, 16, 128], strides = [1, 1, 1]} : vector<10x20x128xbf16> to vector<8x16x128xbf16>
    %106 = vector.shape_cast %105 : vector<8x16x128xbf16> to vector<128x128xbf16>
    %c2_56 = arith.constant 2 : index
    %c1_57 = arith.constant 1 : index
    %c0_58 = arith.constant 0 : index
    %c0_59 = arith.constant 0 : index
    %107 = vector.load %arg7[%c2_56, %c1_57, %c0_58, %c0_59] : memref<3x3x128x128xbf16, #tpu.memory_space<vmem>>, vector<1x1x128x128xbf16>
    %108 = vector.shape_cast %107 : vector<1x1x128x128xbf16> to vector<128x128xbf16>
    %cst_60 = arith.constant dense<0.000000e+00> : vector<128x128xf32>
    %109 = tpu.matmul %106, %108, %cst_60 {dimension_numbers = #tpu.dot_dimension_numbers<[1], [0], [0], [1], [0, 0, 1, 1], [], []>} : vector<128x128xbf16>, vector<128x128xbf16>, vector<128x128xf32> -> vector<128x128xf32>
    %110 = arith.addf %104, %109 : vector<128x128xf32>
    %111 = vector.extract_strided_slice %63 {offsets = [2, 4, 0], sizes = [8, 16, 128], strides = [1, 1, 1]} : vector<10x20x128xbf16> to vector<8x16x128xbf16>
    %112 = vector.shape_cast %111 : vector<8x16x128xbf16> to vector<128x128xbf16>
    %c2_61 = arith.constant 2 : index
    %c2_62 = arith.constant 2 : index
    %c0_63 = arith.constant 0 : index
    %c0_64 = arith.constant 0 : index
    %113 = vector.load %arg7[%c2_61, %c2_62, %c0_63, %c0_64] : memref<3x3x128x128xbf16, #tpu.memory_space<vmem>>, vector<1x1x128x128xbf16>
    %114 = vector.shape_cast %113 : vector<1x1x128x128xbf16> to vector<128x128xbf16>
    %cst_65 = arith.constant dense<0.000000e+00> : vector<128x128xf32>
    %115 = tpu.matmul %112, %114, %cst_65 {dimension_numbers = #tpu.dot_dimension_numbers<[1], [0], [0], [1], [0, 0, 1, 1], [], []>} : vector<128x128xbf16>, vector<128x128xbf16>, vector<128x128xf32> -> vector<128x128xf32>
    %116 = arith.addf %110, %115 : vector<128x128xf32>
    %c0_66 = arith.constant 0 : index
    %c0_67 = arith.constant 0 : index
    %117 = vector.load %arg8[%c0_66, %c0_67] : memref<1x128xf32, #tpu.memory_space<vmem>>, vector<1x128xf32>
    %118 = vector.broadcast %117 : vector<1x128xf32> to vector<128x128xf32>
    %119 = arith.addf %116, %118 : vector<128x128xf32>
    %c0_68 = arith.constant 0 : index
    %c0_69 = arith.constant 0 : index
    %120 = vector.load %arg9[%c0_68, %c0_69] : memref<1x128xf32, #tpu.memory_space<vmem>>, vector<1x128xf32>
    %c0_70 = arith.constant 0 : index
    %c0_71 = arith.constant 0 : index
    %121 = vector.load %arg10[%c0_70, %c0_71] : memref<1x128xf32, #tpu.memory_space<vmem>>, vector<1x128xf32>
    %cst_72 = arith.constant dense<0.000000e+00> : vector<128xf32>
    %122 = vector.multi_reduction <add>, %119, %cst_72 [0] : vector<128x128xf32> to vector<128xf32>
    %123 = vector.shape_cast %122 : vector<128xf32> to vector<1x128xf32>
    %cst_73 = arith.constant 7.812500e-03 : f32
    %124 = vector.broadcast %cst_73 : f32 to vector<1x128xf32>
    %125 = arith.mulf %123, %124 : vector<1x128xf32>
    %126 = vector.broadcast %125 : vector<1x128xf32> to vector<128x128xf32>
    %127 = arith.subf %119, %126 : vector<128x128xf32>
    %128 = arith.mulf %127, %127 : vector<128x128xf32>
    %cst_74 = arith.constant dense<0.000000e+00> : vector<128xf32>
    %129 = vector.multi_reduction <add>, %128, %cst_74 [0] : vector<128x128xf32> to vector<128xf32>
    %130 = vector.shape_cast %129 : vector<128xf32> to vector<1x128xf32>
    %cst_75 = arith.constant 7.812500e-03 : f32
    %131 = vector.broadcast %cst_75 : f32 to vector<1x128xf32>
    %132 = arith.mulf %130, %131 : vector<1x128xf32>
    %cst_76 = arith.constant 8.000000e-01 : f32
    %133 = vector.broadcast %cst_76 : f32 to vector<1x128xf32>
    %134 = arith.addf %132, %133 : vector<1x128xf32>
    %135 = math.rsqrt %134 : vector<1x128xf32>
    %136 = arith.mulf %120, %135 : vector<1x128xf32>
    %137 = vector.broadcast %136 : vector<1x128xf32> to vector<128x128xf32>
    %138 = arith.mulf %127, %137 : vector<128x128xf32>
    %139 = vector.broadcast %121 : vector<1x128xf32> to vector<128x128xf32>
    %140 = arith.addf %138, %139 : vector<128x128xf32>
    %cst_77 = arith.constant 0.000000e+00 : f32
    %141 = vector.broadcast %cst_77 : f32 to vector<128x128xf32>
    %142 = arith.maximumf %140, %141 : vector<128x128xf32>
    %143 = arith.truncf %142 : vector<128x128xf32> to vector<128x128xbf16>
    %144 = vector.shape_cast %143 : vector<128x128xbf16> to vector<8x8x1x2x128xbf16>
    %145 = tpu.concatenate %144, %144 in 2 : vector<8x8x1x2x128xbf16>, vector<8x8x1x2x128xbf16> -> vector<8x8x2x2x128xbf16>
    %146 = vector.shape_cast %145 : vector<8x8x2x2x128xbf16> to vector<8x1x16x2x128xbf16>
    %147 = tpu.concatenate %146, %146 in 1 : vector<8x1x16x2x128xbf16>, vector<8x1x16x2x128xbf16> -> vector<8x2x16x2x128xbf16>
    %148 = vector.shape_cast %147 : vector<8x2x16x2x128xbf16> to vector<16x32x128xbf16>
    %cst_78 = arith.constant 0.000000e+00 : bf16
    %149 = vector.broadcast %cst_78 : bf16 to vector<16x2x128xbf16>
    %150 = tpu.concatenate %149, %148, %149 in 1 : vector<16x2x128xbf16>, vector<16x32x128xbf16>, vector<16x2x128xbf16> -> vector<16x36x128xbf16>
    %cst_79 = arith.constant 0.000000e+00 : bf16
    %151 = vector.broadcast %cst_79 : bf16 to vector<1x36x128xbf16>
    %152 = tpu.concatenate %151, %150, %151 in 0 : vector<1x36x128xbf16>, vector<16x36x128xbf16>, vector<1x36x128xbf16> -> vector<18x36x128xbf16>
    %153 = vector.extract_strided_slice %152 {offsets = [0, 0, 0], sizes = [16, 32, 128], strides = [1, 1, 1]} : vector<18x36x128xbf16> to vector<16x32x128xbf16>
    %154 = vector.shape_cast %153 : vector<16x32x128xbf16> to vector<512x128xbf16>
    %c0_80 = arith.constant 0 : index
    %c0_81 = arith.constant 0 : index
    %c0_82 = arith.constant 0 : index
    %c0_83 = arith.constant 0 : index
    %155 = vector.load %arg11[%c0_80, %c0_81, %c0_82, %c0_83] : memref<3x3x128x128xbf16, #tpu.memory_space<vmem>>, vector<1x1x128x128xbf16>
    %156 = vector.shape_cast %155 : vector<1x1x128x128xbf16> to vector<128x128xbf16>
    %cst_84 = arith.constant dense<0.000000e+00> : vector<512x128xf32>
    %157 = tpu.matmul %154, %156, %cst_84 {dimension_numbers = #tpu.dot_dimension_numbers<[1], [0], [0], [1], [0, 0, 1, 1], [], []>} : vector<512x128xbf16>, vector<128x128xbf16>, vector<512x128xf32> -> vector<512x128xf32>
    %158 = vector.extract_strided_slice %152 {offsets = [0, 2, 0], sizes = [16, 32, 128], strides = [1, 1, 1]} : vector<18x36x128xbf16> to vector<16x32x128xbf16>
    %159 = vector.shape_cast %158 : vector<16x32x128xbf16> to vector<512x128xbf16>
    %c0_85 = arith.constant 0 : index
    %c1_86 = arith.constant 1 : index
    %c0_87 = arith.constant 0 : index
    %c0_88 = arith.constant 0 : index
    %160 = vector.load %arg11[%c0_85, %c1_86, %c0_87, %c0_88] : memref<3x3x128x128xbf16, #tpu.memory_space<vmem>>, vector<1x1x128x128xbf16>
    %161 = vector.shape_cast %160 : vector<1x1x128x128xbf16> to vector<128x128xbf16>
    %cst_89 = arith.constant dense<0.000000e+00> : vector<512x128xf32>
    %162 = tpu.matmul %159, %161, %cst_89 {dimension_numbers = #tpu.dot_dimension_numbers<[1], [0], [0], [1], [0, 0, 1, 1], [], []>} : vector<512x128xbf16>, vector<128x128xbf16>, vector<512x128xf32> -> vector<512x128xf32>
    %163 = arith.addf %157, %162 : vector<512x128xf32>
    %164 = vector.extract_strided_slice %152 {offsets = [0, 4, 0], sizes = [16, 32, 128], strides = [1, 1, 1]} : vector<18x36x128xbf16> to vector<16x32x128xbf16>
    %165 = vector.shape_cast %164 : vector<16x32x128xbf16> to vector<512x128xbf16>
    %c0_90 = arith.constant 0 : index
    %c2_91 = arith.constant 2 : index
    %c0_92 = arith.constant 0 : index
    %c0_93 = arith.constant 0 : index
    %166 = vector.load %arg11[%c0_90, %c2_91, %c0_92, %c0_93] : memref<3x3x128x128xbf16, #tpu.memory_space<vmem>>, vector<1x1x128x128xbf16>
    %167 = vector.shape_cast %166 : vector<1x1x128x128xbf16> to vector<128x128xbf16>
    %cst_94 = arith.constant dense<0.000000e+00> : vector<512x128xf32>
    %168 = tpu.matmul %165, %167, %cst_94 {dimension_numbers = #tpu.dot_dimension_numbers<[1], [0], [0], [1], [0, 0, 1, 1], [], []>} : vector<512x128xbf16>, vector<128x128xbf16>, vector<512x128xf32> -> vector<512x128xf32>
    %169 = arith.addf %163, %168 : vector<512x128xf32>
    %170 = vector.extract_strided_slice %152 {offsets = [1, 0, 0], sizes = [16, 32, 128], strides = [1, 1, 1]} : vector<18x36x128xbf16> to vector<16x32x128xbf16>
    %171 = vector.shape_cast %170 : vector<16x32x128xbf16> to vector<512x128xbf16>
    %c1_95 = arith.constant 1 : index
    %c0_96 = arith.constant 0 : index
    %c0_97 = arith.constant 0 : index
    %c0_98 = arith.constant 0 : index
    %172 = vector.load %arg11[%c1_95, %c0_96, %c0_97, %c0_98] : memref<3x3x128x128xbf16, #tpu.memory_space<vmem>>, vector<1x1x128x128xbf16>
    %173 = vector.shape_cast %172 : vector<1x1x128x128xbf16> to vector<128x128xbf16>
    %cst_99 = arith.constant dense<0.000000e+00> : vector<512x128xf32>
    %174 = tpu.matmul %171, %173, %cst_99 {dimension_numbers = #tpu.dot_dimension_numbers<[1], [0], [0], [1], [0, 0, 1, 1], [], []>} : vector<512x128xbf16>, vector<128x128xbf16>, vector<512x128xf32> -> vector<512x128xf32>
    %175 = arith.addf %169, %174 : vector<512x128xf32>
    %176 = vector.extract_strided_slice %152 {offsets = [1, 2, 0], sizes = [16, 32, 128], strides = [1, 1, 1]} : vector<18x36x128xbf16> to vector<16x32x128xbf16>
    %177 = vector.shape_cast %176 : vector<16x32x128xbf16> to vector<512x128xbf16>
    %c1_100 = arith.constant 1 : index
    %c1_101 = arith.constant 1 : index
    %c0_102 = arith.constant 0 : index
    %c0_103 = arith.constant 0 : index
    %178 = vector.load %arg11[%c1_100, %c1_101, %c0_102, %c0_103] : memref<3x3x128x128xbf16, #tpu.memory_space<vmem>>, vector<1x1x128x128xbf16>
    %179 = vector.shape_cast %178 : vector<1x1x128x128xbf16> to vector<128x128xbf16>
    %cst_104 = arith.constant dense<0.000000e+00> : vector<512x128xf32>
    %180 = tpu.matmul %177, %179, %cst_104 {dimension_numbers = #tpu.dot_dimension_numbers<[1], [0], [0], [1], [0, 0, 1, 1], [], []>} : vector<512x128xbf16>, vector<128x128xbf16>, vector<512x128xf32> -> vector<512x128xf32>
    %181 = arith.addf %175, %180 : vector<512x128xf32>
    %182 = vector.extract_strided_slice %152 {offsets = [1, 4, 0], sizes = [16, 32, 128], strides = [1, 1, 1]} : vector<18x36x128xbf16> to vector<16x32x128xbf16>
    %183 = vector.shape_cast %182 : vector<16x32x128xbf16> to vector<512x128xbf16>
    %c1_105 = arith.constant 1 : index
    %c2_106 = arith.constant 2 : index
    %c0_107 = arith.constant 0 : index
    %c0_108 = arith.constant 0 : index
    %184 = vector.load %arg11[%c1_105, %c2_106, %c0_107, %c0_108] : memref<3x3x128x128xbf16, #tpu.memory_space<vmem>>, vector<1x1x128x128xbf16>
    %185 = vector.shape_cast %184 : vector<1x1x128x128xbf16> to vector<128x128xbf16>
    %cst_109 = arith.constant dense<0.000000e+00> : vector<512x128xf32>
    %186 = tpu.matmul %183, %185, %cst_109 {dimension_numbers = #tpu.dot_dimension_numbers<[1], [0], [0], [1], [0, 0, 1, 1], [], []>} : vector<512x128xbf16>, vector<128x128xbf16>, vector<512x128xf32> -> vector<512x128xf32>
    %187 = arith.addf %181, %186 : vector<512x128xf32>
    %188 = vector.extract_strided_slice %152 {offsets = [2, 0, 0], sizes = [16, 32, 128], strides = [1, 1, 1]} : vector<18x36x128xbf16> to vector<16x32x128xbf16>
    %189 = vector.shape_cast %188 : vector<16x32x128xbf16> to vector<512x128xbf16>
    %c2_110 = arith.constant 2 : index
    %c0_111 = arith.constant 0 : index
    %c0_112 = arith.constant 0 : index
    %c0_113 = arith.constant 0 : index
    %190 = vector.load %arg11[%c2_110, %c0_111, %c0_112, %c0_113] : memref<3x3x128x128xbf16, #tpu.memory_space<vmem>>, vector<1x1x128x128xbf16>
    %191 = vector.shape_cast %190 : vector<1x1x128x128xbf16> to vector<128x128xbf16>
    %cst_114 = arith.constant dense<0.000000e+00> : vector<512x128xf32>
    %192 = tpu.matmul %189, %191, %cst_114 {dimension_numbers = #tpu.dot_dimension_numbers<[1], [0], [0], [1], [0, 0, 1, 1], [], []>} : vector<512x128xbf16>, vector<128x128xbf16>, vector<512x128xf32> -> vector<512x128xf32>
    %193 = arith.addf %187, %192 : vector<512x128xf32>
    %194 = vector.extract_strided_slice %152 {offsets = [2, 2, 0], sizes = [16, 32, 128], strides = [1, 1, 1]} : vector<18x36x128xbf16> to vector<16x32x128xbf16>
    %195 = vector.shape_cast %194 : vector<16x32x128xbf16> to vector<512x128xbf16>
    %c2_115 = arith.constant 2 : index
    %c1_116 = arith.constant 1 : index
    %c0_117 = arith.constant 0 : index
    %c0_118 = arith.constant 0 : index
    %196 = vector.load %arg11[%c2_115, %c1_116, %c0_117, %c0_118] : memref<3x3x128x128xbf16, #tpu.memory_space<vmem>>, vector<1x1x128x128xbf16>
    %197 = vector.shape_cast %196 : vector<1x1x128x128xbf16> to vector<128x128xbf16>
    %cst_119 = arith.constant dense<0.000000e+00> : vector<512x128xf32>
    %198 = tpu.matmul %195, %197, %cst_119 {dimension_numbers = #tpu.dot_dimension_numbers<[1], [0], [0], [1], [0, 0, 1, 1], [], []>} : vector<512x128xbf16>, vector<128x128xbf16>, vector<512x128xf32> -> vector<512x128xf32>
    %199 = arith.addf %193, %198 : vector<512x128xf32>
    %200 = vector.extract_strided_slice %152 {offsets = [2, 4, 0], sizes = [16, 32, 128], strides = [1, 1, 1]} : vector<18x36x128xbf16> to vector<16x32x128xbf16>
    %201 = vector.shape_cast %200 : vector<16x32x128xbf16> to vector<512x128xbf16>
    %c2_120 = arith.constant 2 : index
    %c2_121 = arith.constant 2 : index
    %c0_122 = arith.constant 0 : index
    %c0_123 = arith.constant 0 : index
    %202 = vector.load %arg11[%c2_120, %c2_121, %c0_122, %c0_123] : memref<3x3x128x128xbf16, #tpu.memory_space<vmem>>, vector<1x1x128x128xbf16>
    %203 = vector.shape_cast %202 : vector<1x1x128x128xbf16> to vector<128x128xbf16>
    %cst_124 = arith.constant dense<0.000000e+00> : vector<512x128xf32>
    %204 = tpu.matmul %201, %203, %cst_124 {dimension_numbers = #tpu.dot_dimension_numbers<[1], [0], [0], [1], [0, 0, 1, 1], [], []>} : vector<512x128xbf16>, vector<128x128xbf16>, vector<512x128xf32> -> vector<512x128xf32>
    %205 = arith.addf %199, %204 : vector<512x128xf32>
    %c0_125 = arith.constant 0 : index
    %c0_126 = arith.constant 0 : index
    %206 = vector.load %arg12[%c0_125, %c0_126] : memref<1x128xf32, #tpu.memory_space<vmem>>, vector<1x128xf32>
    %207 = vector.broadcast %206 : vector<1x128xf32> to vector<512x128xf32>
    %208 = arith.addf %205, %207 : vector<512x128xf32>
    %c0_127 = arith.constant 0 : index
    %c0_128 = arith.constant 0 : index
    %209 = vector.load %arg13[%c0_127, %c0_128] : memref<1x128xf32, #tpu.memory_space<vmem>>, vector<1x128xf32>
    %c0_129 = arith.constant 0 : index
    %c0_130 = arith.constant 0 : index
    %210 = vector.load %arg14[%c0_129, %c0_130] : memref<1x128xf32, #tpu.memory_space<vmem>>, vector<1x128xf32>
    %cst_131 = arith.constant dense<0.000000e+00> : vector<128xf32>
    %211 = vector.multi_reduction <add>, %208, %cst_131 [0] : vector<512x128xf32> to vector<128xf32>
    %212 = vector.shape_cast %211 : vector<128xf32> to vector<1x128xf32>
    %cst_132 = arith.constant 0.001953125 : f32
    %213 = vector.broadcast %cst_132 : f32 to vector<1x128xf32>
    %214 = arith.mulf %212, %213 : vector<1x128xf32>
    %215 = vector.broadcast %214 : vector<1x128xf32> to vector<512x128xf32>
    %216 = arith.subf %208, %215 : vector<512x128xf32>
    %217 = arith.mulf %216, %216 : vector<512x128xf32>
    %cst_133 = arith.constant dense<0.000000e+00> : vector<128xf32>
    %218 = vector.multi_reduction <add>, %217, %cst_133 [0] : vector<512x128xf32> to vector<128xf32>
    %219 = vector.shape_cast %218 : vector<128xf32> to vector<1x128xf32>
    %cst_134 = arith.constant 0.001953125 : f32
    %220 = vector.broadcast %cst_134 : f32 to vector<1x128xf32>
    %221 = arith.mulf %219, %220 : vector<1x128xf32>
    %cst_135 = arith.constant 8.000000e-01 : f32
    %222 = vector.broadcast %cst_135 : f32 to vector<1x128xf32>
    %223 = arith.addf %221, %222 : vector<1x128xf32>
    %224 = math.rsqrt %223 : vector<1x128xf32>
    %225 = arith.mulf %209, %224 : vector<1x128xf32>
    %226 = vector.broadcast %225 : vector<1x128xf32> to vector<512x128xf32>
    %227 = arith.mulf %216, %226 : vector<512x128xf32>
    %228 = vector.broadcast %210 : vector<1x128xf32> to vector<512x128xf32>
    %229 = arith.addf %227, %228 : vector<512x128xf32>
    %cst_136 = arith.constant 0.000000e+00 : f32
    %230 = vector.broadcast %cst_136 : f32 to vector<512x128xf32>
    %231 = arith.maximumf %229, %230 : vector<512x128xf32>
    %232 = arith.truncf %231 : vector<512x128xf32> to vector<512x128xbf16>
    %233 = vector.shape_cast %232 : vector<512x128xbf16> to vector<16x32x128xbf16>
    %cst_137 = arith.constant 0.000000e+00 : bf16
    %234 = vector.broadcast %cst_137 : bf16 to vector<16x2x128xbf16>
    %235 = tpu.concatenate %234, %233, %234 in 1 : vector<16x2x128xbf16>, vector<16x32x128xbf16>, vector<16x2x128xbf16> -> vector<16x36x128xbf16>
    %cst_138 = arith.constant 0.000000e+00 : bf16
    %236 = vector.broadcast %cst_138 : bf16 to vector<1x36x128xbf16>
    %237 = tpu.concatenate %236, %235, %236 in 0 : vector<1x36x128xbf16>, vector<16x36x128xbf16>, vector<1x36x128xbf16> -> vector<18x36x128xbf16>
    %238 = vector.extract_strided_slice %237 {offsets = [0, 0, 0], sizes = [16, 32, 128], strides = [1, 1, 1]} : vector<18x36x128xbf16> to vector<16x32x128xbf16>
    %239 = vector.shape_cast %238 : vector<16x32x128xbf16> to vector<512x128xbf16>
    %c0_139 = arith.constant 0 : index
    %c0_140 = arith.constant 0 : index
    %c0_141 = arith.constant 0 : index
    %c0_142 = arith.constant 0 : index
    %240 = vector.load %arg15[%c0_139, %c0_140, %c0_141, %c0_142] : memref<3x3x128x128xbf16, #tpu.memory_space<vmem>>, vector<1x1x128x128xbf16>
    %241 = vector.shape_cast %240 : vector<1x1x128x128xbf16> to vector<128x128xbf16>
    %cst_143 = arith.constant dense<0.000000e+00> : vector<512x128xf32>
    %242 = tpu.matmul %239, %241, %cst_143 {dimension_numbers = #tpu.dot_dimension_numbers<[1], [0], [0], [1], [0, 0, 1, 1], [], []>} : vector<512x128xbf16>, vector<128x128xbf16>, vector<512x128xf32> -> vector<512x128xf32>
    %243 = vector.extract_strided_slice %237 {offsets = [0, 2, 0], sizes = [16, 32, 128], strides = [1, 1, 1]} : vector<18x36x128xbf16> to vector<16x32x128xbf16>
    %244 = vector.shape_cast %243 : vector<16x32x128xbf16> to vector<512x128xbf16>
    %c0_144 = arith.constant 0 : index
    %c1_145 = arith.constant 1 : index
    %c0_146 = arith.constant 0 : index
    %c0_147 = arith.constant 0 : index
    %245 = vector.load %arg15[%c0_144, %c1_145, %c0_146, %c0_147] : memref<3x3x128x128xbf16, #tpu.memory_space<vmem>>, vector<1x1x128x128xbf16>
    %246 = vector.shape_cast %245 : vector<1x1x128x128xbf16> to vector<128x128xbf16>
    %cst_148 = arith.constant dense<0.000000e+00> : vector<512x128xf32>
    %247 = tpu.matmul %244, %246, %cst_148 {dimension_numbers = #tpu.dot_dimension_numbers<[1], [0], [0], [1], [0, 0, 1, 1], [], []>} : vector<512x128xbf16>, vector<128x128xbf16>, vector<512x128xf32> -> vector<512x128xf32>
    %248 = arith.addf %242, %247 : vector<512x128xf32>
    %249 = vector.extract_strided_slice %237 {offsets = [0, 4, 0], sizes = [16, 32, 128], strides = [1, 1, 1]} : vector<18x36x128xbf16> to vector<16x32x128xbf16>
    %250 = vector.shape_cast %249 : vector<16x32x128xbf16> to vector<512x128xbf16>
    %c0_149 = arith.constant 0 : index
    %c2_150 = arith.constant 2 : index
    %c0_151 = arith.constant 0 : index
    %c0_152 = arith.constant 0 : index
    %251 = vector.load %arg15[%c0_149, %c2_150, %c0_151, %c0_152] : memref<3x3x128x128xbf16, #tpu.memory_space<vmem>>, vector<1x1x128x128xbf16>
    %252 = vector.shape_cast %251 : vector<1x1x128x128xbf16> to vector<128x128xbf16>
    %cst_153 = arith.constant dense<0.000000e+00> : vector<512x128xf32>
    %253 = tpu.matmul %250, %252, %cst_153 {dimension_numbers = #tpu.dot_dimension_numbers<[1], [0], [0], [1], [0, 0, 1, 1], [], []>} : vector<512x128xbf16>, vector<128x128xbf16>, vector<512x128xf32> -> vector<512x128xf32>
    %254 = arith.addf %248, %253 : vector<512x128xf32>
    %255 = vector.extract_strided_slice %237 {offsets = [1, 0, 0], sizes = [16, 32, 128], strides = [1, 1, 1]} : vector<18x36x128xbf16> to vector<16x32x128xbf16>
    %256 = vector.shape_cast %255 : vector<16x32x128xbf16> to vector<512x128xbf16>
    %c1_154 = arith.constant 1 : index
    %c0_155 = arith.constant 0 : index
    %c0_156 = arith.constant 0 : index
    %c0_157 = arith.constant 0 : index
    %257 = vector.load %arg15[%c1_154, %c0_155, %c0_156, %c0_157] : memref<3x3x128x128xbf16, #tpu.memory_space<vmem>>, vector<1x1x128x128xbf16>
    %258 = vector.shape_cast %257 : vector<1x1x128x128xbf16> to vector<128x128xbf16>
    %cst_158 = arith.constant dense<0.000000e+00> : vector<512x128xf32>
    %259 = tpu.matmul %256, %258, %cst_158 {dimension_numbers = #tpu.dot_dimension_numbers<[1], [0], [0], [1], [0, 0, 1, 1], [], []>} : vector<512x128xbf16>, vector<128x128xbf16>, vector<512x128xf32> -> vector<512x128xf32>
    %260 = arith.addf %254, %259 : vector<512x128xf32>
    %261 = vector.extract_strided_slice %237 {offsets = [1, 2, 0], sizes = [16, 32, 128], strides = [1, 1, 1]} : vector<18x36x128xbf16> to vector<16x32x128xbf16>
    %262 = vector.shape_cast %261 : vector<16x32x128xbf16> to vector<512x128xbf16>
    %c1_159 = arith.constant 1 : index
    %c1_160 = arith.constant 1 : index
    %c0_161 = arith.constant 0 : index
    %c0_162 = arith.constant 0 : index
    %263 = vector.load %arg15[%c1_159, %c1_160, %c0_161, %c0_162] : memref<3x3x128x128xbf16, #tpu.memory_space<vmem>>, vector<1x1x128x128xbf16>
    %264 = vector.shape_cast %263 : vector<1x1x128x128xbf16> to vector<128x128xbf16>
    %cst_163 = arith.constant dense<0.000000e+00> : vector<512x128xf32>
    %265 = tpu.matmul %262, %264, %cst_163 {dimension_numbers = #tpu.dot_dimension_numbers<[1], [0], [0], [1], [0, 0, 1, 1], [], []>} : vector<512x128xbf16>, vector<128x128xbf16>, vector<512x128xf32> -> vector<512x128xf32>
    %266 = arith.addf %260, %265 : vector<512x128xf32>
    %267 = vector.extract_strided_slice %237 {offsets = [1, 4, 0], sizes = [16, 32, 128], strides = [1, 1, 1]} : vector<18x36x128xbf16> to vector<16x32x128xbf16>
    %268 = vector.shape_cast %267 : vector<16x32x128xbf16> to vector<512x128xbf16>
    %c1_164 = arith.constant 1 : index
    %c2_165 = arith.constant 2 : index
    %c0_166 = arith.constant 0 : index
    %c0_167 = arith.constant 0 : index
    %269 = vector.load %arg15[%c1_164, %c2_165, %c0_166, %c0_167] : memref<3x3x128x128xbf16, #tpu.memory_space<vmem>>, vector<1x1x128x128xbf16>
    %270 = vector.shape_cast %269 : vector<1x1x128x128xbf16> to vector<128x128xbf16>
    %cst_168 = arith.constant dense<0.000000e+00> : vector<512x128xf32>
    %271 = tpu.matmul %268, %270, %cst_168 {dimension_numbers = #tpu.dot_dimension_numbers<[1], [0], [0], [1], [0, 0, 1, 1], [], []>} : vector<512x128xbf16>, vector<128x128xbf16>, vector<512x128xf32> -> vector<512x128xf32>
    %272 = arith.addf %266, %271 : vector<512x128xf32>
    %273 = vector.extract_strided_slice %237 {offsets = [2, 0, 0], sizes = [16, 32, 128], strides = [1, 1, 1]} : vector<18x36x128xbf16> to vector<16x32x128xbf16>
    %274 = vector.shape_cast %273 : vector<16x32x128xbf16> to vector<512x128xbf16>
    %c2_169 = arith.constant 2 : index
    %c0_170 = arith.constant 0 : index
    %c0_171 = arith.constant 0 : index
    %c0_172 = arith.constant 0 : index
    %275 = vector.load %arg15[%c2_169, %c0_170, %c0_171, %c0_172] : memref<3x3x128x128xbf16, #tpu.memory_space<vmem>>, vector<1x1x128x128xbf16>
    %276 = vector.shape_cast %275 : vector<1x1x128x128xbf16> to vector<128x128xbf16>
    %cst_173 = arith.constant dense<0.000000e+00> : vector<512x128xf32>
    %277 = tpu.matmul %274, %276, %cst_173 {dimension_numbers = #tpu.dot_dimension_numbers<[1], [0], [0], [1], [0, 0, 1, 1], [], []>} : vector<512x128xbf16>, vector<128x128xbf16>, vector<512x128xf32> -> vector<512x128xf32>
    %278 = arith.addf %272, %277 : vector<512x128xf32>
    %279 = vector.extract_strided_slice %237 {offsets = [2, 2, 0], sizes = [16, 32, 128], strides = [1, 1, 1]} : vector<18x36x128xbf16> to vector<16x32x128xbf16>
    %280 = vector.shape_cast %279 : vector<16x32x128xbf16> to vector<512x128xbf16>
    %c2_174 = arith.constant 2 : index
    %c1_175 = arith.constant 1 : index
    %c0_176 = arith.constant 0 : index
    %c0_177 = arith.constant 0 : index
    %281 = vector.load %arg15[%c2_174, %c1_175, %c0_176, %c0_177] : memref<3x3x128x128xbf16, #tpu.memory_space<vmem>>, vector<1x1x128x128xbf16>
    %282 = vector.shape_cast %281 : vector<1x1x128x128xbf16> to vector<128x128xbf16>
    %cst_178 = arith.constant dense<0.000000e+00> : vector<512x128xf32>
    %283 = tpu.matmul %280, %282, %cst_178 {dimension_numbers = #tpu.dot_dimension_numbers<[1], [0], [0], [1], [0, 0, 1, 1], [], []>} : vector<512x128xbf16>, vector<128x128xbf16>, vector<512x128xf32> -> vector<512x128xf32>
    %284 = arith.addf %278, %283 : vector<512x128xf32>
    %285 = vector.extract_strided_slice %237 {offsets = [2, 4, 0], sizes = [16, 32, 128], strides = [1, 1, 1]} : vector<18x36x128xbf16> to vector<16x32x128xbf16>
    %286 = vector.shape_cast %285 : vector<16x32x128xbf16> to vector<512x128xbf16>
    %c2_179 = arith.constant 2 : index
    %c2_180 = arith.constant 2 : index
    %c0_181 = arith.constant 0 : index
    %c0_182 = arith.constant 0 : index
    %287 = vector.load %arg15[%c2_179, %c2_180, %c0_181, %c0_182] : memref<3x3x128x128xbf16, #tpu.memory_space<vmem>>, vector<1x1x128x128xbf16>
    %288 = vector.shape_cast %287 : vector<1x1x128x128xbf16> to vector<128x128xbf16>
    %cst_183 = arith.constant dense<0.000000e+00> : vector<512x128xf32>
    %289 = tpu.matmul %286, %288, %cst_183 {dimension_numbers = #tpu.dot_dimension_numbers<[1], [0], [0], [1], [0, 0, 1, 1], [], []>} : vector<512x128xbf16>, vector<128x128xbf16>, vector<512x128xf32> -> vector<512x128xf32>
    %290 = arith.addf %284, %289 : vector<512x128xf32>
    %c0_184 = arith.constant 0 : index
    %c0_185 = arith.constant 0 : index
    %291 = vector.load %arg16[%c0_184, %c0_185] : memref<1x128xf32, #tpu.memory_space<vmem>>, vector<1x128xf32>
    %292 = vector.broadcast %291 : vector<1x128xf32> to vector<512x128xf32>
    %293 = arith.addf %290, %292 : vector<512x128xf32>
    %294 = vector.extract_strided_slice %293 {offsets = [0, 0], sizes = [512, 3], strides = [1, 1]} : vector<512x128xf32> to vector<512x3xf32>
    %295 = math.tanh %294 : vector<512x3xf32>
    %c0_186 = arith.constant 0 : index
    %c0_187 = arith.constant 0 : index
    %296 = vector.load %arg17[%c0_186, %c0_187] : memref<512x3xf32, #tpu.memory_space<vmem>>, vector<512x3xf32>
    tpu.vector_store %arg17[%c0_186, %c0_187], %295 {strides = array<i32>} : memref<512x3xf32, #tpu.memory_space<vmem>>, vector<512x3xf32>,
    return
  }
}

</mosaic_0001>

<bundles_post_ra>
// kernel: generator_forward.1
= control target key start
LH: loop header
LB: loop body
LE: loop exit
PB: predicated region body
PF: predicated region fallthrough
CT: control target
= control target key end

     0   :  { %s22330_s0 = inlined_call_operand.vmem [shape: s32[2,1], index: 0, kind: input, shape index: {}]   ;;  %s22331_s1 = inlined_call_operand.vmem [shape: f32[2,32], index: 1, kind: input, shape index: {}]   ;;  %s22332_s2 = inlined_call_operand.vmem [shape: f32[10,32], index: 2, kind: input, shape index: {}]   ;;  %s22333_s3 = inlined_call_operand.hbm [shape: f32[32,2048], index: 3, kind: input, shape index: {}]   ;;  %s22334_s4 = inlined_call_operand.hbm [shape: f32[1,2048], index: 4, kind: input, shape index: {}]   ;;  %s22335_s5 = inlined_call_operand.vmem [shape: f32[1,128], index: 5, kind: input, shape index: {}]   ;;  %s22336_s6 = inlined_call_operand.vmem [shape: f32[1,128], index: 6, kind: input, shape index: {}]   ;;  %s22337_s7 = inlined_call_operand.hbm [shape: bf16[3,3,128,128], index: 7, kind: input, shape index: {}]   ;;  %s22338_s8 = inlined_call_operand.vmem [shape: f32[1,128], index: 8, kind: input, shape index: {}]   ;;  %s22339_s9 = inlined_call_operand.vmem [shape: f32[1,128], index: 9, kind: input, shape index: {}]   ;;  %s22340_s10 = inlined_call_operand.vmem [shape: f32[1,128], index: 10, kind: input, shape index: {}]   ;;  %s22341_s11 = inlined_call_operand.hbm [shape: bf16[3,3,128,128], index: 11, kind: input, shape index: {}]   ;;  %s22342_s12 = inlined_call_operand.vmem [shape: f32[1,128], index: 12, kind: input, shape index: {}]   ;;  %s22343_s13 = inlined_call_operand.vmem [shape: f32[1,128], index: 13, kind: input, shape index: {}]   ;;  %s22344_s14 = inlined_call_operand.vmem [shape: f32[1,128], index: 14, kind: input, shape index: {}]   ;;  %s22345_s15 = inlined_call_operand.hbm [shape: bf16[3,3,128,128], index: 15, kind: input, shape index: {}]   ;;  %s22346_s16 = inlined_call_operand.vmem [shape: f32[1,128], index: 16, kind: input, shape index: {}]   ;;  %s22347_s17 = inlined_call_operand.vmem [shape: f32[512,3], index: 17, kind: output, shape index: {}]  }
   0x1   :  { %22475 = sst [smem:[#allocation122_spill]] %s22330_s0 }
   0x2   :  { %22476 = sst [smem:[#allocation123_spill]] %s22331_s1 }
   0x3   :  { %22 = vsyncpa [#allocation3], 0 }
   0x4   :  { %23 = vsyncpa [#allocation5], 0 }
   0x5   :  { %24 = vsyncpa [#allocation8], 0  ;;  %s18417_s24 = smov [#allocation4]   ;;  %s18301_s28 = scalar_lea.hbm %s22334_s4, 256 }
   0x6   :  { %s49_s25 = sshll.u32 %s18417_s24, 4  ;;  %p18302_p0 = scmp.ne.s32.totalorder %s22334_s4, %s18301_s28  ;;  %s50_s25 = int_to_ptr.vmem [resolvable:$true] %s49_s25 }
   0x7   :  { %p18305_p1 = scmp.lt.u32.totalorder %s18301_s28, %s22334_s4 }
   0x9   :  { %p18307_p2 = pnand %p18305_p1, %p18302_p0 }
   0xb   :  { %18310 = shalt.err (!%p18307_p2)
}
   0xc   :  { %s18311_s19 = scalar_lea.vmem %s50_s25, 256  ;;  %p18316_p4 = scmp.lt.s32.totalorder %s50_s25, %s50_s25 }
   0xd   :  { %p18312_p3 = scmp.ne.s32.totalorder %s50_s25, %s18311_s19  ;;  %p18317_p5 = scmp.lt.s32.totalorder %s18311_s19, %s18311_s19 }
   0xf   :  { %p18318_p6 = por %p18317_p5, %p18316_p4 }
  0x11   :  { %p18319_p7 = pnand %p18318_p6, %p18312_p3 }
  0x13   :  { %18322 = shalt.err (!%p18319_p7)
}
  0x14   :  { %52 = dma.hbm_to_vmem [thread:$0]  %s22334_s4, 256, %s50_s25, [#allocation5]  }
  0x15   :  { %s18418_s21 = smov [#allocation7]   ;;  %s18419_s23 = smov [#allocation2]  }
  0x16   :  { %s80_s22 = sshll.u32 %s18418_s21, 4  ;;  %s36_s24 = sshll.u32 %s18419_s23, 4  ;;  %s81_s22 = int_to_ptr.vmem [resolvable:$true] %s80_s22  ;;  %s37_s24 = int_to_ptr.vmem [resolvable:$true] %s36_s24 }
  0x17   :  { %s18323_s28 = scalar_lea.hbm %s22341_s11, 9216 }
  0x18   :  { %p18324_p8 = scmp.ne.s32.totalorder %s22341_s11, %s18323_s28  ;;  %p18327_p9 = scmp.lt.u32.totalorder %s18323_s28, %s22341_s11 }
  0x1a   :  { %p18329_p10 = pnand %p18327_p9, %p18324_p8 }
  0x1c   :  { %18332 = shalt.err (!%p18329_p10)
}
  0x1d   :  { %s18333_s4 = scalar_lea.vmem %s81_s22, 9216  ;;  %p18338_p12 = scmp.lt.s32.totalorder %s81_s22, %s81_s22 }
  0x1e   :  { %p18334_p11 = scmp.ne.s32.totalorder %s81_s22, %s18333_s4  ;;  %p18339_p13 = scmp.lt.s32.totalorder %s18333_s4, %s18333_s4 }
  0x20   :  { %p18340_p0 = por %p18339_p13, %p18338_p12 }
  0x22   :  { %p18341_p1 = pnand %p18340_p0, %p18334_p11 }
  0x24   :  { %18344 = shalt.err (!%p18341_p1)
}
  0x25   :  { %s22348_s25 = smov 64   ;;  %s18421_s19 = smov 4  }
  0x26   :  { %86 = dma.hbm_to_vmem [thread:$0]  %s22341_s11, 9216, %s81_s22, [#allocation8], %s22348_s25, %s22348_s25, %s18421_s19  }
  0x27   :  { %s18345_s26 = scalar_lea.hbm %s22333_s3, 8192 }
  0x28   :  { %p18346_p2 = scmp.ne.s32.totalorder %s22333_s3, %s18345_s26  ;;  %p18349_p3 = scmp.lt.u32.totalorder %s18345_s26, %s22333_s3 }
  0x2a   :  { %p18351_p4 = pnand %p18349_p3, %p18346_p2 }
  0x2c   :  { %18354 = shalt.err (!%p18351_p4)
}
  0x2d   :  { %s18355_s30 = scalar_lea.vmem %s37_s24, 8192  ;;  %p18360_p6 = scmp.lt.s32.totalorder %s37_s24, %s37_s24 }
  0x2e   :  { %p18356_p5 = scmp.ne.s32.totalorder %s37_s24, %s18355_s30  ;;  %p18361_p7 = scmp.lt.s32.totalorder %s18355_s30, %s18355_s30 }
  0x30   :  { %p18362_p8 = por %p18361_p7, %p18360_p6 }
  0x32   :  { %p18363_p9 = pnand %p18362_p8, %p18356_p5 }
  0x34   :  { %18366 = shalt.err (!%p18363_p9)
}
  0x35   :  { %s18422_s11 = smov 2048   ;;  %s18423_s22 = smov 128  }
  0x36   :  { %42 = dma.hbm_to_vmem [thread:$0]  %s22333_s3, 8192, %s37_s24, [#allocation3], %s18422_s11, %s18422_s11, %s18423_s22  }
  0x37   :  { %s18424_s1 = smov [#allocation6]   ;;  %s18425_s21 = smov [#allocation9]  }
  0x38   :  { %s62_s20 = sshll.u32 %s18424_s1, 4  ;;  %s98_s23 = sshll.u32 %s18425_s21, 4  ;;  %s63_s20 = int_to_ptr.vmem [resolvable:$true] %s62_s20  ;;  %s99_s23 = int_to_ptr.vmem [resolvable:$true] %s98_s23 }
  0x39   :  { %s18367_s28 = scalar_lea.hbm %s22337_s7, 9216 }
  0x3a   :  { %p18368_p10 = scmp.ne.s32.totalorder %s22337_s7, %s18367_s28  ;;  %p18371_p11 = scmp.lt.u32.totalorder %s18367_s28, %s22337_s7 }
  0x3c   :  { %p18373_p12 = pnand %p18371_p11, %p18368_p10 }
  0x3e   :  { %18376 = shalt.err (!%p18373_p12)
}
  0x3f   :  { %s18377_s3 = scalar_lea.vmem %s63_s20, 9216  ;;  %p18382_p0 = scmp.lt.s32.totalorder %s63_s20, %s63_s20 }
  0x40   :  { %p18378_p13 = scmp.ne.s32.totalorder %s63_s20, %s18377_s3  ;;  %p18383_p1 = scmp.lt.s32.totalorder %s18377_s3, %s18377_s3 }
  0x42   :  { %p18384_p2 = por %p18383_p1, %p18382_p0 }
  0x44   :  { %p18385_p3 = pnand %p18384_p2, %p18378_p13 }
  0x46   :  { %18388 = shalt.err (!%p18385_p3)
}
  0x47   :  { %s22477_s24 = smov 64   ;;  %s18389_s4 = scalar_lea.hbm %s22345_s15, 9216 }
  0x48   :  { %68 = dma.hbm_to_vmem [thread:$0]  %s22337_s7, 9216, %s63_s20, [#allocation5], %s22477_s24, %s22477_s24, %s18421_s19  }
  0x49   :  { %p18390_p4 = scmp.ne.s32.totalorder %s22345_s15, %s18389_s4  ;;  %p18393_p5 = scmp.lt.u32.totalorder %s18389_s4, %s22345_s15 }
  0x4b   :  { %p18395_p6 = pnand %p18393_p5, %p18390_p4 }
  0x4d   :  { %18398 = shalt.err (!%p18395_p6)
}
  0x4e   :  { %s18399_s28 = scalar_lea.vmem %s99_s23, 9216  ;;  %p18404_p8 = scmp.lt.s32.totalorder %s99_s23, %s99_s23 }
  0x4f   :  { %p18400_p7 = scmp.ne.s32.totalorder %s99_s23, %s18399_s28  ;;  %p18405_p9 = scmp.lt.s32.totalorder %s18399_s28, %s18399_s28 }
  0x51   :  { %p18406_p10 = por %p18405_p9, %p18404_p8 }
  0x53   :  { %p18407_p11 = pnand %p18406_p10, %p18400_p7 }
  0x55   :  { %18410 = shalt.err (!%p18407_p11)
}
  0x56   :  { %104 = dma.hbm_to_vmem [thread:$0]  %s22345_s15, 9216, %s99_s23, [#allocation8], %s22477_s24, %s22477_s24, %s18421_s19  }
  0x57   :  { %18411 = dma.done.wait [#allocation3], 8192  }
  0x58   :  { %18412 = vsyncadd [#allocation3], 4294959104 }
  0x59   :  { %18413 = dma.done.wait [#allocation5], 9472  }
  0x5a   :  { %18414 = vsyncadd [#allocation5], 4294957824 }
  0x5b   :  { %18415 = dma.done.wait [#allocation8], 18432  }
  0x5c   :  { %18416 = vsyncadd [#allocation8], 4294948864  ;;  %v22350_v0 = vmov 0   ;;  %v18427_v1 = vmov 0.0   ;;  %s22478_s30 = sld [smem:[#allocation122_spill]]  ;;  %vm137_vm0 = vcmask 1041408   ;;  %v124_v22 = vlaneseq }
  0x5d   :  { %17950 = vset.pattern.permute.xlu0 %v22350_v0  ;;  %889 = vmatprep.mubr.f32.mxu1 %v18427_v1  ;;  %v132_v3 = vld [vmem:[%s22332_s2 + $0x8] sm:$0x3]  ;;  %v131_v4 = vld [vmem:[%s22332_s2] sm:$0xff]  ;;  %v18428_v6 = vmov 0.0|0.0   ;;  %vm18429_vm1 = vmmov 0   ;;  %v605_v21 = vld [vmem:[#allocation2 + $0x18] sm:$0xff] }
  0x5e   :  { %v139_v5 = vsel %vm137_vm0, %v132_v3, 0  ;;  %16692 = vmatprep.subr.bf16.mxu0 %v18428_v6  ;;  %v142_v7 = vand.u32 4294901760, %v131_v4  ;;  %14926 = vmatprep.mubr.msk.f32.mxu0 %vm18429_vm1, %v18427_v1  ;;  %v621_v23 = vld [vmem:[#allocation2 + $0x98] sm:$0xff]  ;;  %v604_v25 = vld [vmem:[#allocation2 + $0x10] sm:$0xff]  ;;  %v125_v31 = vand.u32 127, %v124_v22  ;;  %vm133_vm2 = vcmask 80896  }
  0x5f   :  { %v145_v8 = vand.u32 4294901760, %v139_v5  ;;  %v16718_v24 = vpack.c.bf16 %v621_v23, %v605_v21  ;;  %v620_v26 = vld [vmem:[#allocation2 + $0x90] sm:$0xff]  ;;  %v637_v28 = vld [vmem:[#allocation2 + $0x118] sm:$0xff]  ;;  %v603_v42 = vld [vmem:[#allocation2 + $0x8] sm:$0xff]  ;;  %s22479_s24 = sld [smem:[#allocation123_spill]]  ;;  %vm750_vm4 = vcmask 261120  }
  0x60   :  { %v220_v10 = vsub.f32 %v131_v4, %v142_v7  ;;  %v16720_v27 = vpack.c.bf16 %v620_v26, %v604_v25  ;;  %v653_v29 = vld [vmem:[#allocation2 + $0x198] sm:$0xff]  ;;  %v636_v32 = vld [vmem:[#allocation2 + $0x110] sm:$0xff]  ;;  %v619_v43 = vld [vmem:[#allocation2 + $0x88] sm:$0xff]  ;;  %vm1359_vm5 = vcmask 1043456   ;;  %vm1361_vm6 = vcmask 1045504  }
  0x61   :  { %v16693_v9 = vpack.c.bf16 %v145_v8, %v142_v7  ;;  %v227_v11 = vsub.f32 %v139_v5, %v145_v8  ;;  %16719 = vmatprep.subr.bf16.mxu1 %v16718_v24  ;;  %v16722_v30 = vpack.c.bf16 %v653_v29, %v637_v28  ;;  %v652_v33 = vld [vmem:[#allocation2 + $0x190] sm:$0xff]  ;;  %v16710_v44 = vpack.c.bf16 %v619_v43, %v603_v42  ;;  %v602_v45 = vld [vmem:[#allocation2] sm:$0xff]  ;;  %v635_v47 = vld [vmem:[#allocation2 + $0x108] sm:$0xff] }
  0x62   :  { %v123_v2 = vld [vmem:[%s22478_s30] sm:$0x3]  ;;  %v221_v12 = vand.u32 4294901760, %v220_v10  ;;  %16721 = vmatpush1.bf16.msra.mxu1 %v16720_v27  ;;  %v16724_v34 = vpack.c.bf16 %v652_v33, %v636_v32  ;;  %v651_v48 = vld [vmem:[#allocation2 + $0x188] sm:$0xff]  ;;  %v609_v56 = vld [vmem:[#allocation2 + $0x38] sm:$0xff]  ;;  %vm1779_vm7 = vcmask 1040384  }
  0x63   :  { %127 = vperm.xlu0 %17950, %v123_v2   ;;  %16694 = vmatpush3.bf16.msra.mxu0 %v16693_v9  ;;  %v228_v13 = vand.u32 4294901760, %v227_v11  ;;  %v16699_v19 = vpack.c.bf16 %v227_v11, %v220_v10  ;;  %v618_v46 = vld [vmem:[#allocation2 + $0x80] sm:$0xff]  ;;  %v16714_v50 = vpack.c.bf16 %v651_v48, %v635_v47  ;;  %v607_v54 = vld [vmem:[#allocation2 + $0x28] sm:$0xff]  ;;  %v625_v58 = vld [vmem:[#allocation2 + $0xb8] sm:$0xff]  ;;  %vm1826_vm8 = vcmask 1046528  }
  0x64   :  { %16695 = vmatprep.subr.bf16.mxu0 %v18428_v6  ;;  %v222_v14 = vsub.f32 %v220_v10, %v221_v12  ;;  %16723 = vmatprep.subr.bf16.mxu1 %v16722_v30  ;;  %v16712_v49 = vpack.c.bf16 %v618_v46, %v602_v45  ;;  %v634_v51 = vld [vmem:[#allocation2 + $0x100] sm:$0xff]  ;;  %v623_v55 = vld [vmem:[#allocation2 + $0xa8] sm:$0xff]  ;;  %v16734_v59 = vpack.c.bf16 %v625_v58, %v609_v56  ;;  %v608_v63 = vld [vmem:[#allocation2 + $0x30] sm:$0xff]  ;;  %vm13477_vm10 = vcmask 23552  }
  0x65   :  { %v229_v15 = vsub.f32 %v227_v11, %v228_v13  ;;  %v16705_v20 = vpack.c.bf16 %v228_v13, %v221_v12  ;;  %v650_v52 = vld [vmem:[#allocation2 + $0x180] sm:$0xff]  ;;  %v16726_v57 = vpack.c.bf16 %v623_v55, %v607_v54  ;;  %v624_v2 = vld [vmem:[#allocation2 + $0xb0] sm:$0xff]  ;;  %v639_v3 = vld [vmem:[#allocation2 + $0x128] sm:$0xff] }
  0x66   :  { %v223_v16 = vand.u32 4294901760, %v222_v14  ;;  %16725 = vmatpush1.bf16.msra.mxu1 %v16724_v34  ;;  %v16716_v53 = vpack.c.bf16 %v650_v52, %v634_v51  ;;  %v600_v60 = vld [vmem:[%s22479_s24] sm:$0x3]  ;;  %v655_v4 = vld [vmem:[#allocation2 + $0x1a8] sm:$0xff]  ;;  %v641_v5 = vld [vmem:[#allocation2 + $0x138] sm:$0xff] }
  0x67   :  { %v230_v17 = vand.u32 4294901760, %v229_v15  ;;  %16727 = vmatprep.subr.bf16.mxu1 %v16726_v57  ;;  %v606_v61 = vld [vmem:[#allocation2 + $0x20] sm:$0xff]  ;;  %v16730_v14 = vpack.c.bf16 %v655_v4, %v639_v3  ;;  %v629_v21 = vld [vmem:[#allocation2 + $0xd8] sm:$0xff]  ;;  %v612_v29 = vld [vmem:[#allocation2 + $0x50] sm:$0xff] }
  0x68   :  { %v622_v62 = vld [vmem:[#allocation2 + $0xa0] sm:$0xff]  ;;  %v628_v30 = vld [vmem:[#allocation2 + $0xd0] sm:$0xff]  ;;  %v659_v32 = vld [vmem:[#allocation2 + $0x1c8] sm:$0xff] }
  0x69   :  { %v16696_v18 = vpack.c.bf16 %v230_v17, %v223_v16  ;;  %v16728_v8 = vpack.c.bf16 %v622_v62, %v606_v61  ;;  %v638_v10 = vld [vmem:[#allocation2 + $0x120] sm:$0xff]  ;;  %v640_v16 = vld [vmem:[#allocation2 + $0x130] sm:$0xff]  ;;  %v645_v33 = vld [vmem:[#allocation2 + $0x158] sm:$0xff] }
  0x6a   :  { %v654_v11 = vld [vmem:[#allocation2 + $0x1a0] sm:$0xff]  ;;  %v656_v17 = vld [vmem:[#allocation2 + $0x1b0] sm:$0xff]  ;;  %v661_v34 = vld [vmem:[#allocation2 + $0x1d8] sm:$0xff] }
  0x6b   :  { %v16732_v23 = vpack.c.bf16 %v654_v11, %v638_v10  ;;  %v16740_v24 = vpack.c.bf16 %v656_v17, %v640_v16  ;;  %v610_v25 = vld [vmem:[#allocation2 + $0x40] sm:$0xff]  ;;  %v660_v42 = vld [vmem:[#allocation2 + $0x1d0] sm:$0xff]  ;;  %v615_v43 = vld [vmem:[#allocation2 + $0x68] sm:$0xff]  ;;  %v18656_v16 = vshrl.u32 %v124_v22, 7 }
  0x6c   :  { %v626_v26 = vld [vmem:[#allocation2 + $0xc0] sm:$0xff]  ;;  %v617_v45 = vld [vmem:[#allocation2 + $0x78] sm:$0xff]  ;;  %v632_v54 = vld [vmem:[#allocation2 + $0xf0] sm:$0xff] }
  0x6d   :  { %v633_v46 = vld [vmem:[#allocation2 + $0xf8] sm:$0xff]  ;;  %v647_v55 = vld [vmem:[#allocation2 + $0x168] sm:$0xff]  ;;  %v646_v61 = vld [vmem:[#allocation2 + $0x160] sm:$0xff]  ;;  %v680_v17 = vsub.s32 2, %v18656_v16 }
  0x6e   :  { %v16766_v52 = vpack.c.bf16 %v633_v46, %v617_v45  ;;  %v663_v56 = vld [vmem:[#allocation2 + $0x1e8] sm:$0xff]  ;;  %v649_v57 = vld [vmem:[#allocation2 + $0x178] sm:$0xff]  ;;  %v648_v3 = vld [vmem:[#allocation2 + $0x170] sm:$0xff] }
  0x6f   :  { %v665_v58 = vld [vmem:[#allocation2 + $0x1f8] sm:$0xff]  ;;  %v16762_v62 = vpack.c.bf16 %v663_v56, %v647_v55  ;;  %v664_v4 = vld [vmem:[#allocation2 + $0x1f0] sm:$0xff]  ;;  %v17954_v10 = vld [vmem:[#allocation6 + $0x58] sm:$0xff]  }
  0x70   :  { %v17956_v11 = vld [vmem:[#allocation6 + $0x68] sm:$0xff]   ;;  %v667_v55 = vld [vmem:[#allocation4 + $0x8] sm:$0xff]  ;;  %vm18810_vm9 = vmneg %vm1779_vm7 }
  0xe2   :  { %v128_v35 = vpop.permute.xlu0 %127 }
  0xe3   :  { %vm129_vm3 = vcmp.eq.s32.totalorder %v125_v31, %v128_v35  ;;  %v643_v31 = vld [vmem:[#allocation2 + $0x148] sm:$0xff]  ;;  %v16744_v35 = vpack.c.bf16 %v626_v26, %v610_v25 }
  0xe4   :  { %v130_v36 = vsel %vm129_vm3, 1.0, %v18427_v1 }
  0xe5   :  { %v135_v37 = vsel %vm133_vm2, %v130_v36, 0 }
  0xe6   :  { %v209_v38 = vsub.f32 %v135_v37, %v135_v37  ;;  %v642_v37 = vld [vmem:[#allocation2 + $0x140] sm:$0xff] }
  0xe8   :  { %v210_v39 = vand.u32 4294901760, %v209_v38 }
  0xea   :  { %v211_v40 = vsub.f32 %v209_v38, %v210_v39 }
  0xec   :  { %v212_v41 = vand.u32 4294901760, %v211_v40  ;;  %v16754_v40 = vpack.c.bf16 %v661_v34, %v645_v33  ;;  %v692_v34 = vsub.s32 5, %v18656_v16 }
  0xee   :  { %14927 = vmatmul.mubr.f32.vlgmr.msra.gmra.mrb[0].mxu0 %v212_v41  ;;  %v644_v41 = vld [vmem:[#allocation2 + $0x150] sm:$0xff] }
  0xef   :  { %16697 = vmatpush3.bf16.msra.mxu0 %v16696_v18  ;;  %14933 = vmatprep.mubr.msk.f32.mxu0 %vm18429_vm1, %v18427_v1  ;;  %v611_v18 = vld [vmem:[#allocation2 + $0x48] sm:$0xff]  ;;  %v16756_v48 = vpack.c.bf16 %v660_v42, %v644_v41 }
  0xf0   :  { %16698 = vmatprep.subr.bf16.mxu0 %v18428_v6 }
  0xf6   :  { %14934 = vmatmul.mubr.msk.f32.vlgmr.msra.gmra.mrb[0].mxu0 %vm133_vm2, %v130_v36 }
  0xf7   :  { %16700 = vmatpush3.bf16.msra.mxu0 %v16699_v19  ;;  %14940 = vmatprep.mubr.msk.f32.mxu0 %vm18429_vm1, %v18427_v1  ;;  %v627_v19 = vld [vmem:[#allocation2 + $0xc8] sm:$0xff] }
  0xf8   :  { %16701 = vmatprep.subr.bf16.mxu0 %v18428_v6  ;;  %v16742_v27 = vpack.c.bf16 %v627_v19, %v611_v18  ;;  %v666_v18 = vld [vmem:[#allocation4] sm:$0xff]  ;;  %v676_v19 = vsub.s32 1, %v18656_v16 }
  0xfe   :  { %14941 = vmatmul.mubr.f32.vlgmr.msra.gmra.mrb[0].mxu0 %v209_v38  ;;  %v658_v38 = vld [vmem:[#allocation2 + $0x1c0] sm:$0xff] }
  0xff   :  { %16703 = vmatpush3.bf16.msra.mxu0 %v16693_v9  ;;  %14947 = vmatprep.mubr.msk.f32.mxu0 %vm18429_vm1, %v18427_v1  ;;  %v16748_v47 = vpack.c.bf16 %v658_v38, %v642_v37  ;;  %v688_v38 = vsub.s32 4, %v18656_v16 }
 0x100   :  { %16704 = vmatprep.subr.bf16.mxu0 %v18428_v6 }
 0x106   :  { %14948 = vmatmul.mubr.f32.vlgmr.msra.gmra.mrb[0].mxu0 %v210_v39  ;;  %v16746_v39 = vpack.c.bf16 %v659_v32, %v643_v31  ;;  %v696_v31 = vsub.s32 6, %v18656_v16 }
 0x107   :  { %16706 = vmatpush3.bf16.msra.mxu0 %v16705_v20  ;;  %14954 = vmatprep.mubr.msk.f32.mxu0 %vm18429_vm1, %v18427_v1  ;;  %v613_v20 = vld [vmem:[#allocation2 + $0x58] sm:$0xff] }
 0x108   :  { %16707 = vmatprep.subr.bf16.mxu0 %v18428_v6  ;;  %v657_v6 = vld [vmem:[#allocation2 + $0x1b8] sm:$0xff]  ;;  %v16750_v28 = vpack.c.bf16 %v629_v21, %v613_v20  ;;  %v684_v20 = vsub.s32 3, %v18656_v16  ;;  %v18663_v21 = vsub.s32 0, %v18656_v16 }
 0x109   :  { %v16738_v15 = vpack.c.bf16 %v657_v6, %v641_v5  ;;  %v16772_v6 = vpack.c.bf16 %v664_v4, %v648_v3 }
 0x10a   :  { %22481 = vst [vmem:[#allocation14_spill] sm:$0xff] %v18663_v21  ;;  %v685_v25 = vrot.slane %v666_v18, %v684_v20  ;;  %v673_v26 = vrot.slane %v666_v18, %v18663_v21  ;;  %v705_v4 = vrot.slane %v667_v55, %v18663_v21 }
 0x10e   :  { %14955 = vmatmul.mubr.msk.f32.vlgmr.msra.gmra.mrb[0].mxu0 %vm133_vm2, %v130_v36 }
 0x10f   :  { %16709 = vmatpush3.bf16.msra.mxu0 %v16693_v9  ;;  %14961 = vmatprep.mubr.msk.f32.mxu0 %vm18429_vm1, %v18427_v1  ;;  %v16736_v9 = vpack.c.bf16 %v624_v2, %v608_v63  ;;  %v16770_v63 = vpack.c.bf16 %v665_v58, %v649_v57  ;;  %v662_v2 = vld [vmem:[#allocation2 + $0x1e0] sm:$0xff] }
 0x110   :  { %16711 = vmatprep.subr.bf16.mxu0 %v16710_v44  ;;  %v631_v44 = vld [vmem:[#allocation2 + $0xe8] sm:$0xff]  ;;  %v16764_v5 = vpack.c.bf16 %v662_v2, %v646_v61 }
 0x111   :  { %v16758_v51 = vpack.c.bf16 %v631_v44, %v615_v43  ;;  %v693_v43 = vrot.slane %v666_v18, %v692_v34 }
 0x116   :  { %14962 = vmatmul.mubr.msk.f32.vlgmr.msra.gmra.mrb[0].mxu0 %vm133_vm2, %v130_v36  ;;  %v16752_v36 = vpack.c.bf16 %v628_v30, %v612_v29 }
 0x117   :  { %16713 = vmatpush1.bf16.msra.mxu0 %v16712_v49  ;;  %818 = vmatprep.mubr.f32.mxu0 %v18427_v1  ;;  %v614_v49 = vld [vmem:[#allocation2 + $0x60] sm:$0xff] }
 0x118   :  { %16715 = vmatprep.subr.bf16.mxu0 %v16714_v50  ;;  %v630_v50 = vld [vmem:[#allocation2 + $0xe0] sm:$0xff] }
 0x11b   :  { %16717 = vmatpush1.bf16.msra.mxu0 %v16716_v53  ;;  %v616_v53 = vld [vmem:[#allocation2 + $0x70] sm:$0xff] }
 0x11c   :  { %16735 = vmatprep.subr.bf16.mxu0 %v16734_v59  ;;  %v16760_v59 = vpack.c.bf16 %v630_v50, %v614_v49 }
 0x1e9   :  { %v596_v7 = vpop.f32.mrb[0].mxu0 }
 0x1ea   :  { %v18624_v12 = vmul.f32 %v600_v60, %v596_v7  ;;  %v14963_v13 = vpop.f32.mrb[1].mxu0  ;;  %v16768_v60 = vpack.c.bf16 %v632_v54, %v616_v53  ;;  %v17951_v7 = vld [vmem:[#allocation6 + $0x40] sm:$0xff]  }
 0x1eb   :  { %v17957_v13 = vld [vmem:[#allocation6 + $0x70] sm:$0xff]  }
 0x1ec   :  { %13552 = vmatmul.mubr.msk.f32.vlgmr.msra.gmra.mrb[2].mxu0 %vm750_vm4, %v18624_v12  ;;  %13553 = vmatmul.mubr.msk.f32.vlgmr.msra.gmra.mrb[0].mxu1 %vm750_vm4, %v18624_v12 }
 0x1ed   :  { %16729 = vmatpush1.bf16.msra.mxu1 %v16728_v8  ;;  %16737 = vmatpush1.bf16.msra.mxu0 %v16736_v9  ;;  %v17952_v8 = vld [vmem:[#allocation6 + $0x48] sm:$0xff]   ;;  %v17953_v9 = vld [vmem:[#allocation6 + $0x50] sm:$0xff]  }
 0x1ee   :  { %16731 = vmatprep.subr.bf16.mxu1 %v16730_v14  ;;  %16739 = vmatprep.subr.bf16.mxu0 %v16738_v15  ;;  %v18649_v14 = vrot.slane %v22350_v0, 1  ;;  %v18652_v15 = vld [vmem:[#allocation6] sm:$0xff]  }
 0x1ef   :  { %960 = vmatprep.mubr.f32.mxu1 %v18427_v1  ;;  %1031 = vmatprep.mubr.f32.mxu0 %v18427_v1 }
 0x1f0   :  { %22480 = vst [vmem:[#allocation13_spill] sm:$0xff] %v18649_v14 }
 0x1f1   :  { %16733 = vmatpush1.bf16.msra.mxu1 %v16732_v23  ;;  %16741 = vmatpush1.bf16.msra.mxu0 %v16740_v24  ;;  %v681_v23 = vrot.slane %v666_v18, %v680_v17  ;;  %v677_v24 = vrot.slane %v666_v18, %v676_v19 }
 0x1f2   :  { %16743 = vmatprep.subr.bf16.mxu1 %v16742_v27  ;;  %16751 = vmatprep.subr.bf16.mxu0 %v16750_v28 }
 0x1f4   :  { %13554 = vmatmul.mubr.msk.f32.vlgmr.msra.gmra.mrb[2].mxu1 %vm750_vm4, %v18624_v12  ;;  %13555 = vmatmul.mubr.msk.f32.vlgmr.msra.gmra.mrb[4].mxu0 %vm750_vm4, %v18624_v12 }
 0x1f5   :  { %16745 = vmatpush1.bf16.msra.mxu1 %v16744_v35  ;;  %16753 = vmatpush1.bf16.msra.mxu0 %v16752_v36  ;;  %v700_v35 = vsub.s32 7, %v18656_v16 }
 0x1f6   :  { %16747 = vmatprep.subr.bf16.mxu1 %v16746_v39  ;;  %16755 = vmatprep.subr.bf16.mxu0 %v16754_v40  ;;  %v697_v40 = vrot.slane %v666_v18, %v696_v31 }
 0x1f7   :  { %1102 = vmatprep.mubr.f32.mxu1 %v18427_v1  ;;  %1173 = vmatprep.mubr.f32.mxu0 %v18427_v1  ;;  %v701_v44 = vrot.slane %v666_v18, %v700_v35 }
 0x1f9   :  { %16749 = vmatpush1.bf16.msra.mxu1 %v16748_v47  ;;  %16757 = vmatpush1.bf16.msra.mxu0 %v16756_v48  ;;  %v689_v47 = vrot.slane %v666_v18, %v688_v38  ;;  %v729_v18 = vrot.slane %v667_v55, %v696_v31 }
 0x1fa   :  { %16759 = vmatprep.subr.bf16.mxu1 %v16758_v51  ;;  %16767 = vmatprep.subr.bf16.mxu0 %v16766_v52 }
 0x1fc   :  { %13556 = vmatmul.mubr.msk.f32.vlgmr.msra.gmra.mrb[4].mxu1 %vm750_vm4, %v18624_v12  ;;  %13557 = vmatmul.mubr.msk.f32.vlgmr.msra.gmra.mrb[6].mxu0 %vm750_vm4, %v18624_v12 }
 0x1fd   :  { %16761 = vmatpush1.bf16.msra.mxu1 %v16760_v59  ;;  %16769 = vmatpush1.bf16.msra.mxu0 %v16768_v60  ;;  %v713_v59 = vrot.slane %v667_v55, %v680_v17 }
 0x1fe   :  { %16763 = vmatprep.subr.bf16.mxu1 %v16762_v62  ;;  %16771 = vmatprep.subr.bf16.mxu0 %v16770_v63  ;;  %v709_v62 = vrot.slane %v667_v55, %v676_v19  ;;  %v717_v63 = vrot.slane %v667_v55, %v684_v20 }
 0x1ff   :  { %1244 = vmatprep.mubr.f32.mxu1 %v18427_v1  ;;  %1315 = vmatprep.mubr.f32.mxu0 %v18427_v1  ;;  %v17955_v1 = vld [vmem:[#allocation6 + $0x60] sm:$0xff]  }
 0x201   :  { %16765 = vmatpush1.bf16.msra.mxu1 %v16764_v5  ;;  %16773 = vmatpush1.bf16.msra.mxu0 %v16772_v6 }
 0x202   :  { %14964 = vmatprep.subr.bf16.mxu1 %v17951_v7 }
 0x204   :  { %13558 = vmatmul.mubr.msk.f32.vlgmr.msra.gmra.mrb[6].mxu1 %vm750_vm4, %v18624_v12  ;;  %13559 = vmatmul.mubr.msk.f32.vlgmr.msra.gmra.mrb[8].mxu0 %vm750_vm4, %v18624_v12  ;;  %v17958_v12 = vld [vmem:[#allocation6 + $0x78] sm:$0xff]  }
 0x205   :  { %14965 = vmatpush3.bf16.msra.mxu1 %v17951_v7  ;;  %14980 = vmatprep.mubr.bf16.mxu1 %v18649_v14 }
 0x206   :  { %14966 = vmatprep.subr.bf16.mxu1 %v17952_v8  ;;  %15268 = vmatprep.mubr.bf16.mxu0 %v18649_v14 }
 0x209   :  { %14967 = vmatpush3.bf16.msra.mxu1 %v17952_v8 }
 0x20a   :  { %14968 = vmatprep.subr.bf16.mxu1 %v17953_v9 }
 0x20d   :  { %14969 = vmatpush3.bf16.msra.mxu1 %v17953_v9 }
 0x20e   :  { %14970 = vmatprep.subr.bf16.mxu1 %v17954_v10 }
 0x211   :  { %14971 = vmatpush3.bf16.msra.mxu1 %v17954_v10 }
 0x212   :  { %14972 = vmatprep.subr.bf16.mxu1 %v17955_v1 }
 0x215   :  { %14973 = vmatpush3.bf16.msra.mxu1 %v17955_v1 }
 0x216   :  { %14974 = vmatprep.subr.bf16.mxu1 %v17956_v11 }
 0x219   :  { %14975 = vmatpush3.bf16.msra.mxu1 %v17956_v11 }
 0x21a   :  { %14976 = vmatprep.subr.bf16.mxu1 %v17957_v13 }
 0x21d   :  { %14977 = vmatpush3.bf16.msra.mxu1 %v17957_v13 }
 0x21e   :  { %14978 = vmatprep.subr.bf16.mxu1 %v17958_v12 }
 0x221   :  { %14979 = vmatpush3.bf16.msra.mxu1 %v17958_v12 }
 0x222   :  { %14996 = vmatprep.subr.bf16.mxu1 %v18652_v15 }
 0x2bf   :  { %v820_v22 = vpop.f32.mrb[2].mxu0  ;;  %v891_v27 = vpop.f32.mrb[0].mxu1 }
 0x2c0   :  { %v892_v28 = vadd.f32 %v891_v27, %v681_v23  ;;  %v822_v29 = vpop.f32.mrb[3].mxu0  ;;  %v893_v30 = vpop.f32.mrb[1].mxu1  ;;  %v821_v36 = vadd.f32 %v820_v22, %v673_v26  ;;  %v725_v23 = vrot.slane %v667_v55, %v692_v34  ;;  %v721_v22 = vrot.slane %v667_v55, %v688_v38 }
 0x2c1   :  { %v823_v32 = vadd.f32 %v822_v29, %v677_v24  ;;  %v894_v33 = vadd.f32 %v893_v30, %v685_v25  ;;  %v733_v24 = vrot.slane %v667_v55, %v700_v35 }
 0x2c2   :  { %v1326_v39 = vrot.slane %v892_v28, 4 }
 0x2c3   :  { %v1323_v37 = vrot.slane %v823_v32, 6  ;;  %v1329_v42 = vrot.slane %v894_v33, 2 }
 0x2c5   :  { %v1358_v41 = vsel %vm137_vm0, %v821_v36, %v1323_v37 }
 0x2c6   :  { %v1360_v45 = vsel %vm1359_vm5, %v1358_v41, %v1326_v39 }
 0x2c7   :  { %v18673_v46 = vsel %vm1361_vm6, %v1360_v45, %v1329_v42  ;;  %v962_v48 = vpop.f32.mrb[2].mxu1  ;;  %v1033_v49 = vpop.f32.mrb[4].mxu0 }
 0x2c8   :  { %v1034_v50 = vadd.f32 %v1033_v49, %v697_v40  ;;  %v964_v51 = vpop.f32.mrb[3].mxu1  ;;  %v1035_v52 = vpop.f32.mrb[5].mxu0  ;;  %v963_v56 = vadd.f32 %v962_v48, %v689_v47 }
 0x2c9   :  { %v965_v53 = vadd.f32 %v964_v51, %v693_v43  ;;  %v1036_v54 = vadd.f32 %v1035_v52, %v701_v44 }
 0x2ca   :  { %v1335_v58 = vrot.slane %v1034_v50, 4 }
 0x2cb   :  { %v1332_v57 = vrot.slane %v965_v53, 6  ;;  %v1338_v61 = vrot.slane %v1036_v54, 2 }
 0x2cd   :  { %v1363_v60 = vsel %vm137_vm0, %v963_v56, %v1332_v57 }
 0x2ce   :  { %v1364_v2 = vsel %vm1359_vm5, %v1363_v60, %v1335_v58 }
 0x2cf   :  { %v1365_v3 = vsel %vm1361_vm6, %v1364_v2, %v1338_v61  ;;  %v1104_v5 = vpop.f32.mrb[4].mxu1  ;;  %v1175_v6 = vpop.f32.mrb[6].mxu0 }
 0x2d0   :  { %v1374_v7 = vadd.f32 %v1365_v3, %v18673_v46  ;;  %v1176_v8 = vadd.f32 %v1175_v6, %v713_v59  ;;  %v1106_v9 = vpop.f32.mrb[5].mxu1  ;;  %v1177_v10 = vpop.f32.mrb[7].mxu0  ;;  %v1105_v13 = vadd.f32 %v1104_v5, %v705_v4 }
 0x2d1   :  { %v1107_v1 = vadd.f32 %v1106_v9, %v709_v62  ;;  %v1178_v11 = vadd.f32 %v1177_v10, %v717_v63  ;;  %v1372_v9 = vld [vmem:[%s22335_s5] sm:$0x1] }
 0x2d2   :  { %v1344_v17 = vrot.slane %v1176_v8, 4 }
 0x2d3   :  { %v1341_v12 = vrot.slane %v1107_v1, 6  ;;  %v1347_v20 = vrot.slane %v1178_v11, 2 }
 0x2d5   :  { %v1366_v19 = vsel %vm137_vm0, %v1105_v13, %v1341_v12  ;;  %v13560_v12 = vld [vmem:[%s22336_s6] ss:$0 sm:$0xff] }
 0x2d6   :  { %v1367_v25 = vsel %vm1359_vm5, %v1366_v19, %v1344_v17 }
 0x2d7   :  { %v1368_v26 = vsel %vm1361_vm6, %v1367_v25, %v1347_v20  ;;  %v1246_v27 = vpop.f32.mrb[6].mxu1  ;;  %v1317_v28 = vpop.f32.mrb[8].mxu0 }
 0x2d8   :  { %v1375_v29 = vadd.f32 %v1374_v7, %v1368_v26  ;;  %v1318_v30 = vadd.f32 %v1317_v28, %v729_v18  ;;  %v1248_v32 = vpop.f32.mrb[7].mxu1  ;;  %v1319_v33 = vpop.f32.mrb[9].mxu0  ;;  %v1247_v39 = vadd.f32 %v1246_v27, %v721_v22 }
 0x2d9   :  { %v1249_v36 = vadd.f32 %v1248_v32, %v725_v23  ;;  %v1320_v37 = vadd.f32 %v1319_v33, %v733_v24 }
 0x2da   :  { %v1353_v40 = vrot.slane %v1318_v30, 4 }
 0x2db   :  { %v1350_v31 = vrot.slane %v1249_v36, 6  ;;  %v1356_v34 = vrot.slane %v1320_v37, 2 }
 0x2dd   :  { %v1369_v41 = vsel %vm137_vm0, %v1247_v39, %v1350_v31 }
 0x2de   :  { %v1370_v35 = vsel %vm1359_vm5, %v1369_v41, %v1353_v40 }
 0x2df   :  { %v1371_v42 = vsel %vm1361_vm6, %v1370_v35, %v1356_v34 }
 0x2e0   :  { %v1376_v43 = vadd.f32 %v1375_v29, %v1371_v42 }
 0x2e2   :  { %v1377_v38 = vrot.slane %v1376_v43, 4 }
 0x2e4   :  { %v1378_v44 = vadd.f32 %v1377_v38, %v1376_v43 }
 0x2e6   :  { %v1379_v45 = vrot.slane %v1378_v44, 2 }
 0x2e8   :  { %v1380_v47 = vadd.f32 %v1379_v45, %v1378_v44 }
 0x2ea   :  { %v1381_v48 = vrot.slane %v1380_v47, 1 }
 0x2ec   :  { %v1382_v49 = vadd.f32 %v1381_v48, %v1380_v47 }
 0x2ee   :  { %v1383_v50 = vmul.f32 0.03125, %v1382_v49 }
 0x2f0   :  { %v1384_v51 = vsub.f32 %v18673_v46, %v1383_v50  ;;  %v1385_v52 = vsub.f32 %v1365_v3, %v1383_v50  ;;  %v1386_v53 = vsub.f32 %v1368_v26, %v1383_v50  ;;  %v1387_v54 = vsub.f32 %v1371_v42, %v1383_v50 }
 0x2f1   :  { %v18430_v46 = vmov 1966171168  }
 0x2f2   :  { %v1388_v55 = vmul.f32 %v1384_v51, %v1384_v51  ;;  %v1389_v56 = vmul.f32 %v1385_v52, %v1385_v52  ;;  %v1390_v57 = vmul.f32 %v1386_v53, %v1386_v53  ;;  %v1391_v59 = vmul.f32 %v1387_v54, %v1387_v54 }
 0x2f3   :  { %v1431_v3 = vunpack.c.l.s4 %v18430_v46 }
 0x2f4   :  { %v1392_v58 = vadd.f32 %v1389_v56, %v1388_v55 }
 0x2f5   :  { %v1432_v11 = vunpack.c.0.s8 %v1431_v3 }
 0x2f6   :  { %v1393_v60 = vadd.f32 %v1392_v58, %v1390_v57 }
 0x2f7   :  { %v18695_v23 = vsub.s32 %v1432_v11, %v18656_v16 }
 0x2f8   :  { %v1394_v61 = vadd.f32 %v1393_v60, %v1391_v59 }
 0x2fa   :  { %v1395_v62 = vrot.slane %v1394_v61, 4 }
 0x2fc   :  { %v1396_v63 = vadd.f32 %v1395_v62, %v1394_v61 }
 0x2fe   :  { %v1397_v2 = vrot.slane %v1396_v63, 2 }
 0x300   :  { %v1398_v4 = vadd.f32 %v1397_v2, %v1396_v63 }
 0x302   :  { %v1399_v5 = vrot.slane %v1398_v4, 1 }
 0x304   :  { %v1400_v6 = vadd.f32 %v1399_v5, %v1398_v4 }
 0x306   :  { %v1401_v7 = vmul.f32 0.03125, %v1400_v6 }
 0x308   :  { %v1402_v8 = vadd.f32 1e-05, %v1401_v7 }
 0x30a   :  { %18167 = vrsqrt.f32 %v1402_v8 }
 0x314   :  { %v18168_v10 = vpop.eup %18167 }
 0x315   :  { %v1404_v1 = vmul.f32 %v18168_v10, %v1372_v9 }
 0x317   :  { %v1409_v13 = vrot.slane %v1404_v1, %v18663_v21 }
 0x319   :  { %v1411_v17 = vmul.f32 %v1409_v13, %v1384_v51  ;;  %v1412_v18 = vmul.f32 %v1409_v13, %v1385_v52  ;;  %v1413_v19 = vmul.f32 %v1409_v13, %v1386_v53  ;;  %v1414_v20 = vmul.f32 %v1409_v13, %v1387_v54 }
 0x31b   :  { %v1421_v24 = vadd.f32 %v13560_v12, %v1411_v17  ;;  %v1422_v25 = vadd.f32 %v13560_v12, %v1412_v18  ;;  %v1423_v26 = vadd.f32 %v13560_v12, %v1413_v19  ;;  %v1424_v22 = vadd.f32 %v13560_v12, %v1414_v20 }
 0x31d   :  { %v1425_v27 = vpack.c.bf16 %v1422_v25, %v1421_v24  ;;  %v1426_v28 = vpack.c.bf16 %v1424_v22, %v1423_v26  ;;  %v13561_v29 = vpack.c.bf16 %v1422_v25, %v1422_v25  ;;  %v13562_v30 = vpack.c.bf16 %v1424_v22, %v1424_v22 }
 0x31f   :  { %v1436_v32 = vrot.slane %v1425_v27, %v18695_v23  ;;  %v1443_v33 = vrot.slane %v13561_v29, %v18695_v23  ;;  %v1485_v36 = vrot.slane %v1426_v28, %v18695_v23  ;;  %v1492_v37 = vrot.slane %v13562_v30, %v18695_v23 }
 0x321   :  { %v1445_v39 = vcombine.high %v1443_v33, %v1443_v33  ;;  %v18702_v16 = vrot.slane %v1436_v32, %v18695_v23  ;;  %v1459_v31 = vrot.slane %v1443_v33, %v18695_v23  ;;  %v1493_v40 = vcombine.high %v1485_v36, %v1485_v36 }
 0x322   :  { %v1494_v41 = vcombine.high %v1492_v37, %v1492_v37  ;;  %v1501_v34 = vrot.slane %v1485_v36, %v18695_v23  ;;  %v1508_v35 = vrot.slane %v1492_v37, %v18695_v23  ;;  %v1444_v42 = vcombine.high %v1436_v32, %v1436_v32 }
 0x323   :  { %v1473_v43 = vrot.slane %v1445_v39, %v18695_v23  ;;  %v1474_v38 = vcombine.high %v18702_v16, %v18702_v16  ;;  %v1475_v44 = vcombine.high %v1459_v31, %v1459_v31  ;;  %v1515_v45 = vrot.slane %v1493_v40, %v18695_v23 }
 0x324   :  { %v18712_v47 = vrot.slane %v1494_v41, %v18695_v23  ;;  %v1523_v48 = vcombine.high %v1501_v34, %v1501_v34  ;;  %v1527_v49 = vcombine.low %v18702_v16, %v18702_v16  ;;  %v1524_v50 = vcombine.high %v1508_v35, %v1508_v35 }
 0x325   :  { %v1590_v51 = vcombine.low %v1459_v31, %v1459_v31  ;;  %v1591_v52 = vcombine.low %v1459_v31, %v1473_v43  ;;  %v1592_v53 = vcombine.low %v1473_v43, %v1475_v44  ;;  %v13564_v54 = vcombine.high %v1459_v31, %v1473_v43 }
 0x326   :  { %v1653_v55 = vcombine.low %v1501_v34, %v1501_v34  ;;  %v1654_v56 = vcombine.low %v1501_v34, %v1515_v45  ;;  %v1655_v57 = vcombine.low %v1515_v45, %v1523_v48  ;;  %v13565_v61 = vcombine.high %v1501_v34, %v1515_v45 }
 0x327   :  { %v1600_v58 = vrot.slane %v1590_v51, %v18695_v23  ;;  %v1607_v59 = vrot.slane %v1591_v52, %v18695_v23  ;;  %v1614_v60 = vrot.slane %v1592_v53, %v18695_v23  ;;  %v1621_v62 = vrot.slane %v13564_v54, %v18695_v23 }
 0x328   :  { %v1663_v63 = vrot.slane %v1653_v55, %v18695_v23  ;;  %v1670_v2 = vrot.slane %v1654_v56, %v18695_v23  ;;  %v1677_v4 = vrot.slane %v1655_v57, %v18695_v23  ;;  %v1684_v6 = vrot.slane %v13565_v61, %v18695_v23 }
 0x329   :  { %v1622_v5 = vcombine.low %v1600_v58, %v1607_v59  ;;  %v1716_v7 = vcombine.low %v1508_v35, %v1508_v35  ;;  %v1717_v8 = vcombine.low %v1508_v35, %v18712_v47  ;;  %v1623_v46 = vcombine.low %v1614_v60, %v1621_v62 }
 0x32a   :  { %v1685_v3 = vcombine.low %v1663_v63, %v1670_v2  ;;  %v1718_v9 = vcombine.low %v18712_v47, %v1524_v50  ;;  %v13566_v10 = vcombine.high %v1508_v35, %v18712_v47  ;;  %v1686_v11 = vcombine.low %v1677_v4, %v1684_v6 }
 0x32b   :  { %v1630_v1 = vrot.slane %v1622_v5, %v18695_v23  ;;  %v1726_v13 = vrot.slane %v1716_v7, %v18695_v23  ;;  %v1733_v12 = vrot.slane %v1717_v8, %v18695_v23  ;;  %v1637_v17 = vrot.slane %v1623_v46, %v18695_v23 }
 0x32c   :  { %v1693_v18 = vrot.slane %v1685_v3, %v18695_v23  ;;  %v1740_v19 = vrot.slane %v1718_v9, %v18695_v23  ;;  %v1747_v20 = vrot.slane %v13566_v10, %v18695_v23  ;;  %v1700_v24 = vrot.slane %v1686_v11, %v18695_v23 }
 0x32d   :  { %v1748_v25 = vcombine.low %v1726_v13, %v1733_v12  ;;  %v1466_v26 = vrot.slane %v1444_v42, %v18695_v23  ;;  %v1477_v22 = vcombine.high %v1473_v43, %v1473_v43  ;;  %v1537_v27 = vrot.slane %v1527_v49, %v18695_v23 }
 0x32e   :  { %v1749_v28 = vcombine.low %v1740_v19, %v1747_v20  ;;  %v1525_v29 = vcombine.high %v1515_v45, %v1515_v45  ;;  %v18739_v36 = vcombine.low %v1630_v1, %v1637_v17  ;;  %v18744_v41 = vcombine.low %v1693_v18, %v1700_v24  ;;  %v17960_v1 = vld [vmem:[#allocation6 + $0x8] sm:$0xff]   ;;  %v17961_v19 = vld [vmem:[#allocation6 + $0x10] sm:$0xff]  }
 0x32f   :  { %v1756_v30 = vrot.slane %v1748_v25, %v18695_v23  ;;  %v1476_v32 = vcombine.high %v1466_v26, %v1466_v26  ;;  %v1528_v33 = vcombine.low %v18702_v16, %v1466_v26  ;;  %v1529_v39 = vcombine.low %v1466_v26, %v1474_v38  ;;  %v17962_v25 = vld [vmem:[#allocation6 + $0x18] sm:$0xff]  }
 0x330   :  { %v1763_v37 = vrot.slane %v1749_v28, %v18695_v23  ;;  %v13563_v31 = vcombine.high %v18702_v16, %v1466_v26  ;;  %v1645_v40 = vrot.slane %v1477_v22, %v18695_v23  ;;  %v1708_v42 = vrot.slane %v1525_v29, %v18695_v23  ;;  %v17963_v22 = vld [vmem:[#allocation6 + $0x20] sm:$0xff]   ;;  %v17964_v28 = vld [vmem:[#allocation6 + $0x28] sm:$0xff]  }
 0x331   :  { %v1544_v34 = vrot.slane %v1528_v33, %v18695_v23  ;;  %v1582_v35 = vrot.slane %v1476_v32, %v18695_v23  ;;  %v1551_v43 = vrot.slane %v1529_v39, %v18695_v23  ;;  %v1526_v38 = vcombine.high %v18712_v47, %v18712_v47 }
 0x332   :  { %v1558_v44 = vrot.slane %v13563_v31, %v18695_v23  ;;  %v1652_v45 = vrot.slane %v1645_v40, %v18695_v23  ;;  %v1715_v49 = vrot.slane %v1708_v42, %v18695_v23  ;;  %v1785_v51 = vsel %vm1779_vm7, 0, %v18739_v36  ;;  %v17967_v31 = vld [vmem:[#allocation6 + $0x80] sm:$0xff]   ;;  %v17970_v42 = vld [vmem:[#allocation6 + $0x98] sm:$0xff]  }
 0x333   :  { %v1559_v16 = vcombine.low %v1537_v27, %v1544_v34  ;;  %v1589_v48 = vrot.slane %v1582_v35, %v18695_v23  ;;  %v18758_v52 = vcombine.low %v1756_v30, %v1763_v37  ;;  %v1788_v54 = vsel %vm1779_vm7, 0, %v18744_v41  ;;  %v17965_v30 = vld [vmem:[#allocation6 + $0x30] sm:$0xff]   ;;  %v17966_v37 = vld [vmem:[#allocation6 + $0x38] sm:$0xff]   ;;  %v17968_v34 = vld [vmem:[#allocation6 + $0x88] sm:$0xff]  }
 0x334   :  { %v1560_v50 = vcombine.low %v1551_v43, %v1558_v44  ;;  %v1796_v56 = vsel %vm1779_vm7, %v1652_v45, 0  ;;  %v1771_v57 = vrot.slane %v1526_v38, %v18695_v23  ;;  %v1798_v58 = vsel %vm1779_vm7, %v1715_v49, 0  ;;  %v17969_v35 = vld [vmem:[#allocation6 + $0x90] sm:$0xff]   ;;  %v17971_v43 = vld [vmem:[#allocation6 + $0xa0] sm:$0xff]   ;;  %v17972_v44 = vld [vmem:[#allocation6 + $0xa8] sm:$0xff]  }
 0x335   :  { %v1567_v53 = vrot.slane %v1559_v16, %v18695_v23  ;;  %v1794_v47 = vsel %vm1779_vm7, %v1589_v48, 0  ;;  %v1791_v59 = vsel %vm1779_vm7, 0, %v18758_v52  ;;  %v2159_v60 = vrot.slane %v1785_v51, 2  ;;  %v17973_v45 = vld [vmem:[#allocation6 + $0xb0] sm:$0xff]   ;;  %v17974_v16 = vld [vmem:[#allocation6 + $0xb8] sm:$0xff]   ;;  %v17975_v48 = vld [vmem:[#allocation6 + $0xc0] sm:$0xff]  }
 0x336   :  { %v1574_v55 = vrot.slane %v1560_v50, %v18695_v23  ;;  %v1778_v62 = vrot.slane %v1771_v57, %v18695_v23  ;;  %v1830_v63 = vrot.slane %v1794_v47, 1  ;;  %v2160_v2 = vrot.slane %v1796_v56, 2  ;;  %v17976_v49 = vld [vmem:[#allocation6 + $0xc8] sm:$0xff]   ;;  %v17977_v50 = vld [vmem:[#allocation6 + $0xd0] sm:$0xff]  }
 0x337   :  { %v2162_v4 = vrot.slane %v1788_v54, 2  ;;  %v2163_v7 = vrot.slane %v1798_v58, 2  ;;  %v2165_v8 = vrot.slane %v1791_v59, 2  ;;  %v2157_v9 = vrot.slane %v1794_v47, 2  ;;  %v17982_v47 = vld [vmem:[#allocation6 + $0xf8] sm:$0xff]   ;;  %v17984_v57 = vld [vmem:[#allocation6 + $0x108] sm:$0xff]  }
 0x338   :  { %v18770_v61 = vcombine.low %v1567_v53, %v1574_v55  ;;  %v1800_v6 = vsel %vm1779_vm7, %v1778_v62, 0  ;;  %v18777_v10 = vsel %vm1361_vm6, %v2159_v60, %v2160_v2  ;;  %v1832_v20 = vrot.slane %v1785_v51, 1  ;;  %v17978_v51 = vld [vmem:[#allocation6 + $0xd8] sm:$0xff]   ;;  %v17979_v53 = vld [vmem:[#allocation6 + $0xe0] sm:$0xff]   ;;  %v17981_v55 = vld [vmem:[#allocation6 + $0xf0] sm:$0xff]  }
 0x339   :  { %v18780_v11 = vsel %vm1361_vm6, %v2162_v4, %v2163_v7  ;;  %v2166_v13 = vrot.slane %v1800_v6, 2  ;;  %v1833_v24 = vrot.slane %v1796_v56, 1  ;;  %v1836_v27 = vrot.slane %v1798_v58, 1  ;;  %v17983_v56 = vld [vmem:[#allocation6 + $0x100] sm:$0xff]   ;;  %v17985_v58 = vld [vmem:[#allocation6 + $0x110] sm:$0xff]   ;;  %v17988_v62 = vld [vmem:[#allocation6 + $0x128] sm:$0xff]  }
 0x33a   :  { %v1782_v5 = vsel %vm1779_vm7, 0, %v18770_v61  ;;  %v1838_v32 = vrot.slane %v1791_v59, 1  ;;  %v1839_v33 = vrot.slane %v1800_v6, 1  ;;  %v22482_v40 = vmov 0  ;;  %v17986_v59 = vld [vmem:[#allocation6 + $0x118] sm:$0xff]   ;;  %v17987_v60 = vld [vmem:[#allocation6 + $0x120] sm:$0xff]  }
 0x33b   :  { %v1829_v46 = vrot.slane %v1782_v5, 1  ;;  %v2156_v3 = vrot.slane %v1782_v5, 2  ;;  %v18790_v18 = vsel %vm1361_vm6, %v2165_v8, %v2166_v13  ;;  %v18795_v26 = vsel %vm1826_vm8, %v1832_v20, %v1833_v24  ;;  %v17990_v2 = vld [vmem:[#allocation6 + $0x138] sm:$0xff]   ;;  %v17991_v4 = vld [vmem:[#allocation6 + $0x140] sm:$0xff]   ;;  %v17992_v5 = vld [vmem:[#allocation6 + $0x148] sm:$0xff]  }
 0x33c   :  { %v18805_v39 = vsel %vm1826_vm8, %v1838_v32, %v1839_v33  ;;  %v22483_v40 = vsel %vm18810_vm9, 4294967295, %v22482_v40  ;;  %v18833_v38 = vrot.slane %v22350_v0, 2  ;;  %v17993_v6 = vld [vmem:[#allocation6 + $0x150] sm:$0xff]   ;;  %v17994_v7 = vld [vmem:[#allocation6 + $0x158] sm:$0xff]   ;;  %v17995_v8 = vld [vmem:[#allocation6 + $0x160] sm:$0xff]  }
 0x33d   :  { %v18783_v12 = vsel %vm1826_vm8, %v1829_v46, %v1830_v63  ;;  %v18786_v17 = vsel %vm1361_vm6, %v2156_v3, %v2157_v9  ;;  %22484 = vst [vmem:[#allocation15_spill] sm:$0xff] %v22483_v40  ;;  %v17989_v63 = vld [vmem:[#allocation6 + $0x130] sm:$0xff]   ;;  %v17996_v46 = vld [vmem:[#allocation6 + $0x168] sm:$0xff]   ;;  %v17998_v9 = vld [vmem:[#allocation6 + $0x178] sm:$0xff]  }
 0x33e   :  { %14981 = vmatmul.mubr.bf16.vlgmr.msra.gmra.mrb[8].mxu1 %v18783_v12  ;;  %22485 = vst [vmem:[#allocation16_spill] sm:$0xff] %v18833_v38  ;;  %v17997_v3 = vld [vmem:[#allocation6 + $0x170] sm:$0xff]   ;;  %v18000_v13 = vld [vmem:[#allocation6 + $0x188] sm:$0xff]   ;;  %v18002_v20 = vld [vmem:[#allocation6 + $0x198] sm:$0xff]  }
 0x33f   :  { %14997 = vmatpush3.bf16.msra.mxu1 %v18652_v15  ;;  %14984 = vmatprep.mubr.bf16.mxu1 %v18783_v12  ;;  %v1835_v15 = vrot.slane %v1788_v54, 1  ;;  %v17980_v54 = vld [vmem:[#allocation6 + $0xe8] sm:$0xff]   ;;  %v18003_v24 = vld [vmem:[#allocation6 + $0x1a0] sm:$0xff]   ;;  %v18010_v32 = vld [vmem:[#allocation6 + $0x1d8] sm:$0xff]  }
 0x340   :  { %14998 = vmatprep.subr.bf16.mxu1 %v17960_v1  ;;  %v18012_v33 = vld [vmem:[#allocation6 + $0x1e8] sm:$0xff]  }
 0x341   :  { %v18800_v29 = vsel %vm1826_vm8, %v1835_v15, %v1836_v27  ;;  %v18006_v15 = vld [vmem:[#allocation6 + $0x1b8] sm:$0xff]   ;;  %v18007_v27 = vld [vmem:[#allocation6 + $0x1c0] sm:$0xff]  }
 0x343   :  { %14999 = vmatpush3.bf16.msra.mxu1 %v17960_v1  ;;  %v17999_v1 = vld [vmem:[#allocation6 + $0x180] sm:$0xff]  }
 0x344   :  { %15000 = vmatprep.subr.bf16.mxu1 %v17961_v19 }
 0x346   :  { %14985 = vmatmul.mubr.bf16.gmra.mrb[12].mxu1 %v18795_v26 }
 0x347   :  { %15001 = vmatpush3.bf16.msra.mxu1 %v17961_v19  ;;  %14988 = vmatprep.mubr.bf16.mxu1 %v18795_v26  ;;  %v18001_v19 = vld [vmem:[#allocation6 + $0x190] sm:$0xff]  }
 0x348   :  { %15002 = vmatprep.subr.bf16.mxu1 %v17962_v25 }
 0x34b   :  { %15003 = vmatpush3.bf16.msra.mxu1 %v17962_v25  ;;  %v18004_v25 = vld [vmem:[#allocation6 + $0x1a8] sm:$0xff]  }
 0x34c   :  { %15004 = vmatprep.subr.bf16.mxu1 %v17963_v22 }
 0x34e   :  { %14989 = vmatmul.mubr.bf16.gmra.mrb[16].mxu1 %v18800_v29 }
 0x34f   :  { %15005 = vmatpush3.bf16.msra.mxu1 %v17963_v22  ;;  %14992 = vmatprep.mubr.bf16.mxu1 %v18800_v29  ;;  %v18005_v22 = vld [vmem:[#allocation6 + $0x1b0] sm:$0xff]  }
 0x350   :  { %15006 = vmatprep.subr.bf16.mxu1 %v17964_v28 }
 0x353   :  { %15007 = vmatpush3.bf16.msra.mxu1 %v17964_v28  ;;  %v18008_v28 = vld [vmem:[#allocation6 + $0x1c8] sm:$0xff]  }
 0x354   :  { %15008 = vmatprep.subr.bf16.mxu1 %v17965_v30 }
 0x356   :  { %14993 = vmatmul.mubr.bf16.gmra.mrb[20].mxu1 %v18805_v39 }
 0x357   :  { %15009 = vmatpush3.bf16.msra.mxu1 %v17965_v30  ;;  %15012 = vmatprep.mubr.bf16.mxu1 %v22350_v0  ;;  %v18009_v30 = vld [vmem:[#allocation6 + $0x1d0] sm:$0xff]  }
 0x358   :  { %15010 = vmatprep.subr.bf16.mxu1 %v17966_v37 }
 0x35b   :  { %15011 = vmatpush3.bf16.msra.mxu1 %v17966_v37  ;;  %v18014_v37 = vld [vmem:[#allocation6 + $0x1f8] sm:$0xff]  }
 0x35c   :  { %15028 = vmatprep.subr.bf16.mxu1 %v17967_v31 }
 0x35e   :  { %15013 = vmatmul.mubr.msk.bf16.vlgmr.msra.gmra.mrb[8].mxu1 %vm18810_vm9, %v18770_v61 }
 0x35f   :  { %15029 = vmatpush3.bf16.msra.mxu1 %v17967_v31  ;;  %15016 = vmatprep.mubr.msk.bf16.mxu1 %vm18810_vm9, %v18770_v61  ;;  %v18016_v31 = vld [vmem:[#allocation6 + $0x208] sm:$0xff]  }
 0x360   :  { %15030 = vmatprep.subr.bf16.mxu1 %v17968_v34 }
 0x363   :  { %15031 = vmatpush3.bf16.msra.mxu1 %v17968_v34  ;;  %v18018_v34 = vld [vmem:[#allocation6 + $0x218] sm:$0xff]  }
 0x364   :  { %15032 = vmatprep.subr.bf16.mxu1 %v17969_v35 }
 0x366   :  { %15017 = vmatmul.mubr.msk.bf16.gmra.mrb[12].mxu1 %vm18810_vm9, %v18739_v36 }
 0x367   :  { %15033 = vmatpush3.bf16.msra.mxu1 %v17969_v35  ;;  %15020 = vmatprep.mubr.msk.bf16.mxu1 %vm18810_vm9, %v18739_v36  ;;  %v18020_v35 = vld [vmem:[#allocation6 + $0x228] sm:$0xff]  }
 0x368   :  { %15034 = vmatprep.subr.bf16.mxu1 %v17970_v42 }
 0x36b   :  { %15035 = vmatpush3.bf16.msra.mxu1 %v17970_v42  ;;  %v18022_v42 = vld [vmem:[#allocation6 + $0x238] sm:$0xff]  }
 0x36c   :  { %15036 = vmatprep.subr.bf16.mxu1 %v17971_v43 }
 0x36e   :  { %15021 = vmatmul.mubr.msk.bf16.gmra.mrb[16].mxu1 %vm18810_vm9, %v18744_v41 }
 0x36f   :  { %15037 = vmatpush3.bf16.msra.mxu1 %v17971_v43  ;;  %15024 = vmatprep.mubr.msk.bf16.mxu1 %vm18810_vm9, %v18744_v41 }
 0x370   :  { %15038 = vmatprep.subr.bf16.mxu1 %v17972_v44 }
 0x373   :  { %15039 = vmatpush3.bf16.msra.mxu1 %v17972_v44 }
 0x374   :  { %15040 = vmatprep.subr.bf16.mxu1 %v17973_v45 }
 0x376   :  { %15025 = vmatmul.mubr.msk.bf16.gmra.mrb[20].mxu1 %vm18810_vm9, %v18758_v52 }
 0x377   :  { %15041 = vmatpush3.bf16.msra.mxu1 %v17973_v45  ;;  %15044 = vmatprep.mubr.bf16.mxu1 %v18833_v38 }
 0x378   :  { %15042 = vmatprep.subr.bf16.mxu1 %v17974_v16 }
 0x37b   :  { %15043 = vmatpush3.bf16.msra.mxu1 %v17974_v16 }
 0x37c   :  { %15060 = vmatprep.subr.bf16.mxu1 %v17975_v48 }
 0x37e   :  { %15045 = vmatmul.mubr.bf16.vlgmr.msra.gmra.mrb[8].mxu1 %v18786_v17 }
 0x37f   :  { %15061 = vmatpush3.bf16.msra.mxu1 %v17975_v48  ;;  %15048 = vmatprep.mubr.bf16.mxu1 %v18786_v17 }
 0x380   :  { %15062 = vmatprep.subr.bf16.mxu1 %v17976_v49 }
 0x383   :  { %15063 = vmatpush3.bf16.msra.mxu1 %v17976_v49 }
 0x384   :  { %15064 = vmatprep.subr.bf16.mxu1 %v17977_v50 }
 0x386   :  { %15049 = vmatmul.mubr.bf16.gmra.mrb[12].mxu1 %v18777_v10 }
 0x387   :  { %15065 = vmatpush3.bf16.msra.mxu1 %v17977_v50  ;;  %15052 = vmatprep.mubr.bf16.mxu1 %v18777_v10 }
 0x388   :  { %15066 = vmatprep.subr.bf16.mxu1 %v17978_v51 }
 0x38b   :  { %15067 = vmatpush3.bf16.msra.mxu1 %v17978_v51 }
 0x38c   :  { %15068 = vmatprep.subr.bf16.mxu1 %v17979_v53 }
 0x38e   :  { %15053 = vmatmul.mubr.bf16.gmra.mrb[16].mxu1 %v18780_v11 }
 0x38f   :  { %15069 = vmatpush3.bf16.msra.mxu1 %v17979_v53  ;;  %15056 = vmatprep.mubr.bf16.mxu1 %v18780_v11 }
 0x390   :  { %15070 = vmatprep.subr.bf16.mxu1 %v17980_v54 }
 0x393   :  { %15071 = vmatpush3.bf16.msra.mxu1 %v17980_v54 }
 0x394   :  { %15072 = vmatprep.subr.bf16.mxu1 %v17981_v55 }
 0x396   :  { %15057 = vmatmul.mubr.bf16.gmra.mrb[20].mxu1 %v18790_v18 }
 0x397   :  { %15073 = vmatpush3.bf16.msra.mxu1 %v17981_v55  ;;  %15076 = vmatprep.mubr.msk.bf16.mxu1 %vm18810_vm9, %v18770_v61 }
 0x398   :  { %15074 = vmatprep.subr.bf16.mxu1 %v17982_v47 }
 0x39b   :  { %15075 = vmatpush3.bf16.msra.mxu1 %v17982_v47 }
 0x39c   :  { %15092 = vmatprep.subr.bf16.mxu1 %v17983_v56 }
 0x39e   :  { %15077 = vmatmul.mubr.msk.bf16.vlgmr.msra.gmra.mrb[8].mxu1 %vm18810_vm9, %v18770_v61 }
 0x39f   :  { %15093 = vmatpush3.bf16.msra.mxu1 %v17983_v56  ;;  %15080 = vmatprep.mubr.msk.bf16.mxu1 %vm18810_vm9, %v18739_v36 }
 0x3a0   :  { %15094 = vmatprep.subr.bf16.mxu1 %v17984_v57 }
 0x3a3   :  { %15095 = vmatpush3.bf16.msra.mxu1 %v17984_v57 }
 0x3a4   :  { %15096 = vmatprep.subr.bf16.mxu1 %v17985_v58 }
 0x3a6   :  { %15081 = vmatmul.mubr.msk.bf16.gmra.mrb[12].mxu1 %vm18810_vm9, %v18739_v36 }
 0x3a7   :  { %15097 = vmatpush3.bf16.msra.mxu1 %v17985_v58  ;;  %15084 = vmatprep.mubr.msk.bf16.mxu1 %vm18810_vm9, %v18744_v41 }
 0x3a8   :  { %15098 = vmatprep.subr.bf16.mxu1 %v17986_v59 }
 0x3ab   :  { %15099 = vmatpush3.bf16.msra.mxu1 %v17986_v59 }
 0x3ac   :  { %15100 = vmatprep.subr.bf16.mxu1 %v17987_v60 }
 0x3ae   :  { %15085 = vmatmul.mubr.msk.bf16.gmra.mrb[16].mxu1 %vm18810_vm9, %v18744_v41 }
 0x3af   :  { %15101 = vmatpush3.bf16.msra.mxu1 %v17987_v60  ;;  %15088 = vmatprep.mubr.msk.bf16.mxu1 %vm18810_vm9, %v18758_v52 }
 0x3b0   :  { %15102 = vmatprep.subr.bf16.mxu1 %v17988_v62 }
 0x3b3   :  { %15103 = vmatpush3.bf16.msra.mxu1 %v17988_v62 }
 0x3b4   :  { %15104 = vmatprep.subr.bf16.mxu1 %v17989_v63 }
 0x3b6   :  { %15089 = vmatmul.mubr.msk.bf16.gmra.mrb[20].mxu1 %vm18810_vm9, %v18758_v52 }
 0x3b7   :  { %15105 = vmatpush3.bf16.msra.mxu1 %v17989_v63  ;;  %15108 = vmatprep.mubr.bf16.mxu1 %v18783_v12 }
 0x3b8   :  { %15106 = vmatprep.subr.bf16.mxu1 %v17990_v2 }
 0x3bb   :  { %15107 = vmatpush3.bf16.msra.mxu1 %v17990_v2 }
 0x3bc   :  { %15124 = vmatprep.subr.bf16.mxu1 %v17991_v4 }
 0x3be   :  { %15109 = vmatmul.mubr.bf16.vlgmr.msra.gmra.mrb[8].mxu1 %v18783_v12 }
 0x3bf   :  { %15125 = vmatpush3.bf16.msra.mxu1 %v17991_v4  ;;  %15112 = vmatprep.mubr.bf16.mxu1 %v18795_v26 }
 0x3c0   :  { %15126 = vmatprep.subr.bf16.mxu1 %v17992_v5 }
 0x3c3   :  { %15127 = vmatpush3.bf16.msra.mxu1 %v17992_v5 }
 0x3c4   :  { %15128 = vmatprep.subr.bf16.mxu1 %v17993_v6 }
 0x3c6   :  { %15113 = vmatmul.mubr.bf16.gmra.mrb[12].mxu1 %v18795_v26 }
 0x3c7   :  { %15129 = vmatpush3.bf16.msra.mxu1 %v17993_v6  ;;  %15116 = vmatprep.mubr.bf16.mxu1 %v18800_v29 }
 0x3c8   :  { %15130 = vmatprep.subr.bf16.mxu1 %v17994_v7 }
 0x3cb   :  { %15131 = vmatpush3.bf16.msra.mxu1 %v17994_v7 }
 0x3cc   :  { %15132 = vmatprep.subr.bf16.mxu1 %v17995_v8 }
 0x3ce   :  { %15117 = vmatmul.mubr.bf16.gmra.mrb[16].mxu1 %v18800_v29 }
 0x3cf   :  { %15133 = vmatpush3.bf16.msra.mxu1 %v17995_v8  ;;  %15120 = vmatprep.mubr.bf16.mxu1 %v18805_v39 }
 0x3d0   :  { %15134 = vmatprep.subr.bf16.mxu1 %v17996_v46 }
 0x3d3   :  { %15135 = vmatpush3.bf16.msra.mxu1 %v17996_v46 }
 0x3d4   :  { %15136 = vmatprep.subr.bf16.mxu1 %v17997_v3 }
 0x3d6   :  { %15121 = vmatmul.mubr.bf16.gmra.mrb[20].mxu1 %v18805_v39 }
 0x3d7   :  { %15137 = vmatpush3.bf16.msra.mxu1 %v17997_v3  ;;  %15140 = vmatprep.mubr.bf16.mxu1 %v18786_v17 }
 0x3d8   :  { %15138 = vmatprep.subr.bf16.mxu1 %v17998_v9 }
 0x3db   :  { %15139 = vmatpush3.bf16.msra.mxu1 %v17998_v9 }
 0x3dc   :  { %15156 = vmatprep.subr.bf16.mxu1 %v17999_v1 }
 0x3de   :  { %15141 = vmatmul.mubr.bf16.vlgmr.msra.gmra.mrb[8].mxu1 %v18786_v17 }
 0x3df   :  { %15157 = vmatpush3.bf16.msra.mxu1 %v17999_v1  ;;  %15144 = vmatprep.mubr.bf16.mxu1 %v18777_v10 }
 0x3e0   :  { %15158 = vmatprep.subr.bf16.mxu1 %v18000_v13 }
 0x3e3   :  { %15159 = vmatpush3.bf16.msra.mxu1 %v18000_v13 }
 0x3e4   :  { %15160 = vmatprep.subr.bf16.mxu1 %v18001_v19 }
 0x3e6   :  { %15145 = vmatmul.mubr.bf16.gmra.mrb[12].mxu1 %v18777_v10 }
 0x3e7   :  { %15161 = vmatpush3.bf16.msra.mxu1 %v18001_v19  ;;  %15148 = vmatprep.mubr.bf16.mxu1 %v18780_v11 }
 0x3e8   :  { %15162 = vmatprep.subr.bf16.mxu1 %v18002_v20 }
 0x3eb   :  { %15163 = vmatpush3.bf16.msra.mxu1 %v18002_v20 }
 0x3ec   :  { %15164 = vmatprep.subr.bf16.mxu1 %v18003_v24 }
 0x3ee   :  { %15149 = vmatmul.mubr.bf16.gmra.mrb[16].mxu1 %v18780_v11 }
 0x3ef   :  { %15165 = vmatpush3.bf16.msra.mxu1 %v18003_v24  ;;  %15152 = vmatprep.mubr.bf16.mxu1 %v18790_v18 }
 0x3f0   :  { %15166 = vmatprep.subr.bf16.mxu1 %v18004_v25 }
 0x3f3   :  { %15167 = vmatpush3.bf16.msra.mxu1 %v18004_v25 }
 0x3f4   :  { %15168 = vmatprep.subr.bf16.mxu1 %v18005_v22 }
 0x3f6   :  { %15153 = vmatmul.mubr.bf16.gmra.mrb[20].mxu1 %v18790_v18 }
 0x3f7   :  { %15169 = vmatpush3.bf16.msra.mxu1 %v18005_v22  ;;  %15172 = vmatprep.mubr.msk.bf16.mxu1 %vm18810_vm9, %v18770_v61  ;;  %v18011_v61 = vld [vmem:[#allocation6 + $0x1e0] sm:$0xff]  }
 0x3f8   :  { %15170 = vmatprep.subr.bf16.mxu1 %v18006_v15 }
 0x3fb   :  { %15171 = vmatpush3.bf16.msra.mxu1 %v18006_v15 }
 0x3fc   :  { %15188 = vmatprep.subr.bf16.mxu1 %v18007_v27 }
 0x3fe   :  { %15173 = vmatmul.mubr.msk.bf16.vlgmr.msra.gmra.mrb[8].mxu1 %vm18810_vm9, %v18739_v36 }
 0x3ff   :  { %15189 = vmatpush3.bf16.msra.mxu1 %v18007_v27  ;;  %15176 = vmatprep.mubr.msk.bf16.mxu1 %vm18810_vm9, %v18739_v36  ;;  %v18013_v36 = vld [vmem:[#allocation6 + $0x1f0] sm:$0xff]  }
 0x400   :  { %15190 = vmatprep.subr.bf16.mxu1 %v18008_v28 }
 0x403   :  { %15191 = vmatpush3.bf16.msra.mxu1 %v18008_v28 }
 0x404   :  { %15192 = vmatprep.subr.bf16.mxu1 %v18009_v30 }
 0x406   :  { %15177 = vmatmul.mubr.msk.bf16.gmra.mrb[12].mxu1 %vm18810_vm9, %v18744_v41 }
 0x407   :  { %15193 = vmatpush3.bf16.msra.mxu1 %v18009_v30  ;;  %15180 = vmatprep.mubr.msk.bf16.mxu1 %vm18810_vm9, %v18744_v41  ;;  %v18015_v41 = vld [vmem:[#allocation6 + $0x200] sm:$0xff]  }
 0x408   :  { %15194 = vmatprep.subr.bf16.mxu1 %v18010_v32 }
 0x40b   :  { %15195 = vmatpush3.bf16.msra.mxu1 %v18010_v32  ;;  %v18023_v32 = vld [vmem:[#allocation7 + $0x40] sm:$0xff]  }
 0x40c   :  { %15196 = vmatprep.subr.bf16.mxu1 %v18011_v61  ;;  %15252 = vmatprep.subr.bf16.mxu0 %v18023_v32 }
 0x40d   :  { %15253 = vmatpush3.bf16.msra.mxu0 %v18023_v32 }
 0x40e   :  { %15181 = vmatmul.mubr.msk.bf16.gmra.mrb[16].mxu1 %vm18810_vm9, %v18758_v52 }
 0x40f   :  { %15197 = vmatpush3.bf16.msra.mxu1 %v18011_v61  ;;  %15184 = vmatprep.mubr.msk.bf16.mxu1 %vm18810_vm9, %v18758_v52  ;;  %v18017_v52 = vld [vmem:[#allocation6 + $0x210] sm:$0xff]  }
 0x410   :  { %15198 = vmatprep.subr.bf16.mxu1 %v18012_v33 }
 0x413   :  { %15199 = vmatpush3.bf16.msra.mxu1 %v18012_v33 }
 0x414   :  { %15200 = vmatprep.subr.bf16.mxu1 %v18013_v36 }
 0x416   :  { %15185 = vmatmul.mubr.bf16.gmra.mrb[20].mxu1 %v22350_v0 }
 0x417   :  { %15201 = vmatpush3.bf16.msra.mxu1 %v18013_v36  ;;  %15204 = vmatprep.mubr.bf16.mxu1 %v18783_v12  ;;  %v18019_v12 = vld [vmem:[#allocation6 + $0x220] sm:$0xff]  }
 0x418   :  { %15202 = vmatprep.subr.bf16.mxu1 %v18014_v37 }
 0x41b   :  { %15203 = vmatpush3.bf16.msra.mxu1 %v18014_v37  ;;  %v18024_v37 = vld [vmem:[#allocation7 + $0x48] sm:$0xff]  }
 0x41c   :  { %15220 = vmatprep.subr.bf16.mxu1 %v18015_v41  ;;  %15254 = vmatprep.subr.bf16.mxu0 %v18024_v37 }
 0x41d   :  { %15255 = vmatpush3.bf16.msra.mxu0 %v18024_v37 }
 0x41e   :  { %15205 = vmatmul.mubr.bf16.vlgmr.msra.gmra.mrb[8].mxu1 %v18795_v26 }
 0x41f   :  { %15221 = vmatpush3.bf16.msra.mxu1 %v18015_v41  ;;  %15208 = vmatprep.mubr.bf16.mxu1 %v18795_v26  ;;  %v18021_v26 = vld [vmem:[#allocation6 + $0x230] sm:$0xff]  }
 0x420   :  { %15222 = vmatprep.subr.bf16.mxu1 %v18016_v31 }
 0x423   :  { %15223 = vmatpush3.bf16.msra.mxu1 %v18016_v31 }
 0x424   :  { %15224 = vmatprep.subr.bf16.mxu1 %v18017_v52 }
 0x426   :  { %15209 = vmatmul.mubr.bf16.gmra.mrb[12].mxu1 %v18800_v29 }
 0x427   :  { %15225 = vmatpush3.bf16.msra.mxu1 %v18017_v52  ;;  %15212 = vmatprep.mubr.bf16.mxu1 %v18800_v29  ;;  %v18025_v52 = vld [vmem:[#allocation7 + $0x50] sm:$0xff]  }
 0x428   :  { %15226 = vmatprep.subr.bf16.mxu1 %v18018_v34  ;;  %15256 = vmatprep.subr.bf16.mxu0 %v18025_v52 }
 0x429   :  { %15257 = vmatpush3.bf16.msra.mxu0 %v18025_v52 }
 0x42b   :  { %15227 = vmatpush3.bf16.msra.mxu1 %v18018_v34 }
 0x42c   :  { %15228 = vmatprep.subr.bf16.mxu1 %v18019_v12 }
 0x42e   :  { %15213 = vmatmul.mubr.bf16.gmra.mrb[16].mxu1 %v18805_v39 }
 0x42f   :  { %15229 = vmatpush3.bf16.msra.mxu1 %v18019_v12  ;;  %15216 = vmatprep.mubr.bf16.mxu1 %v18805_v39 }
 0x430   :  { %15230 = vmatprep.subr.bf16.mxu1 %v18020_v35 }
 0x433   :  { %15231 = vmatpush3.bf16.msra.mxu1 %v18020_v35  ;;  %v18026_v35 = vld [vmem:[#allocation7 + $0x58] sm:$0xff]  }
 0x434   :  { %15232 = vmatprep.subr.bf16.mxu1 %v18021_v26  ;;  %15258 = vmatprep.subr.bf16.mxu0 %v18026_v35 }
 0x435   :  { %15259 = vmatpush3.bf16.msra.mxu0 %v18026_v35 }
 0x436   :  { %15217 = vmatmul.mubr.bf16.gmra.mrb[20].mxu1 %v18649_v14 }
 0x437   :  { %15233 = vmatpush3.bf16.msra.mxu1 %v18021_v26  ;;  %15236 = vmatprep.mubr.bf16.mxu1 %v18786_v17  ;;  %v13683_v17 = vld [vmem:[%s22338_s8] ss:$0 sm:$0xff] }
 0x438   :  { %15234 = vmatprep.subr.bf16.mxu1 %v18022_v42 }
 0x43b   :  { %15235 = vmatpush3.bf16.msra.mxu1 %v18022_v42 }
 0x43e   :  { %15237 = vmatmul.mubr.bf16.vlgmr.msra.gmra.mrb[8].mxu1 %v18777_v10 }
 0x43f   :  { %15240 = vmatprep.mubr.bf16.mxu1 %v18777_v10 }
 0x446   :  { %15241 = vmatmul.mubr.bf16.gmra.mrb[12].mxu1 %v18780_v11 }
 0x447   :  { %15244 = vmatprep.mubr.bf16.mxu1 %v18780_v11 }
 0x44e   :  { %15245 = vmatmul.mubr.bf16.gmra.mrb[16].mxu1 %v18790_v18 }
 0x44f   :  { %15248 = vmatprep.mubr.bf16.mxu1 %v18790_v18 }
 0x456   :  { %15249 = vmatmul.mubr.bf16.gmra.mrb[20].mxu1 %v18833_v38 }
 0x457   :  { %16068 = vmatprep.mubr.bf16.mxu1 %v22350_v0 }
 0x511   :  { %v15238_v29 = vpop.f32.mrb[8].mxu1 }
 0x512   :  { %v3340_v39 = vpop.f32.mrb[9].mxu1  ;;  %v18932_v11 = vadd.f32 %v15238_v29, %v13683_v17  ;;  %v18027_v29 = vld [vmem:[#allocation7 + $0x60] sm:$0xff]  }
 0x513   :  { %v15239_v43 = vpop.f32.mrb[10].mxu1  ;;  %v18928_v44 = vadd.f32 %v13683_v17, %v3340_v39  ;;  %15260 = vmatprep.subr.bf16.mxu0 %v18027_v29 }
 0x514   :  { %v3343_v10 = vpop.f32.mrb[11].mxu1  ;;  %v18936_v16 = vadd.f32 %v15239_v43, %v13683_v17  ;;  %15261 = vmatpush3.bf16.msra.mxu0 %v18027_v29 }
 0x515   :  { %v18930_v45 = vadd.f32 %v13683_v17, %v3343_v10 }
 0x517   :  { %v3444_v18 = vadd.f32 %v18930_v45, %v18928_v44 }
 0x519   :  { %v3445_v48 = vadd.f32 %v3444_v18, %v18932_v11  ;;  %v15242_v49 = vpop.f32.mrb[12].mxu1 }
 0x51a   :  { %v3356_v50 = vpop.f32.mrb[13].mxu1  ;;  %v3432_v57 = vadd.f32 %v15242_v49, %v13683_v17 }
 0x51b   :  { %v3430_v51 = vadd.f32 %v13683_v17, %v3356_v50  ;;  %v3446_v53 = vadd.f32 %v3445_v48, %v18936_v16  ;;  %v15243_v54 = vpop.f32.mrb[14].mxu1  ;;  %v18028_v48 = vld [vmem:[#allocation7 + $0x68] sm:$0xff]  }
 0x51c   :  { %v3359_v55 = vpop.f32.mrb[15].mxu1  ;;  %v3433_v59 = vadd.f32 %v15243_v54, %v13683_v17  ;;  %15262 = vmatprep.subr.bf16.mxu0 %v18028_v48 }
 0x51d   :  { %v3447_v47 = vadd.f32 %v3446_v53, %v3430_v51  ;;  %v3431_v56 = vadd.f32 %v13683_v17, %v3359_v55  ;;  %15263 = vmatpush3.bf16.msra.mxu0 %v18028_v48 }
 0x51f   :  { %v3448_v58 = vadd.f32 %v3447_v47, %v3431_v56 }
 0x521   :  { %v3449_v60 = vadd.f32 %v3448_v58, %v3432_v57  ;;  %v15246_v62 = vpop.f32.mrb[16].mxu1 }
 0x522   :  { %v3372_v63 = vpop.f32.mrb[17].mxu1  ;;  %v3436_v46 = vadd.f32 %v15246_v62, %v13683_v17 }
 0x523   :  { %v3434_v2 = vadd.f32 %v13683_v17, %v3372_v63  ;;  %v3450_v4 = vadd.f32 %v3449_v60, %v3433_v59  ;;  %v15247_v5 = vpop.f32.mrb[18].mxu1  ;;  %v18030_v63 = vld [vmem:[#allocation7 + $0x78] sm:$0xff]  }
 0x524   :  { %v3375_v6 = vpop.f32.mrb[19].mxu1  ;;  %v3437_v9 = vadd.f32 %v15247_v5, %v13683_v17  ;;  %v18031_v5 = vld [vmem:[#allocation7] sm:$0xff]  }
 0x525   :  { %v3451_v7 = vadd.f32 %v3450_v4, %v3434_v2  ;;  %v3435_v8 = vadd.f32 %v13683_v17, %v3375_v6 }
 0x527   :  { %v3452_v3 = vadd.f32 %v3451_v7, %v3435_v8 }
 0x529   :  { %v3453_v1 = vadd.f32 %v3452_v3, %v3436_v46  ;;  %v15250_v13 = vpop.f32.mrb[20].mxu1 }
 0x52a   :  { %v3388_v19 = vpop.f32.mrb[21].mxu1  ;;  %v3440_v28 = vadd.f32 %v15250_v13, %v13683_v17 }
 0x52b   :  { %v3438_v20 = vadd.f32 %v13683_v17, %v3388_v19  ;;  %v3454_v24 = vadd.f32 %v3453_v1, %v3437_v9  ;;  %v15251_v25 = vpop.f32.mrb[22].mxu1 }
 0x52c   :  { %v3391_v22 = vpop.f32.mrb[23].mxu1  ;;  %v3441_v61 = vadd.f32 %v15251_v25, %v13683_v17 }
 0x52d   :  { %v3455_v15 = vadd.f32 %v3454_v24, %v3438_v20  ;;  %v3439_v27 = vadd.f32 %v13683_v17, %v3391_v22 }
 0x52f   :  { %v3456_v30 = vadd.f32 %v3455_v15, %v3439_v27 }
 0x531   :  { %v3457_v33 = vadd.f32 %v3456_v30, %v3440_v28  ;;  %v18032_v30 = vld [vmem:[#allocation7 + $0x8] sm:$0xff]  }
 0x533   :  { %v3458_v36 = vadd.f32 %v3457_v33, %v3441_v61 }
 0x535   :  { %v3459_v41 = vrot.slane %v3458_v36, 4 }
 0x537   :  { %v3460_v31 = vadd.f32 %v3459_v41, %v3458_v36 }
 0x539   :  { %v3461_v34 = vrot.slane %v3460_v31, 2 }
 0x53b   :  { %v3462_v12 = vadd.f32 %v3461_v34, %v3460_v31 }
 0x53d   :  { %v3463_v26 = vrot.slane %v3462_v12, 1 }
 0x53f   :  { %v3464_v42 = vadd.f32 %v3463_v26, %v3462_v12 }
 0x541   :  { %v3465_v17 = vmul.f32 0.0078125, %v3464_v42  ;;  %v18033_v42 = vld [vmem:[#allocation7 + $0x10] sm:$0xff]  }
 0x543   :  { %v18941_v39 = vsub.f32 %v18928_v44, %v3465_v17  ;;  %v18944_v43 = vsub.f32 %v18930_v45, %v3465_v17  ;;  %v18947_v10 = vsub.f32 %v18932_v11, %v3465_v17  ;;  %v18950_v18 = vsub.f32 %v18936_v16, %v3465_v17 }
 0x544   :  { %v18952_v49 = vsub.f32 %v3430_v51, %v3465_v17  ;;  %v18954_v50 = vsub.f32 %v3431_v56, %v3465_v17  ;;  %v18956_v53 = vsub.f32 %v3432_v57, %v3465_v17  ;;  %v18958_v54 = vsub.f32 %v3433_v59, %v3465_v17  ;;  %v18029_v59 = vld [vmem:[#allocation7 + $0x70] sm:$0xff]  }
 0x545   :  { %v18960_v44 = vsub.f32 %v3434_v2, %v3465_v17  ;;  %v18962_v55 = vsub.f32 %v3435_v8, %v3465_v17  ;;  %v18964_v45 = vsub.f32 %v3436_v46, %v3465_v17  ;;  %v18966_v11 = vsub.f32 %v3437_v9, %v3465_v17  ;;  %15264 = vmatprep.subr.bf16.mxu0 %v18029_v59 }
 0x546   :  { %v18968_v16 = vsub.f32 %v3438_v20, %v3465_v17  ;;  %v18970_v47 = vsub.f32 %v3439_v27, %v3465_v17  ;;  %v18972_v51 = vsub.f32 %v3440_v28, %v3465_v17  ;;  %v18974_v56 = vsub.f32 %v3441_v61, %v3465_v17  ;;  %15265 = vmatpush3.bf16.msra.mxu0 %v18029_v59  ;;  %v18034_v59 = vld [vmem:[#allocation7 + $0x18] sm:$0xff]  }
 0x547   :  { %v3482_v57 = vmul.f32 %v18941_v39, %v18941_v39  ;;  %v3483_v58 = vmul.f32 %v18944_v43, %v18944_v43  ;;  %v3484_v60 = vmul.f32 %v18947_v10, %v18947_v10  ;;  %v3485_v2 = vmul.f32 %v18950_v18, %v18950_v18  ;;  %15266 = vmatprep.subr.bf16.mxu0 %v18030_v63 }
 0x548   :  { %v3486_v6 = vmul.f32 %v18952_v49, %v18952_v49  ;;  %v3487_v8 = vmul.f32 %v18954_v50, %v18954_v50  ;;  %v3488_v3 = vmul.f32 %v18956_v53, %v18956_v53  ;;  %v3489_v1 = vmul.f32 %v18958_v54, %v18958_v54 }
 0x549   :  { %v3498_v62 = vadd.f32 %v3483_v58, %v3482_v57  ;;  %v3490_v19 = vmul.f32 %v18960_v44, %v18960_v44  ;;  %v3491_v24 = vmul.f32 %v18962_v55, %v18962_v55  ;;  %v3492_v22 = vmul.f32 %v18964_v45, %v18964_v45 }
 0x54a   :  { %15267 = vmatpush3.bf16.msra.mxu0 %v18030_v63  ;;  %v3493_v27 = vmul.f32 %v18966_v11, %v18966_v11  ;;  %v3494_v32 = vmul.f32 %v18968_v16, %v18968_v16  ;;  %v3495_v33 = vmul.f32 %v18970_v47, %v18970_v47  ;;  %v3496_v37 = vmul.f32 %v18972_v51, %v18972_v51 }
 0x54b   :  { %v3499_v4 = vadd.f32 %v3498_v62, %v3484_v60  ;;  %15332 = vmatprep.subr.bf16.mxu0 %v18031_v5  ;;  %v3497_v31 = vmul.f32 %v18974_v56, %v18974_v56  ;;  %v3442_v60 = vld [vmem:[%s22339_s9] sm:$0x1] }
 0x54d   :  { %v3500_v7 = vadd.f32 %v3499_v4, %v3485_v2  ;;  %15269 = vmatmul.mubr.bf16.vlgmr.msra.gmra.mrb[12].mxu0 %v18649_v14 }
 0x54e   :  { %15333 = vmatpush3.bf16.msra.mxu0 %v18031_v5 }
 0x54f   :  { %v3501_v46 = vadd.f32 %v3500_v7, %v3486_v6  ;;  %15334 = vmatprep.subr.bf16.mxu0 %v18032_v30  ;;  %v19022_v6 = vld [vmem:[%s22340_s10] ss:$0 sm:$0xff] }
 0x551   :  { %v3502_v9 = vadd.f32 %v3501_v46, %v3487_v8 }
 0x552   :  { %15335 = vmatpush3.bf16.msra.mxu0 %v18032_v30 }
 0x553   :  { %v3503_v13 = vadd.f32 %v3502_v9, %v3488_v3  ;;  %15336 = vmatprep.subr.bf16.mxu0 %v18033_v42 }
 0x555   :  { %v3504_v20 = vadd.f32 %v3503_v13, %v3489_v1  ;;  %v18035_v13 = vld [vmem:[#allocation7 + $0x20] sm:$0xff]  }
 0x556   :  { %15337 = vmatpush3.bf16.msra.mxu0 %v18033_v42 }
 0x557   :  { %v3505_v25 = vadd.f32 %v3504_v20, %v3490_v19  ;;  %15338 = vmatprep.subr.bf16.mxu0 %v18034_v59 }
 0x559   :  { %v3506_v15 = vadd.f32 %v3505_v25, %v3491_v24 }
 0x55a   :  { %15339 = vmatpush3.bf16.msra.mxu0 %v18034_v59 }
 0x55b   :  { %v3507_v28 = vadd.f32 %v3506_v15, %v3492_v22  ;;  %15340 = vmatprep.subr.bf16.mxu0 %v18035_v13 }
 0x55d   :  { %v3508_v61 = vadd.f32 %v3507_v28, %v3493_v27 }
 0x55e   :  { %15341 = vmatpush3.bf16.msra.mxu0 %v18035_v13 }
 0x55f   :  { %v3509_v36 = vadd.f32 %v3508_v61, %v3494_v32 }
 0x561   :  { %v3510_v41 = vadd.f32 %v3509_v36, %v3495_v33  ;;  %v18036_v36 = vld [vmem:[#allocation7 + $0x28] sm:$0xff]  }
 0x562   :  { %15342 = vmatprep.subr.bf16.mxu0 %v18036_v36 }
 0x563   :  { %v3511_v52 = vadd.f32 %v3510_v41, %v3496_v37  ;;  %15343 = vmatpush3.bf16.msra.mxu0 %v18036_v36 }
 0x565   :  { %v3512_v34 = vadd.f32 %v3511_v52, %v3497_v31 }
 0x567   :  { %v3513_v12 = vrot.slane %v3512_v34, 4 }
 0x569   :  { %v3514_v35 = vadd.f32 %v3513_v12, %v3512_v34 }
 0x56b   :  { %v3515_v26 = vrot.slane %v3514_v35, 2 }
 0x56d   :  { %v3516_v29 = vadd.f32 %v3515_v26, %v3514_v35 }
 0x56f   :  { %v3517_v17 = vrot.slane %v3516_v29, 1 }
 0x571   :  { %v3518_v48 = vadd.f32 %v3517_v17, %v3516_v29  ;;  %v18037_v29 = vld [vmem:[#allocation7 + $0x30] sm:$0xff]  }
 0x572   :  { %15344 = vmatprep.subr.bf16.mxu0 %v18037_v29 }
 0x573   :  { %v3519_v57 = vmul.f32 0.0078125, %v3518_v48  ;;  %15345 = vmatpush3.bf16.msra.mxu0 %v18037_v29  ;;  %v18038_v29 = vld [vmem:[#allocation7 + $0x38] sm:$0xff]  }
 0x574   :  { %15346 = vmatprep.subr.bf16.mxu0 %v18038_v29 }
 0x575   :  { %v3520_v58 = vadd.f32 0.8, %v3519_v57 }
 0x577   :  { %18169 = vrsqrt.f32 %v3520_v58  ;;  %15347 = vmatpush3.bf16.msra.mxu0 %v18038_v29 }
 0x581   :  { %v18170_v62 = vpop.eup %18169 }
 0x582   :  { %v3522_v63 = vmul.f32 %v18170_v62, %v3442_v60 }
 0x584   :  { %v19013_v2 = vrot.slane %v3522_v63, %v18663_v21 }
 0x586   :  { %v3529_v4 = vmul.f32 %v19013_v2, %v18941_v39  ;;  %v3530_v5 = vmul.f32 %v19013_v2, %v18944_v43  ;;  %v3539_v7 = vmul.f32 %v19013_v2, %v18964_v45  ;;  %v3540_v8 = vmul.f32 %v19013_v2, %v18966_v11 }
 0x587   :  { %v3541_v46 = vmul.f32 %v19013_v2, %v18968_v16  ;;  %v3542_v39 = vmul.f32 %v19013_v2, %v18970_v47  ;;  %v3543_v43 = vmul.f32 %v19013_v2, %v18972_v51  ;;  %v3544_v3 = vmul.f32 %v19013_v2, %v18974_v56 }
 0x588   :  { %v3551_v9 = vadd.f32 %v19022_v6, %v3529_v4  ;;  %v3552_v1 = vadd.f32 %v19022_v6, %v3530_v5  ;;  %v3561_v45 = vadd.f32 %v19022_v6, %v3539_v7  ;;  %v3562_v11 = vadd.f32 %v19022_v6, %v3540_v8 }
 0x589   :  { %v3563_v16 = vadd.f32 %v19022_v6, %v3541_v46  ;;  %v3564_v19 = vadd.f32 %v19022_v6, %v3542_v39  ;;  %v3565_v47 = vadd.f32 %v19022_v6, %v3543_v43  ;;  %v3566_v51 = vadd.f32 %v19022_v6, %v3544_v3 }
 0x58a   :  { %v3567_v20 = vmax.f32 %v3551_v9, 0.0  ;;  %v3568_v24 = vmax.f32 %v3552_v1, 0.0  ;;  %v3577_v56 = vmax.f32 %v3561_v45, 0.0  ;;  %v3578_v25 = vmax.f32 %v3562_v11, 0.0 }
 0x58b   :  { %v3579_v22 = vmax.f32 %v3563_v16, 0.0  ;;  %v3580_v15 = vmax.f32 %v3564_v19, 0.0  ;;  %v3581_v27 = vmax.f32 %v3565_v47, 0.0  ;;  %v19044_v28 = vmax.f32 %v3566_v51, 0.0 }
 0x58c   :  { %v3583_v30 = vpack.c.bf16 %v3568_v24, %v3567_v20  ;;  %v3588_v32 = vpack.c.bf16 %v3578_v25, %v3577_v56  ;;  %v3531_v37 = vmul.f32 %v19013_v2, %v18947_v10  ;;  %v3532_v41 = vmul.f32 %v19013_v2, %v18950_v18 }
 0x58d   :  { %v3589_v61 = vpack.c.bf16 %v3580_v15, %v3579_v22  ;;  %v3590_v33 = vpack.c.bf16 %v19044_v28, %v3581_v27  ;;  %v3533_v31 = vmul.f32 %v19013_v2, %v18952_v49  ;;  %v3534_v52 = vmul.f32 %v19013_v2, %v18954_v50 }
 0x58e   :  { %v19056_v34 = vrot.slane %v3588_v32, %v18695_v23  ;;  %v13690_v12 = vpack.c.bf16 %v3578_v25, %v3578_v25  ;;  %v3535_v35 = vmul.f32 %v19013_v2, %v18956_v53  ;;  %v3536_v26 = vmul.f32 %v19013_v2, %v18958_v54 }
 0x58f   :  { %v3553_v10 = vadd.f32 %v19022_v6, %v3531_v37  ;;  %v3554_v18 = vadd.f32 %v19022_v6, %v3532_v41  ;;  %v3555_v42 = vadd.f32 %v19022_v6, %v3533_v31  ;;  %v3556_v49 = vadd.f32 %v19022_v6, %v3534_v52 }
 0x590   :  { %v3859_v50 = vcombine.high %v19056_v34, %v19056_v34  ;;  %v3858_v17 = vrot.slane %v13690_v12, %v18695_v23  ;;  %v3557_v48 = vadd.f32 %v19022_v6, %v3535_v35  ;;  %v3558_v53 = vadd.f32 %v19022_v6, %v3536_v26 }
 0x591   :  { %v3569_v57 = vmax.f32 %v3553_v10, 0.0  ;;  %v3570_v54 = vmax.f32 %v3554_v18, 0.0  ;;  %v3571_v58 = vmax.f32 %v3555_v42, 0.0  ;;  %v3572_v59 = vmax.f32 %v3556_v49, 0.0 }
 0x592   :  { %v19072_v60 = vrot.slane %v3589_v61, %v18695_v23  ;;  %v19075_v62 = vrot.slane %v3859_v50, %v18695_v23  ;;  %v13691_v63 = vpack.c.bf16 %v3580_v15, %v3580_v15  ;;  %v3860_v4 = vcombine.high %v3858_v17, %v3858_v17 }
 0x593   :  { %v3573_v5 = vmax.f32 %v3557_v48, 0.0  ;;  %v19077_v7 = vmax.f32 %v3558_v53, 0.0  ;;  %v3584_v8 = vpack.c.bf16 %v3570_v54, %v3569_v57  ;;  %v3874_v46 = vrot.slane %v3858_v17, %v18695_v23 }
 0x594   :  { %v3585_v39 = vpack.c.bf16 %v3572_v59, %v3571_v58  ;;  %v13685_v43 = vpack.c.bf16 %v3568_v24, %v3568_v24  ;;  %v3908_v3 = vcombine.high %v19072_v60, %v19072_v60  ;;  %v19083_v9 = vrot.slane %v3583_v30, %v18695_v23 }
 0x595   :  { %v3891_v1 = vcombine.high %v19075_v62, %v19075_v62  ;;  %v3907_v45 = vrot.slane %v13691_v63, %v18695_v23  ;;  %v19090_v11 = vmul.f32 %v19013_v2, %v18960_v44  ;;  %v13686_v13 = vpack.c.bf16 %v3570_v54, %v3570_v54 }
 0x596   :  { %v19093_v16 = vrot.slane %v3860_v4, %v18695_v23  ;;  %v19096_v19 = vrot.slane %v3590_v33, %v18695_v23  ;;  %v19099_v47 = vpack.c.bf16 %v19077_v7, %v3573_v5  ;;  %v3655_v51 = vrot.slane %v3584_v8, %v18695_v23 }
 0x597   :  { %v3890_v20 = vcombine.high %v3874_v46, %v3874_v46  ;;  %v13692_v24 = vpack.c.bf16 %v19044_v28, %v19044_v28  ;;  %v3613_v56 = vrot.slane %v13685_v43, %v18695_v23  ;;  %v13687_v44 = vpack.c.bf16 %v3572_v59, %v3572_v59 }
 0x598   :  { %v3704_v25 = vrot.slane %v3585_v39, %v18695_v23  ;;  %v19107_v22 = vrot.slane %v3908_v3, %v18695_v23  ;;  %v3614_v15 = vcombine.high %v19083_v9, %v19083_v9  ;;  %v3909_v27 = vcombine.high %v3907_v45, %v3907_v45 }
 0x599   :  { %v3923_v30 = vrot.slane %v3907_v45, %v18695_v23  ;;  %v4600_v32 = vcombine.low %v3891_v1, %v3874_v46  ;;  %v19114_v61 = vrot.slane %v19083_v9, %v18695_v23  ;;  %v3662_v28 = vrot.slane %v13686_v13, %v18695_v23 }
 0x59a   :  { %v3957_v33 = vcombine.high %v19096_v19, %v19096_v19  ;;  %v4601_v36 = vcombine.low %v3874_v46, %v19093_v16  ;;  %v3663_v37 = vcombine.high %v3655_v51, %v3655_v51  ;;  %v3956_v41 = vrot.slane %v13692_v24, %v18695_v23 }
 0x59b   :  { %v4602_v31 = vcombine.low %v19093_v16, %v3890_v20  ;;  %v13704_v52 = vcombine.high %v3874_v46, %v19093_v16  ;;  %v3711_v12 = vrot.slane %v13687_v44, %v18695_v23  ;;  %v3940_v35 = vcombine.high %v19107_v22, %v19107_v22 }
 0x59c   :  { %v4610_v26 = vrot.slane %v4600_v32, %v18695_v23  ;;  %v4617_v10 = vrot.slane %v4601_v36, %v18695_v23  ;;  %v19129_v18 = vrot.slane %v3909_v27, %v18695_v23  ;;  %v3939_v42 = vcombine.high %v3923_v30, %v3923_v30 }
 0x59d   :  { %v4624_v49 = vrot.slane %v4602_v31, %v18695_v23  ;;  %v4631_v50 = vrot.slane %v13704_v52, %v18695_v23  ;;  %v19134_v17 = vrot.slane %v3655_v51, %v18695_v23  ;;  %v3712_v48 = vcombine.high %v3704_v25, %v3704_v25 }
 0x59e   :  { %v19137_v53 = vrot.slane %v3957_v33, %v18695_v23  ;;  %v4632_v57 = vcombine.low %v4610_v26, %v4617_v10  ;;  %v3615_v54 = vcombine.high %v3613_v56, %v3613_v56  ;;  %v3664_v58 = vcombine.high %v3662_v28, %v3662_v28 }
 0x59f   :  { %v3958_v59 = vcombine.high %v3956_v41, %v3956_v41  ;;  %v4633_v63 = vcombine.low %v4624_v49, %v4631_v50  ;;  %v19140_v4 = vrot.slane %v3662_v28, %v18695_v23  ;;  %v19143_v5 = vrot.slane %v3663_v37, %v18695_v23 }
 0x5a0   :  { %v4640_v8 = vrot.slane %v4632_v57, %v18695_v23  ;;  %v4712_v46 = vcombine.low %v3940_v35, %v3923_v30  ;;  %v3713_v39 = vcombine.high %v3711_v12, %v3711_v12  ;;  %v4713_v3 = vcombine.low %v3923_v30, %v19129_v18 }
 0x5a1   :  { %v4647_v43 = vrot.slane %v4633_v63, %v18695_v23  ;;  %v4714_v1 = vcombine.low %v19129_v18, %v3939_v42  ;;  %v19150_v45 = vrot.slane %v3704_v25, %v18695_v23  ;;  %v3989_v13 = vcombine.high %v19137_v53, %v19137_v53 }
 0x5a2   :  { %v13706_v51 = vcombine.high %v3923_v30, %v19129_v18  ;;  %v4722_v20 = vrot.slane %v4712_v46, %v18695_v23  ;;  %v19157_v24 = vrot.slane %v3958_v59, %v18695_v23  ;;  %v4729_v27 = vrot.slane %v4713_v3, %v18695_v23 }
 0x5a3   :  { %v19159_v44 = vcombine.low %v4640_v8, %v4647_v43  ;;  %v4736_v32 = vrot.slane %v4714_v1, %v18695_v23  ;;  %v3695_v25 = vcombine.high %v19143_v5, %v19143_v5  ;;  %v19166_v28 = vrot.slane %v3711_v12, %v18695_v23 }
 0x5a4   :  { %v19169_v33 = vrot.slane %v3956_v41, %v18695_v23  ;;  %v4743_v30 = vrot.slane %v13706_v51, %v18695_v23  ;;  %v3629_v36 = vrot.slane %v3613_v56, %v18695_v23  ;;  %v3643_v37 = vrot.slane %v3615_v54, %v18695_v23 }
 0x5a5   :  { %v19175_v31 = vrot.slane %v3664_v58, %v18695_v23  ;;  %v4744_v52 = vcombine.low %v4722_v20, %v4729_v27  ;;  %v3694_v35 = vcombine.high %v19140_v4, %v19140_v4  ;;  %v19180_v26 = vrot.slane %v3712_v48, %v18695_v23 }
 0x5a6   :  { %v4745_v12 = vcombine.low %v4736_v32, %v4743_v30  ;;  %v4824_v41 = vcombine.low %v3989_v13, %v19169_v33  ;;  %v19184_v10 = vrot.slane %v3713_v39, %v18695_v23  ;;  %v3742_v56 = vcombine.high %v19150_v45, %v19150_v45 }
 0x5a7   :  { %v4752_v42 = vrot.slane %v4744_v52, %v18695_v23  ;;  %v4825_v49 = vcombine.low %v19169_v33, %v19157_v24  ;;  %v3743_v50 = vcombine.high %v19166_v28, %v19166_v28  ;;  %v19194_v29 = vcombine.low %v3695_v25, %v19140_v4 }
 0x5a8   :  { %v4759_v48 = vrot.slane %v4745_v12, %v18695_v23  ;;  %v4834_v57 = vrot.slane %v4824_v41, %v18695_v23  ;;  %v3636_v58 = vrot.slane %v3614_v15, %v18695_v23  ;;  %v3644_v59 = vcombine.high %v19114_v61, %v19114_v61 }
 0x5a9   :  { %v4841_v54 = vrot.slane %v4825_v49, %v18695_v23  ;;  %v3645_v63 = vcombine.high %v3629_v36, %v3629_v36  ;;  %v4153_v8 = vcombine.low %v19140_v4, %v19175_v31  ;;  %v19208_v46 = vcombine.low %v19175_v31, %v3694_v35  ;;  %v19223_v35 = vld [vmem:[#allocation7 + $0x80] sm:$0xff]  }
 0x5aa   :  { %v19210_v39 = vcombine.low %v4752_v42, %v4759_v48  ;;  %v3991_v43 = vcombine.low %v19114_v61, %v19114_v61  ;;  %v3646_v1 = vcombine.high %v3636_v58, %v3636_v58  ;;  %v3992_v9 = vcombine.low %v19114_v61, %v3636_v58  ;;  %15412 = vmatprep.subr.bf16.mxu0 %v19223_v35 }
 0x5ab   :  { %v19214_v3 = vcombine.low %v4834_v57, %v4841_v54  ;;  %v3993_v15 = vcombine.low %v3636_v58, %v3644_v59  ;;  %v13696_v13 = vcombine.high %v19140_v4, %v19175_v31  ;;  %v13693_v51 = vcombine.high %v19114_v61, %v3636_v58 }
 0x5ac   :  { %v4001_v20 = vrot.slane %v3991_v43, %v18695_v23  ;;  %v4041_v27 = vcombine.low %v3629_v36, %v3643_v37  ;;  %v4008_v32 = vrot.slane %v3992_v9, %v18695_v23  ;;  %v4040_v30 = vcombine.low %v3646_v1, %v3629_v36 }
 0x5ad   :  { %v4015_v25 = vrot.slane %v3993_v15, %v18695_v23  ;;  %v4042_v52 = vcombine.low %v3643_v37, %v3645_v63  ;;  %v4022_v12 = vrot.slane %v13693_v51, %v18695_v23  ;;  %v13694_v41 = vcombine.high %v3629_v36, %v3643_v37 }
 0x5ae   :  { %v4057_v42 = vrot.slane %v4041_v27, %v18695_v23  ;;  %v3647_v49 = vcombine.high %v3643_v37, %v3643_v37  ;;  %v4023_v4 = vcombine.low %v4001_v20, %v4008_v32  ;;  %v4050_v61 = vrot.slane %v4040_v30, %v18695_v23 }
 0x5af   :  { %v4064_v48 = vrot.slane %v4042_v52, %v18695_v23  ;;  %v3693_v57 = vcombine.high %v19134_v17, %v19134_v17  ;;  %v4024_v54 = vcombine.low %v4015_v25, %v4022_v12  ;;  %v4071_v58 = vrot.slane %v13694_v41, %v18695_v23 }
 0x5b0   :  { %v4095_v59 = vrot.slane %v3647_v49, %v18695_v23  ;;  %v4103_v36 = vcombine.low %v19134_v17, %v19134_v17  ;;  %v4031_v37 = vrot.slane %v4023_v4, %v18695_v23  ;;  %v4072_v63 = vcombine.low %v4050_v61, %v4057_v42 }
 0x5b1   :  { %v4104_v43 = vcombine.low %v19134_v17, %v19143_v5  ;;  %v4105_v1 = vcombine.low %v19143_v5, %v3693_v57  ;;  %v4038_v9 = vrot.slane %v4024_v54, %v18695_v23  ;;  %v4073_v15 = vcombine.low %v4064_v48, %v4071_v58 }
 0x5b2   :  { %v4102_v51 = vrot.slane %v4095_v59, %v18695_v23  ;;  %v13695_v20 = vcombine.high %v19134_v17, %v19143_v5  ;;  %v4080_v27 = vrot.slane %v4072_v63, %v18695_v23  ;;  %v4113_v32 = vrot.slane %v4103_v36, %v18695_v23 }
 0x5b3   :  { %v4120_v25 = vrot.slane %v4104_v43, %v18695_v23  ;;  %v4127_v30 = vrot.slane %v4105_v1, %v18695_v23  ;;  %v3744_v52 = vcombine.high %v19180_v26, %v19180_v26  ;;  %v19250_v12 = vcombine.low %v4031_v37, %v4038_v9 }
 0x5b4   :  { %v4087_v41 = vrot.slane %v4073_v15, %v18695_v23  ;;  %v4134_v42 = vrot.slane %v13695_v20, %v18695_v23  ;;  %v19255_v49 = vsel %vm1779_vm7, %v4102_v51, 0  ;;  %v4162_v5 = vrot.slane %v19194_v29, %v18695_v23 }
 0x5b5   :  { %v4135_v17 = vcombine.low %v4113_v32, %v4120_v25  ;;  %v4169_v4 = vrot.slane %v4153_v8, %v18695_v23  ;;  %v19264_v48 = vsel %vm1779_vm7, 0, %v19250_v12  ;;  %v4176_v54 = vrot.slane %v19208_v46, %v18695_v23 }
 0x5b6   :  { %v19260_v61 = vcombine.low %v4080_v27, %v4087_v41  ;;  %v4136_v57 = vcombine.low %v4127_v30, %v4134_v42  ;;  %v4967_v58 = vrot.slane %v19264_v48, 1  ;;  %v4183_v36 = vrot.slane %v13696_v13, %v18695_v23 }
 0x5b7   :  { %v4143_v59 = vrot.slane %v4135_v17, %v18695_v23  ;;  %v4184_v37 = vcombine.low %v4162_v5, %v4169_v4  ;;  %v4216_v29 = vcombine.low %v19150_v45, %v19180_v26  ;;  %v4970_v63 = vrot.slane %v19255_v49, 1 }
 0x5b8   :  { %v4968_v8 = vrot.slane %v19260_v61, 1  ;;  %v4150_v43 = vrot.slane %v4136_v57, %v18695_v23  ;;  %v13697_v1 = vcombine.high %v19150_v45, %v19180_v26  ;;  %v4185_v46 = vcombine.low %v4176_v54, %v4183_v36 }
 0x5b9   :  { %v4192_v9 = vrot.slane %v4184_v37, %v18695_v23  ;;  %v4217_v13 = vcombine.low %v19180_v26, %v3742_v56  ;;  %v3696_v27 = vcombine.high %v19175_v31, %v19175_v31  ;;  %v3538_v32 = vmul.f32 %v19013_v2, %v18962_v55 }
 0x5ba   :  { %v19284_v15 = vsel %vm1826_vm8, %v4967_v58, %v4968_v8  ;;  %v19287_v51 = vsel %vm1826_vm8, %v4968_v8, %v4970_v63  ;;  %v19289_v20 = vcombine.low %v4143_v59, %v4150_v43  ;;  %v13688_v25 = vpack.c.bf16 %v19077_v7, %v19077_v7 }
 0x5bb   :  { %v4215_v26 = vcombine.low %v19150_v45, %v19150_v45  ;;  %15272 = vmatprep.mubr.bf16.mxu0 %v19284_v15  ;;  %v4199_v56 = vrot.slane %v4185_v46, %v18695_v23  ;;  %v3559_v30 = vadd.f32 %v19022_v6, %v19090_v11  ;;  %v3753_v41 = vrot.slane %v19099_v47, %v18695_v23 }
 0x5bc   :  { %v4264_v31 = vcombine.low %v3744_v52, %v19166_v28  ;;  %15273 = vmatmul.mubr.bf16.gmra.mrb[16].mxu0 %v19287_v51  ;;  %v4232_v55 = vrot.slane %v4216_v29, %v18695_v23  ;;  %v19313_v7 = vsel %vm1779_vm7, 0, %v19289_v20  ;;  %v4239_v45 = vrot.slane %v4217_v13, %v18695_v23 }
 0x5bd   :  { %15276 = vmatprep.mubr.bf16.mxu0 %v19284_v15  ;;  %v19309_v2 = vcombine.low %v4192_v9, %v4199_v56  ;;  %v4246_v11 = vrot.slane %v13697_v1, %v18695_v23  ;;  %v4265_v47 = vcombine.low %v19166_v28, %v19184_v10  ;;  %v4266_v52 = vcombine.low %v19184_v10, %v3743_v50 }
 0x5be   :  { %v13698_v42 = vcombine.high %v19166_v28, %v19184_v10  ;;  %v4207_v17 = vrot.slane %v3696_v27, %v18695_v23  ;;  %v3560_v5 = vadd.f32 %v19022_v6, %v3538_v32  ;;  %v3760_v4 = vrot.slane %v13688_v25, %v18695_v23 }
 0x5bf   :  { %v3988_v57 = vcombine.high %v19169_v33, %v19169_v33  ;;  %v4225_v54 = vrot.slane %v4215_v26, %v18695_v23  ;;  %v3761_v58 = vcombine.high %v3753_v41, %v3753_v41  ;;  %v4274_v59 = vrot.slane %v4264_v31, %v18695_v23 }
 0x5c0   :  { %v4972_v36 = vrot.slane %v19313_v7, 1  ;;  %v4973_v50 = vrot.slane %v19309_v2, 1  ;;  %v3769_v28 = vrot.slane %v3753_v41, %v18695_v23  ;;  %v4248_v29 = vcombine.low %v4239_v45, %v4246_v11 }
 0x5c1   :  { %v4247_v37 = vcombine.low %v4225_v54, %v4232_v55  ;;  %v4281_v6 = vrot.slane %v4265_v47, %v18695_v23  ;;  %v4288_v8 = vrot.slane %v4266_v52, %v18695_v23  ;;  %v4295_v63 = vrot.slane %v13698_v42, %v18695_v23 }
 0x5c2   :  { %v4214_v43 = vrot.slane %v4207_v17, %v18695_v23  ;;  %v3575_v1 = vmax.f32 %v3559_v30, 0.0  ;;  %v3576_v46 = vmax.f32 %v3560_v5, 0.0  ;;  %v4826_v9 = vcombine.low %v19157_v24, %v3988_v57 }
 0x5c3   :  { %v13708_v13 = vcombine.high %v19169_v33, %v19157_v24  ;;  %v3762_v27 = vcombine.high %v3760_v4, %v3760_v4  ;;  %v3783_v32 = vrot.slane %v3761_v58, %v18695_v23  ;;  %v19345_v25 = vsel %vm1826_vm8, %v4972_v36, %v4973_v50 }
 0x5c4   :  { %15277 = vmatmul.mubr.bf16.gmra.mrb[20].mxu0 %v19287_v51  ;;  %v4296_v26 = vcombine.low %v4274_v59, %v4281_v6  ;;  %v3791_v56 = vcombine.high %v3769_v28, %v3769_v28  ;;  %v4255_v30 = vrot.slane %v4247_v37, %v18695_v23  ;;  %v4262_v41 = vrot.slane %v4248_v29, %v18695_v23 }
 0x5c5   :  { %15280 = vmatprep.mubr.bf16.mxu0 %v19345_v25  ;;  %v3776_v31 = vrot.slane %v3760_v4, %v18695_v23  ;;  %v19352_v33 = vsel %vm1779_vm7, %v4214_v43, 0  ;;  %v4297_v55 = vcombine.low %v4288_v8, %v4295_v63  ;;  %v3587_v45 = vpack.c.bf16 %v3576_v46, %v3575_v1 }
 0x5c6   :  { %v4848_v11 = vrot.slane %v4826_v9, %v18695_v23  ;;  %v4855_v47 = vrot.slane %v13708_v13, %v18695_v23  ;;  %v19357_v52 = vrot.slane %v3762_v27, %v18695_v23  ;;  %v3793_v42 = vcombine.high %v3783_v32, %v3783_v32 }
 0x5c7   :  { %v4328_v17 = vcombine.low %v3769_v28, %v3783_v32  ;;  %v4304_v5 = vrot.slane %v4296_v26, %v18695_v23  ;;  %v4329_v57 = vcombine.low %v3783_v32, %v3791_v56  ;;  %v13699_v54 = vcombine.high %v3769_v28, %v3783_v32 }
 0x5c8   :  { %v4975_v4 = vrot.slane %v19352_v33, 1  ;;  %v19361_v58 = vcombine.low %v4255_v30, %v4262_v41  ;;  %v3792_v59 = vcombine.high %v3776_v31, %v3776_v31  ;;  %v4311_v36 = vrot.slane %v4297_v55, %v18695_v23 }
 0x5c9   :  { %v3745_v37 = vcombine.high %v19184_v10, %v19184_v10  ;;  %v13689_v29 = vpack.c.bf16 %v3576_v46, %v3576_v46  ;;  %v4327_v6 = vcombine.low %v3769_v28, %v3769_v28  ;;  %v4857_v8 = vcombine.low %v4848_v11, %v4855_v47 }
 0x5ca   :  { %v19367_v63 = vsel %vm1826_vm8, %v4973_v50, %v4975_v4  ;;  %v3802_v43 = vrot.slane %v3587_v45, %v18695_v23  ;;  %v4344_v1 = vrot.slane %v4328_v17, %v18695_v23  ;;  %v4376_v9 = vcombine.low %v3793_v42, %v3776_v31 }
 0x5cb   :  { %v19372_v13 = vcombine.low %v4304_v5, %v4311_v36  ;;  %v4358_v27 = vrot.slane %v13699_v54, %v18695_v23  ;;  %v4377_v32 = vcombine.low %v3776_v31, %v19357_v52  ;;  %v19379_v10 = vsel %vm1779_vm7, 0, %v19361_v58 }
 0x5cc   :  { %15281 = vmatmul.mubr.bf16.gmra.mrb[24].mxu0 %v19367_v63  ;;  %v4351_v50 = vrot.slane %v4329_v57, %v18695_v23  ;;  %v4378_v28 = vcombine.low %v19357_v52, %v3792_v59  ;;  %v13700_v46 = vcombine.high %v3776_v31, %v19357_v52  ;;  %v4319_v26 = vrot.slane %v3745_v37, %v18695_v23 }
 0x5cd   :  { %15284 = vmatprep.mubr.bf16.mxu0 %v19345_v25  ;;  %v4864_v56 = vrot.slane %v19214_v3, %v18695_v23  ;;  %v3809_v30 = vrot.slane %v13689_v29, %v18695_v23  ;;  %v4337_v41 = vrot.slane %v4327_v6, %v18695_v23  ;;  %v4871_v55 = vrot.slane %v4857_v8, %v18695_v23 }
 0x5ce   :  { %v3810_v45 = vcombine.high %v3802_v43, %v3802_v43  ;;  %v4386_v11 = vrot.slane %v4376_v9, %v18695_v23  ;;  %v4977_v47 = vrot.slane %v19379_v10, 1  ;;  %v4978_v42 = vrot.slane %v19372_v13, 1 }
 0x5cf   :  { %v3818_v31 = vrot.slane %v3802_v43, %v18695_v23  ;;  %v4359_v17 = vcombine.low %v4337_v41, %v4344_v1  ;;  %v4360_v5 = vcombine.low %v4351_v50, %v4358_v27  ;;  %v19394_v57 = vcombine.low %v4864_v56, %v4871_v55 }
 0x5d0   :  { %v4393_v3 = vrot.slane %v4377_v32, %v18695_v23  ;;  %v4400_v54 = vrot.slane %v4378_v28, %v18695_v23  ;;  %v4407_v4 = vrot.slane %v13700_v46, %v18695_v23  ;;  %v4326_v59 = vrot.slane %v4319_v26, %v18695_v23 }
 0x5d1   :  { %v3832_v36 = vrot.slane %v3810_v45, %v18695_v23  ;;  %v19403_v29 = vsel %vm1826_vm8, %v4977_v47, %v4978_v42  ;;  %v3840_v6 = vcombine.high %v3818_v31, %v3818_v31  ;;  %v4367_v8 = vrot.slane %v4359_v17, %v18695_v23 }
 0x5d2   :  { %v4408_v37 = vcombine.low %v4386_v11, %v4393_v3  ;;  %v4374_v43 = vrot.slane %v4360_v5, %v18695_v23  ;;  %v3811_v1 = vcombine.high %v3809_v30, %v3809_v30  ;;  %v3825_v9 = vrot.slane %v3809_v30, %v18695_v23 }
 0x5d3   :  { %v4409_v27 = vcombine.low %v4400_v54, %v4407_v4  ;;  %v19410_v32 = vsel %vm1779_vm7, %v4326_v59, 0  ;;  %v3842_v50 = vcombine.high %v3832_v36, %v3832_v36  ;;  %v4440_v28 = vcombine.low %v3818_v31, %v3832_v36 }
 0x5d4   :  { %15285 = vmatmul.mubr.bf16.gmra.mrb[28].mxu0 %v19367_v63  ;;  %v4416_v46 = vrot.slane %v4408_v37, %v18695_v23  ;;  %v4441_v26 = vcombine.low %v3832_v36, %v3840_v6  ;;  %v13701_v56 = vcombine.high %v3818_v31, %v3832_v36  ;;  %v4980_v41 = vrot.slane %v19410_v32, 1 }
 0x5d5   :  { %15288 = vmatprep.mubr.bf16.mxu0 %v19403_v29  ;;  %v19414_v55 = vcombine.low %v4367_v8, %v4374_v43  ;;  %v3839_v45 = vrot.slane %v3811_v1, %v18695_v23  ;;  %v3841_v11 = vcombine.high %v3825_v9, %v3825_v9  ;;  %v4423_v47 = vrot.slane %v4409_v27, %v18695_v23 }
 0x5d6   :  { %v3794_v30 = vcombine.high %v19357_v52, %v19357_v52  ;;  %v4439_v17 = vcombine.low %v3818_v31, %v3818_v31  ;;  %v19421_v5 = vsel %vm1826_vm8, %v4978_v42, %v4980_v41  ;;  %v4488_v3 = vcombine.low %v3842_v50, %v3825_v9 }
 0x5d7   :  { %v19424_v54 = vcombine.low %v4416_v46, %v4423_v47  ;;  %v4456_v4 = vrot.slane %v4440_v28, %v18695_v23  ;;  %v4463_v59 = vrot.slane %v4441_v26, %v18695_v23  ;;  %v4470_v36 = vrot.slane %v13701_v56, %v18695_v23 }
 0x5d8   :  { %v19432_v52 = vsel %vm1779_vm7, 0, %v19414_v55  ;;  %v4489_v31 = vcombine.low %v3825_v9, %v3839_v45  ;;  %v4490_v42 = vcombine.low %v3839_v45, %v3841_v11  ;;  %v13702_v37 = vcombine.high %v3825_v9, %v3839_v45 }
 0x5d9   :  { %v4431_v6 = vrot.slane %v3794_v30, %v18695_v23  ;;  %v4449_v8 = vrot.slane %v4439_v17, %v18695_v23  ;;  %v4498_v43 = vrot.slane %v4488_v3, %v18695_v23  ;;  %v4982_v1 = vrot.slane %v19432_v52, 1 }
 0x5da   :  { %v4983_v27 = vrot.slane %v19424_v54, 1  ;;  %v3867_v50 = vrot.slane %v19056_v34, %v18695_v23  ;;  %v4472_v46 = vcombine.low %v4463_v59, %v4470_v36  ;;  %v4505_v26 = vrot.slane %v4489_v31, %v18695_v23 }
 0x5db   :  { %v4471_v28 = vcombine.low %v4449_v8, %v4456_v4  ;;  %v4512_v56 = vrot.slane %v4490_v42, %v18695_v23  ;;  %v4519_v9 = vrot.slane %v13702_v37, %v18695_v23  ;;  %v4438_v41 = vrot.slane %v4431_v6, %v18695_v23 }
 0x5dc   :  { %15289 = vmatmul.mubr.bf16.gmra.mrb[32].mxu0 %v19421_v5  ;;  %v4520_v11 = vcombine.low %v4498_v43, %v4505_v26  ;;  %v19447_v47 = vsel %vm1826_vm8, %v4982_v1, %v4983_v27  ;;  %v3889_v30 = vcombine.high %v3867_v50, %v3867_v50  ;;  %v4486_v17 = vrot.slane %v4472_v46, %v18695_v23 }
 0x5dd   :  { %15292 = vmatprep.mubr.bf16.mxu0 %v19403_v29  ;;  %v4479_v34 = vrot.slane %v4471_v28, %v18695_v23  ;;  %v4521_v3 = vcombine.low %v4512_v56, %v4519_v9  ;;  %v19453_v4 = vsel %vm1779_vm7, %v4438_v41, 0  ;;  %v4552_v36 = vcombine.low %v3867_v50, %v19075_v62 }
 0x5de   :  { %v4528_v59 = vrot.slane %v4520_v11, %v18695_v23  ;;  %v4553_v31 = vcombine.low %v19075_v62, %v3889_v30  ;;  %v13703_v42 = vcombine.high %v3867_v50, %v19075_v62  ;;  %v4985_v37 = vrot.slane %v19453_v4, 1 }
 0x5df   :  { %v19460_v6 = vcombine.low %v4479_v34, %v4486_v17  ;;  %v4535_v8 = vrot.slane %v4521_v3, %v18695_v23  ;;  %v3843_v43 = vcombine.high %v3839_v45, %v3839_v45  ;;  %v4551_v1 = vcombine.low %v3867_v50, %v3867_v50 }
 0x5e0   :  { %v19464_v28 = vsel %vm1826_vm8, %v4983_v27, %v4985_v37  ;;  %v4568_v26 = vrot.slane %v4552_v36, %v18695_v23  ;;  %v4575_v56 = vrot.slane %v4553_v31, %v18695_v23  ;;  %v4582_v62 = vrot.slane %v13703_v42, %v18695_v23 }
 0x5e1   :  { %v19467_v46 = vcombine.low %v4528_v59, %v4535_v8  ;;  %v19475_v9 = vsel %vm1779_vm7, 0, %v19460_v6  ;;  %v4543_v45 = vrot.slane %v3843_v43, %v18695_v23  ;;  %v4561_v27 = vrot.slane %v4551_v1, %v18695_v23 }
 0x5e2   :  { %v4987_v50 = vrot.slane %v19475_v9, 1  ;;  %v3916_v11 = vrot.slane %v19072_v60, %v18695_v23  ;;  %v4584_v34 = vcombine.low %v4575_v56, %v4582_v62 }
 0x5e3   :  { %v4988_v41 = vrot.slane %v19467_v46, 1  ;;  %v4583_v30 = vcombine.low %v4561_v27, %v4568_v26  ;;  %v4550_v17 = vrot.slane %v4543_v45, %v18695_v23  ;;  %v3892_v26 = vcombine.high %v19093_v16, %v19093_v16 }
 0x5e4   :  { %15293 = vmatmul.mubr.bf16.gmra.mrb[36].mxu0 %v19421_v5  ;;  %v3938_v59 = vcombine.high %v3916_v11, %v3916_v11  ;;  %v4598_v31 = vrot.slane %v4584_v34, %v18695_v23  ;;  %v4664_v60 = vcombine.low %v3916_v11, %v19107_v22  ;;  %v13705_v8 = vcombine.high %v3916_v11, %v19107_v22 }
 0x5e5   :  { %15296 = vmatprep.mubr.bf16.mxu0 %v19447_v47  ;;  %v19486_v3 = vsel %vm1826_vm8, %v4987_v50, %v4988_v41  ;;  %v4591_v36 = vrot.slane %v4583_v30, %v18695_v23  ;;  %v19492_v42 = vsel %vm1779_vm7, %v4550_v17, 0  ;;  %v4663_v56 = vcombine.low %v3916_v11, %v3916_v11 }
 0x5e6   :  { %v4665_v37 = vcombine.low %v19107_v22, %v3938_v59  ;;  %v4990_v43 = vrot.slane %v19492_v42, 1  ;;  %v4680_v45 = vrot.slane %v4664_v60, %v18695_v23  ;;  %v4694_v50 = vrot.slane %v13705_v8, %v18695_v23 }
 0x5e7   :  { %v19498_v1 = vcombine.low %v4591_v36, %v4598_v31  ;;  %v4655_v16 = vrot.slane %v3892_v26, %v18695_v23  ;;  %v4673_v11 = vrot.slane %v4663_v56, %v18695_v23  ;;  %v4993_v30 = vrot.slane %v19159_v44, 1 }
 0x5e8   :  { %v19503_v62 = vsel %vm1826_vm8, %v4988_v41, %v4990_v43  ;;  %v4687_v27 = vrot.slane %v4665_v37, %v18695_v23  ;;  %v3965_v34 = vrot.slane %v19096_v19, %v18695_v23 }
 0x5e9   :  { %v19512_v22 = vsel %vm1779_vm7, 0, %v19498_v1  ;;  %v4695_v17 = vcombine.low %v4673_v11, %v4680_v45  ;;  %v4662_v36 = vrot.slane %v4655_v16, %v18695_v23 }
 0x5ea   :  { %v4992_v41 = vrot.slane %v19512_v22, 1  ;;  %v4696_v59 = vcombine.low %v4687_v27, %v4694_v50  ;;  %v3987_v60 = vcombine.high %v3965_v34, %v3965_v34  ;;  %v4776_v19 = vcombine.low %v3965_v34, %v19137_v53 }
 0x5eb   :  { %v4703_v37 = vrot.slane %v4695_v17, %v18695_v23  ;;  %v19529_v43 = vsel %vm1779_vm7, %v4662_v36, 0  ;;  %v13707_v45 = vcombine.high %v3965_v34, %v19137_v53  ;;  %v3941_v50 = vcombine.high %v19129_v18, %v19129_v18 }
 0x5ec   :  { %15297 = vmatmul.mubr.bf16.gmra.mrb[40].mxu0 %v19464_v28  ;;  %v19523_v31 = vsel %vm1826_vm8, %v4992_v41, %v4993_v30  ;;  %v4710_v8 = vrot.slane %v4696_v59, %v18695_v23  ;;  %v4777_v56 = vcombine.low %v19137_v53, %v3987_v60  ;;  %v4995_v27 = vrot.slane %v19529_v43, 1 }
 0x5ed   :  { %15300 = vmatprep.mubr.bf16.mxu0 %v19447_v47  ;;  %v4775_v16 = vcombine.low %v3965_v34, %v3965_v34  ;;  %v4792_v41 = vrot.slane %v4776_v19, %v18695_v23  ;;  %v4806_v59 = vrot.slane %v13707_v45, %v18695_v23  ;;  %v4767_v18 = vrot.slane %v3941_v50, %v18695_v23 }
 0x5ee   :  { %v19532_v26 = vcombine.low %v4703_v37, %v4710_v8  ;;  %v19540_v11 = vsel %vm1826_vm8, %v4993_v30, %v4995_v27  ;;  %v4799_v17 = vrot.slane %v4777_v56, %v18695_v23  ;;  %v4998_v36 = vrot.slane %v19210_v39, 1 }
 0x5ef   :  { %v4785_v34 = vrot.slane %v4775_v16, %v18695_v23  ;;  %v4774_v8 = vrot.slane %v4767_v18, %v18695_v23 }
 0x5f0   :  { %v19549_v53 = vsel %vm1779_vm7, 0, %v19532_v26  ;;  %v4808_v37 = vcombine.low %v4799_v17, %v4806_v59 }
 0x5f1   :  { %v4997_v30 = vrot.slane %v19549_v53, 1  ;;  %v4807_v60 = vcombine.low %v4785_v34, %v4792_v41  ;;  %v19564_v27 = vsel %vm1779_vm7, %v4774_v8, 0  ;;  %v3990_v41 = vcombine.high %v19157_v24, %v19157_v24 }
 0x5f2   :  { %v4822_v45 = vrot.slane %v4808_v37, %v18695_v23  ;;  %v5000_v50 = vrot.slane %v19564_v27, 1 }
 0x5f3   :  { %v19558_v19 = vsel %vm1826_vm8, %v4997_v30, %v4998_v36  ;;  %v4815_v56 = vrot.slane %v4807_v60, %v18695_v23  ;;  %v4879_v18 = vrot.slane %v3990_v41, %v18695_v23  ;;  %v5003_v30 = vrot.slane %v19394_v57, 1  ;;  %v18045_v41 = vld [vmem:[#allocation7 + $0xb0] sm:$0xff]  }
 0x5f4   :  { %15301 = vmatmul.mubr.bf16.gmra.mrb[44].mxu0 %v19464_v28  ;;  %v19572_v17 = vsel %vm1826_vm8, %v4998_v36, %v5000_v50  ;;  %v18043_v50 = vld [vmem:[#allocation7 + $0xa0] sm:$0xff]  }
 0x5f5   :  { %15304 = vmatprep.mubr.bf16.mxu0 %v19486_v3  ;;  %v19567_v16 = vcombine.low %v4815_v56, %v4822_v45  ;;  %v4886_v60 = vrot.slane %v4879_v18, %v18695_v23  ;;  %v18040_v23 = vld [vmem:[#allocation7 + $0x88] sm:$0xff]   ;;  %v18041_v56 = vld [vmem:[#allocation7 + $0x90] sm:$0xff]   ;;  %v18042_v45 = vld [vmem:[#allocation7 + $0x98] sm:$0xff]  }
 0x5f6   :  { %v18046_v18 = vld [vmem:[#allocation7 + $0xb8] sm:$0xff]  }
 0x5f7   :  { %v19578_v59 = vsel %vm1779_vm7, 0, %v19567_v16  ;;  %v19590_v36 = vsel %vm1779_vm7, %v4886_v60, 0  ;;  %v5715_v60 = vrot.slane %v19260_v61, 2 }
 0x5f8   :  { %v5002_v34 = vrot.slane %v19578_v59, 1  ;;  %v5005_v37 = vrot.slane %v19590_v36, 1 }
 0x5fa   :  { %v19586_v24 = vsel %vm1826_vm8, %v5002_v34, %v5003_v30  ;;  %v19594_v8 = vsel %vm1826_vm8, %v5003_v30, %v5005_v37  ;;  %v18047_v34 = vld [vmem:[#allocation7 + $0xc0] sm:$0xff]   ;;  %v5714_v30 = vrot.slane %v19264_v48, 2  ;;  %v18048_v37 = vld [vmem:[#allocation7 + $0xc8] sm:$0xff]  }
 0x5fc   :  { %15305 = vmatmul.mubr.bf16.gmra.mrb[48].mxu0 %v19503_v62 }
 0x5fd   :  { %15308 = vmatprep.mubr.bf16.mxu0 %v19486_v3 }
 0x604   :  { %15309 = vmatmul.mubr.bf16.gmra.mrb[52].mxu0 %v19503_v62 }
 0x605   :  { %15312 = vmatprep.mubr.bf16.mxu0 %v19523_v31 }
 0x60c   :  { %15313 = vmatmul.mubr.bf16.gmra.mrb[56].mxu0 %v19540_v11 }
 0x60d   :  { %15316 = vmatprep.mubr.bf16.mxu0 %v19523_v31 }
 0x614   :  { %15317 = vmatmul.mubr.bf16.gmra.mrb[60].mxu0 %v19540_v11 }
 0x615   :  { %15320 = vmatprep.mubr.bf16.mxu0 %v19558_v19 }
 0x61c   :  { %15321 = vmatmul.mubr.bf16.gmra.mrb[64].mxu0 %v19572_v17 }
 0x61d   :  { %15324 = vmatprep.mubr.bf16.mxu0 %v19558_v19 }
 0x624   :  { %15325 = vmatmul.mubr.bf16.gmra.mrb[68].mxu0 %v19572_v17 }
 0x625   :  { %15328 = vmatprep.mubr.bf16.mxu0 %v19586_v24 }
 0x62c   :  { %15329 = vmatmul.mubr.bf16.gmra.mrb[72].mxu0 %v19594_v8 }
 0x62d   :  { %15348 = vmatprep.mubr.bf16.mxu0 %v22350_v0 }
 0x634   :  { %15349 = vmatmul.mubr.bf16.vlgmr.msra.gmra.mrb[12].mxu0 %v22350_v0 }
 0x635   :  { %15413 = vmatpush3.bf16.msra.mxu0 %v19223_v35  ;;  %15352 = vmatprep.mubr.msk.bf16.mxu0 %vm18810_vm9, %v19250_v12  ;;  %v18044_v35 = vld [vmem:[#allocation7 + $0xa8] sm:$0xff]  }
 0x636   :  { %15414 = vmatprep.subr.bf16.mxu0 %v18040_v23 }
 0x639   :  { %15415 = vmatpush3.bf16.msra.mxu0 %v18040_v23  ;;  %v19665_v23 = vsel %vm1361_vm6, %v5714_v30, %v5715_v60  ;;  %v18053_v30 = vld [vmem:[#allocation7 + $0xf0] sm:$0xff]  }
 0x63a   :  { %15416 = vmatprep.subr.bf16.mxu0 %v18041_v56 }
 0x63c   :  { %15353 = vmatmul.mubr.bf16.gmra.mrb[16].mxu0 %v19260_v61 }
 0x63d   :  { %15356 = vmatprep.mubr.msk.bf16.mxu0 %vm18810_vm9, %v19250_v12  ;;  %15417 = vmatpush3.bf16.msra.mxu0 %v18041_v56  ;;  %v18049_v56 = vld [vmem:[#allocation7 + $0xd0] sm:$0xff]  }
 0x63e   :  { %15418 = vmatprep.subr.bf16.mxu0 %v18042_v45 }
 0x641   :  { %15419 = vmatpush3.bf16.msra.mxu0 %v18042_v45  ;;  %v5717_v45 = vrot.slane %v19255_v49, 2  ;;  %v18052_v49 = vld [vmem:[#allocation7 + $0xe8] sm:$0xff]  }
 0x642   :  { %15420 = vmatprep.subr.bf16.mxu0 %v18043_v50 }
 0x643   :  { %v19670_v48 = vsel %vm1361_vm6, %v5715_v60, %v5717_v45  ;;  %v5722_v60 = vrot.slane %v19352_v33, 2  ;;  %v5724_v45 = vrot.slane %v19379_v10, 2  ;;  %v5729_v10 = vrot.slane %v19432_v52, 2 }
 0x644   :  { %15357 = vmatmul.mubr.bf16.gmra.mrb[20].mxu0 %v19260_v61  ;;  %v5734_v52 = vrot.slane %v19475_v9, 2  ;;  %v5739_v9 = vrot.slane %v19512_v22, 2  ;;  %v5744_v22 = vrot.slane %v19549_v53, 2  ;;  %v5749_v53 = vrot.slane %v19578_v59, 2  ;;  %v18056_v59 = vld [vmem:[#allocation7 + $0x108] sm:$0xff]  }
 0x645   :  { %15360 = vmatprep.mubr.msk.bf16.mxu0 %vm18810_vm9, %v19289_v20  ;;  %15421 = vmatpush3.bf16.msra.mxu0 %v18043_v50  ;;  %v18050_v50 = vld [vmem:[#allocation7 + $0xd8] sm:$0xff]  }
 0x646   :  { %15422 = vmatprep.subr.bf16.mxu0 %v18044_v35 }
 0x649   :  { %15423 = vmatpush3.bf16.msra.mxu0 %v18044_v35  ;;  %v18051_v35 = vld [vmem:[#allocation7 + $0xe0] sm:$0xff]  }
 0x64a   :  { %15424 = vmatprep.subr.bf16.mxu0 %v18045_v41 }
 0x64c   :  { %15361 = vmatmul.mubr.bf16.gmra.mrb[24].mxu0 %v19309_v2 }
 0x64d   :  { %15364 = vmatprep.mubr.msk.bf16.mxu0 %vm18810_vm9, %v19289_v20  ;;  %15425 = vmatpush3.bf16.msra.mxu0 %v18045_v41  ;;  %v5719_v41 = vrot.slane %v19313_v7, 2  ;;  %v18054_v7 = vld [vmem:[#allocation7 + $0xf8] sm:$0xff]  }
 0x64e   :  { %15426 = vmatprep.subr.bf16.mxu0 %v18046_v18 }
 0x651   :  { %15427 = vmatpush3.bf16.msra.mxu0 %v18046_v18  ;;  %v5720_v18 = vrot.slane %v19309_v2, 2 }
 0x652   :  { %15492 = vmatprep.subr.bf16.mxu0 %v18047_v34 }
 0x654   :  { %15365 = vmatmul.mubr.bf16.gmra.mrb[28].mxu0 %v19309_v2 }
 0x655   :  { %15368 = vmatprep.mubr.msk.bf16.mxu0 %vm18810_vm9, %v19361_v58 }
 0x65c   :  { %15369 = vmatmul.mubr.bf16.gmra.mrb[32].mxu0 %v19372_v13 }
 0x65d   :  { %15372 = vmatprep.mubr.msk.bf16.mxu0 %vm18810_vm9, %v19361_v58 }
 0x664   :  { %15373 = vmatmul.mubr.bf16.gmra.mrb[36].mxu0 %v19372_v13 }
 0x665   :  { %15376 = vmatprep.mubr.msk.bf16.mxu0 %vm18810_vm9, %v19414_v55 }
 0x66c   :  { %15377 = vmatmul.mubr.bf16.gmra.mrb[40].mxu0 %v19424_v54 }
 0x66d   :  { %15380 = vmatprep.mubr.msk.bf16.mxu0 %vm18810_vm9, %v19414_v55 }
 0x674   :  { %15381 = vmatmul.mubr.bf16.gmra.mrb[44].mxu0 %v19424_v54 }
 0x675   :  { %15384 = vmatprep.mubr.msk.bf16.mxu0 %vm18810_vm9, %v19460_v6 }
 0x67c   :  { %15385 = vmatmul.mubr.bf16.gmra.mrb[48].mxu0 %v19467_v46 }
 0x67d   :  { %15388 = vmatprep.mubr.msk.bf16.mxu0 %vm18810_vm9, %v19460_v6 }
 0x684   :  { %15389 = vmatmul.mubr.bf16.gmra.mrb[52].mxu0 %v19467_v46 }
 0x685   :  { %15392 = vmatprep.mubr.msk.bf16.mxu0 %vm18810_vm9, %v19498_v1 }
 0x68c   :  { %15393 = vmatmul.mubr.bf16.gmra.mrb[56].mxu0 %v19159_v44 }
 0x68d   :  { %15396 = vmatprep.mubr.msk.bf16.mxu0 %vm18810_vm9, %v19498_v1 }
 0x694   :  { %15397 = vmatmul.mubr.bf16.gmra.mrb[60].mxu0 %v19159_v44 }
 0x695   :  { %15400 = vmatprep.mubr.msk.bf16.mxu0 %vm18810_vm9, %v19532_v26 }
 0x69c   :  { %15401 = vmatmul.mubr.bf16.gmra.mrb[64].mxu0 %v19210_v39 }
 0x69d   :  { %15404 = vmatprep.mubr.msk.bf16.mxu0 %vm18810_vm9, %v19532_v26 }
 0x6a4   :  { %15405 = vmatmul.mubr.bf16.gmra.mrb[68].mxu0 %v19210_v39 }
 0x6a5   :  { %15408 = vmatprep.mubr.msk.bf16.mxu0 %vm18810_vm9, %v19567_v16 }
 0x6ac   :  { %15409 = vmatmul.mubr.bf16.gmra.mrb[72].mxu0 %v19394_v57 }
 0x6ad   :  { %15428 = vmatprep.mubr.bf16.mxu0 %v18833_v38 }
 0x6b4   :  { %15429 = vmatmul.mubr.bf16.vlgmr.msra.gmra.mrb[12].mxu0 %v18833_v38 }
 0x6b5   :  { %15493 = vmatpush3.bf16.msra.mxu0 %v18047_v34  ;;  %15432 = vmatprep.mubr.bf16.mxu0 %v19665_v23  ;;  %v19678_v34 = vsel %vm1361_vm6, %v5719_v41, %v5720_v18 }
 0x6b6   :  { %15494 = vmatprep.subr.bf16.mxu0 %v18048_v37 }
 0x6b9   :  { %15495 = vmatpush3.bf16.msra.mxu0 %v18048_v37  ;;  %v19683_v37 = vsel %vm1361_vm6, %v5720_v18, %v5722_v60  ;;  %v5730_v18 = vrot.slane %v19424_v54, 2  ;;  %v5735_v60 = vrot.slane %v19467_v46, 2 }
 0x6ba   :  { %15496 = vmatprep.subr.bf16.mxu0 %v18049_v56 }
 0x6bc   :  { %15433 = vmatmul.mubr.bf16.gmra.mrb[16].mxu0 %v19670_v48 }
 0x6bd   :  { %15436 = vmatprep.mubr.bf16.mxu0 %v19665_v23  ;;  %15497 = vmatpush3.bf16.msra.mxu0 %v18049_v56  ;;  %v18055_v56 = vld [vmem:[#allocation7 + $0x100] sm:$0xff]  }
 0x6be   :  { %15498 = vmatprep.subr.bf16.mxu0 %v18050_v50 }
 0x6c1   :  { %15499 = vmatpush3.bf16.msra.mxu0 %v18050_v50  ;;  %v5725_v50 = vrot.slane %v19372_v13, 2 }
 0x6c2   :  { %15500 = vmatprep.subr.bf16.mxu0 %v18051_v35 }
 0x6c3   :  { %v19691_v33 = vsel %vm1361_vm6, %v5724_v45, %v5725_v50 }
 0x6c4   :  { %15437 = vmatmul.mubr.bf16.gmra.mrb[20].mxu0 %v19670_v48 }
 0x6c5   :  { %15440 = vmatprep.mubr.bf16.mxu0 %v19678_v34  ;;  %15501 = vmatpush3.bf16.msra.mxu0 %v18051_v35  ;;  %v5727_v35 = vrot.slane %v19410_v32, 2  ;;  %v5732_v32 = vrot.slane %v19453_v4, 2  ;;  %v5737_v4 = vrot.slane %v19492_v42, 2  ;;  %v5742_v42 = vrot.slane %v19529_v43, 2 }
 0x6c6   :  { %15502 = vmatprep.subr.bf16.mxu0 %v18052_v49  ;;  %v5747_v43 = vrot.slane %v19564_v27, 2  ;;  %v5752_v27 = vrot.slane %v19590_v36, 2  ;;  %v18058_v36 = vld [vmem:[#allocation7 + $0x118] sm:$0xff]  }
 0x6c7   :  { %v19696_v41 = vsel %vm1361_vm6, %v5725_v50, %v5727_v35  ;;  %v19722_v45 = vsel %vm1361_vm6, %v5735_v60, %v5737_v4  ;;  %v5740_v50 = vrot.slane %v19159_v44, 2 }
 0x6c9   :  { %15503 = vmatpush3.bf16.msra.mxu0 %v18052_v49  ;;  %v19704_v49 = vsel %vm1361_vm6, %v5729_v10, %v5730_v18  ;;  %v19730_v35 = vsel %vm1361_vm6, %v5739_v9, %v5740_v50  ;;  %v19735_v10 = vsel %vm1361_vm6, %v5740_v50, %v5742_v42  ;;  %v18057_v50 = vld [vmem:[#allocation7 + $0x110] sm:$0xff]   ;;  %v18059_v42 = vld [vmem:[#allocation7 + $0x120] sm:$0xff]  }
 0x6ca   :  { %15504 = vmatprep.subr.bf16.mxu0 %v18053_v30 }
 0x6cc   :  { %15441 = vmatmul.mubr.bf16.gmra.mrb[24].mxu0 %v19683_v37 }
 0x6cd   :  { %15444 = vmatprep.mubr.bf16.mxu0 %v19678_v34  ;;  %15505 = vmatpush3.bf16.msra.mxu0 %v18053_v30  ;;  %v19709_v30 = vsel %vm1361_vm6, %v5730_v18, %v5732_v32  ;;  %v5745_v18 = vrot.slane %v19210_v39, 2 }
 0x6ce   :  { %15506 = vmatprep.subr.bf16.mxu0 %v18054_v7 }
 0x6cf   :  { %v19743_v32 = vsel %vm1361_vm6, %v5744_v22, %v5745_v18  ;;  %v18061_v22 = vld [vmem:[#allocation7 + $0x130] sm:$0xff]  }
 0x6d1   :  { %15507 = vmatpush3.bf16.msra.mxu0 %v18054_v7  ;;  %v19717_v7 = vsel %vm1361_vm6, %v5734_v52, %v5735_v60  ;;  %v19748_v52 = vsel %vm1361_vm6, %v5745_v18, %v5747_v43  ;;  %v5750_v60 = vrot.slane %v19394_v57, 2  ;;  %v18062_v18 = vld [vmem:[#allocation7 + $0x138] sm:$0xff]   ;;  %v18063_v43 = vld [vmem:[#allocation7 + $0x140] sm:$0xff]  }
 0x6d2   :  { %15572 = vmatprep.subr.bf16.mxu0 %v18055_v56 }
 0x6d3   :  { %v19756_v4 = vsel %vm1361_vm6, %v5749_v53, %v5750_v60  ;;  %v19761_v9 = vsel %vm1361_vm6, %v5750_v60, %v5752_v27  ;;  %v18064_v53 = vld [vmem:[#allocation7 + $0x148] sm:$0xff]   ;;  %v18065_v60 = vld [vmem:[#allocation7 + $0x150] sm:$0xff]   ;;  %v18066_v27 = vld [vmem:[#allocation7 + $0x158] sm:$0xff]  }
 0x6d4   :  { %15445 = vmatmul.mubr.bf16.gmra.mrb[28].mxu0 %v19683_v37 }
 0x6d5   :  { %15448 = vmatprep.mubr.bf16.mxu0 %v19691_v33 }
 0x6dc   :  { %15449 = vmatmul.mubr.bf16.gmra.mrb[32].mxu0 %v19696_v41 }
 0x6dd   :  { %15452 = vmatprep.mubr.bf16.mxu0 %v19691_v33 }
 0x6e4   :  { %15453 = vmatmul.mubr.bf16.gmra.mrb[36].mxu0 %v19696_v41 }
 0x6e5   :  { %15456 = vmatprep.mubr.bf16.mxu0 %v19704_v49 }
 0x6ec   :  { %15457 = vmatmul.mubr.bf16.gmra.mrb[40].mxu0 %v19709_v30 }
 0x6ed   :  { %15460 = vmatprep.mubr.bf16.mxu0 %v19704_v49 }
 0x6f4   :  { %15461 = vmatmul.mubr.bf16.gmra.mrb[44].mxu0 %v19709_v30 }
 0x6f5   :  { %15464 = vmatprep.mubr.bf16.mxu0 %v19717_v7 }
 0x6fc   :  { %15465 = vmatmul.mubr.bf16.gmra.mrb[48].mxu0 %v19722_v45 }
 0x6fd   :  { %15468 = vmatprep.mubr.bf16.mxu0 %v19717_v7 }
 0x704   :  { %15469 = vmatmul.mubr.bf16.gmra.mrb[52].mxu0 %v19722_v45 }
 0x705   :  { %15472 = vmatprep.mubr.bf16.mxu0 %v19730_v35 }
 0x70c   :  { %15473 = vmatmul.mubr.bf16.gmra.mrb[56].mxu0 %v19735_v10 }
 0x70d   :  { %15476 = vmatprep.mubr.bf16.mxu0 %v19730_v35 }
 0x714   :  { %15477 = vmatmul.mubr.bf16.gmra.mrb[60].mxu0 %v19735_v10 }
 0x715   :  { %15480 = vmatprep.mubr.bf16.mxu0 %v19743_v32 }
 0x71c   :  { %15481 = vmatmul.mubr.bf16.gmra.mrb[64].mxu0 %v19748_v52 }
 0x71d   :  { %15484 = vmatprep.mubr.bf16.mxu0 %v19743_v32 }
 0x724   :  { %15485 = vmatmul.mubr.bf16.gmra.mrb[68].mxu0 %v19748_v52 }
 0x725   :  { %15488 = vmatprep.mubr.bf16.mxu0 %v19756_v4 }
 0x72c   :  { %15489 = vmatmul.mubr.bf16.gmra.mrb[72].mxu0 %v19761_v9 }
 0x72d   :  { %15508 = vmatprep.mubr.msk.bf16.mxu0 %vm18810_vm9, %v19250_v12 }
 0x734   :  { %15509 = vmatmul.mubr.bf16.vlgmr.msra.gmra.mrb[12].mxu0 %v19260_v61 }
 0x735   :  { %15573 = vmatpush3.bf16.msra.mxu0 %v18055_v56  ;;  %15512 = vmatprep.mubr.msk.bf16.mxu0 %vm18810_vm9, %v19250_v12  ;;  %v18060_v56 = vld [vmem:[#allocation7 + $0x128] sm:$0xff]  }
 0x736   :  { %15574 = vmatprep.subr.bf16.mxu0 %v18056_v59 }
 0x739   :  { %15575 = vmatpush3.bf16.msra.mxu0 %v18056_v59  ;;  %v18067_v59 = vld [vmem:[#allocation7 + $0x160] sm:$0xff]  }
 0x73a   :  { %15576 = vmatprep.subr.bf16.mxu0 %v18057_v50 }
 0x73c   :  { %15513 = vmatmul.mubr.bf16.gmra.mrb[16].mxu0 %v19260_v61 }
 0x73d   :  { %15516 = vmatprep.mubr.msk.bf16.mxu0 %vm18810_vm9, %v19289_v20  ;;  %15577 = vmatpush3.bf16.msra.mxu0 %v18057_v50  ;;  %v18068_v50 = vld [vmem:[#allocation7 + $0x168] sm:$0xff]  }
 0x73e   :  { %15578 = vmatprep.subr.bf16.mxu0 %v18058_v36 }
 0x741   :  { %15579 = vmatpush3.bf16.msra.mxu0 %v18058_v36  ;;  %v18069_v36 = vld [vmem:[#allocation7 + $0x170] sm:$0xff]  }
 0x742   :  { %15580 = vmatprep.subr.bf16.mxu0 %v18059_v42 }
 0x744   :  { %15517 = vmatmul.mubr.bf16.gmra.mrb[20].mxu0 %v19309_v2 }
 0x745   :  { %15520 = vmatprep.mubr.msk.bf16.mxu0 %vm18810_vm9, %v19289_v20  ;;  %15581 = vmatpush3.bf16.msra.mxu0 %v18059_v42  ;;  %v18070_v42 = vld [vmem:[#allocation7 + $0x178] sm:$0xff]  }
 0x746   :  { %15582 = vmatprep.subr.bf16.mxu0 %v18060_v56 }
 0x749   :  { %15583 = vmatpush3.bf16.msra.mxu0 %v18060_v56  ;;  %v18071_v56 = vld [vmem:[#allocation7 + $0x180] sm:$0xff]  }
 0x74a   :  { %15584 = vmatprep.subr.bf16.mxu0 %v18061_v22 }
 0x74c   :  { %15521 = vmatmul.mubr.bf16.gmra.mrb[24].mxu0 %v19309_v2 }
 0x74d   :  { %15524 = vmatprep.mubr.msk.bf16.mxu0 %vm18810_vm9, %v19361_v58  ;;  %15585 = vmatpush3.bf16.msra.mxu0 %v18061_v22  ;;  %v18072_v22 = vld [vmem:[#allocation7 + $0x188] sm:$0xff]  }
 0x74e   :  { %15586 = vmatprep.subr.bf16.mxu0 %v18062_v18 }
 0x751   :  { %15587 = vmatpush3.bf16.msra.mxu0 %v18062_v18  ;;  %v18073_v18 = vld [vmem:[#allocation7 + $0x190] sm:$0xff]  }
 0x752   :  { %15652 = vmatprep.subr.bf16.mxu0 %v18063_v43 }
 0x754   :  { %15525 = vmatmul.mubr.bf16.gmra.mrb[28].mxu0 %v19372_v13 }
 0x755   :  { %15528 = vmatprep.mubr.msk.bf16.mxu0 %vm18810_vm9, %v19361_v58 }
 0x75c   :  { %15529 = vmatmul.mubr.bf16.gmra.mrb[32].mxu0 %v19372_v13 }
 0x75d   :  { %15532 = vmatprep.mubr.msk.bf16.mxu0 %vm18810_vm9, %v19414_v55 }
 0x764   :  { %15533 = vmatmul.mubr.bf16.gmra.mrb[36].mxu0 %v19424_v54 }
 0x765   :  { %15536 = vmatprep.mubr.msk.bf16.mxu0 %vm18810_vm9, %v19414_v55 }
 0x76c   :  { %15537 = vmatmul.mubr.bf16.gmra.mrb[40].mxu0 %v19424_v54 }
 0x76d   :  { %15540 = vmatprep.mubr.msk.bf16.mxu0 %vm18810_vm9, %v19460_v6 }
 0x774   :  { %15541 = vmatmul.mubr.bf16.gmra.mrb[44].mxu0 %v19467_v46 }
 0x775   :  { %15544 = vmatprep.mubr.msk.bf16.mxu0 %vm18810_vm9, %v19460_v6 }
 0x77c   :  { %15545 = vmatmul.mubr.bf16.gmra.mrb[48].mxu0 %v19467_v46 }
 0x77d   :  { %15548 = vmatprep.mubr.msk.bf16.mxu0 %vm18810_vm9, %v19498_v1 }
 0x784   :  { %15549 = vmatmul.mubr.bf16.gmra.mrb[52].mxu0 %v19159_v44 }
 0x785   :  { %15552 = vmatprep.mubr.msk.bf16.mxu0 %vm18810_vm9, %v19498_v1 }
 0x78c   :  { %15553 = vmatmul.mubr.bf16.gmra.mrb[56].mxu0 %v19159_v44 }
 0x78d   :  { %15556 = vmatprep.mubr.msk.bf16.mxu0 %vm18810_vm9, %v19532_v26 }
 0x794   :  { %15557 = vmatmul.mubr.bf16.gmra.mrb[60].mxu0 %v19210_v39 }
 0x795   :  { %15560 = vmatprep.mubr.msk.bf16.mxu0 %vm18810_vm9, %v19532_v26 }
 0x79c   :  { %15561 = vmatmul.mubr.bf16.gmra.mrb[64].mxu0 %v19210_v39 }
 0x79d   :  { %15564 = vmatprep.mubr.msk.bf16.mxu0 %vm18810_vm9, %v19567_v16 }
 0x7a4   :  { %15565 = vmatmul.mubr.bf16.gmra.mrb[68].mxu0 %v19394_v57 }
 0x7a5   :  { %15568 = vmatprep.mubr.msk.bf16.mxu0 %vm18810_vm9, %v19567_v16 }
 0x7ac   :  { %15569 = vmatmul.mubr.bf16.gmra.mrb[72].mxu0 %v19394_v57 }
 0x7ad   :  { %15588 = vmatprep.mubr.bf16.mxu0 %v19284_v15 }
 0x7b4   :  { %15589 = vmatmul.mubr.bf16.vlgmr.msra.gmra.mrb[12].mxu0 %v19287_v51 }
 0x7b5   :  { %15653 = vmatpush3.bf16.msra.mxu0 %v18063_v43  ;;  %15592 = vmatprep.mubr.bf16.mxu0 %v19284_v15  ;;  %v18074_v43 = vld [vmem:[#allocation7 + $0x198] sm:$0xff]  }
 0x7b6   :  { %15654 = vmatprep.subr.bf16.mxu0 %v18064_v53 }
 0x7b9   :  { %15655 = vmatpush3.bf16.msra.mxu0 %v18064_v53  ;;  %v18075_v53 = vld [vmem:[#allocation7 + $0x1a0] sm:$0xff]  }
 0x7ba   :  { %15656 = vmatprep.subr.bf16.mxu0 %v18065_v60 }
 0x7bc   :  { %15593 = vmatmul.mubr.bf16.gmra.mrb[16].mxu0 %v19287_v51 }
 0x7bd   :  { %15596 = vmatprep.mubr.bf16.mxu0 %v19345_v25  ;;  %15657 = vmatpush3.bf16.msra.mxu0 %v18065_v60  ;;  %v18076_v60 = vld [vmem:[#allocation7 + $0x1a8] sm:$0xff]  }
 0x7be   :  { %15658 = vmatprep.subr.bf16.mxu0 %v18066_v27 }
 0x7c1   :  { %15659 = vmatpush3.bf16.msra.mxu0 %v18066_v27  ;;  %v18077_v27 = vld [vmem:[#allocation7 + $0x1b0] sm:$0xff]  }
 0x7c2   :  { %15660 = vmatprep.subr.bf16.mxu0 %v18067_v59 }
 0x7c4   :  { %15597 = vmatmul.mubr.bf16.gmra.mrb[20].mxu0 %v19367_v63 }
 0x7c5   :  { %15600 = vmatprep.mubr.bf16.mxu0 %v19345_v25  ;;  %15661 = vmatpush3.bf16.msra.mxu0 %v18067_v59  ;;  %v18078_v59 = vld [vmem:[#allocation7 + $0x1b8] sm:$0xff]  }
 0x7c6   :  { %15662 = vmatprep.subr.bf16.mxu0 %v18068_v50 }
 0x7c9   :  { %15663 = vmatpush3.bf16.msra.mxu0 %v18068_v50  ;;  %v18079_v50 = vld [vmem:[#allocation7 + $0x1c0] sm:$0xff]  }
 0x7ca   :  { %15664 = vmatprep.subr.bf16.mxu0 %v18069_v36 }
 0x7cc   :  { %15601 = vmatmul.mubr.bf16.gmra.mrb[24].mxu0 %v19367_v63 }
 0x7cd   :  { %15604 = vmatprep.mubr.bf16.mxu0 %v19403_v29  ;;  %15665 = vmatpush3.bf16.msra.mxu0 %v18069_v36  ;;  %v18080_v36 = vld [vmem:[#allocation7 + $0x1c8] sm:$0xff]  }
 0x7ce   :  { %15666 = vmatprep.subr.bf16.mxu0 %v18070_v42 }
 0x7d1   :  { %15667 = vmatpush3.bf16.msra.mxu0 %v18070_v42  ;;  %v18081_v42 = vld [vmem:[#allocation7 + $0x1d0] sm:$0xff]  }
 0x7d2   :  { %15732 = vmatprep.subr.bf16.mxu0 %v18071_v56 }
 0x7d4   :  { %15605 = vmatmul.mubr.bf16.gmra.mrb[28].mxu0 %v19421_v5 }
 0x7d5   :  { %15608 = vmatprep.mubr.bf16.mxu0 %v19403_v29 }
 0x7dc   :  { %15609 = vmatmul.mubr.bf16.gmra.mrb[32].mxu0 %v19421_v5 }
 0x7dd   :  { %15612 = vmatprep.mubr.bf16.mxu0 %v19447_v47 }
 0x7e4   :  { %15613 = vmatmul.mubr.bf16.gmra.mrb[36].mxu0 %v19464_v28 }
 0x7e5   :  { %15616 = vmatprep.mubr.bf16.mxu0 %v19447_v47 }
 0x7ec   :  { %15617 = vmatmul.mubr.bf16.gmra.mrb[40].mxu0 %v19464_v28 }
 0x7ed   :  { %15620 = vmatprep.mubr.bf16.mxu0 %v19486_v3 }
 0x7f4   :  { %15621 = vmatmul.mubr.bf16.gmra.mrb[44].mxu0 %v19503_v62 }
 0x7f5   :  { %15624 = vmatprep.mubr.bf16.mxu0 %v19486_v3 }
 0x7fc   :  { %15625 = vmatmul.mubr.bf16.gmra.mrb[48].mxu0 %v19503_v62 }
 0x7fd   :  { %15628 = vmatprep.mubr.bf16.mxu0 %v19523_v31 }
 0x804   :  { %15629 = vmatmul.mubr.bf16.gmra.mrb[52].mxu0 %v19540_v11 }
 0x805   :  { %15632 = vmatprep.mubr.bf16.mxu0 %v19523_v31 }
 0x80c   :  { %15633 = vmatmul.mubr.bf16.gmra.mrb[56].mxu0 %v19540_v11 }
 0x80d   :  { %15636 = vmatprep.mubr.bf16.mxu0 %v19558_v19 }
 0x814   :  { %15637 = vmatmul.mubr.bf16.gmra.mrb[60].mxu0 %v19572_v17 }
 0x815   :  { %15640 = vmatprep.mubr.bf16.mxu0 %v19558_v19 }
 0x81c   :  { %15641 = vmatmul.mubr.bf16.gmra.mrb[64].mxu0 %v19572_v17 }
 0x81d   :  { %15644 = vmatprep.mubr.bf16.mxu0 %v19586_v24 }
 0x824   :  { %15645 = vmatmul.mubr.bf16.gmra.mrb[68].mxu0 %v19594_v8 }
 0x825   :  { %15648 = vmatprep.mubr.bf16.mxu0 %v19586_v24 }
 0x82c   :  { %15649 = vmatmul.mubr.bf16.gmra.mrb[72].mxu0 %v19594_v8 }
 0x82d   :  { %15668 = vmatprep.mubr.bf16.mxu0 %v19665_v23 }
 0x834   :  { %15669 = vmatmul.mubr.bf16.vlgmr.msra.gmra.mrb[12].mxu0 %v19670_v48 }
 0x835   :  { %15733 = vmatpush3.bf16.msra.mxu0 %v18071_v56  ;;  %15672 = vmatprep.mubr.bf16.mxu0 %v19665_v23  ;;  %v18082_v56 = vld [vmem:[#allocation7 + $0x1d8] sm:$0xff]  }
 0x836   :  { %15734 = vmatprep.subr.bf16.mxu0 %v18072_v22 }
 0x839   :  { %15735 = vmatpush3.bf16.msra.mxu0 %v18072_v22  ;;  %v18085_v22 = vld [vmem:[#allocation7 + $0x1f0] sm:$0xff]  }
 0x83a   :  { %15736 = vmatprep.subr.bf16.mxu0 %v18073_v18 }
 0x83c   :  { %15673 = vmatmul.mubr.bf16.gmra.mrb[16].mxu0 %v19670_v48 }
 0x83d   :  { %15676 = vmatprep.mubr.bf16.mxu0 %v19678_v34  ;;  %15737 = vmatpush3.bf16.msra.mxu0 %v18073_v18  ;;  %v18086_v18 = vld [vmem:[#allocation7 + $0x1f8] sm:$0xff]  }
 0x83e   :  { %15738 = vmatprep.subr.bf16.mxu0 %v18074_v43 }
 0x841   :  { %15739 = vmatpush3.bf16.msra.mxu0 %v18074_v43 }
 0x842   :  { %15740 = vmatprep.subr.bf16.mxu0 %v18075_v53 }
 0x844   :  { %15677 = vmatmul.mubr.bf16.gmra.mrb[20].mxu0 %v19683_v37 }
 0x845   :  { %15680 = vmatprep.mubr.bf16.mxu0 %v19678_v34  ;;  %15741 = vmatpush3.bf16.msra.mxu0 %v18075_v53 }
 0x846   :  { %15742 = vmatprep.subr.bf16.mxu0 %v18076_v60 }
 0x849   :  { %15743 = vmatpush3.bf16.msra.mxu0 %v18076_v60 }
 0x84a   :  { %15744 = vmatprep.subr.bf16.mxu0 %v18077_v27 }
 0x84c   :  { %15681 = vmatmul.mubr.bf16.gmra.mrb[24].mxu0 %v19683_v37 }
 0x84d   :  { %15684 = vmatprep.mubr.bf16.mxu0 %v19691_v33  ;;  %15745 = vmatpush3.bf16.msra.mxu0 %v18077_v27 }
 0x84e   :  { %15746 = vmatprep.subr.bf16.mxu0 %v18078_v59 }
 0x851   :  { %15747 = vmatpush3.bf16.msra.mxu0 %v18078_v59 }
 0x852   :  { %15812 = vmatprep.subr.bf16.mxu0 %v18079_v50 }
 0x854   :  { %15685 = vmatmul.mubr.bf16.gmra.mrb[28].mxu0 %v19696_v41 }
 0x855   :  { %15688 = vmatprep.mubr.bf16.mxu0 %v19691_v33 }
 0x85c   :  { %15689 = vmatmul.mubr.bf16.gmra.mrb[32].mxu0 %v19696_v41 }
 0x85d   :  { %15692 = vmatprep.mubr.bf16.mxu0 %v19704_v49 }
 0x864   :  { %15693 = vmatmul.mubr.bf16.gmra.mrb[36].mxu0 %v19709_v30 }
 0x865   :  { %15696 = vmatprep.mubr.bf16.mxu0 %v19704_v49 }
 0x86c   :  { %15697 = vmatmul.mubr.bf16.gmra.mrb[40].mxu0 %v19709_v30 }
 0x86d   :  { %15700 = vmatprep.mubr.bf16.mxu0 %v19717_v7 }
 0x874   :  { %15701 = vmatmul.mubr.bf16.gmra.mrb[44].mxu0 %v19722_v45 }
 0x875   :  { %15704 = vmatprep.mubr.bf16.mxu0 %v19717_v7 }
 0x87c   :  { %15705 = vmatmul.mubr.bf16.gmra.mrb[48].mxu0 %v19722_v45 }
 0x87d   :  { %15708 = vmatprep.mubr.bf16.mxu0 %v19730_v35 }
 0x884   :  { %15709 = vmatmul.mubr.bf16.gmra.mrb[52].mxu0 %v19735_v10 }
 0x885   :  { %15712 = vmatprep.mubr.bf16.mxu0 %v19730_v35 }
 0x88c   :  { %15713 = vmatmul.mubr.bf16.gmra.mrb[56].mxu0 %v19735_v10 }
 0x88d   :  { %15716 = vmatprep.mubr.bf16.mxu0 %v19743_v32 }
 0x894   :  { %15717 = vmatmul.mubr.bf16.gmra.mrb[60].mxu0 %v19748_v52 }
 0x895   :  { %15720 = vmatprep.mubr.bf16.mxu0 %v19743_v32 }
 0x89c   :  { %15721 = vmatmul.mubr.bf16.gmra.mrb[64].mxu0 %v19748_v52 }
 0x89d   :  { %15724 = vmatprep.mubr.bf16.mxu0 %v19756_v4 }
 0x8a4   :  { %15725 = vmatmul.mubr.bf16.gmra.mrb[68].mxu0 %v19761_v9 }
 0x8a5   :  { %15728 = vmatprep.mubr.bf16.mxu0 %v19756_v4 }
 0x8ac   :  { %15729 = vmatmul.mubr.bf16.gmra.mrb[72].mxu0 %v19761_v9 }
 0x8ad   :  { %15748 = vmatprep.mubr.msk.bf16.mxu0 %vm18810_vm9, %v19250_v12  ;;  %v18083_v12 = vld [vmem:[#allocation7 + $0x1e0] sm:$0xff]  }
 0x8b4   :  { %15749 = vmatmul.mubr.bf16.vlgmr.msra.gmra.mrb[12].mxu0 %v19260_v61  ;;  %v18084_v61 = vld [vmem:[#allocation7 + $0x1e8] sm:$0xff]  }
 0x8b5   :  { %15813 = vmatpush3.bf16.msra.mxu0 %v18079_v50  ;;  %15752 = vmatprep.mubr.msk.bf16.mxu0 %vm18810_vm9, %v19289_v20 }
 0x8b6   :  { %15814 = vmatprep.subr.bf16.mxu0 %v18080_v36 }
 0x8b9   :  { %15815 = vmatpush3.bf16.msra.mxu0 %v18080_v36 }
 0x8ba   :  { %15816 = vmatprep.subr.bf16.mxu0 %v18081_v42 }
 0x8bc   :  { %15753 = vmatmul.mubr.bf16.gmra.mrb[16].mxu0 %v19309_v2 }
 0x8bd   :  { %15756 = vmatprep.mubr.msk.bf16.mxu0 %vm18810_vm9, %v19289_v20  ;;  %15817 = vmatpush3.bf16.msra.mxu0 %v18081_v42  ;;  %v18087_v20 = vld [vmem:[#allocation7 + $0x200] sm:$0xff]  }
 0x8be   :  { %15818 = vmatprep.subr.bf16.mxu0 %v18082_v56 }
 0x8c1   :  { %15819 = vmatpush3.bf16.msra.mxu0 %v18082_v56 }
 0x8c2   :  { %15820 = vmatprep.subr.bf16.mxu0 %v18083_v12 }
 0x8c4   :  { %15757 = vmatmul.mubr.bf16.gmra.mrb[20].mxu0 %v19309_v2  ;;  %v18090_v2 = vld [vmem:[#allocation7 + $0x218] sm:$0xff]  }
 0x8c5   :  { %15760 = vmatprep.mubr.msk.bf16.mxu0 %vm18810_vm9, %v19361_v58  ;;  %15821 = vmatpush3.bf16.msra.mxu0 %v18083_v12 }
 0x8c6   :  { %15822 = vmatprep.subr.bf16.mxu0 %v18084_v61 }
 0x8c9   :  { %15823 = vmatpush3.bf16.msra.mxu0 %v18084_v61 }
 0x8ca   :  { %15824 = vmatprep.subr.bf16.mxu0 %v18085_v22 }
 0x8cc   :  { %15761 = vmatmul.mubr.bf16.gmra.mrb[24].mxu0 %v19372_v13 }
 0x8cd   :  { %15764 = vmatprep.mubr.msk.bf16.mxu0 %vm18810_vm9, %v19361_v58  ;;  %15825 = vmatpush3.bf16.msra.mxu0 %v18085_v22  ;;  %v18091_v58 = vld [vmem:[#allocation7 + $0x220] sm:$0xff]  }
 0x8ce   :  { %15826 = vmatprep.subr.bf16.mxu0 %v18086_v18 }
 0x8d1   :  { %15827 = vmatpush3.bf16.msra.mxu0 %v18086_v18 }
 0x8d2   :  { %15892 = vmatprep.subr.bf16.mxu0 %v18087_v20 }
 0x8d4   :  { %15765 = vmatmul.mubr.bf16.gmra.mrb[28].mxu0 %v19372_v13  ;;  %v18094_v13 = vld [vmem:[#allocation7 + $0x238] sm:$0xff]  }
 0x8d5   :  { %15768 = vmatprep.mubr.msk.bf16.mxu0 %vm18810_vm9, %v19414_v55 }
 0x8dc   :  { %15769 = vmatmul.mubr.bf16.gmra.mrb[32].mxu0 %v19424_v54 }
 0x8dd   :  { %15772 = vmatprep.mubr.msk.bf16.mxu0 %vm18810_vm9, %v19414_v55 }
 0x8e4   :  { %15773 = vmatmul.mubr.bf16.gmra.mrb[36].mxu0 %v19424_v54 }
 0x8e5   :  { %15776 = vmatprep.mubr.msk.bf16.mxu0 %vm18810_vm9, %v19460_v6 }
 0x8ec   :  { %15777 = vmatmul.mubr.bf16.gmra.mrb[40].mxu0 %v19467_v46 }
 0x8ed   :  { %15780 = vmatprep.mubr.msk.bf16.mxu0 %vm18810_vm9, %v19460_v6 }
 0x8f4   :  { %15781 = vmatmul.mubr.bf16.gmra.mrb[44].mxu0 %v19467_v46 }
 0x8f5   :  { %15784 = vmatprep.mubr.msk.bf16.mxu0 %vm18810_vm9, %v19498_v1 }
 0x8fc   :  { %15785 = vmatmul.mubr.bf16.gmra.mrb[48].mxu0 %v19159_v44 }
 0x8fd   :  { %15788 = vmatprep.mubr.msk.bf16.mxu0 %vm18810_vm9, %v19498_v1 }
 0x904   :  { %15789 = vmatmul.mubr.bf16.gmra.mrb[52].mxu0 %v19159_v44  ;;  %v18088_v44 = vld [vmem:[#allocation7 + $0x208] sm:$0xff]  }
 0x905   :  { %15792 = vmatprep.mubr.msk.bf16.mxu0 %vm18810_vm9, %v19532_v26 }
 0x90c   :  { %15793 = vmatmul.mubr.bf16.gmra.mrb[56].mxu0 %v19210_v39 }
 0x90d   :  { %15796 = vmatprep.mubr.msk.bf16.mxu0 %vm18810_vm9, %v19532_v26 }
 0x914   :  { %15797 = vmatmul.mubr.bf16.gmra.mrb[60].mxu0 %v19210_v39  ;;  %v18089_v39 = vld [vmem:[#allocation7 + $0x210] sm:$0xff]  }
 0x915   :  { %15800 = vmatprep.mubr.msk.bf16.mxu0 %vm18810_vm9, %v19567_v16 }
 0x91c   :  { %15801 = vmatmul.mubr.bf16.gmra.mrb[64].mxu0 %v19394_v57 }
 0x91d   :  { %15804 = vmatprep.mubr.msk.bf16.mxu0 %vm18810_vm9, %v19567_v16 }
 0x924   :  { %15805 = vmatmul.mubr.bf16.gmra.mrb[68].mxu0 %v19394_v57 }
 0x925   :  { %15808 = vmatprep.mubr.bf16.mxu0 %v22350_v0 }
 0x92c   :  { %15809 = vmatmul.mubr.bf16.gmra.mrb[72].mxu0 %v22350_v0 }
 0x92d   :  { %15828 = vmatprep.mubr.bf16.mxu0 %v19284_v15  ;;  %v18092_v15 = vld [vmem:[#allocation7 + $0x228] sm:$0xff]  }
 0x934   :  { %15829 = vmatmul.mubr.bf16.vlgmr.msra.gmra.mrb[12].mxu0 %v19287_v51  ;;  %v18093_v51 = vld [vmem:[#allocation7 + $0x230] sm:$0xff]  }
 0x935   :  { %15893 = vmatpush3.bf16.msra.mxu0 %v18087_v20  ;;  %15832 = vmatprep.mubr.bf16.mxu0 %v19345_v25 }
 0x936   :  { %15894 = vmatprep.subr.bf16.mxu0 %v18088_v44 }
 0x939   :  { %15895 = vmatpush3.bf16.msra.mxu0 %v18088_v44 }
 0x93a   :  { %15896 = vmatprep.subr.bf16.mxu0 %v18089_v39 }
 0x93c   :  { %15833 = vmatmul.mubr.bf16.gmra.mrb[16].mxu0 %v19367_v63 }
 0x93d   :  { %15836 = vmatprep.mubr.bf16.mxu0 %v19345_v25  ;;  %15897 = vmatpush3.bf16.msra.mxu0 %v18089_v39 }
 0x93e   :  { %15898 = vmatprep.subr.bf16.mxu0 %v18090_v2 }
 0x941   :  { %15899 = vmatpush3.bf16.msra.mxu0 %v18090_v2 }
 0x942   :  { %15900 = vmatprep.subr.bf16.mxu0 %v18091_v58 }
 0x944   :  { %15837 = vmatmul.mubr.bf16.gmra.mrb[20].mxu0 %v19367_v63  ;;  %v20022_v63 = vld [vmem:[%s22342_s12] ss:$0 sm:$0xff] }
 0x945   :  { %15840 = vmatprep.mubr.bf16.mxu0 %v19403_v29  ;;  %15901 = vmatpush3.bf16.msra.mxu0 %v18091_v58 }
 0x946   :  { %15902 = vmatprep.subr.bf16.mxu0 %v18092_v15 }
 0x949   :  { %15903 = vmatpush3.bf16.msra.mxu0 %v18092_v15 }
 0x94a   :  { %15904 = vmatprep.subr.bf16.mxu0 %v18093_v51 }
 0x94c   :  { %15841 = vmatmul.mubr.bf16.gmra.mrb[24].mxu0 %v19421_v5 }
 0x94d   :  { %15844 = vmatprep.mubr.bf16.mxu0 %v19403_v29  ;;  %15905 = vmatpush3.bf16.msra.mxu0 %v18093_v51 }
 0x94e   :  { %15906 = vmatprep.subr.bf16.mxu0 %v18094_v13 }
 0x951   :  { %15907 = vmatpush3.bf16.msra.mxu0 %v18094_v13 }
 0x954   :  { %15845 = vmatmul.mubr.bf16.gmra.mrb[28].mxu0 %v19421_v5 }
 0x955   :  { %15848 = vmatprep.mubr.bf16.mxu0 %v19447_v47 }
 0x95c   :  { %15849 = vmatmul.mubr.bf16.gmra.mrb[32].mxu0 %v19464_v28 }
 0x95d   :  { %15852 = vmatprep.mubr.bf16.mxu0 %v19447_v47 }
 0x964   :  { %15853 = vmatmul.mubr.bf16.gmra.mrb[36].mxu0 %v19464_v28 }
 0x965   :  { %15856 = vmatprep.mubr.bf16.mxu0 %v19486_v3 }
 0x96c   :  { %15857 = vmatmul.mubr.bf16.gmra.mrb[40].mxu0 %v19503_v62 }
 0x96d   :  { %15860 = vmatprep.mubr.bf16.mxu0 %v19486_v3 }
 0x974   :  { %15861 = vmatmul.mubr.bf16.gmra.mrb[44].mxu0 %v19503_v62 }
 0x975   :  { %15864 = vmatprep.mubr.bf16.mxu0 %v19523_v31 }
 0x97c   :  { %15865 = vmatmul.mubr.bf16.gmra.mrb[48].mxu0 %v19540_v11 }
 0x97d   :  { %15868 = vmatprep.mubr.bf16.mxu0 %v19523_v31 }
 0x984   :  { %15869 = vmatmul.mubr.bf16.gmra.mrb[52].mxu0 %v19540_v11 }
 0x985   :  { %15872 = vmatprep.mubr.bf16.mxu0 %v19558_v19 }
 0x98c   :  { %15873 = vmatmul.mubr.bf16.gmra.mrb[56].mxu0 %v19572_v17 }
 0x98d   :  { %15876 = vmatprep.mubr.bf16.mxu0 %v19558_v19 }
 0x994   :  { %15877 = vmatmul.mubr.bf16.gmra.mrb[60].mxu0 %v19572_v17 }
 0x995   :  { %15880 = vmatprep.mubr.bf16.mxu0 %v19586_v24 }
 0x99c   :  { %15881 = vmatmul.mubr.bf16.gmra.mrb[64].mxu0 %v19594_v8 }
 0x99d   :  { %15884 = vmatprep.mubr.bf16.mxu0 %v19586_v24 }
 0x9a4   :  { %15885 = vmatmul.mubr.bf16.gmra.mrb[68].mxu0 %v19594_v8 }
 0x9a5   :  { %15888 = vmatprep.mubr.bf16.mxu0 %v18649_v14 }
 0x9ac   :  { %15889 = vmatmul.mubr.bf16.gmra.mrb[72].mxu0 %v18649_v14 }
 0x9ad   :  { %15908 = vmatprep.mubr.bf16.mxu0 %v19665_v23 }
 0x9b4   :  { %15909 = vmatmul.mubr.bf16.vlgmr.msra.gmra.mrb[12].mxu0 %v19670_v48 }
 0x9b5   :  { %15912 = vmatprep.mubr.bf16.mxu0 %v19678_v34 }
 0x9bc   :  { %15913 = vmatmul.mubr.bf16.gmra.mrb[16].mxu0 %v19683_v37 }
 0x9bd   :  { %15916 = vmatprep.mubr.bf16.mxu0 %v19678_v34 }
 0x9c4   :  { %15917 = vmatmul.mubr.bf16.gmra.mrb[20].mxu0 %v19683_v37 }
 0x9c5   :  { %15920 = vmatprep.mubr.bf16.mxu0 %v19691_v33 }
 0x9cc   :  { %15921 = vmatmul.mubr.bf16.gmra.mrb[24].mxu0 %v19696_v41 }
 0x9cd   :  { %15924 = vmatprep.mubr.bf16.mxu0 %v19691_v33 }
 0x9d4   :  { %15925 = vmatmul.mubr.bf16.gmra.mrb[28].mxu0 %v19696_v41 }
 0x9d5   :  { %15928 = vmatprep.mubr.bf16.mxu0 %v19704_v49 }
 0x9dc   :  { %15929 = vmatmul.mubr.bf16.gmra.mrb[32].mxu0 %v19709_v30 }
 0x9dd   :  { %15932 = vmatprep.mubr.bf16.mxu0 %v19704_v49 }
 0x9e4   :  { %15933 = vmatmul.mubr.bf16.gmra.mrb[36].mxu0 %v19709_v30 }
 0x9e5   :  { %15936 = vmatprep.mubr.bf16.mxu0 %v19717_v7 }
 0x9ec   :  { %15937 = vmatmul.mubr.bf16.gmra.mrb[40].mxu0 %v19722_v45 }
 0x9ed   :  { %15940 = vmatprep.mubr.bf16.mxu0 %v19717_v7 }
 0x9f4   :  { %15941 = vmatmul.mubr.bf16.gmra.mrb[44].mxu0 %v19722_v45 }
 0x9f5   :  { %15944 = vmatprep.mubr.bf16.mxu0 %v19730_v35 }
 0x9fc   :  { %15945 = vmatmul.mubr.bf16.gmra.mrb[48].mxu0 %v19735_v10 }
 0x9fd   :  { %15948 = vmatprep.mubr.bf16.mxu0 %v19730_v35 }
 0xa04   :  { %15949 = vmatmul.mubr.bf16.gmra.mrb[52].mxu0 %v19735_v10 }
 0xa05   :  { %15952 = vmatprep.mubr.bf16.mxu0 %v19743_v32 }
 0xa0c   :  { %15953 = vmatmul.mubr.bf16.gmra.mrb[56].mxu0 %v19748_v52 }
 0xa0d   :  { %15956 = vmatprep.mubr.bf16.mxu0 %v19743_v32 }
 0xa14   :  { %15957 = vmatmul.mubr.bf16.gmra.mrb[60].mxu0 %v19748_v52 }
 0xa15   :  { %15960 = vmatprep.mubr.bf16.mxu0 %v19756_v4 }
 0xa1c   :  { %15961 = vmatmul.mubr.bf16.gmra.mrb[64].mxu0 %v19761_v9 }
 0xa1d   :  { %15964 = vmatprep.mubr.bf16.mxu0 %v19756_v4 }
 0xa24   :  { %15965 = vmatmul.mubr.bf16.gmra.mrb[68].mxu0 %v19761_v9 }
 0xa25   :  { %15968 = vmatprep.mubr.bf16.mxu0 %v18833_v38 }
 0xa2c   :  { %15969 = vmatmul.mubr.bf16.gmra.mrb[72].mxu0 %v18833_v38 }
 0xa2d   :  { %15988 = vmatprep.mubr.bf16.mxu0 %v18649_v14 }
 0xa87   :  { %v15910_v25 = vpop.f32.mrb[12].mxu0 }
 0xa88   :  { %v8377_v57 = vpop.f32.mrb[13].mxu0  ;;  %v20031_v47 = vadd.f32 %v15910_v25, %v20022_v63 }
 0xa89   :  { %v15911_v29 = vpop.f32.mrb[14].mxu0  ;;  %v20025_v5 = vadd.f32 %v20022_v63, %v8377_v57 }
 0xa8a   :  { %v8380_v55 = vpop.f32.mrb[15].mxu0  ;;  %v20036_v28 = vadd.f32 %v15911_v29, %v20022_v63 }
 0xa8b   :  { %v20028_v54 = vadd.f32 %v20022_v63, %v8380_v55 }
 0xa8d   :  { %v8769_v6 = vadd.f32 %v20028_v54, %v20025_v5 }
 0xa8f   :  { %v8770_v46 = vadd.f32 %v8769_v6, %v20031_v47  ;;  %v15914_v3 = vpop.f32.mrb[16].mxu0 }
 0xa90   :  { %v8393_v1 = vpop.f32.mrb[17].mxu0  ;;  %v20048_v17 = vadd.f32 %v15914_v3, %v20022_v63 }
 0xa91   :  { %v20040_v62 = vadd.f32 %v20022_v63, %v8393_v1  ;;  %v8771_v31 = vadd.f32 %v8770_v46, %v20036_v28  ;;  %v15915_v26 = vpop.f32.mrb[18].mxu0 }
 0xa92   :  { %v8396_v11 = vpop.f32.mrb[19].mxu0  ;;  %v20052_v8 = vadd.f32 %v15915_v26, %v20022_v63 }
 0xa93   :  { %v8772_v19 = vadd.f32 %v8771_v31, %v20040_v62  ;;  %v20045_v16 = vadd.f32 %v20022_v63, %v8396_v11 }
 0xa95   :  { %v8773_v24 = vadd.f32 %v8772_v19, %v20045_v16 }
 0xa97   :  { %v8774_v23 = vadd.f32 %v8773_v24, %v20048_v17  ;;  %v15918_v48 = vpop.f32.mrb[20].mxu0 }
 0xa98   :  { %v8409_v34 = vpop.f32.mrb[21].mxu0  ;;  %v20064_v45 = vadd.f32 %v15918_v48, %v20022_v63 }
 0xa99   :  { %v20056_v37 = vadd.f32 %v20022_v63, %v8409_v34  ;;  %v8775_v33 = vadd.f32 %v8774_v23, %v20052_v8  ;;  %v15919_v41 = vpop.f32.mrb[22].mxu0 }
 0xa9a   :  { %v8412_v49 = vpop.f32.mrb[23].mxu0  ;;  %v20068_v10 = vadd.f32 %v15919_v41, %v20022_v63 }
 0xa9b   :  { %v8776_v30 = vadd.f32 %v8775_v33, %v20056_v37  ;;  %v20061_v7 = vadd.f32 %v20022_v63, %v8412_v49 }
 0xa9d   :  { %v8777_v35 = vadd.f32 %v8776_v30, %v20061_v7 }
 0xa9f   :  { %v8778_v32 = vadd.f32 %v8777_v35, %v20064_v45  ;;  %v15922_v52 = vpop.f32.mrb[24].mxu0 }
 0xaa0   :  { %v8425_v4 = vpop.f32.mrb[25].mxu0  ;;  %v20080_v50 = vadd.f32 %v15922_v52, %v20022_v63 }
 0xaa1   :  { %v20072_v9 = vadd.f32 %v20022_v63, %v8425_v4  ;;  %v8779_v43 = vadd.f32 %v8778_v32, %v20068_v10  ;;  %v15923_v53 = vpop.f32.mrb[26].mxu0 }
 0xaa2   :  { %v8428_v60 = vpop.f32.mrb[27].mxu0  ;;  %v20084_v42 = vadd.f32 %v15923_v53, %v20022_v63 }
 0xaa3   :  { %v8780_v27 = vadd.f32 %v8779_v43, %v20072_v9  ;;  %v20077_v59 = vadd.f32 %v20022_v63, %v8428_v60 }
 0xaa5   :  { %v8781_v36 = vadd.f32 %v8780_v27, %v20077_v59 }
 0xaa7   :  { %v8782_v56 = vadd.f32 %v8781_v36, %v20080_v50  ;;  %v15926_v12 = vpop.f32.mrb[28].mxu0 }
 0xaa8   :  { %v8441_v61 = vpop.f32.mrb[29].mxu0  ;;  %v20096_v58 = vadd.f32 %v15926_v12, %v20022_v63 }
 0xaa9   :  { %v20088_v22 = vadd.f32 %v20022_v63, %v8441_v61  ;;  %v8783_v18 = vadd.f32 %v8782_v56, %v20084_v42  ;;  %v15927_v20 = vpop.f32.mrb[30].mxu0 }
 0xaaa   :  { %v8444_v44 = vpop.f32.mrb[31].mxu0  ;;  %v20100_v51 = vadd.f32 %v15927_v20, %v20022_v63 }
 0xaab   :  { %v8784_v39 = vadd.f32 %v8783_v18, %v20088_v22  ;;  %v20093_v2 = vadd.f32 %v20022_v63, %v8444_v44 }
 0xaad   :  { %v8785_v15 = vadd.f32 %v8784_v39, %v20093_v2 }
 0xaaf   :  { %v8786_v13 = vadd.f32 %v8785_v15, %v20096_v58  ;;  %v15930_v25 = vpop.f32.mrb[32].mxu0 }
 0xab0   :  { %v8457_v57 = vpop.f32.mrb[33].mxu0  ;;  %v20112_v31 = vadd.f32 %v15930_v25, %v20022_v63 }
 0xab1   :  { %v20104_v29 = vadd.f32 %v20022_v63, %v8457_v57  ;;  %v8787_v55 = vadd.f32 %v8786_v13, %v20100_v51  ;;  %v15931_v6 = vpop.f32.mrb[34].mxu0 }
 0xab2   :  { %v8460_v46 = vpop.f32.mrb[35].mxu0  ;;  %v20116_v11 = vadd.f32 %v15931_v6, %v20022_v63 }
 0xab3   :  { %v8788_v3 = vadd.f32 %v8787_v55, %v20104_v29  ;;  %v20109_v1 = vadd.f32 %v20022_v63, %v8460_v46 }
 0xab5   :  { %v8789_v26 = vadd.f32 %v8788_v3, %v20109_v1 }
 0xab7   :  { %v8790_v19 = vadd.f32 %v8789_v26, %v20112_v31  ;;  %v15934_v24 = vpop.f32.mrb[36].mxu0 }
 0xab8   :  { %v8473_v23 = vpop.f32.mrb[37].mxu0  ;;  %v20128_v35 = vadd.f32 %v15934_v24, %v20022_v63 }
 0xab9   :  { %v20120_v48 = vadd.f32 %v20022_v63, %v8473_v23  ;;  %v8791_v34 = vadd.f32 %v8790_v19, %v20116_v11  ;;  %v15935_v33 = vpop.f32.mrb[38].mxu0 }
 0xaba   :  { %v8476_v41 = vpop.f32.mrb[39].mxu0  ;;  %v20132_v52 = vadd.f32 %v15935_v33, %v20022_v63 }
 0xabb   :  { %v8792_v49 = vadd.f32 %v8791_v34, %v20120_v48  ;;  %v20125_v30 = vadd.f32 %v20022_v63, %v8476_v41 }
 0xabd   :  { %v8793_v32 = vadd.f32 %v8792_v49, %v20125_v30 }
 0xabf   :  { %v8794_v4 = vadd.f32 %v8793_v32, %v20128_v35  ;;  %v15938_v43 = vpop.f32.mrb[40].mxu0 }
 0xac0   :  { %v8489_v53 = vpop.f32.mrb[41].mxu0  ;;  %v20144_v18 = vadd.f32 %v15938_v43, %v20022_v63 }
 0xac1   :  { %v20136_v60 = vadd.f32 %v20022_v63, %v8489_v53  ;;  %v8795_v27 = vadd.f32 %v8794_v4, %v20132_v52  ;;  %v15939_v36 = vpop.f32.mrb[42].mxu0 }
 0xac2   :  { %v8492_v56 = vpop.f32.mrb[43].mxu0  ;;  %22488 = vst [vmem:[#allocation19_spill] sm:$0xff] %v20144_v18  ;;  %v20148_v44 = vadd.f32 %v15939_v36, %v20022_v63 }
 0xac3   :  { %22486 = vst [vmem:[#allocation17_spill] sm:$0xff] %v20136_v60  ;;  %v8796_v12 = vadd.f32 %v8795_v27, %v20136_v60  ;;  %v20141_v61 = vadd.f32 %v20022_v63, %v8492_v56 }
 0xac4   :  { %22489 = vst [vmem:[#allocation20_spill] sm:$0xff] %v20148_v44 }
 0xac5   :  { %22487 = vst [vmem:[#allocation18_spill] sm:$0xff] %v20141_v61  ;;  %v8797_v20 = vadd.f32 %v8796_v12, %v20141_v61 }
 0xac7   :  { %v8798_v39 = vadd.f32 %v8797_v20, %v20144_v18  ;;  %v15942_v15 = vpop.f32.mrb[44].mxu0 }
 0xac8   :  { %v8505_v13 = vpop.f32.mrb[45].mxu0  ;;  %v20160_v26 = vadd.f32 %v15942_v15, %v20022_v63 }
 0xac9   :  { %v20152_v25 = vadd.f32 %v20022_v63, %v8505_v13  ;;  %v8799_v57 = vadd.f32 %v8798_v39, %v20148_v44  ;;  %v15943_v55 = vpop.f32.mrb[46].mxu0 }
 0xaca   :  { %v8508_v6 = vpop.f32.mrb[47].mxu0  ;;  %22492 = vst [vmem:[#allocation23_spill] sm:$0xff] %v20160_v26  ;;  %v20164_v24 = vadd.f32 %v15943_v55, %v20022_v63 }
 0xacb   :  { %22490 = vst [vmem:[#allocation21_spill] sm:$0xff] %v20152_v25  ;;  %v8800_v46 = vadd.f32 %v8799_v57, %v20152_v25  ;;  %v20157_v3 = vadd.f32 %v20022_v63, %v8508_v6 }
 0xacc   :  { %22493 = vst [vmem:[#allocation24_spill] sm:$0xff] %v20164_v24 }
 0xacd   :  { %22491 = vst [vmem:[#allocation22_spill] sm:$0xff] %v20157_v3  ;;  %v8801_v19 = vadd.f32 %v8800_v46, %v20157_v3 }
 0xacf   :  { %v8802_v23 = vadd.f32 %v8801_v19, %v20160_v26  ;;  %v15946_v34 = vpop.f32.mrb[48].mxu0 }
 0xad0   :  { %v8521_v33 = vpop.f32.mrb[49].mxu0  ;;  %v20176_v27 = vadd.f32 %v15946_v34, %v20022_v63 }
 0xad1   :  { %v20168_v41 = vadd.f32 %v20022_v63, %v8521_v33  ;;  %v8803_v49 = vadd.f32 %v8802_v23, %v20164_v24  ;;  %v15947_v32 = vpop.f32.mrb[50].mxu0 }
 0xad2   :  { %v8524_v4 = vpop.f32.mrb[51].mxu0  ;;  %22496 = vst [vmem:[#allocation27_spill] sm:$0xff] %v20176_v27  ;;  %v20180_v56 = vadd.f32 %v15947_v32, %v20022_v63 }
 0xad3   :  { %22494 = vst [vmem:[#allocation25_spill] sm:$0xff] %v20168_v41  ;;  %v8804_v43 = vadd.f32 %v8803_v49, %v20168_v41  ;;  %v20173_v53 = vadd.f32 %v20022_v63, %v8524_v4 }
 0xad4   :  { %22497 = vst [vmem:[#allocation28_spill] sm:$0xff] %v20180_v56 }
 0xad5   :  { %22495 = vst [vmem:[#allocation26_spill] sm:$0xff] %v20173_v53  ;;  %v8805_v36 = vadd.f32 %v8804_v43, %v20173_v53 }
 0xad7   :  { %v8806_v12 = vadd.f32 %v8805_v36, %v20176_v27  ;;  %v15950_v20 = vpop.f32.mrb[52].mxu0 }
 0xad8   :  { %v8537_v39 = vpop.f32.mrb[53].mxu0  ;;  %v20192_v19 = vadd.f32 %v15950_v20, %v20022_v63 }
 0xad9   :  { %v20184_v15 = vadd.f32 %v20022_v63, %v8537_v39  ;;  %v8807_v13 = vadd.f32 %v8806_v12, %v20180_v56  ;;  %v15951_v57 = vpop.f32.mrb[54].mxu0 }
 0xada   :  { %v8540_v55 = vpop.f32.mrb[55].mxu0  ;;  %22500 = vst [vmem:[#allocation31_spill] sm:$0xff] %v20192_v19  ;;  %v20196_v34 = vadd.f32 %v15951_v57, %v20022_v63 }
 0xadb   :  { %22498 = vst [vmem:[#allocation29_spill] sm:$0xff] %v20184_v15  ;;  %v8808_v6 = vadd.f32 %v8807_v13, %v20184_v15  ;;  %v20189_v46 = vadd.f32 %v20022_v63, %v8540_v55 }
 0xadc   :  { %22501 = vst [vmem:[#allocation32_spill] sm:$0xff] %v20196_v34 }
 0xadd   :  { %22499 = vst [vmem:[#allocation30_spill] sm:$0xff] %v20189_v46  ;;  %v8809_v23 = vadd.f32 %v8808_v6, %v20189_v46 }
 0xadf   :  { %v8810_v33 = vadd.f32 %v8809_v23, %v20192_v19  ;;  %v15954_v49 = vpop.f32.mrb[56].mxu0 }
 0xae0   :  { %v8553_v32 = vpop.f32.mrb[57].mxu0  ;;  %v8749_v13 = vadd.f32 %v15954_v49, %v20022_v63 }
 0xae1   :  { %v20200_v4 = vadd.f32 %v20022_v63, %v8553_v32  ;;  %v8811_v43 = vadd.f32 %v8810_v33, %v20196_v34  ;;  %v15955_v36 = vpop.f32.mrb[58].mxu0 }
 0xae2   :  { %v8556_v12 = vpop.f32.mrb[59].mxu0  ;;  %v8750_v57 = vadd.f32 %v15955_v36, %v20022_v63 }
 0xae3   :  { %22502 = vst [vmem:[#allocation33_spill] sm:$0xff] %v20200_v4  ;;  %v8812_v39 = vadd.f32 %v8811_v43, %v20200_v4  ;;  %v8748_v20 = vadd.f32 %v20022_v63, %v8556_v12 }
 0xae5   :  { %v8813_v55 = vadd.f32 %v8812_v39, %v8748_v20 }
 0xae7   :  { %v8814_v6 = vadd.f32 %v8813_v55, %v8749_v13  ;;  %v15958_v23 = vpop.f32.mrb[60].mxu0 }
 0xae8   :  { %v8569_v0 = vpop.f32.mrb[61].mxu0  ;;  %v8753_v43 = vadd.f32 %v15958_v23, %v20022_v63 }
 0xae9   :  { %v8751_v38 = vadd.f32 %v20022_v63, %v8569_v0  ;;  %v8815_v32 = vadd.f32 %v8814_v6, %v8750_v57  ;;  %v15959_v40 = vpop.f32.mrb[62].mxu0 }
 0xaea   :  { %v8572_v21 = vpop.f32.mrb[63].mxu0  ;;  %v8754_v12 = vadd.f32 %v15959_v40, %v20022_v63 }
 0xaeb   :  { %v8816_v33 = vadd.f32 %v8815_v32, %v8751_v38  ;;  %v8752_v14 = vadd.f32 %v20022_v63, %v8572_v21 }
 0xaed   :  { %v8817_v4 = vadd.f32 %v8816_v33, %v8752_v14 }
 0xaef   :  { %v8818_v49 = vadd.f32 %v8817_v4, %v8753_v43  ;;  %v15962_v39 = vpop.f32.mrb[64].mxu0 }
 0xaf0   :  { %v8585_v34 = vpop.f32.mrb[65].mxu0  ;;  %v8757_v32 = vadd.f32 %v15962_v39, %v20022_v63 }
 0xaf1   :  { %v8755_v36 = vadd.f32 %v20022_v63, %v8585_v34  ;;  %v8819_v55 = vadd.f32 %v8818_v49, %v8754_v12  ;;  %v15963_v19 = vpop.f32.mrb[66].mxu0 }
 0xaf2   :  { %v8588_v46 = vpop.f32.mrb[67].mxu0  ;;  %v8758_v21 = vadd.f32 %v15963_v19, %v20022_v63 }
 0xaf3   :  { %v8820_v0 = vadd.f32 %v8819_v55, %v8755_v36  ;;  %v8756_v6 = vadd.f32 %v20022_v63, %v8588_v46 }
 0xaf5   :  { %v8821_v15 = vadd.f32 %v8820_v0, %v8756_v6 }
 0xaf7   :  { %v8822_v23 = vadd.f32 %v8821_v15, %v8757_v32  ;;  %v15966_v33 = vpop.f32.mrb[68].mxu0 }
 0xaf8   :  { %v8601_v56 = vpop.f32.mrb[69].mxu0  ;;  %v8761_v55 = vadd.f32 %v15966_v33, %v20022_v63 }
 0xaf9   :  { %v8759_v40 = vadd.f32 %v20022_v63, %v8601_v56  ;;  %v8823_v4 = vadd.f32 %v8822_v23, %v8758_v21  ;;  %v15967_v27 = vpop.f32.mrb[70].mxu0 }
 0xafa   :  { %v8604_v53 = vpop.f32.mrb[71].mxu0  ;;  %v8762_v46 = vadd.f32 %v15967_v27, %v20022_v63 }
 0xafb   :  { %v8824_v34 = vadd.f32 %v8823_v4, %v8759_v40  ;;  %v8760_v49 = vadd.f32 %v20022_v63, %v8604_v53 }
 0xafd   :  { %v8825_v41 = vadd.f32 %v8824_v34, %v8760_v49 }
 0xaff   :  { %v8826_v39 = vadd.f32 %v8825_v41, %v8761_v55  ;;  %v15970_v0 = vpop.f32.mrb[72].mxu0 }
 0xb00   :  { %v8617_v24 = vpop.f32.mrb[73].mxu0  ;;  %v8765_v4 = vadd.f32 %v15970_v0, %v20022_v63 }
 0xb01   :  { %v8763_v15 = vadd.f32 %v20022_v63, %v8617_v24  ;;  %v8827_v19 = vadd.f32 %v8826_v39, %v8762_v46  ;;  %v15971_v26 = vpop.f32.mrb[74].mxu0 }
 0xb02   :  { %v8620_v3 = vpop.f32.mrb[75].mxu0  ;;  %v8766_v53 = vadd.f32 %v15971_v26, %v20022_v63 }
 0xb03   :  { %v8828_v56 = vadd.f32 %v8827_v19, %v8763_v15  ;;  %v8764_v23 = vadd.f32 %v20022_v63, %v8620_v3 }
 0xb05   :  { %v8829_v25 = vadd.f32 %v8828_v56, %v8764_v23 }
 0xb07   :  { %v8830_v33 = vadd.f32 %v8829_v25, %v8765_v4 }
 0xb09   :  { %v8831_v34 = vadd.f32 %v8830_v33, %v8766_v53 }
 0xb0b   :  { %v8832_v44 = vrot.slane %v8831_v34, 4 }
 0xb0d   :  { %v8833_v27 = vadd.f32 %v8832_v44, %v8831_v34 }
 0xb0f   :  { %v8834_v41 = vrot.slane %v8833_v27, 2 }
 0xb11   :  { %v8835_v18 = vadd.f32 %v8834_v41, %v8833_v27 }
 0xb13   :  { %v8836_v61 = vrot.slane %v8835_v18, 1 }
 0xb15   :  { %v8837_v60 = vadd.f32 %v8836_v61, %v8835_v18 }
 0xb17   :  { %v20223_v24 = vmul.f32 0.001953125, %v8837_v60 }
 0xb19   :  { %v20226_v39 = vsub.f32 %v8748_v20, %v20223_v24  ;;  %v20229_v3 = vsub.f32 %v8749_v13, %v20223_v24  ;;  %v20232_v0 = vsub.f32 %v8750_v57, %v20223_v24  ;;  %v20235_v63 = vsub.f32 %v8751_v38, %v20223_v24 }
 0xb1a   :  { %v20238_v44 = vsub.f32 %v8752_v14, %v20223_v24  ;;  %v20241_v25 = vsub.f32 %v8753_v43, %v20223_v24  ;;  %v20244_v60 = vsub.f32 %v8754_v12, %v20223_v24  ;;  %v20247_v61 = vsub.f32 %v8755_v36, %v20223_v24 }
 0xb1b   :  { %v20250_v18 = vsub.f32 %v8756_v6, %v20223_v24  ;;  %v20253_v26 = vsub.f32 %v8757_v32, %v20223_v24  ;;  %v20256_v38 = vsub.f32 %v8758_v21, %v20223_v24  ;;  %v20259_v14 = vsub.f32 %v8759_v40, %v20223_v24 }
 0xb1c   :  { %v20262_v20 = vsub.f32 %v8760_v49, %v20223_v24  ;;  %v20265_v13 = vsub.f32 %v8761_v55, %v20223_v24  ;;  %v20268_v57 = vsub.f32 %v8762_v46, %v20223_v24  ;;  %v20271_v43 = vsub.f32 %v8763_v15, %v20223_v24 }
 0xb1d   :  { %v20274_v12 = vsub.f32 %v8764_v23, %v20223_v24  ;;  %v20277_v36 = vsub.f32 %v8765_v4, %v20223_v24  ;;  %v20280_v6 = vsub.f32 %v8766_v53, %v20223_v24  ;;  %v20284_v32 = vsub.f32 %v20025_v5, %v20223_v24 }
 0xb1e   :  { %v20288_v21 = vsub.f32 %v20028_v54, %v20223_v24  ;;  %v20292_v40 = vsub.f32 %v20031_v47, %v20223_v24  ;;  %v20300_v46 = vsub.f32 %v20036_v28, %v20223_v24  ;;  %v20304_v5 = vsub.f32 %v20040_v62, %v20223_v24 }
 0xb1f   :  { %v8903_v49 = vmul.f32 %v20284_v32, %v20284_v32  ;;  %v20310_v47 = vsub.f32 %v20045_v16, %v20223_v24  ;;  %v20316_v28 = vsub.f32 %v20048_v17, %v20223_v24  ;;  %v20322_v4 = vsub.f32 %v20052_v8, %v20223_v24 }
 0xb20   :  { %v8904_v55 = vmul.f32 %v20288_v21, %v20288_v21  ;;  %v8905_v54 = vmul.f32 %v20292_v40, %v20292_v40  ;;  %v8906_v19 = vmul.f32 %v20300_v46, %v20300_v46  ;;  %v8907_v62 = vmul.f32 %v20304_v5, %v20304_v5 }
 0xb21   :  { %v8908_v16 = vmul.f32 %v20310_v47, %v20310_v47  ;;  %v20328_v33 = vsub.f32 %v20056_v37, %v20223_v24  ;;  %v8909_v17 = vmul.f32 %v20316_v28, %v20316_v28  ;;  %v20334_v27 = vsub.f32 %v20061_v7, %v20223_v24 }
 0xb22   :  { %v8967_v15 = vadd.f32 %v8904_v55, %v8903_v49  ;;  %v8910_v8 = vmul.f32 %v20322_v4, %v20322_v4  ;;  %v20340_v49 = vsub.f32 %v20064_v45, %v20223_v24 }
 0xb23   :  { %v8911_v37 = vmul.f32 %v20328_v33, %v20328_v33  ;;  %v8912_v7 = vmul.f32 %v20334_v27, %v20334_v27 }
 0xb24   :  { %v8968_v56 = vadd.f32 %v8967_v15, %v8905_v54  ;;  %v20346_v54 = vsub.f32 %v20068_v10, %v20223_v24  ;;  %v8913_v45 = vmul.f32 %v20340_v49, %v20340_v49 }
 0xb26   :  { %v8969_v23 = vadd.f32 %v8968_v56, %v8906_v19  ;;  %v18095_v19 = vld [vmem:[#allocation9] sm:$0xff]   ;;  %v20352_v56 = vsub.f32 %v20072_v9, %v20223_v24  ;;  %v8914_v10 = vmul.f32 %v20346_v54, %v20346_v54 }
 0xb27   :  { %16052 = vmatprep.subr.bf16.mxu1 %v18095_v19 }
 0xb28   :  { %v8970_v53 = vadd.f32 %v8969_v23, %v8907_v62  ;;  %16053 = vmatpush3.bf16.msra.mxu1 %v18095_v19  ;;  %v20358_v23 = vsub.f32 %v20077_v59, %v20223_v24  ;;  %v8915_v9 = vmul.f32 %v20352_v56, %v20352_v56 }
 0xb2a   :  { %v8971_v34 = vadd.f32 %v8970_v53, %v8908_v16  ;;  %v20364_v53 = vsub.f32 %v20080_v50, %v20223_v24  ;;  %v8916_v59 = vmul.f32 %v20358_v23, %v20358_v23 }
 0xb2c   :  { %v8972_v41 = vadd.f32 %v8971_v34, %v8909_v17  ;;  %v20370_v34 = vsub.f32 %v20084_v42, %v20223_v24  ;;  %v8917_v50 = vmul.f32 %v20364_v53, %v20364_v53 }
 0xb2e   :  { %v8973_v55 = vadd.f32 %v8972_v41, %v8910_v8  ;;  %v20376_v41 = vsub.f32 %v20088_v22, %v20223_v24  ;;  %v8918_v42 = vmul.f32 %v20370_v34, %v20370_v34 }
 0xb30   :  { %v8974_v15 = vadd.f32 %v8973_v55, %v8911_v37  ;;  %v20382_v55 = vsub.f32 %v20093_v2, %v20223_v24  ;;  %v8919_v22 = vmul.f32 %v20376_v41, %v20376_v41 }
 0xb32   :  { %v8975_v62 = vadd.f32 %v8974_v15, %v8912_v7  ;;  %v20388_v15 = vsub.f32 %v20096_v58, %v20223_v24  ;;  %v8920_v2 = vmul.f32 %v20382_v55, %v20382_v55 }
 0xb34   :  { %v8976_v16 = vadd.f32 %v8975_v62, %v8913_v45  ;;  %22503 = vst [vmem:[#allocation34_spill] sm:$0xff] %v20388_v15  ;;  %v20394_v45 = vsub.f32 %v20100_v51, %v20223_v24  ;;  %v8921_v58 = vmul.f32 %v20388_v15, %v20388_v15  ;;  %v18115_v15 = vld [vmem:[#allocation9 + $0xa0] sm:$0xff]  }
 0xb36   :  { %v8977_v17 = vadd.f32 %v8976_v16, %v8914_v10  ;;  %22504 = vst [vmem:[#allocation35_spill] sm:$0xff] %v20394_v45  ;;  %v20400_v10 = vsub.f32 %v20104_v29, %v20223_v24  ;;  %v8922_v51 = vmul.f32 %v20394_v45, %v20394_v45 }
 0xb38   :  { %v8978_v8 = vadd.f32 %v8977_v17, %v8915_v9  ;;  %22505 = vst [vmem:[#allocation36_spill] sm:$0xff] %v20400_v10  ;;  %v20406_v9 = vsub.f32 %v20109_v1, %v20223_v24  ;;  %v8923_v29 = vmul.f32 %v20400_v10, %v20400_v10 }
 0xb3a   :  { %v8979_v37 = vadd.f32 %v8978_v8, %v8916_v59  ;;  %22506 = vst [vmem:[#allocation37_spill] sm:$0xff] %v20406_v9  ;;  %v20412_v59 = vsub.f32 %v20112_v31, %v20223_v24  ;;  %v8924_v1 = vmul.f32 %v20406_v9, %v20406_v9 }
 0xb3c   :  { %v8980_v7 = vadd.f32 %v8979_v37, %v8917_v50  ;;  %22507 = vst [vmem:[#allocation38_spill] sm:$0xff] %v20412_v59  ;;  %v20418_v50 = vsub.f32 %v20116_v11, %v20223_v24  ;;  %v8925_v31 = vmul.f32 %v20412_v59, %v20412_v59 }
 0xb3e   :  { %v8981_v19 = vadd.f32 %v8980_v7, %v8918_v42  ;;  %22508 = vst [vmem:[#allocation39_spill] sm:$0xff] %v20418_v50  ;;  %v20424_v42 = vsub.f32 %v20120_v48, %v20223_v24  ;;  %v8926_v11 = vmul.f32 %v20418_v50, %v20418_v50 }
 0xb40   :  { %v8982_v62 = vadd.f32 %v8981_v19, %v8919_v22  ;;  %22509 = vst [vmem:[#allocation40_spill] sm:$0xff] %v20424_v42  ;;  %v20430_v22 = vsub.f32 %v20125_v30, %v20223_v24  ;;  %v8927_v48 = vmul.f32 %v20424_v42, %v20424_v42 }
 0xb42   :  { %v8983_v16 = vadd.f32 %v8982_v62, %v8920_v2  ;;  %22510 = vst [vmem:[#allocation41_spill] sm:$0xff] %v20430_v22  ;;  %v20436_v2 = vsub.f32 %v20128_v35, %v20223_v24  ;;  %v8928_v30 = vmul.f32 %v20430_v22, %v20430_v22 }
 0xb44   :  { %v8984_v17 = vadd.f32 %v8983_v16, %v8921_v58  ;;  %22511 = vst [vmem:[#allocation42_spill] sm:$0xff] %v20436_v2  ;;  %v18096_v58 = vld [vmem:[#allocation9 + $0x8] sm:$0xff]   ;;  %v20442_v16 = vsub.f32 %v20132_v52, %v20223_v24  ;;  %v8929_v35 = vmul.f32 %v20436_v2, %v20436_v2 }
 0xb45   :  { %16054 = vmatprep.subr.bf16.mxu1 %v18096_v58 }
 0xb46   :  { %v8985_v8 = vadd.f32 %v8984_v17, %v8922_v51  ;;  %22512 = vst [vmem:[#allocation43_spill] sm:$0xff] %v20442_v16  ;;  %v22513_v17 = vld [vmem:[#allocation17_spill] sm:$0xff]  ;;  %16055 = vmatpush3.bf16.msra.mxu1 %v18096_v58  ;;  %v8930_v52 = vmul.f32 %v20442_v16, %v20442_v16 }
 0xb48   :  { %v8986_v37 = vadd.f32 %v8985_v8, %v8923_v29  ;;  %v20448_v29 = vsub.f32 %v22513_v17, %v20223_v24  ;;  %v18097_v17 = vld [vmem:[#allocation9 + $0x40] sm:$0xff]  }
 0xb49   :  { %15972 = vmatprep.subr.bf16.mxu0 %v18097_v17 }
 0xb4a   :  { %v8987_v7 = vadd.f32 %v8986_v37, %v8924_v1  ;;  %22514 = vst [vmem:[#allocation17_spill] sm:$0xff] %v20448_v29  ;;  %v22515_v1 = vld [vmem:[#allocation18_spill] sm:$0xff]  ;;  %15973 = vmatpush3.bf16.msra.mxu0 %v18097_v17 }
 0xb4b   :  { %v20454_v37 = vsub.f32 %v22515_v1, %v20223_v24  ;;  %v22521_v1 = vld [vmem:[#allocation21_spill] sm:$0xff] }
 0xb4c   :  { %v8988_v19 = vadd.f32 %v8987_v7, %v8925_v31  ;;  %v22517_v7 = vld [vmem:[#allocation19_spill] sm:$0xff] }
 0xb4d   :  { %22516 = vst [vmem:[#allocation18_spill] sm:$0xff] %v20454_v37  ;;  %v8932_v58 = vmul.f32 %v20454_v37, %v20454_v37  ;;  %v22525_v37 = vld [vmem:[#allocation23_spill] sm:$0xff] }
 0xb4e   :  { %v8989_v62 = vadd.f32 %v8988_v19, %v8926_v11  ;;  %v20460_v11 = vsub.f32 %v22517_v7, %v20223_v24  ;;  %v8931_v19 = vmul.f32 %v20448_v29, %v20448_v29 }
 0xb50   :  { %v8990_v51 = vadd.f32 %v8989_v62, %v8927_v48  ;;  %22518 = vst [vmem:[#allocation19_spill] sm:$0xff] %v20460_v11  ;;  %v22519_v62 = vld [vmem:[#allocation20_spill] sm:$0xff] }
 0xb52   :  { %v8991_v8 = vadd.f32 %v8990_v51, %v8928_v30  ;;  %v20466_v30 = vsub.f32 %v22519_v62, %v20223_v24 }
 0xb54   :  { %v8992_v31 = vadd.f32 %v8991_v8, %v8929_v35  ;;  %22520 = vst [vmem:[#allocation20_spill] sm:$0xff] %v20466_v30  ;;  %v20472_v35 = vsub.f32 %v22521_v1, %v20223_v24  ;;  %v8933_v8 = vmul.f32 %v20460_v11, %v20460_v11  ;;  %v8934_v62 = vmul.f32 %v20466_v30, %v20466_v30  ;;  %v18101_v30 = vld [vmem:[#allocation9 + $0x50] sm:$0xff]  }
 0xb55   :  { %v20484_v1 = vsub.f32 %v22525_v37, %v20223_v24  ;;  %v22529_v37 = vld [vmem:[#allocation25_spill] sm:$0xff] }
 0xb56   :  { %v8993_v48 = vadd.f32 %v8992_v31, %v8930_v52  ;;  %22522 = vst [vmem:[#allocation21_spill] sm:$0xff] %v20472_v35  ;;  %v22523_v52 = vld [vmem:[#allocation22_spill] sm:$0xff]  ;;  %v8935_v11 = vmul.f32 %v20472_v35, %v20472_v35  ;;  %v20496_v16 = vsub.f32 %v22529_v37, %v20223_v24  ;;  %v22531_v37 = vld [vmem:[#allocation27_spill] sm:$0xff] }
 0xb57   :  { %v20478_v31 = vsub.f32 %v22523_v52, %v20223_v24  ;;  %22526 = vst [vmem:[#allocation23_spill] sm:$0xff] %v20484_v1 }
 0xb58   :  { %v8994_v51 = vadd.f32 %v8993_v48, %v8931_v19  ;;  %v18098_v19 = vld [vmem:[#allocation9 + $0x10] sm:$0xff]   ;;  %v18099_v48 = vld [vmem:[#allocation9 + $0x48] sm:$0xff]  }
 0xb59   :  { %22524 = vst [vmem:[#allocation22_spill] sm:$0xff] %v20478_v31  ;;  %16056 = vmatprep.subr.bf16.mxu1 %v18098_v19  ;;  %15974 = vmatprep.subr.bf16.mxu0 %v18099_v48 }
 0xb5a   :  { %v8995_v7 = vadd.f32 %v8994_v51, %v8932_v58  ;;  %v22527_v51 = vld [vmem:[#allocation24_spill] sm:$0xff]  ;;  %16057 = vmatpush3.bf16.msra.mxu1 %v18098_v19  ;;  %15975 = vmatpush3.bf16.msra.mxu0 %v18099_v48  ;;  %v18102_v48 = vld [vmem:[#allocation9 + $0x20] sm:$0xff]  }
 0xb5b   :  { %v20490_v52 = vsub.f32 %v22527_v51, %v20223_v24  ;;  %15976 = vmatprep.subr.bf16.mxu0 %v18101_v30  ;;  %v22530_v51 = vld [vmem:[#allocation26_spill] sm:$0xff] }
 0xb5c   :  { %v8996_v29 = vadd.f32 %v8995_v7, %v8933_v8  ;;  %v8936_v8 = vmul.f32 %v20478_v31, %v20478_v31  ;;  %v18100_v7 = vld [vmem:[#allocation9 + $0x18] sm:$0xff]   ;;  %v20502_v35 = vsub.f32 %v22530_v51, %v20223_v24  ;;  %v20508_v31 = vsub.f32 %v22531_v37, %v20223_v24  ;;  %v22533_v37 = vld [vmem:[#allocation29_spill] sm:$0xff] }
 0xb5d   :  { %22528 = vst [vmem:[#allocation24_spill] sm:$0xff] %v20490_v52  ;;  %16058 = vmatprep.subr.bf16.mxu1 %v18100_v7  ;;  %v22532_v51 = vld [vmem:[#allocation28_spill] sm:$0xff] }
 0xb5e   :  { %v8997_v58 = vadd.f32 %v8996_v29, %v8934_v62  ;;  %v8937_v29 = vmul.f32 %v20484_v1, %v20484_v1  ;;  %16059 = vmatpush3.bf16.msra.mxu1 %v18100_v7  ;;  %15977 = vmatpush3.bf16.msra.mxu0 %v18101_v30  ;;  %v20514_v1 = vsub.f32 %v22532_v51, %v20223_v24  ;;  %v22534_v51 = vld [vmem:[#allocation30_spill] sm:$0xff] }
 0xb5f   :  { %16060 = vmatprep.subr.bf16.mxu1 %v18102_v48  ;;  %v8940_v7 = vmul.f32 %v20502_v35, %v20502_v35  ;;  %v20526_v2 = vsub.f32 %v22534_v51, %v20223_v24  ;;  %v22536_v51 = vld [vmem:[#allocation32_spill] sm:$0xff] }
 0xb60   :  { %v8998_v17 = vadd.f32 %v8997_v58, %v8935_v11  ;;  %v8938_v11 = vmul.f32 %v20490_v52, %v20490_v52  ;;  %v18103_v58 = vld [vmem:[#allocation9 + $0x58] sm:$0xff]   ;;  %v20520_v52 = vsub.f32 %v22533_v37, %v20223_v24  ;;  %v22535_v37 = vld [vmem:[#allocation31_spill] sm:$0xff]  ;;  %v20538_v42 = vsub.f32 %v22536_v51, %v20223_v24 }
 0xb61   :  { %15978 = vmatprep.subr.bf16.mxu0 %v18103_v58  ;;  %v20532_v22 = vsub.f32 %v22535_v37, %v20223_v24  ;;  %v22537_v37 = vld [vmem:[#allocation33_spill] sm:$0xff] }
 0xb62   :  { %v8999_v62 = vadd.f32 %v8998_v17, %v8936_v8  ;;  %v8939_v8 = vmul.f32 %v20496_v16, %v20496_v16  ;;  %16061 = vmatpush3.bf16.msra.mxu1 %v18102_v48  ;;  %15979 = vmatpush3.bf16.msra.mxu0 %v18103_v58  ;;  %v8942_v48 = vmul.f32 %v20514_v1, %v20514_v1 }
 0xb63   :  { %v20544_v50 = vsub.f32 %v22537_v37, %v20223_v24  ;;  %v8946_v51 = vmul.f32 %v20538_v42, %v20538_v42  ;;  %v22538_v24 = vmov 0  }
 0xb64   :  { %v9000_v19 = vadd.f32 %v8999_v62, %v8937_v29  ;;  %v18104_v29 = vld [vmem:[#allocation9 + $0x28] sm:$0xff]   ;;  %v18105_v62 = vld [vmem:[#allocation9 + $0x60] sm:$0xff]  }
 0xb65   :  { %16062 = vmatprep.subr.bf16.mxu1 %v18104_v29  ;;  %15980 = vmatprep.subr.bf16.mxu0 %v18105_v62 }
 0xb66   :  { %v9001_v17 = vadd.f32 %v9000_v19, %v8938_v11  ;;  %v8941_v11 = vmul.f32 %v20508_v31, %v20508_v31  ;;  %16063 = vmatpush3.bf16.msra.mxu1 %v18104_v29  ;;  %15981 = vmatpush3.bf16.msra.mxu0 %v18105_v62  ;;  %v8944_v29 = vmul.f32 %v20526_v2, %v20526_v2 }
 0xb68   :  { %v9002_v30 = vadd.f32 %v9001_v17, %v8939_v8  ;;  %v18106_v8 = vld [vmem:[#allocation9 + $0x30] sm:$0xff]   ;;  %v18107_v17 = vld [vmem:[#allocation9 + $0x68] sm:$0xff]  }
 0xb69   :  { %16064 = vmatprep.subr.bf16.mxu1 %v18106_v8  ;;  %15982 = vmatprep.subr.bf16.mxu0 %v18107_v17 }
 0xb6a   :  { %v9003_v19 = vadd.f32 %v9002_v30, %v8940_v7  ;;  %v8943_v7 = vmul.f32 %v20520_v52, %v20520_v52  ;;  %16065 = vmatpush3.bf16.msra.mxu1 %v18106_v8  ;;  %15983 = vmatpush3.bf16.msra.mxu0 %v18107_v17  ;;  %v18111_v8 = vld [vmem:[#allocation9 + $0x78] sm:$0xff]   ;;  %v8947_v17 = vmul.f32 %v20544_v50, %v20544_v50 }
 0xb6c   :  { %v9004_v58 = vadd.f32 %v9003_v19, %v8941_v11  ;;  %v18108_v11 = vld [vmem:[#allocation9 + $0x38] sm:$0xff]   ;;  %v18109_v19 = vld [vmem:[#allocation9 + $0x70] sm:$0xff]  }
 0xb6d   :  { %16066 = vmatprep.subr.bf16.mxu1 %v18108_v11  ;;  %15984 = vmatprep.subr.bf16.mxu0 %v18109_v19 }
 0xb6e   :  { %v9005_v30 = vadd.f32 %v9004_v58, %v8942_v48  ;;  %v8945_v48 = vmul.f32 %v20532_v22, %v20532_v22  ;;  %16067 = vmatpush3.bf16.msra.mxu1 %v18108_v11  ;;  %15985 = vmatpush3.bf16.msra.mxu0 %v18109_v19  ;;  %v8950_v11 = vmul.f32 %v20232_v0, %v20232_v0 }
 0xb6f   :  { %15986 = vmatprep.subr.bf16.mxu0 %v18111_v8 }
 0xb70   :  { %v9006_v62 = vadd.f32 %v9005_v30, %v8943_v7  ;;  %v8948_v30 = vmul.f32 %v20226_v39, %v20226_v39 }
 0xb71   :  { %16069 = vmatmul.mubr.bf16.vlgmr.msra.gmra.mrb[24].mxu1 %v22538_v24  ;;  %v18112_v24 = vld [vmem:[#allocation9 + $0x88] sm:$0xff]  }
 0xb72   :  { %v9007_v58 = vadd.f32 %v9006_v62, %v8944_v29  ;;  %15987 = vmatpush3.bf16.msra.mxu0 %v18111_v8  ;;  %v8949_v62 = vmul.f32 %v20229_v3, %v20229_v3  ;;  %v8952_v8 = vmul.f32 %v20238_v44, %v20238_v44 }
 0xb74   :  { %v9008_v59 = vadd.f32 %v9007_v58, %v8945_v48  ;;  %v22539_v48 = vld [vmem:[#allocation13_spill] sm:$0xff] }
 0xb75   :  { %15989 = vmatmul.mubr.bf16.vlgmr.msra.gmra.mrb[76].mxu0 %v22539_v48  ;;  %v18110_v58 = vld [vmem:[#allocation9 + $0x80] sm:$0xff]  }
 0xb76   :  { %v9009_v7 = vadd.f32 %v9008_v59, %v8946_v51  ;;  %v8951_v59 = vmul.f32 %v20235_v63, %v20235_v63  ;;  %16132 = vmatprep.subr.bf16.mxu1 %v18110_v58 }
 0xb77   :  { %16133 = vmatpush3.bf16.msra.mxu1 %v18110_v58  ;;  %v8957_v58 = vmul.f32 %v20253_v26, %v20253_v26 }
 0xb78   :  { %v9010_v29 = vadd.f32 %v9009_v7, %v8947_v17  ;;  %v8953_v7 = vmul.f32 %v20241_v25, %v20241_v25  ;;  %16134 = vmatprep.subr.bf16.mxu1 %v18112_v24 }
 0xb7a   :  { %v9011_v37 = vadd.f32 %v9010_v29, %v8948_v30  ;;  %v8954_v29 = vmul.f32 %v20244_v60, %v20244_v60 }
 0xb7b   :  { %16135 = vmatpush3.bf16.msra.mxu1 %v18112_v24 }
 0xb7c   :  { %v9012_v19 = vadd.f32 %v9011_v37, %v8949_v62  ;;  %v8955_v62 = vmul.f32 %v20247_v61, %v20247_v61 }
 0xb7e   :  { %v9013_v51 = vadd.f32 %v9012_v19, %v8950_v11  ;;  %v8956_v11 = vmul.f32 %v20250_v18, %v20250_v18 }
 0xb80   :  { %v9014_v17 = vadd.f32 %v9013_v51, %v8951_v59  ;;  %v8958_v51 = vmul.f32 %v20256_v38, %v20256_v38 }
 0xb82   :  { %v9015_v30 = vadd.f32 %v9014_v17, %v8952_v8  ;;  %v8959_v17 = vmul.f32 %v20259_v14, %v20259_v14 }
 0xb84   :  { %v9016_v48 = vadd.f32 %v9015_v30, %v8953_v7 }
 0xb86   :  { %v9017_v37 = vadd.f32 %v9016_v48, %v8954_v29  ;;  %v8960_v48 = vmul.f32 %v20262_v20, %v20262_v20  ;;  %v8961_v29 = vmul.f32 %v20265_v13, %v20265_v13 }
 0xb88   :  { %v9018_v19 = vadd.f32 %v9017_v37, %v8955_v62  ;;  %v8962_v37 = vmul.f32 %v20268_v57, %v20268_v57 }
 0xb8a   :  { %v9019_v59 = vadd.f32 %v9018_v19, %v8956_v11  ;;  %v8963_v11 = vmul.f32 %v20271_v43, %v20271_v43 }
 0xb8c   :  { %v9020_v8 = vadd.f32 %v9019_v59, %v8957_v58  ;;  %v18113_v58 = vld [vmem:[#allocation9 + $0x90] sm:$0xff]   ;;  %v8964_v59 = vmul.f32 %v20274_v12, %v20274_v12 }
 0xb8d   :  { %16136 = vmatprep.subr.bf16.mxu1 %v18113_v58 }
 0xb8e   :  { %v9021_v7 = vadd.f32 %v9020_v8, %v8958_v51  ;;  %v8965_v8 = vmul.f32 %v20277_v36, %v20277_v36  ;;  %16137 = vmatpush3.bf16.msra.mxu1 %v18113_v58  ;;  %v8767_v58 = vld [vmem:[%s22343_s13] sm:$0x1] }
 0xb90   :  { %v9022_v30 = vadd.f32 %v9021_v7, %v8959_v17  ;;  %v8966_v7 = vmul.f32 %v20280_v6, %v20280_v6 }
 0xb92   :  { %v9023_v62 = vadd.f32 %v9022_v30, %v8960_v48 }
 0xb94   :  { %v9024_v24 = vadd.f32 %v9023_v62, %v8961_v29 }
 0xb96   :  { %v9025_v19 = vadd.f32 %v9024_v24, %v8962_v37  ;;  %v18114_v24 = vld [vmem:[#allocation9 + $0x98] sm:$0xff]  }
 0xb97   :  { %16138 = vmatprep.subr.bf16.mxu1 %v18114_v24 }
 0xb98   :  { %v9026_v51 = vadd.f32 %v9025_v19, %v8963_v11  ;;  %16139 = vmatpush3.bf16.msra.mxu1 %v18114_v24  ;;  %v18117_v24 = vld [vmem:[#allocation9 + $0xb0] sm:$0xff]  }
 0xb99   :  { %16140 = vmatprep.subr.bf16.mxu1 %v18115_v15 }
 0xb9a   :  { %v9027_v17 = vadd.f32 %v9026_v51, %v8964_v59 }
 0xb9c   :  { %v9028_v48 = vadd.f32 %v9027_v17, %v8965_v8  ;;  %16141 = vmatpush3.bf16.msra.mxu1 %v18115_v15  ;;  %v22540_v8 = vld [vmem:[#allocation14_spill] sm:$0xff] }
 0xb9e   :  { %v9029_v30 = vadd.f32 %v9028_v48, %v8966_v7  ;;  %v18116_v7 = vld [vmem:[#allocation9 + $0xa8] sm:$0xff]  }
 0xb9f   :  { %16142 = vmatprep.subr.bf16.mxu1 %v18116_v7 }
 0xba0   :  { %v9030_v29 = vrot.slane %v9029_v30, 4  ;;  %16143 = vmatpush3.bf16.msra.mxu1 %v18116_v7 }
 0xba1   :  { %16144 = vmatprep.subr.bf16.mxu1 %v18117_v24 }
 0xba2   :  { %v9031_v62 = vadd.f32 %v9030_v29, %v9029_v30 }
 0xba4   :  { %v9032_v9 = vrot.slane %v9031_v62, 2  ;;  %16145 = vmatpush3.bf16.msra.mxu1 %v18117_v24 }
 0xba6   :  { %v9033_v37 = vadd.f32 %v9032_v9, %v9031_v62 }
 0xba8   :  { %v9034_v10 = vrot.slane %v9033_v37, 1 }
 0xbaa   :  { %v9035_v45 = vadd.f32 %v9034_v10, %v9033_v37  ;;  %v20601_v10 = vld [vmem:[%s22344_s14] ss:$0 sm:$0xff] }
 0xbac   :  { %v9036_v11 = vmul.f32 0.001953125, %v9035_v45 }
 0xbae   :  { %v9037_v19 = vadd.f32 0.8, %v9036_v11 }
 0xbb0   :  { %18171 = vrsqrt.f32 %v9037_v19 }
 0xbba   :  { %v18172_v59 = vpop.eup %18171 }
 0xbbb   :  { %v9039_v51 = vmul.f32 %v18172_v59, %v8767_v58 }
 0xbbd   :  { %v20596_v17 = vrot.slane %v9039_v51, %v22540_v8 }
 0xbbf   :  { %v9107_v45 = vmul.f32 %v20596_v17, %v20274_v12  ;;  %v9082_v15 = vmul.f32 %v20596_v17, %v20496_v16  ;;  %v9083_v48 = vmul.f32 %v20596_v17, %v20502_v35  ;;  %v9084_v30 = vmul.f32 %v20596_v17, %v20508_v31 }
 0xbc0   :  { %v9085_v29 = vmul.f32 %v20596_v17, %v20514_v1  ;;  %v9086_v12 = vmul.f32 %v20596_v17, %v20520_v52  ;;  %v9087_v62 = vmul.f32 %v20596_v17, %v20526_v2  ;;  %v9088_v37 = vmul.f32 %v20596_v17, %v20532_v22 }
 0xbc1   :  { %v20606_v9 = vadd.f32 %v20601_v10, %v9107_v45  ;;  %v9089_v16 = vmul.f32 %v20596_v17, %v20538_v42  ;;  %v9090_v35 = vmul.f32 %v20596_v17, %v20544_v50  ;;  %v9091_v31 = vmul.f32 %v20596_v17, %v20226_v39 }
 0xbc2   :  { %v9092_v1 = vmul.f32 %v20596_v17, %v20229_v3  ;;  %v9093_v52 = vmul.f32 %v20596_v17, %v20232_v0  ;;  %v9094_v2 = vmul.f32 %v20596_v17, %v20235_v63  ;;  %v9095_v22 = vmul.f32 %v20596_v17, %v20238_v44 }
 0xbc3   :  { %v9096_v42 = vmul.f32 %v20596_v17, %v20241_v25  ;;  %v9097_v50 = vmul.f32 %v20596_v17, %v20244_v60  ;;  %v9098_v39 = vmul.f32 %v20596_v17, %v20247_v61  ;;  %v9099_v3 = vmul.f32 %v20596_v17, %v20250_v18 }
 0xbc4   :  { %v9100_v0 = vmul.f32 %v20596_v17, %v20253_v26  ;;  %v9101_v63 = vmul.f32 %v20596_v17, %v20256_v38  ;;  %v9102_v44 = vmul.f32 %v20596_v17, %v20259_v14  ;;  %v9103_v25 = vmul.f32 %v20596_v17, %v20262_v20 }
 0xbc5   :  { %v9104_v60 = vmul.f32 %v20596_v17, %v20265_v13  ;;  %v9105_v61 = vmul.f32 %v20596_v17, %v20268_v57  ;;  %v9106_v18 = vmul.f32 %v20596_v17, %v20271_v43  ;;  %v9108_v26 = vmul.f32 %v20596_v17, %v20277_v36 }
 0xbc6   :  { %v9109_v38 = vmul.f32 %v20596_v17, %v20280_v6  ;;  %v20663_v14 = vadd.f32 %v20601_v10, %v9082_v15  ;;  %v20666_v20 = vadd.f32 %v20601_v10, %v9083_v48  ;;  %v20669_v13 = vadd.f32 %v20601_v10, %v9084_v30 }
 0xbc7   :  { %v20672_v57 = vadd.f32 %v20601_v10, %v9085_v29  ;;  %v20675_v43 = vadd.f32 %v20601_v10, %v9086_v12  ;;  %v20678_v36 = vadd.f32 %v20601_v10, %v9087_v62  ;;  %v20681_v6 = vadd.f32 %v20601_v10, %v9088_v37 }
 0xbc8   :  { %v20684_v11 = vadd.f32 %v20601_v10, %v9089_v16  ;;  %v20687_v19 = vadd.f32 %v20601_v10, %v9090_v35  ;;  %v20690_v58 = vadd.f32 %v20601_v10, %v9091_v31  ;;  %v20693_v59 = vadd.f32 %v20601_v10, %v9092_v1 }
 0xbc9   :  { %v20696_v51 = vadd.f32 %v20601_v10, %v9093_v52  ;;  %v20699_v8 = vadd.f32 %v20601_v10, %v9094_v2  ;;  %v20702_v45 = vadd.f32 %v20601_v10, %v9095_v22  ;;  %v20705_v7 = vadd.f32 %v20601_v10, %v9096_v42 }
 0xbca   :  { %v20708_v15 = vadd.f32 %v20601_v10, %v9097_v50  ;;  %v20711_v48 = vadd.f32 %v20601_v10, %v9098_v39  ;;  %v20714_v30 = vadd.f32 %v20601_v10, %v9099_v3  ;;  %v20717_v29 = vadd.f32 %v20601_v10, %v9100_v0 }
 0xbcb   :  { %v20720_v12 = vadd.f32 %v20601_v10, %v9101_v63  ;;  %v20723_v62 = vadd.f32 %v20601_v10, %v9102_v44  ;;  %v20726_v37 = vadd.f32 %v20601_v10, %v9103_v25  ;;  %v20729_v16 = vadd.f32 %v20601_v10, %v9104_v60  ;;  %v18118_v63 = vld [vmem:[#allocation9 + $0xb8] sm:$0xff]  }
 0xbcc   :  { %v20732_v35 = vadd.f32 %v20601_v10, %v9105_v61  ;;  %v20735_v31 = vadd.f32 %v20601_v10, %v9106_v18  ;;  %v20738_v1 = vadd.f32 %v20601_v10, %v9108_v26  ;;  %v20741_v52 = vadd.f32 %v20601_v10, %v9109_v38  ;;  %16146 = vmatprep.subr.bf16.mxu1 %v18118_v63 }
 0xbcd   :  { %v9046_v2 = vmul.f32 %v20596_v17, %v20284_v32  ;;  %v9047_v22 = vmul.f32 %v20596_v17, %v20288_v21  ;;  %v9048_v42 = vmul.f32 %v20596_v17, %v20292_v40  ;;  %v9049_v50 = vmul.f32 %v20596_v17, %v20300_v46  ;;  %16147 = vmatpush3.bf16.msra.mxu1 %v18118_v63 }
 0xbce   :  { %v9050_v39 = vmul.f32 %v20596_v17, %v20304_v5  ;;  %v9051_v3 = vmul.f32 %v20596_v17, %v20310_v47  ;;  %v9052_v0 = vmul.f32 %v20596_v17, %v20316_v28  ;;  %v9053_v32 = vmul.f32 %v20596_v17, %v20322_v4 }
 0xbcf   :  { %v9054_v21 = vmul.f32 %v20596_v17, %v20328_v33  ;;  %v9055_v40 = vmul.f32 %v20596_v17, %v20334_v27  ;;  %v9056_v46 = vmul.f32 %v20596_v17, %v20340_v49  ;;  %v9057_v5 = vmul.f32 %v20596_v17, %v20346_v54 }
 0xbd0   :  { %v20768_v47 = vadd.f32 %v20601_v10, %v9046_v2  ;;  %v20771_v28 = vadd.f32 %v20601_v10, %v9047_v22  ;;  %v20774_v4 = vadd.f32 %v20601_v10, %v9048_v42  ;;  %v20777_v33 = vadd.f32 %v20601_v10, %v9049_v50 }
 0xbd1   :  { %v9120_v27 = vadd.f32 %v20601_v10, %v9050_v39  ;;  %v9121_v49 = vadd.f32 %v20601_v10, %v9051_v3  ;;  %v9122_v54 = vadd.f32 %v20601_v10, %v9052_v0  ;;  %v9123_v44 = vadd.f32 %v20601_v10, %v9053_v32 }
 0xbd2   :  { %v9216_v25 = vmax.f32 %v20663_v14, 0.0  ;;  %v9217_v60 = vmax.f32 %v20666_v20, 0.0  ;;  %v9218_v61 = vmax.f32 %v20669_v13, 0.0  ;;  %v9219_v18 = vmax.f32 %v20672_v57, 0.0 }
 0xbd3   :  { %v9220_v24 = vmax.f32 %v20675_v43, 0.0  ;;  %v9221_v26 = vmax.f32 %v20678_v36, 0.0  ;;  %v9222_v38 = vmax.f32 %v20681_v6, 0.0  ;;  %v9223_v2 = vmax.f32 %v20684_v11, 0.0 }
 0xbd4   :  { %v9224_v22 = vmax.f32 %v20687_v19, 0.0  ;;  %v9225_v42 = vmax.f32 %v20690_v58, 0.0  ;;  %v9226_v14 = vmax.f32 %v20693_v59, 0.0  ;;  %v9227_v20 = vmax.f32 %v20696_v51, 0.0 }
 0xbd5   :  { %v9228_v13 = vmax.f32 %v20699_v8, 0.0  ;;  %v9229_v57 = vmax.f32 %v20702_v45, 0.0  ;;  %v9230_v43 = vmax.f32 %v20705_v7, 0.0  ;;  %v9231_v36 = vmax.f32 %v20708_v15, 0.0 }
 0xbd6   :  { %v9232_v6 = vmax.f32 %v20711_v48, 0.0  ;;  %v9233_v11 = vmax.f32 %v20714_v30, 0.0  ;;  %v9234_v19 = vmax.f32 %v20717_v29, 0.0  ;;  %v9235_v58 = vmax.f32 %v20720_v12, 0.0 }
 0xbd7   :  { %v9236_v59 = vmax.f32 %v20723_v62, 0.0  ;;  %v9237_v51 = vmax.f32 %v20726_v37, 0.0  ;;  %v9238_v8 = vmax.f32 %v20729_v16, 0.0  ;;  %v9239_v45 = vmax.f32 %v20732_v35, 0.0 }
 0xbd8   :  { %v9184_v50 = vmax.f32 %v9120_v27, 0.0  ;;  %v9185_v7 = vmax.f32 %v9121_v49, 0.0  ;;  %v9186_v39 = vmax.f32 %v9122_v54, 0.0  ;;  %v9187_v15 = vmax.f32 %v9123_v44, 0.0  ;;  %v20833_v44 = vld [vmem:[#allocation9 + $0xc0] sm:$0xff]  }
 0xbd9   :  { %v20807_v3 = vpack.c.bf16 %v9217_v60, %v9216_v25  ;;  %v20809_v48 = vpack.c.bf16 %v9219_v18, %v9218_v61  ;;  %v20811_v30 = vpack.c.bf16 %v9221_v26, %v9220_v24  ;;  %v20813_v29 = vpack.c.bf16 %v9223_v2, %v9222_v38  ;;  %16212 = vmatprep.subr.bf16.mxu1 %v20833_v44 }
 0xbda   :  { %v20815_v12 = vpack.c.bf16 %v9225_v42, %v9224_v22  ;;  %v20817_v62 = vpack.c.bf16 %v9227_v20, %v9226_v14  ;;  %v20819_v37 = vpack.c.bf16 %v9229_v57, %v9228_v13  ;;  %v20821_v16 = vpack.c.bf16 %v9231_v36, %v9230_v43 }
 0xbdb   :  { %v20823_v35 = vpack.c.bf16 %v9233_v11, %v9232_v6  ;;  %v20825_v0 = vpack.c.bf16 %v9235_v58, %v9234_v19  ;;  %v20827_v32 = vpack.c.bf16 %v9237_v51, %v9236_v59  ;;  %v20829_v63 = vpack.c.bf16 %v9239_v45, %v9238_v8  ;;  %v22542_v58 = vld [vmem:[#allocation35_spill] sm:$0xff]  ;;  %v18162_v45 = vld [vmem:[#allocation9 + $0x218] sm:$0xff]  }
 0xbdc   :  { %v9124_v27 = vadd.f32 %v20601_v10, %v9054_v21  ;;  %v9125_v49 = vadd.f32 %v20601_v10, %v9055_v40  ;;  %v9246_v54 = vpack.c.bf16 %v9185_v7, %v9184_v50  ;;  %v9126_v25 = vadd.f32 %v20601_v10, %v9056_v46 }
 0xbdd   :  { %v9127_v60 = vadd.f32 %v20601_v10, %v9057_v5  ;;  %v9247_v61 = vpack.c.bf16 %v9187_v15, %v9186_v39  ;;  %v9058_v18 = vmul.f32 %v20596_v17, %v20352_v56  ;;  %v9059_v24 = vmul.f32 %v20596_v17, %v20358_v23 }
 0xbde   :  { %v9060_v26 = vmul.f32 %v20596_v17, %v20364_v53  ;;  %v9180_v21 = vmax.f32 %v20768_v47, 0.0  ;;  %v9181_v40 = vmax.f32 %v20771_v28, 0.0  ;;  %v9182_v46 = vmax.f32 %v20774_v4, 0.0 }
 0xbdf   :  { %v9183_v5 = vmax.f32 %v20777_v33, 0.0  ;;  %v9061_v38 = vmul.f32 %v20596_v17, %v20370_v34  ;;  %v9188_v56 = vmax.f32 %v9124_v27, 0.0  ;;  %v9189_v2 = vmax.f32 %v9125_v49, 0.0 }
 0xbe0   :  { %v20850_v22 = vrot.slane %v9246_v54, 7  ;;  %v9190_v23 = vmax.f32 %v9126_v25, 0.0  ;;  %v9191_v42 = vmax.f32 %v9127_v60, 0.0  ;;  %v9313_v53 = vrot.slane %v9247_v61, 7 }
 0xbe1   :  { %v9128_v14 = vadd.f32 %v20601_v10, %v9058_v18  ;;  %v9129_v47 = vadd.f32 %v20601_v10, %v9059_v24  ;;  %v9062_v28 = vmul.f32 %v20596_v17, %v20376_v41  ;;  %v9063_v4 = vmul.f32 %v20596_v17, %v20382_v55  ;;  %v22541_v55 = vld [vmem:[#allocation34_spill] sm:$0xff] }
 0xbe2   :  { %v9244_v33 = vpack.c.bf16 %v9181_v40, %v9180_v21  ;;  %v9245_v20 = vpack.c.bf16 %v9183_v5, %v9182_v46  ;;  %v9130_v34 = vadd.f32 %v20601_v10, %v9060_v26  ;;  %v9131_v13 = vadd.f32 %v20601_v10, %v9061_v38 }
 0xbe3   :  { %v9248_v57 = vpack.c.bf16 %v9189_v2, %v9188_v56  ;;  %v20862_v43 = vsel %vm1779_vm7, 0, %v20850_v22  ;;  %v9249_v36 = vpack.c.bf16 %v9191_v42, %v9190_v23  ;;  %v20868_v41 = vsel %vm1779_vm7, %v20850_v22, %v9313_v53 }
 0xbe4   :  { %v20864_v6 = vrot.slane %v9244_v33, 7  ;;  %v9310_v11 = vrot.slane %v9245_v20, 7  ;;  %v9064_v19 = vmul.f32 %v20596_v17, %v22541_v55  ;;  %v9065_v59 = vmul.f32 %v20596_v17, %v22542_v58  ;;  %v22548_v33 = vld [vmem:[#allocation37_spill] sm:$0xff] }
 0xbe5   :  { %v9192_v51 = vmax.f32 %v9128_v14, 0.0  ;;  %v9193_v8 = vmax.f32 %v9129_v47, 0.0  ;;  %v9504_v15 = vrot.slane %v20862_v43, 1  ;;  %v9505_v25 = vrot.slane %v20868_v41, 1 }
 0xbe6   :  { %16072 = vmatprep.mubr.msk.bf16.mxu1 %vm18810_vm9, %v20864_v6  ;;  %v20879_v50 = vsel %vm1779_vm7, %v20864_v6, %v9310_v11  ;;  %v20883_v7 = vsel %vm1779_vm7, 0, %v20864_v6  ;;  %v20886_v39 = vsel %vm1779_vm7, %v9310_v11, 0  ;;  %v9194_v60 = vmax.f32 %v9130_v34, 0.0 }
 0xbe7   :  { %16073 = vmatmul.mubr.bf16.gmra.mrb[28].mxu1 %v20879_v50  ;;  %v9499_v27 = vrot.slane %v20883_v7, 1  ;;  %v9500_v49 = vrot.slane %v20879_v50, 1  ;;  %v9502_v54 = vrot.slane %v20886_v39, 1  ;;  %v9195_v61 = vmax.f32 %v9131_v13, 0.0  ;;  %v22550_v13 = vld [vmem:[#allocation39_spill] sm:$0xff] }
 0xbe8   :  { %v20894_v18 = vrot.slane %v9248_v57, 7  ;;  %v9316_v24 = vrot.slane %v9249_v36, 7  ;;  %16076 = vmatprep.mubr.msk.bf16.mxu1 %vm18810_vm9, %v20850_v22  ;;  %v9132_v40 = vadd.f32 %v20601_v10, %v9062_v28  ;;  %v9133_v46 = vadd.f32 %v20601_v10, %v9063_v4  ;;  %v22547_v28 = vld [vmem:[#allocation36_spill] sm:$0xff] }
 0xbe9   :  { %v20900_v26 = vsel %vm1826_vm8, %v9499_v27, %v9500_v49  ;;  %v20903_v21 = vsel %vm1826_vm8, %v9500_v49, %v9502_v54  ;;  %v9134_v5 = vadd.f32 %v20601_v10, %v9064_v19  ;;  %v9135_v38 = vadd.f32 %v20601_v10, %v9065_v59 }
 0xbea   :  { %22544 = vst [vmem:[#allocation25_spill] sm:$0xff] %v20900_v26  ;;  %22545 = vst [vmem:[#allocation26_spill] sm:$0xff] %v20903_v21  ;;  %15992 = vmatprep.mubr.bf16.mxu0 %v20900_v26  ;;  %v20912_v56 = vsel %vm1826_vm8, %v9504_v15, %v9505_v25  ;;  %v20915_v2 = vsel %vm1779_vm7, %v9313_v53, 0  ;;  %v9250_v23 = vpack.c.bf16 %v9193_v8, %v9192_v51  ;;  %v20924_v47 = vsel %vm1779_vm7, 0, %v20894_v18  ;;  %v22549_v53 = vld [vmem:[#allocation38_spill] sm:$0xff] }
 0xbeb   :  { %15993 = vmatmul.mubr.bf16.gmra.mrb[80].mxu0 %v20903_v21  ;;  %22546 = vst [vmem:[#allocation27_spill] sm:$0xff] %v20912_v56  ;;  %v9251_v42 = vpack.c.bf16 %v9195_v61, %v9194_v60  ;;  %v20920_v14 = vsel %vm1779_vm7, %v20894_v18, %v9316_v24  ;;  %v9066_v4 = vmul.f32 %v20596_v17, %v22547_v28  ;;  %v9507_v36 = vrot.slane %v20915_v2, 1 }
 0xbec   :  { %15996 = vmatprep.mubr.bf16.mxu0 %v20912_v56  ;;  %v9067_v20 = vmul.f32 %v20596_v17, %v22548_v33  ;;  %v9068_v34 = vmul.f32 %v20596_v17, %v22549_v53  ;;  %v9069_v57 = vmul.f32 %v20596_v17, %v22550_v13  ;;  %v9196_v11 = vmax.f32 %v9132_v40, 0.0  ;;  %v22557_v53 = vld [vmem:[#allocation43_spill] sm:$0xff] }
 0xbed   :  { %v9197_v55 = vmax.f32 %v9133_v46, 0.0  ;;  %v9509_v19 = vrot.slane %v20924_v47, 1  ;;  %v9510_v58 = vrot.slane %v20920_v14, 1  ;;  %v9198_v59 = vmax.f32 %v9134_v5, 0.0 }
 0xbee   :  { %v9199_v51 = vmax.f32 %v9135_v38, 0.0  ;;  %v20938_v8 = vrot.slane %v9250_v23, 7  ;;  %v9319_v15 = vrot.slane %v9251_v42, 7  ;;  %v9136_v27 = vadd.f32 %v20601_v10, %v9066_v4  ;;  %v22554_v42 = vld [vmem:[#allocation40_spill] sm:$0xff]  ;;  %v22555_v4 = vld [vmem:[#allocation41_spill] sm:$0xff] }
 0xbef   :  { %16077 = vmatmul.mubr.bf16.gmra.mrb[32].mxu1 %v20868_v41  ;;  %v9137_v49 = vadd.f32 %v20601_v10, %v9067_v20  ;;  %v20946_v54 = vsel %vm1826_vm8, %v9505_v25, %v9507_v36  ;;  %v9138_v60 = vadd.f32 %v20601_v10, %v9068_v34  ;;  %v9139_v61 = vadd.f32 %v20601_v10, %v9069_v57 }
 0xbf0   :  { %22551 = vst [vmem:[#allocation28_spill] sm:$0xff] %v20938_v8  ;;  %16080 = vmatprep.mubr.msk.bf16.mxu1 %vm18810_vm9, %v20894_v18  ;;  %22552 = vst [vmem:[#allocation29_spill] sm:$0xff] %v20946_v54  ;;  %v20952_v40 = vsel %vm1826_vm8, %v9509_v19, %v9510_v58  ;;  %v20955_v46 = vsel %vm1779_vm7, %v9316_v24, 0  ;;  %v9252_v5 = vpack.c.bf16 %v9197_v55, %v9196_v11  ;;  %v20964_v23 = vsel %vm1779_vm7, 0, %v20938_v8  ;;  %v22556_v24 = vld [vmem:[#allocation42_spill] sm:$0xff] }
 0xbf1   :  { %22553 = vst [vmem:[#allocation30_spill] sm:$0xff] %v20952_v40  ;;  %v9253_v38 = vpack.c.bf16 %v9199_v51, %v9198_v59  ;;  %v20960_v25 = vsel %vm1779_vm7, %v20938_v8, %v9319_v15  ;;  %v9070_v28 = vmul.f32 %v20596_v17, %v22554_v42  ;;  %v9071_v33 = vmul.f32 %v20596_v17, %v22555_v4 }
 0xbf2   :  { %v9072_v20 = vmul.f32 %v20596_v17, %v22556_v24  ;;  %v9073_v34 = vmul.f32 %v20596_v17, %v22557_v53  ;;  %v9512_v13 = vrot.slane %v20955_v46, 1  ;;  %v9200_v57 = vmax.f32 %v9136_v27, 0.0 }
 0xbf3   :  { %15997 = vmatmul.mubr.bf16.gmra.mrb[84].mxu0 %v20946_v54  ;;  %v9201_v36 = vmax.f32 %v9137_v49, 0.0  ;;  %v9514_v11 = vrot.slane %v20964_v23, 1  ;;  %v9515_v55 = vrot.slane %v20960_v25, 1  ;;  %v9202_v19 = vmax.f32 %v9138_v60, 0.0 }
 0xbf4   :  { %16000 = vmatprep.mubr.bf16.mxu0 %v20952_v40  ;;  %v9203_v59 = vmax.f32 %v9139_v61, 0.0  ;;  %v20978_v51 = vrot.slane %v9252_v5, 7  ;;  %v9322_v42 = vrot.slane %v9253_v38, 7  ;;  %v9140_v4 = vadd.f32 %v20601_v10, %v9070_v28 }
 0xbf5   :  { %v9141_v27 = vadd.f32 %v20601_v10, %v9071_v33  ;;  %v20986_v49 = vsel %vm1826_vm8, %v9510_v58, %v9512_v13  ;;  %v9142_v24 = vadd.f32 %v20601_v10, %v9072_v20  ;;  %v9143_v53 = vadd.f32 %v20601_v10, %v9073_v34  ;;  %v22561_v33 = vld [vmem:[#allocation17_spill] sm:$0xff]  ;;  %v22562_v34 = vld [vmem:[#allocation18_spill] sm:$0xff] }
 0xbf6   :  { %22558 = vst [vmem:[#allocation31_spill] sm:$0xff] %v20978_v51  ;;  %22559 = vst [vmem:[#allocation32_spill] sm:$0xff] %v20986_v49  ;;  %v20992_v60 = vsel %vm1826_vm8, %v9514_v11, %v9515_v55  ;;  %v20995_v61 = vsel %vm1779_vm7, %v9319_v15, 0  ;;  %v9254_v5 = vpack.c.bf16 %v9201_v36, %v9200_v57  ;;  %v9255_v38 = vpack.c.bf16 %v9203_v59, %v9202_v19  ;;  %v22563_v15 = vld [vmem:[#allocation19_spill] sm:$0xff]  ;;  %v22564_v36 = vld [vmem:[#allocation20_spill] sm:$0xff] }
 0xbf7   :  { %16081 = vmatmul.mubr.bf16.gmra.mrb[36].mxu1 %v20920_v14  ;;  %22560 = vst [vmem:[#allocation33_spill] sm:$0xff] %v20992_v60  ;;  %v21000_v58 = vsel %vm1779_vm7, %v20978_v51, %v9322_v42  ;;  %v21004_v28 = vsel %vm1779_vm7, 0, %v20978_v51  ;;  %v9074_v20 = vmul.f32 %v20596_v17, %v22561_v33  ;;  %v9075_v13 = vmul.f32 %v20596_v17, %v22562_v34 }
 0xbf8   :  { %16084 = vmatprep.mubr.msk.bf16.mxu1 %vm18810_vm9, %v20938_v8  ;;  %v9076_v57 = vmul.f32 %v20596_v17, %v22563_v15  ;;  %v9077_v11 = vmul.f32 %v20596_v17, %v22564_v36  ;;  %v9517_v19 = vrot.slane %v20995_v61, 1  ;;  %v9204_v59 = vmax.f32 %v9140_v4, 0.0 }
 0xbf9   :  { %v9520_v40 = vrot.slane %v21000_v58, 1  ;;  %v9206_v33 = vmax.f32 %v9142_v24, 0.0  ;;  %v9207_v54 = vmax.f32 %v9143_v53, 0.0  ;;  %v21018_v56 = vrot.slane %v9254_v5, 7 }
 0xbfa   :  { %v9325_v34 = vrot.slane %v9255_v38, 7  ;;  %v9144_v15 = vadd.f32 %v20601_v10, %v9074_v20  ;;  %v9145_v4 = vadd.f32 %v20601_v10, %v9075_v13  ;;  %v9146_v36 = vadd.f32 %v20601_v10, %v9076_v57  ;;  %v22567_v13 = vld [vmem:[#allocation21_spill] sm:$0xff] }
 0xbfb   :  { %16001 = vmatmul.mubr.bf16.gmra.mrb[88].mxu0 %v20986_v49  ;;  %v9519_v49 = vrot.slane %v21004_v28, 1  ;;  %v9147_v21 = vadd.f32 %v20601_v10, %v9077_v11  ;;  %v21035_v53 = vsel %vm1779_vm7, %v9322_v42, 0  ;;  %v9257_v38 = vpack.c.bf16 %v9207_v54, %v9206_v33  ;;  %v22569_v42 = vld [vmem:[#allocation23_spill] sm:$0xff]  ;;  %v22570_v54 = vld [vmem:[#allocation24_spill] sm:$0xff] }
 0xbfc   :  { %16004 = vmatprep.mubr.bf16.mxu0 %v20992_v60  ;;  %v9205_v60 = vmax.f32 %v9141_v27, 0.0  ;;  %v21026_v27 = vsel %vm1826_vm8, %v9515_v55, %v9517_v19  ;;  %v21040_v55 = vsel %vm1779_vm7, %v21018_v56, %v9325_v34  ;;  %v21044_v20 = vsel %vm1779_vm7, 0, %v21018_v56 }
 0xbfd   :  { %22565 = vst [vmem:[#allocation14_spill] sm:$0xff] %v21026_v27  ;;  %v21032_v24 = vsel %vm1826_vm8, %v9519_v49, %v9520_v40  ;;  %v9078_v57 = vmul.f32 %v20596_v17, %v22567_v13  ;;  %v22568_v49 = vld [vmem:[#allocation22_spill] sm:$0xff]  ;;  %v9081_v19 = vmul.f32 %v20596_v17, %v22570_v54  ;;  %v9208_v33 = vmax.f32 %v9144_v15, 0.0 }
 0xbfe   :  { %22566 = vst [vmem:[#allocation34_spill] sm:$0xff] %v21032_v24  ;;  %v9256_v5 = vpack.c.bf16 %v9205_v60, %v9204_v59  ;;  %v9079_v11 = vmul.f32 %v20596_v17, %v22568_v49  ;;  %v9080_v60 = vmul.f32 %v20596_v17, %v22569_v42  ;;  %v9522_v59 = vrot.slane %v21035_v53, 1 }
 0xbff   :  { %16085 = vmatmul.mubr.bf16.gmra.mrb[40].mxu1 %v20960_v25  ;;  %v9525_v26 = vrot.slane %v21040_v55, 1  ;;  %v9210_v13 = vmax.f32 %v9146_v36, 0.0  ;;  %v9328_v49 = vrot.slane %v9257_v38, 7  ;;  %v9148_v17 = vadd.f32 %v20601_v10, %v9078_v57 }
 0xc00   :  { %16088 = vmatprep.mubr.msk.bf16.mxu1 %vm18810_vm9, %v20978_v51  ;;  %v9211_v51 = vmax.f32 %v9147_v21, 0.0  ;;  %v21058_v8 = vrot.slane %v9256_v5, 7  ;;  %v9149_v15 = vadd.f32 %v20601_v10, %v9079_v11  ;;  %v9150_v42 = vadd.f32 %v20601_v10, %v9080_v60 }
 0xc01   :  { %v9151_v54 = vadd.f32 %v20601_v10, %v9081_v19  ;;  %v21075_v36 = vsel %vm1779_vm7, %v9325_v34, 0  ;;  %v9241_v10 = vmax.f32 %v20606_v9, 0.0  ;;  %v9212_v11 = vmax.f32 %v9148_v17, 0.0 }
 0xc02   :  { %v9259_v38 = vpack.c.bf16 %v9211_v51, %v9210_v13  ;;  %v21084_v57 = vsel %vm1779_vm7, 0, %v21058_v8  ;;  %v9240_v60 = vmax.f32 %v20735_v31, 0.0  ;;  %v9527_v34 = vrot.slane %v21075_v36, 1 }
 0xc03   :  { %16005 = vmatmul.mubr.bf16.gmra.mrb[92].mxu0 %v21026_v27  ;;  %v9524_v27 = vrot.slane %v21044_v20, 1  ;;  %v9242_v51 = vmax.f32 %v20738_v1, 0.0  ;;  %v9529_v19 = vrot.slane %v21084_v57, 1  ;;  %v9215_v13 = vmax.f32 %v9151_v54, 0.0 }
 0xc04   :  { %16008 = vmatprep.mubr.bf16.mxu0 %v21032_v24  ;;  %v9209_v24 = vmax.f32 %v9145_v4, 0.0  ;;  %v21066_v4 = vsel %vm1826_vm8, %v9520_v40, %v9522_v59  ;;  %v21080_v40 = vsel %vm1779_vm7, %v21058_v8, %v9328_v49  ;;  %v9331_v9 = vrot.slane %v9259_v38, 7 }
 0xc05   :  { %22571 = vst [vmem:[#allocation35_spill] sm:$0xff] %v21066_v4  ;;  %v21072_v21 = vsel %vm1826_vm8, %v9524_v27, %v9525_v26  ;;  %v9213_v27 = vmax.f32 %v9149_v15, 0.0  ;;  %v9530_v59 = vrot.slane %v21080_v40, 1  ;;  %v21100_v31 = vsel %vm1826_vm8, %v9525_v26, %v9527_v34 }
 0xc06   :  { %22572 = vst [vmem:[#allocation15_spill] sm:$0xff] %v21072_v21  ;;  %v9258_v5 = vpack.c.bf16 %v9209_v24, %v9208_v33  ;;  %v9243_v24 = vmax.f32 %v20741_v52, 0.0  ;;  %v9214_v33 = vmax.f32 %v9150_v42, 0.0  ;;  %22573 = vst [vmem:[#allocation36_spill] sm:$0xff] %v21100_v31  ;;  %v21102_v1 = vpack.c.bf16 %v9241_v10, %v9240_v60 }
 0xc07   :  { %16089 = vmatmul.mubr.bf16.gmra.mrb[44].mxu1 %v21000_v58  ;;  %v21106_v52 = vsel %vm1826_vm8, %v9529_v19, %v9530_v59  ;;  %v21109_v17 = vsel %vm1779_vm7, %v9328_v49, 0  ;;  %v9260_v42 = vpack.c.bf16 %v9213_v27, %v9212_v11 }
 0xc08   :  { %16092 = vmatprep.mubr.msk.bf16.mxu1 %vm18810_vm9, %v21018_v56  ;;  %22574 = vst [vmem:[#allocation37_spill] sm:$0xff] %v21102_v1  ;;  %22575 = vst [vmem:[#allocation38_spill] sm:$0xff] %v21106_v52  ;;  %v21111_v15 = vpack.c.bf16 %v9243_v24, %v9242_v51  ;;  %v9261_v54 = vpack.c.bf16 %v9215_v13, %v9214_v33  ;;  %v9532_v38 = vrot.slane %v21109_v17, 1  ;;  %v21139_v51 = vsel %vm1779_vm7, %v9331_v9, 0 }
 0xc09   :  { %v21126_v11 = vrot.slane %v9260_v42, 7  ;;  %v9337_v42 = vrot.slane %v20809_v48, 7 }
 0xc0a   :  { %22576 = vst [vmem:[#allocation39_spill] sm:$0xff] %v21111_v15  ;;  %v9334_v27 = vrot.slane %v9261_v54, 7  ;;  %v21132_v60 = vsel %vm1826_vm8, %v9530_v59, %v9532_v38  ;;  %v9537_v59 = vrot.slane %v21139_v51, 1 }
 0xc0b   :  { %16009 = vmatmul.mubr.bf16.gmra.mrb[96].mxu0 %v21066_v4  ;;  %22577 = vst [vmem:[#allocation40_spill] sm:$0xff] %v21132_v60  ;;  %v21148_v19 = vsel %vm1779_vm7, 0, %v21126_v11 }
 0xc0c   :  { %16012 = vmatprep.mubr.bf16.mxu0 %v21072_v21  ;;  %v21094_v21 = vrot.slane %v9258_v5, 7  ;;  %v21144_v24 = vsel %vm1779_vm7, %v21126_v11, %v9334_v27  ;;  %v9539_v33 = vrot.slane %v21148_v19, 1 }
 0xc0d   :  { %v9540_v13 = vrot.slane %v21144_v24, 1 }
 0xc0e   :  { %v21116_v26 = vsel %vm1779_vm7, %v21094_v21, %v9331_v9  ;;  %v21120_v5 = vsel %vm1779_vm7, 0, %v21094_v21  ;;  %v21155_v9 = vrot.slane %v20807_v3, 7 }
 0xc0f   :  { %16093 = vmatmul.mubr.bf16.gmra.mrb[48].mxu1 %v21040_v55  ;;  %v9534_v49 = vrot.slane %v21120_v5, 1  ;;  %v9535_v10 = vrot.slane %v21116_v26, 1  ;;  %v21166_v38 = vsel %vm1826_vm8, %v9539_v33, %v9540_v13 }
 0xc10   :  { %16096 = vmatprep.mubr.msk.bf16.mxu1 %vm18810_vm9, %v21058_v8  ;;  %22579 = vst [vmem:[#allocation42_spill] sm:$0xff] %v21155_v9  ;;  %22581 = vst [vmem:[#allocation17_spill] sm:$0xff] %v21166_v38  ;;  %v21174_v3 = vsel %vm1779_vm7, %v21155_v9, %v9337_v42  ;;  %v21178_v48 = vsel %vm1779_vm7, 0, %v21155_v9 }
 0xc11   :  { %v21136_v34 = vsel %vm1826_vm8, %v9534_v49, %v9535_v10  ;;  %v21162_v54 = vsel %vm1826_vm8, %v9535_v10, %v9537_v59  ;;  %v21169_v49 = vsel %vm1779_vm7, %v9334_v27, 0  ;;  %v9544_v59 = vrot.slane %v21178_v48, 1 }
 0xc12   :  { %22578 = vst [vmem:[#allocation41_spill] sm:$0xff] %v21136_v34  ;;  %22580 = vst [vmem:[#allocation43_spill] sm:$0xff] %v21162_v54  ;;  %v9542_v10 = vrot.slane %v21169_v49, 1  ;;  %v9545_v33 = vrot.slane %v21174_v3, 1  ;;  %v21185_v27 = vrot.slane %v20811_v30, 7 }
 0xc13   :  { %16013 = vmatmul.mubr.bf16.gmra.mrb[100].mxu0 %v21100_v31 }
 0xc14   :  { %16016 = vmatprep.mubr.bf16.mxu0 %v21106_v52  ;;  %22582 = vst [vmem:[#allocation18_spill] sm:$0xff] %v21185_v27 }
 0xc17   :  { %16097 = vmatmul.mubr.bf16.gmra.mrb[52].mxu1 %v21080_v40 }
 0xc18   :  { %16100 = vmatprep.mubr.msk.bf16.mxu1 %vm18810_vm9, %v21094_v21 }
 0xc1b   :  { %16017 = vmatmul.mubr.bf16.gmra.mrb[104].mxu0 %v21132_v60  ;;  %v21199_v60 = vsel %vm1779_vm7, %v9337_v42, 0  ;;  %v21215_v42 = vrot.slane %v20815_v12, 7 }
 0xc1c   :  { %16020 = vmatprep.mubr.bf16.mxu0 %v21136_v34  ;;  %v21196_v34 = vsel %vm1826_vm8, %v9544_v59, %v9545_v33 }
 0xc1d   :  { %22584 = vst [vmem:[#allocation20_spill] sm:$0xff] %v21196_v34  ;;  %22586 = vst [vmem:[#allocation22_spill] sm:$0xff] %v21215_v42 }
 0xc1f   :  { %16101 = vmatmul.mubr.bf16.gmra.mrb[56].mxu1 %v21116_v26 }
 0xc20   :  { %16104 = vmatprep.mubr.msk.bf16.mxu1 %vm18810_vm9, %v21126_v11 }
 0xc23   :  { %16021 = vmatmul.mubr.bf16.gmra.mrb[108].mxu0 %v21162_v54  ;;  %v21192_v54 = vsel %vm1826_vm8, %v9540_v13, %v9542_v10  ;;  %v9547_v13 = vrot.slane %v21199_v60, 1 }
 0xc24   :  { %16024 = vmatprep.mubr.bf16.mxu0 %v21166_v38  ;;  %v9340_v38 = vrot.slane %v20813_v29, 7  ;;  %22583 = vst [vmem:[#allocation19_spill] sm:$0xff] %v21192_v54  ;;  %v21208_v29 = vsel %vm1779_vm7, 0, %v21185_v27 }
 0xc25   :  { %v9549_v10 = vrot.slane %v21208_v29, 1 }
 0xc26   :  { %v21204_v30 = vsel %vm1779_vm7, %v21185_v27, %v9340_v38  ;;  %v21229_v31 = vsel %vm1779_vm7, %v9340_v38, 0  ;;  %v21245_v38 = vrot.slane %v20819_v37, 7 }
 0xc27   :  { %16105 = vmatmul.mubr.bf16.gmra.mrb[60].mxu1 %v21144_v24  ;;  %22585 = vst [vmem:[#allocation21_spill] sm:$0xff] %v21204_v30  ;;  %v9550_v59 = vrot.slane %v21204_v30, 1 }
 0xc28   :  { %16108 = vmatprep.mubr.msk.bf16.mxu1 %vm18810_vm9, %v21155_v9  ;;  %22590 = vst [vmem:[#allocation45_spill] sm:$0xff] %v21245_v38  ;;  %v22608_v9 = vld [vmem:[#allocation16_spill] sm:$0xff] }
 0xc29   :  { %v21226_v52 = vsel %vm1826_vm8, %v9549_v10, %v9550_v59 }
 0xc2a   :  { %22588 = vst [vmem:[#allocation24_spill] sm:$0xff] %v21226_v52 }
 0xc2b   :  { %16025 = vmatmul.mubr.bf16.gmra.mrb[112].mxu0 %v21192_v54  ;;  %v21222_v54 = vsel %vm1826_vm8, %v9545_v33, %v9547_v13  ;;  %v9552_v33 = vrot.slane %v21229_v31, 1 }
 0xc2c   :  { %16028 = vmatprep.mubr.bf16.mxu0 %v21196_v34  ;;  %v9343_v34 = vrot.slane %v20817_v62, 7  ;;  %22587 = vst [vmem:[#allocation23_spill] sm:$0xff] %v21222_v54  ;;  %v21238_v62 = vsel %vm1779_vm7, 0, %v21215_v42 }
 0xc2d   :  { %v9554_v13 = vrot.slane %v21238_v62, 1  ;;  %v21256_v15 = vsel %vm1826_vm8, %v9550_v59, %v9552_v33  ;;  %v21276_v59 = vsel %vm1779_vm7, 0, %v21245_v38 }
 0xc2e   :  { %v21234_v12 = vsel %vm1779_vm7, %v21215_v42, %v9343_v34  ;;  %22593 = vst [vmem:[#allocation48_spill] sm:$0xff] %v21256_v15 }
 0xc2f   :  { %16109 = vmatmul.mubr.bf16.gmra.mrb[64].mxu1 %v21174_v3  ;;  %22589 = vst [vmem:[#allocation44_spill] sm:$0xff] %v21234_v12  ;;  %v9555_v10 = vrot.slane %v21234_v12, 1 }
 0xc30   :  { %16112 = vmatprep.mubr.msk.bf16.mxu1 %vm18810_vm9, %v21185_v27 }
 0xc31   :  { %v21262_v37 = vsel %vm1826_vm8, %v9554_v13, %v9555_v10  ;;  %v9559_v13 = vrot.slane %v21276_v59, 1 }
 0xc32   :  { %22595 = vst [vmem:[#allocation50_spill] sm:$0xff] %v21262_v37 }
 0xc33   :  { %16029 = vmatmul.mubr.bf16.gmra.mrb[116].mxu0 %v21222_v54 }
 0xc34   :  { %16032 = vmatprep.mubr.bf16.mxu0 %v21226_v52  ;;  %v9346_v52 = vrot.slane %v20821_v16, 7  ;;  %v21265_v16 = vsel %vm1779_vm7, %v9343_v34, 0 }
 0xc35   :  { %v9557_v33 = vrot.slane %v21265_v16, 1 }
 0xc37   :  { %16113 = vmatmul.mubr.bf16.gmra.mrb[68].mxu1 %v21204_v30 }
 0xc38   :  { %16116 = vmatprep.mubr.msk.bf16.mxu1 %vm18810_vm9, %v21215_v42 }
 0xc3b   :  { %16033 = vmatmul.mubr.bf16.gmra.mrb[120].mxu0 %v21256_v15  ;;  %v21297_v15 = vsel %vm1779_vm7, %v9346_v52, 0 }
 0xc3c   :  { %16036 = vmatprep.mubr.bf16.mxu0 %v21262_v37 }
 0xc3f   :  { %16117 = vmatmul.mubr.bf16.gmra.mrb[72].mxu1 %v21234_v12 }
 0xc40   :  { %16120 = vmatprep.mubr.msk.bf16.mxu1 %vm18810_vm9, %v21245_v38 }
 0xc48   :  { %v21251_v54 = vpop.f32.mrb[76].mxu0 }
 0xc49   :  { %22591 = vst [vmem:[#allocation46_spill] sm:$0xff] %v21251_v54  ;;  %v21253_v4 = vpop.f32.mrb[77].mxu0  ;;  %v21290_v54 = vsel %vm1826_vm8, %v9555_v10, %v9557_v33  ;;  %v9562_v10 = vrot.slane %v21297_v15, 1 }
 0xc4a   :  { %22592 = vst [vmem:[#allocation47_spill] sm:$0xff] %v21253_v4  ;;  %v21258_v1 = vpop.f32.mrb[78].mxu0  ;;  %v21272_v4 = vsel %vm1779_vm7, %v21245_v38, %v9346_v52  ;;  %22599 = vst [vmem:[#allocation54_spill] sm:$0xff] %v21290_v54  ;;  %16037 = vmatmul.mubr.bf16.gmra.mrb[124].mxu0 %v21290_v54  ;;  %v21313_v52 = vrot.slane %v20827_v32, 7 }
 0xc4b   :  { %22594 = vst [vmem:[#allocation49_spill] sm:$0xff] %v21258_v1  ;;  %v21267_v27 = vpop.f32.mrb[79].mxu0  ;;  %22597 = vst [vmem:[#allocation52_spill] sm:$0xff] %v21272_v4  ;;  %v9560_v34 = vrot.slane %v21272_v4, 1  ;;  %v9349_v1 = vrot.slane %v20825_v0, 7  ;;  %16121 = vmatmul.mubr.bf16.gmra.mrb[76].mxu1 %v21272_v4 }
 0xc4c   :  { %22596 = vst [vmem:[#allocation51_spill] sm:$0xff] %v21267_v27  ;;  %v21283_v27 = vrot.slane %v20823_v35, 7  ;;  %22602 = vst [vmem:[#allocation57_spill] sm:$0xff] %v21313_v52 }
 0xc4d   :  { %v21294_v37 = vsel %vm1826_vm8, %v9559_v13, %v9560_v34  ;;  %v21320_v54 = vsel %vm1826_vm8, %v9560_v34, %v9562_v10  ;;  %v21327_v42 = vsel %vm1779_vm7, %v9349_v1, 0 }
 0xc4e   :  { %22598 = vst [vmem:[#allocation53_spill] sm:$0xff] %v21283_v27  ;;  %22600 = vst [vmem:[#allocation55_spill] sm:$0xff] %v21294_v37  ;;  %16040 = vmatprep.mubr.bf16.mxu0 %v21294_v37  ;;  %v21302_v35 = vsel %vm1779_vm7, %v21283_v27, %v9349_v1  ;;  %v21306_v0 = vsel %vm1779_vm7, 0, %v21283_v27  ;;  %v9352_v37 = vrot.slane %v20829_v63, 7  ;;  %16124 = vmatprep.mubr.msk.bf16.mxu1 %vm18810_vm9, %v21283_v27  ;;  %v21336_v63 = vsel %vm1779_vm7, 0, %v21313_v52 }
 0xc4f   :  { %22601 = vst [vmem:[#allocation56_spill] sm:$0xff] %v21302_v35  ;;  %v9564_v33 = vrot.slane %v21306_v0, 1  ;;  %v9565_v13 = vrot.slane %v21302_v35, 1  ;;  %22603 = vst [vmem:[#allocation58_spill] sm:$0xff] %v21320_v54  ;;  %v9567_v34 = vrot.slane %v21327_v42, 1  ;;  %v9569_v10 = vrot.slane %v21336_v63, 1 }
 0xc50   :  { %v21332_v32 = vsel %vm1779_vm7, %v21313_v52, %v9352_v37 }
 0xc51   :  { %v21324_v38 = vsel %vm1826_vm8, %v9564_v33, %v9565_v13  ;;  %22605 = vst [vmem:[#allocation60_spill] sm:$0xff] %v21332_v32  ;;  %v9570_v33 = vrot.slane %v21332_v32, 1  ;;  %v21346_v1 = vsel %vm1826_vm8, %v9565_v13, %v9567_v34  ;;  %v10295_v13 = vrot.slane %v20883_v7, 2 }
 0xc52   :  { %16041 = vmatmul.mubr.bf16.gmra.mrb[128].mxu0 %v21320_v54  ;;  %22604 = vst [vmem:[#allocation59_spill] sm:$0xff] %v21324_v38  ;;  %22606 = vst [vmem:[#allocation61_spill] sm:$0xff] %v21346_v1  ;;  %v21353_v54 = vsel %vm1779_vm7, %v9352_v37, 0  ;;  %v10296_v34 = vrot.slane %v20879_v50, 2  ;;  %v10301_v7 = vrot.slane %v20868_v41, 2 }
 0xc53   :  { %16044 = vmatprep.mubr.bf16.mxu0 %v21324_v38  ;;  %16125 = vmatmul.mubr.bf16.gmra.mrb[80].mxu1 %v21302_v35  ;;  %v21350_v38 = vsel %vm1826_vm8, %v9569_v10, %v9570_v33  ;;  %v9572_v27 = vrot.slane %v21353_v54, 1  ;;  %v18120_v10 = vld [vmem:[#allocation9 + $0xc8] sm:$0xff]  }
 0xc54   :  { %16128 = vmatprep.mubr.msk.bf16.mxu1 %vm18810_vm9, %v21313_v52  ;;  %22607 = vst [vmem:[#allocation62_spill] sm:$0xff] %v21350_v38  ;;  %v21367_v37 = vsel %vm1361_vm6, %v10295_v13, %v10296_v34  ;;  %v10305_v13 = vrot.slane %v20924_v47, 2  ;;  %v10308_v47 = vrot.slane %v20955_v46, 2  ;;  %v21404_v46 = vld [vmem:[#allocation9 + $0x100] sm:$0xff]  }
 0xc55   :  { %v21360_v52 = vsel %vm1826_vm8, %v9570_v33, %v9572_v27  ;;  %v10298_v27 = vrot.slane %v20886_v39, 2  ;;  %v10300_v33 = vrot.slane %v20862_v43, 2  ;;  %v18123_v39 = vld [vmem:[#allocation9 + $0xe0] sm:$0xff]   ;;  %v10303_v43 = vrot.slane %v20915_v2, 2  ;;  %v18125_v2 = vld [vmem:[#allocation9 + $0xf0] sm:$0xff]  }
 0xc56   :  { %22609 = vst [vmem:[#allocation63_spill] sm:$0xff] %v21360_v52 }
 0xc5a   :  { %16045 = vmatmul.mubr.bf16.gmra.mrb[132].mxu0 %v21346_v1 }
 0xc5b   :  { %16048 = vmatprep.mubr.bf16.mxu0 %v21350_v38  ;;  %16129 = vmatmul.mubr.bf16.gmra.mrb[84].mxu1 %v21332_v32  ;;  %v18121_v38 = vld [vmem:[#allocation9 + $0xd0] sm:$0xff]  }
 0xc5c   :  { %16148 = vmatprep.mubr.bf16.mxu1 %v22608_v9 }
 0xc62   :  { %16049 = vmatmul.mubr.bf16.gmra.mrb[136].mxu0 %v21360_v52  ;;  %v18122_v52 = vld [vmem:[#allocation9 + $0xd8] sm:$0xff]  }
 0xc63   :  { %16149 = vmatmul.mubr.bf16.vlgmr.msra.gmra.mrb[24].mxu1 %v22608_v9  ;;  %v21375_v9 = vsel %vm1361_vm6, %v10296_v34, %v10298_v27  ;;  %v18124_v34 = vld [vmem:[#allocation9 + $0xe8] sm:$0xff]   ;;  %v21386_v27 = vsel %vm1361_vm6, %v10301_v7, %v10303_v43 }
 0xc64   :  { %16213 = vmatpush3.bf16.msra.mxu1 %v20833_v44  ;;  %16152 = vmatprep.mubr.bf16.mxu1 %v21367_v37  ;;  %v21379_v44 = vsel %vm1361_vm6, %v10300_v33, %v10301_v7  ;;  %v18126_v7 = vld [vmem:[#allocation9 + $0xf8] sm:$0xff]  }
 0xc65   :  { %16214 = vmatprep.subr.bf16.mxu1 %v18120_v10 }
 0xc68   :  { %16215 = vmatpush3.bf16.msra.mxu1 %v18120_v10  ;;  %v10306_v10 = vrot.slane %v20920_v14, 2 }
 0xc69   :  { %16216 = vmatprep.subr.bf16.mxu1 %v18121_v38 }
 0xc6a   :  { %v21390_v33 = vsel %vm1361_vm6, %v10305_v13, %v10306_v10  ;;  %v21397_v43 = vsel %vm1361_vm6, %v10306_v10, %v10308_v47 }
 0xc6b   :  { %16153 = vmatmul.mubr.bf16.gmra.mrb[28].mxu1 %v21375_v9 }
 0xc6c   :  { %16156 = vmatprep.mubr.bf16.mxu1 %v21379_v44  ;;  %16217 = vmatpush3.bf16.msra.mxu1 %v18121_v38  ;;  %v10310_v38 = vrot.slane %v20964_v23, 2  ;;  %v10313_v23 = vrot.slane %v20995_v61, 2  ;;  %v10320_v61 = vrot.slane %v21044_v20, 2 }
 0xc6d   :  { %16218 = vmatprep.subr.bf16.mxu1 %v18122_v52 }
 0xc70   :  { %16219 = vmatpush3.bf16.msra.mxu1 %v18122_v52  ;;  %v10311_v52 = vrot.slane %v20960_v25, 2 }
 0xc71   :  { %16220 = vmatprep.subr.bf16.mxu1 %v18123_v39 }
 0xc72   :  { %v21401_v13 = vsel %vm1361_vm6, %v10310_v38, %v10311_v52  ;;  %v21411_v10 = vsel %vm1361_vm6, %v10311_v52, %v10313_v23  ;;  %v10325_v23 = vrot.slane %v21084_v57, 2 }
 0xc73   :  { %16157 = vmatmul.mubr.bf16.gmra.mrb[32].mxu1 %v21386_v27 }
 0xc74   :  { %16160 = vmatprep.mubr.bf16.mxu1 %v21390_v33  ;;  %16221 = vmatpush3.bf16.msra.mxu1 %v18123_v39  ;;  %v10315_v39 = vrot.slane %v21004_v28, 2  ;;  %v10321_v28 = vrot.slane %v21040_v55, 2 }
 0xc75   :  { %16222 = vmatprep.subr.bf16.mxu1 %v18124_v34 }
 0xc76   :  { %v21426_v52 = vsel %vm1361_vm6, %v10320_v61, %v10321_v28 }
 0xc78   :  { %16223 = vmatpush3.bf16.msra.mxu1 %v18124_v34  ;;  %v10316_v34 = vrot.slane %v21000_v58, 2 }
 0xc79   :  { %16224 = vmatprep.subr.bf16.mxu1 %v18125_v2 }
 0xc7a   :  { %v21415_v47 = vsel %vm1361_vm6, %v10315_v39, %v10316_v34 }
 0xc7b   :  { %16161 = vmatmul.mubr.bf16.gmra.mrb[36].mxu1 %v21397_v43 }
 0xc7c   :  { %16164 = vmatprep.mubr.bf16.mxu1 %v21401_v13  ;;  %16225 = vmatpush3.bf16.msra.mxu1 %v18125_v2  ;;  %v10318_v2 = vrot.slane %v21035_v53, 2  ;;  %v10326_v53 = vrot.slane %v21080_v40, 2 }
 0xc7d   :  { %16226 = vmatprep.subr.bf16.mxu1 %v18126_v7 }
 0xc7e   :  { %v21422_v38 = vsel %vm1361_vm6, %v10316_v34, %v10318_v2  ;;  %v21437_v39 = vsel %vm1361_vm6, %v10325_v23, %v10326_v53  ;;  %v10328_v34 = vrot.slane %v21109_v17, 2  ;;  %v10330_v2 = vrot.slane %v21120_v5, 2 }
 0xc7f   :  { %v10336_v17 = vrot.slane %v21144_v24, 2 }
 0xc80   :  { %16227 = vmatpush3.bf16.msra.mxu1 %v18126_v7  ;;  %v10323_v7 = vrot.slane %v21075_v36, 2  ;;  %v10331_v36 = vrot.slane %v21116_v26, 2  ;;  %v21444_v57 = vsel %vm1361_vm6, %v10326_v53, %v10328_v34  ;;  %v10338_v53 = vrot.slane %v21169_v49, 2 }
 0xc81   :  { %16292 = vmatprep.subr.bf16.mxu1 %v21404_v46  ;;  %v10340_v34 = vrot.slane %v21178_v48, 2  ;;  %v10346_v49 = vrot.slane %v21204_v30, 2 }
 0xc82   :  { %v21433_v20 = vsel %vm1361_vm6, %v10321_v28, %v10323_v7  ;;  %v21448_v61 = vsel %vm1361_vm6, %v10330_v2, %v10331_v36  ;;  %v10333_v28 = vrot.slane %v21139_v51, 2  ;;  %v10335_v7 = vrot.slane %v21148_v19, 2 }
 0xc83   :  { %16165 = vmatmul.mubr.bf16.gmra.mrb[40].mxu1 %v21411_v10  ;;  %v10341_v51 = vrot.slane %v21174_v3, 2  ;;  %v21466_v19 = vsel %vm1361_vm6, %v10336_v17, %v10338_v53  ;;  %v10350_v53 = vrot.slane %v21238_v62, 2 }
 0xc84   :  { %16168 = vmatprep.mubr.bf16.mxu1 %v21415_v47  ;;  %v21455_v5 = vsel %vm1361_vm6, %v10331_v36, %v10333_v28  ;;  %v21459_v23 = vsel %vm1361_vm6, %v10335_v7, %v10336_v17  ;;  %v10343_v36 = vrot.slane %v21199_v60, 2  ;;  %v10345_v28 = vrot.slane %v21208_v29, 2 }
 0xc85   :  { %v21470_v2 = vsel %vm1361_vm6, %v10340_v34, %v10341_v51  ;;  %v10348_v17 = vrot.slane %v21229_v31, 2  ;;  %v10351_v60 = vrot.slane %v21234_v12, 2  ;;  %v10356_v31 = vrot.slane %v21272_v4, 2 }
 0xc86   :  { %v21477_v48 = vsel %vm1361_vm6, %v10341_v51, %v10343_v36  ;;  %v21481_v7 = vsel %vm1361_vm6, %v10345_v28, %v10346_v49  ;;  %v10353_v51 = vrot.slane %v21265_v16, 2  ;;  %v10355_v36 = vrot.slane %v21276_v59, 2 }
 0xc87   :  { %v21488_v29 = vsel %vm1361_vm6, %v10346_v49, %v10348_v17  ;;  %v21492_v34 = vsel %vm1361_vm6, %v10350_v53, %v10351_v60  ;;  %v10358_v59 = vrot.slane %v21297_v15, 2 }
 0xc88   :  { %v21501_v62 = vsel %vm1361_vm6, %v10351_v60, %v10353_v51  ;;  %v21507_v17 = vsel %vm1361_vm6, %v10355_v36, %v10356_v31  ;;  %v10361_v60 = vrot.slane %v21302_v35, 2 }
 0xc89   :  { %22611 = vst [vmem:[#allocation65_spill] sm:$0xff] %v21501_v62 }
 0xc8b   :  { %16169 = vmatmul.mubr.bf16.gmra.mrb[44].mxu1 %v21422_v38 }
 0xc8c   :  { %16172 = vmatprep.mubr.bf16.mxu1 %v21426_v52 }
 0xc93   :  { %16173 = vmatmul.mubr.bf16.gmra.mrb[48].mxu1 %v21433_v20 }
 0xc94   :  { %16176 = vmatprep.mubr.bf16.mxu1 %v21437_v39 }
 0xc9b   :  { %16177 = vmatmul.mubr.bf16.gmra.mrb[52].mxu1 %v21444_v57 }
 0xc9c   :  { %16180 = vmatprep.mubr.bf16.mxu1 %v21448_v61 }
 0xca3   :  { %16181 = vmatmul.mubr.bf16.gmra.mrb[56].mxu1 %v21455_v5 }
 0xca4   :  { %16184 = vmatprep.mubr.bf16.mxu1 %v21459_v23 }
 0xcab   :  { %16185 = vmatmul.mubr.bf16.gmra.mrb[60].mxu1 %v21466_v19 }
 0xcac   :  { %16188 = vmatprep.mubr.bf16.mxu1 %v21470_v2 }
 0xcb3   :  { %16189 = vmatmul.mubr.bf16.gmra.mrb[64].mxu1 %v21477_v48 }
 0xcb4   :  { %16192 = vmatprep.mubr.bf16.mxu1 %v21481_v7 }
 0xcbb   :  { %16193 = vmatmul.mubr.bf16.gmra.mrb[68].mxu1 %v21488_v29 }
 0xcbc   :  { %16196 = vmatprep.mubr.bf16.mxu1 %v21492_v34 }
 0xcbe   :  { %v21498_v28 = vpop.f32.mrb[80].mxu0 }
 0xcbf   :  { %22610 = vst [vmem:[#allocation64_spill] sm:$0xff] %v21498_v28  ;;  %v21503_v49 = vpop.f32.mrb[81].mxu0  ;;  %v10360_v28 = vrot.slane %v21306_v0, 2  ;;  %v10363_v0 = vrot.slane %v21327_v42, 2 }
 0xcc0   :  { %22612 = vst [vmem:[#allocation66_spill] sm:$0xff] %v21503_v49  ;;  %v21509_v53 = vpop.f32.mrb[82].mxu0  ;;  %v21520_v49 = vsel %vm1361_vm6, %v10356_v31, %v10358_v59  ;;  %v10366_v31 = vrot.slane %v21332_v32, 2 }
 0xcc1   :  { %22613 = vst [vmem:[#allocation67_spill] sm:$0xff] %v21509_v53  ;;  %v21512_v16 = vpop.f32.mrb[83].mxu0  ;;  %v21526_v36 = vsel %vm1361_vm6, %v10360_v28, %v10361_v60 }
 0xcc2   :  { %22614 = vst [vmem:[#allocation68_spill] sm:$0xff] %v21512_v16 }
 0xcc3   :  { %16197 = vmatmul.mubr.bf16.gmra.mrb[72].mxu1 %v21501_v62 }
 0xcc4   :  { %16200 = vmatprep.mubr.bf16.mxu1 %v21507_v17 }
 0xcc6   :  { %v21517_v51 = vpop.f32.mrb[84].mxu0 }
 0xcc7   :  { %22615 = vst [vmem:[#allocation69_spill] sm:$0xff] %v21517_v51  ;;  %v21522_v62 = vpop.f32.mrb[85].mxu0  ;;  %v10365_v51 = vrot.slane %v21336_v63, 2  ;;  %v10368_v63 = vrot.slane %v21353_v54, 2 }
 0xcc8   :  { %22616 = vst [vmem:[#allocation70_spill] sm:$0xff] %v21522_v62  ;;  %v21528_v53 = vpop.f32.mrb[86].mxu0  ;;  %v21539_v62 = vsel %vm1361_vm6, %v10361_v60, %v10363_v0 }
 0xcc9   :  { %22617 = vst [vmem:[#allocation71_spill] sm:$0xff] %v21528_v53  ;;  %v21531_v15 = vpop.f32.mrb[87].mxu0  ;;  %v21545_v28 = vsel %vm1361_vm6, %v10365_v51, %v10366_v31  ;;  %v21556_v60 = vsel %vm1361_vm6, %v10366_v31, %v10368_v63 }
 0xcca   :  { %22618 = vst [vmem:[#allocation72_spill] sm:$0xff] %v21531_v15 }
 0xccb   :  { %16201 = vmatmul.mubr.bf16.gmra.mrb[76].mxu1 %v21520_v49 }
 0xccc   :  { %16204 = vmatprep.mubr.bf16.mxu1 %v21526_v36 }
 0xcce   :  { %v21536_v59 = vpop.f32.mrb[88].mxu0 }
 0xccf   :  { %22619 = vst [vmem:[#allocation73_spill] sm:$0xff] %v21536_v59  ;;  %v21541_v16 = vpop.f32.mrb[89].mxu0 }
 0xcd0   :  { %22620 = vst [vmem:[#allocation74_spill] sm:$0xff] %v21541_v16  ;;  %v21547_v53 = vpop.f32.mrb[90].mxu0 }
 0xcd1   :  { %22621 = vst [vmem:[#allocation75_spill] sm:$0xff] %v21547_v53  ;;  %v21550_v42 = vpop.f32.mrb[91].mxu0 }
 0xcd2   :  { %22622 = vst [vmem:[#allocation76_spill] sm:$0xff] %v21550_v42  ;;  %v18128_v42 = vld [vmem:[#allocation9 + $0x108] sm:$0xff]  }
 0xcd3   :  { %16205 = vmatmul.mubr.bf16.gmra.mrb[80].mxu1 %v21539_v62 }
 0xcd4   :  { %16208 = vmatprep.mubr.bf16.mxu1 %v21545_v28 }
 0xcd6   :  { %v21553_v15 = vpop.f32.mrb[92].mxu0 }
 0xcd7   :  { %22623 = vst [vmem:[#allocation77_spill] sm:$0xff] %v21553_v15  ;;  %v21558_v0 = vpop.f32.mrb[93].mxu0 }
 0xcd8   :  { %22624 = vst [vmem:[#allocation78_spill] sm:$0xff] %v21558_v0  ;;  %v21561_v16 = vpop.f32.mrb[94].mxu0 }
 0xcd9   :  { %22625 = vst [vmem:[#allocation79_spill] sm:$0xff] %v21561_v16  ;;  %v21566_v51 = vpop.f32.mrb[95].mxu0 }
 0xcda   :  { %22626 = vst [vmem:[#allocation80_spill] sm:$0xff] %v21566_v51  ;;  %v18130_v51 = vld [vmem:[#allocation9 + $0x118] sm:$0xff]  }
 0xcdb   :  { %16209 = vmatmul.mubr.bf16.gmra.mrb[84].mxu1 %v21556_v60 }
 0xcdc   :  { %16228 = vmatprep.mubr.msk.bf16.mxu1 %vm18810_vm9, %v20864_v6  ;;  %v18129_v6 = vld [vmem:[#allocation9 + $0x110] sm:$0xff]  }
 0xcde   :  { %v21568_v53 = vpop.f32.mrb[96].mxu0 }
 0xcdf   :  { %22627 = vst [vmem:[#allocation81_spill] sm:$0xff] %v21568_v53  ;;  %v21570_v54 = vpop.f32.mrb[97].mxu0 }
 0xce0   :  { %22628 = vst [vmem:[#allocation82_spill] sm:$0xff] %v21570_v54  ;;  %v21574_v31 = vpop.f32.mrb[98].mxu0 }
 0xce1   :  { %22629 = vst [vmem:[#allocation83_spill] sm:$0xff] %v21574_v31  ;;  %v21579_v63 = vpop.f32.mrb[99].mxu0 }
 0xce2   :  { %22630 = vst [vmem:[#allocation84_spill] sm:$0xff] %v21579_v63  ;;  %v18131_v63 = vld [vmem:[#allocation9 + $0x120] sm:$0xff]  }
 0xce3   :  { %16229 = vmatmul.mubr.bf16.vlgmr.msra.gmra.mrb[24].mxu1 %v20879_v50 }
 0xce4   :  { %16293 = vmatpush3.bf16.msra.mxu1 %v21404_v46  ;;  %16232 = vmatprep.mubr.msk.bf16.mxu1 %vm18810_vm9, %v20850_v22 }
 0xce5   :  { %16294 = vmatprep.subr.bf16.mxu1 %v18128_v42 }
 0xce6   :  { %v21581_v53 = vpop.f32.mrb[100].mxu0 }
 0xce7   :  { %22631 = vst [vmem:[#allocation85_spill] sm:$0xff] %v21581_v53  ;;  %v21583_v54 = vpop.f32.mrb[101].mxu0 }
 0xce8   :  { %16295 = vmatpush3.bf16.msra.mxu1 %v18128_v42  ;;  %22632 = vst [vmem:[#allocation86_spill] sm:$0xff] %v21583_v54  ;;  %v21586_v50 = vpop.f32.mrb[102].mxu0  ;;  %v18132_v42 = vld [vmem:[#allocation9 + $0x128] sm:$0xff]  }
 0xce9   :  { %16296 = vmatprep.subr.bf16.mxu1 %v18129_v6  ;;  %22633 = vst [vmem:[#allocation87_spill] sm:$0xff] %v21586_v50  ;;  %v21591_v46 = vpop.f32.mrb[103].mxu0  ;;  %v22638_v50 = vld [vmem:[#allocation28_spill] sm:$0xff] }
 0xcea   :  { %22634 = vst [vmem:[#allocation88_spill] sm:$0xff] %v21591_v46  ;;  %v18133_v46 = vld [vmem:[#allocation9 + $0x130] sm:$0xff]  }
 0xceb   :  { %16233 = vmatmul.mubr.bf16.gmra.mrb[28].mxu1 %v20868_v41 }
 0xcec   :  { %16236 = vmatprep.mubr.msk.bf16.mxu1 %vm18810_vm9, %v20894_v18  ;;  %16297 = vmatpush3.bf16.msra.mxu1 %v18129_v6 }
 0xced   :  { %16298 = vmatprep.subr.bf16.mxu1 %v18130_v51 }
 0xcee   :  { %v21593_v31 = vpop.f32.mrb[104].mxu0 }
 0xcef   :  { %22635 = vst [vmem:[#allocation89_spill] sm:$0xff] %v21593_v31  ;;  %v21595_v53 = vpop.f32.mrb[105].mxu0 }
 0xcf0   :  { %16299 = vmatpush3.bf16.msra.mxu1 %v18130_v51  ;;  %22636 = vst [vmem:[#allocation90_spill] sm:$0xff] %v21595_v53  ;;  %v21598_v54 = vpop.f32.mrb[106].mxu0  ;;  %v18134_v51 = vld [vmem:[#allocation9 + $0x138] sm:$0xff]  }
 0xcf1   :  { %16300 = vmatprep.subr.bf16.mxu1 %v18131_v63  ;;  %22637 = vst [vmem:[#allocation91_spill] sm:$0xff] %v21598_v54  ;;  %v21603_v6 = vpop.f32.mrb[107].mxu0  ;;  %v22643_v54 = vld [vmem:[#allocation31_spill] sm:$0xff] }
 0xcf2   :  { %22639 = vst [vmem:[#allocation28_spill] sm:$0xff] %v21603_v6  ;;  %v18135_v6 = vld [vmem:[#allocation9 + $0x140] sm:$0xff]  }
 0xcf3   :  { %16237 = vmatmul.mubr.bf16.gmra.mrb[32].mxu1 %v20920_v14 }
 0xcf4   :  { %16240 = vmatprep.mubr.msk.bf16.mxu1 %vm18810_vm9, %v22638_v50  ;;  %16301 = vmatpush3.bf16.msra.mxu1 %v18131_v63 }
 0xcf5   :  { %16302 = vmatprep.subr.bf16.mxu1 %v18132_v42 }
 0xcf6   :  { %v21605_v16 = vpop.f32.mrb[108].mxu0 }
 0xcf7   :  { %22640 = vst [vmem:[#allocation92_spill] sm:$0xff] %v21605_v16  ;;  %v21607_v31 = vpop.f32.mrb[109].mxu0 }
 0xcf8   :  { %16303 = vmatpush3.bf16.msra.mxu1 %v18132_v42  ;;  %22641 = vst [vmem:[#allocation93_spill] sm:$0xff] %v21607_v31  ;;  %v21610_v53 = vpop.f32.mrb[110].mxu0 }
 0xcf9   :  { %16304 = vmatprep.subr.bf16.mxu1 %v18133_v46  ;;  %22642 = vst [vmem:[#allocation94_spill] sm:$0xff] %v21610_v53  ;;  %v21615_v63 = vpop.f32.mrb[111].mxu0 }
 0xcfa   :  { %22644 = vst [vmem:[#allocation31_spill] sm:$0xff] %v21615_v63 }
 0xcfb   :  { %16241 = vmatmul.mubr.bf16.gmra.mrb[36].mxu1 %v20960_v25 }
 0xcfc   :  { %16244 = vmatprep.mubr.msk.bf16.mxu1 %vm18810_vm9, %v22643_v54  ;;  %16305 = vmatpush3.bf16.msra.mxu1 %v18133_v46 }
 0xcfd   :  { %16306 = vmatprep.subr.bf16.mxu1 %v18134_v51 }
 0xcfe   :  { %v21617_v42 = vpop.f32.mrb[112].mxu0 }
 0xcff   :  { %22645 = vst [vmem:[#allocation95_spill] sm:$0xff] %v21617_v42  ;;  %v21619_v16 = vpop.f32.mrb[113].mxu0 }
 0xd00   :  { %16307 = vmatpush3.bf16.msra.mxu1 %v18134_v51  ;;  %22646 = vst [vmem:[#allocation96_spill] sm:$0xff] %v21619_v16  ;;  %v21622_v31 = vpop.f32.mrb[114].mxu0 }
 0xd01   :  { %16372 = vmatprep.subr.bf16.mxu1 %v18135_v6  ;;  %22647 = vst [vmem:[#allocation97_spill] sm:$0xff] %v21622_v31  ;;  %v21627_v53 = vpop.f32.mrb[115].mxu0 }
 0xd02   :  { %22648 = vst [vmem:[#allocation98_spill] sm:$0xff] %v21627_v53 }
 0xd03   :  { %16245 = vmatmul.mubr.bf16.gmra.mrb[40].mxu1 %v21000_v58 }
 0xd04   :  { %16248 = vmatprep.mubr.msk.bf16.mxu1 %vm18810_vm9, %v21018_v56 }
 0xd06   :  { %v21629_v46 = vpop.f32.mrb[116].mxu0 }
 0xd07   :  { %22649 = vst [vmem:[#allocation99_spill] sm:$0xff] %v21629_v46  ;;  %v21631_v63 = vpop.f32.mrb[117].mxu0 }
 0xd08   :  { %22650 = vst [vmem:[#allocation100_spill] sm:$0xff] %v21631_v63  ;;  %v21634_v51 = vpop.f32.mrb[118].mxu0 }
 0xd09   :  { %22651 = vst [vmem:[#allocation101_spill] sm:$0xff] %v21634_v51  ;;  %v21639_v16 = vpop.f32.mrb[119].mxu0 }
 0xd0a   :  { %22652 = vst [vmem:[#allocation102_spill] sm:$0xff] %v21639_v16 }
 0xd0b   :  { %16249 = vmatmul.mubr.bf16.gmra.mrb[44].mxu1 %v21040_v55 }
 0xd0c   :  { %16252 = vmatprep.mubr.msk.bf16.mxu1 %vm18810_vm9, %v21058_v8 }
 0xd0e   :  { %v21641_v31 = vpop.f32.mrb[120].mxu0 }
 0xd0f   :  { %22653 = vst [vmem:[#allocation103_spill] sm:$0xff] %v21641_v31  ;;  %v21643_v42 = vpop.f32.mrb[121].mxu0 }
 0xd10   :  { %22654 = vst [vmem:[#allocation104_spill] sm:$0xff] %v21643_v42  ;;  %v21646_v53 = vpop.f32.mrb[122].mxu0 }
 0xd11   :  { %22655 = vst [vmem:[#allocation105_spill] sm:$0xff] %v21646_v53  ;;  %v21651_v63 = vpop.f32.mrb[123].mxu0 }
 0xd12   :  { %22656 = vst [vmem:[#allocation106_spill] sm:$0xff] %v21651_v63 }
 0xd13   :  { %16253 = vmatmul.mubr.bf16.gmra.mrb[48].mxu1 %v21080_v40 }
 0xd14   :  { %16256 = vmatprep.mubr.msk.bf16.mxu1 %vm18810_vm9, %v21094_v21 }
 0xd1b   :  { %16257 = vmatmul.mubr.bf16.gmra.mrb[52].mxu1 %v21116_v26 }
 0xd1c   :  { %16260 = vmatprep.mubr.msk.bf16.mxu1 %vm18810_vm9, %v21126_v11 }
 0xd1d   :  { %v21653_v51 = vpop.f32.mrb[124].mxu0 }
 0xd1e   :  { %22657 = vst [vmem:[#allocation107_spill] sm:$0xff] %v21653_v51  ;;  %v21655_v46 = vpop.f32.mrb[125].mxu0  ;;  %v22664_v51 = vld [vmem:[#allocation42_spill] sm:$0xff] }
 0xd1f   :  { %22658 = vst [vmem:[#allocation108_spill] sm:$0xff] %v21655_v46  ;;  %v21658_v16 = vpop.f32.mrb[126].mxu0 }
 0xd20   :  { %22659 = vst [vmem:[#allocation109_spill] sm:$0xff] %v21658_v16  ;;  %v21663_v42 = vpop.f32.mrb[127].mxu0 }
 0xd21   :  { %22660 = vst [vmem:[#allocation110_spill] sm:$0xff] %v21663_v42 }
 0xd23   :  { %16261 = vmatmul.mubr.bf16.gmra.mrb[56].mxu1 %v21144_v24 }
 0xd24   :  { %16264 = vmatprep.mubr.msk.bf16.mxu1 %vm18810_vm9, %v22664_v51 }
 0xd25   :  { %v21665_v53 = vpop.f32.mrb[128].mxu0 }
 0xd26   :  { %22661 = vst [vmem:[#allocation111_spill] sm:$0xff] %v21665_v53  ;;  %v21667_v31 = vpop.f32.mrb[129].mxu0  ;;  %v22669_v53 = vld [vmem:[#allocation18_spill] sm:$0xff] }
 0xd27   :  { %22662 = vst [vmem:[#allocation112_spill] sm:$0xff] %v21667_v31  ;;  %v21670_v63 = vpop.f32.mrb[130].mxu0 }
 0xd28   :  { %22663 = vst [vmem:[#allocation113_spill] sm:$0xff] %v21670_v63  ;;  %v21675_v46 = vpop.f32.mrb[131].mxu0 }
 0xd29   :  { %22665 = vst [vmem:[#allocation42_spill] sm:$0xff] %v21675_v46 }
 0xd2b   :  { %16265 = vmatmul.mubr.bf16.gmra.mrb[60].mxu1 %v21174_v3 }
 0xd2c   :  { %16268 = vmatprep.mubr.msk.bf16.mxu1 %vm18810_vm9, %v22669_v53  ;;  %v22700_v53 = vld [vmem:[#allocation23_spill] sm:$0xff] }
 0xd2d   :  { %v21677_v16 = vpop.f32.mrb[132].mxu0 }
 0xd2e   :  { %22666 = vst [vmem:[#allocation114_spill] sm:$0xff] %v21677_v16  ;;  %v21679_v0 = vpop.f32.mrb[133].mxu0  ;;  %v22674_v16 = vld [vmem:[#allocation22_spill] sm:$0xff] }
 0xd2f   :  { %22667 = vst [vmem:[#allocation115_spill] sm:$0xff] %v21679_v0  ;;  %v21682_v42 = vpop.f32.mrb[134].mxu0 }
 0xd30   :  { %22668 = vst [vmem:[#allocation116_spill] sm:$0xff] %v21682_v42  ;;  %v21687_v31 = vpop.f32.mrb[135].mxu0  ;;  %v22676_v42 = vld [vmem:[#allocation45_spill] sm:$0xff] }
 0xd31   :  { %22670 = vst [vmem:[#allocation117_spill] sm:$0xff] %v21687_v31  ;;  %v22680_v31 = vld [vmem:[#allocation39_spill] sm:$0xff] }
 0xd32   :  { %v9355_v59 = vrot.slane %v22680_v31, 7  ;;  %v22684_v31 = vld [vmem:[#allocation29_spill] sm:$0xff] }
 0xd33   :  { %16269 = vmatmul.mubr.bf16.gmra.mrb[64].mxu1 %v21204_v30  ;;  %v22686_v30 = vld [vmem:[#allocation32_spill] sm:$0xff] }
 0xd34   :  { %16272 = vmatprep.mubr.msk.bf16.mxu1 %vm18810_vm9, %v22674_v16  ;;  %v18139_v16 = vld [vmem:[#allocation9 + $0x160] sm:$0xff]  }
 0xd35   :  { %v21689_v63 = vpop.f32.mrb[136].mxu0 }
 0xd36   :  { %22671 = vst [vmem:[#allocation118_spill] sm:$0xff] %v21689_v63  ;;  %v21691_v15 = vpop.f32.mrb[137].mxu0  ;;  %v22677_v63 = vld [vmem:[#allocation53_spill] sm:$0xff] }
 0xd37   :  { %22672 = vst [vmem:[#allocation119_spill] sm:$0xff] %v21691_v15  ;;  %v21694_v46 = vpop.f32.mrb[138].mxu0  ;;  %v22679_v15 = vld [vmem:[#allocation37_spill] sm:$0xff] }
 0xd38   :  { %22673 = vst [vmem:[#allocation120_spill] sm:$0xff] %v21694_v46  ;;  %v21699_v0 = vpop.f32.mrb[139].mxu0  ;;  %v22678_v46 = vld [vmem:[#allocation57_spill] sm:$0xff] }
 0xd39   :  { %22675 = vst [vmem:[#allocation121_spill] sm:$0xff] %v21699_v0  ;;  %v21714_v0 = vrot.slane %v22679_v15, 7  ;;  %v22683_v15 = vld [vmem:[#allocation27_spill] sm:$0xff] }
 0xd3b   :  { %16273 = vmatmul.mubr.bf16.gmra.mrb[68].mxu1 %v21234_v12  ;;  %v22685_v12 = vld [vmem:[#allocation30_spill] sm:$0xff] }
 0xd3c   :  { %16276 = vmatprep.mubr.msk.bf16.mxu1 %vm18810_vm9, %v22676_v42  ;;  %v18138_v42 = vld [vmem:[#allocation9 + $0x158] sm:$0xff]  }
 0xd43   :  { %16277 = vmatmul.mubr.bf16.gmra.mrb[72].mxu1 %v21272_v4  ;;  %v22682_v4 = vld [vmem:[#allocation26_spill] sm:$0xff] }
 0xd44   :  { %16280 = vmatprep.mubr.msk.bf16.mxu1 %vm18810_vm9, %v22677_v63  ;;  %v21723_v63 = vsel %vm1779_vm7, %v21714_v0, %v9355_v59 }
 0xd4b   :  { %16281 = vmatmul.mubr.bf16.gmra.mrb[76].mxu1 %v21302_v35  ;;  %v22681_v35 = vld [vmem:[#allocation25_spill] sm:$0xff] }
 0xd4c   :  { %16284 = vmatprep.mubr.msk.bf16.mxu1 %vm18810_vm9, %v22678_v46  ;;  %v18136_v46 = vld [vmem:[#allocation9 + $0x148] sm:$0xff]  }
 0xd53   :  { %16285 = vmatmul.mubr.bf16.gmra.mrb[80].mxu1 %v21332_v32  ;;  %v18137_v32 = vld [vmem:[#allocation9 + $0x150] sm:$0xff]  }
 0xd54   :  { %16288 = vmatprep.mubr.msk.bf16.mxu1 %vm18810_vm9, %v21714_v0 }
 0xd5b   :  { %16289 = vmatmul.mubr.bf16.gmra.mrb[84].mxu1 %v21723_v63 }
 0xd5c   :  { %16308 = vmatprep.mubr.bf16.mxu1 %v22681_v35  ;;  %v18140_v35 = vld [vmem:[#allocation9 + $0x168] sm:$0xff]  }
 0xd63   :  { %16309 = vmatmul.mubr.bf16.vlgmr.msra.gmra.mrb[24].mxu1 %v22682_v4  ;;  %v22687_v4 = vld [vmem:[#allocation33_spill] sm:$0xff] }
 0xd64   :  { %16373 = vmatpush3.bf16.msra.mxu1 %v18135_v6  ;;  %16312 = vmatprep.mubr.bf16.mxu1 %v22683_v15  ;;  %v18141_v6 = vld [vmem:[#allocation9 + $0x170] sm:$0xff]   ;;  %v22688_v15 = vld [vmem:[#allocation14_spill] sm:$0xff] }
 0xd65   :  { %16374 = vmatprep.subr.bf16.mxu1 %v18136_v46 }
 0xd68   :  { %16375 = vmatpush3.bf16.msra.mxu1 %v18136_v46  ;;  %v18142_v46 = vld [vmem:[#allocation9 + $0x178] sm:$0xff]  }
 0xd69   :  { %16376 = vmatprep.subr.bf16.mxu1 %v18137_v32 }
 0xd6b   :  { %16313 = vmatmul.mubr.bf16.gmra.mrb[28].mxu1 %v22684_v31  ;;  %v22689_v31 = vld [vmem:[#allocation34_spill] sm:$0xff] }
 0xd6c   :  { %16316 = vmatprep.mubr.bf16.mxu1 %v22685_v12  ;;  %16377 = vmatpush3.bf16.msra.mxu1 %v18137_v32  ;;  %v18143_v32 = vld [vmem:[#allocation9 + $0x180] sm:$0xff]  }
 0xd6d   :  { %16378 = vmatprep.subr.bf16.mxu1 %v18138_v42  ;;  %v22695_v12 = vld [vmem:[#allocation41_spill] sm:$0xff] }
 0xd70   :  { %16379 = vmatpush3.bf16.msra.mxu1 %v18138_v42  ;;  %v22690_v42 = vld [vmem:[#allocation35_spill] sm:$0xff] }
 0xd71   :  { %16380 = vmatprep.subr.bf16.mxu1 %v18139_v16 }
 0xd73   :  { %16317 = vmatmul.mubr.bf16.gmra.mrb[32].mxu1 %v22686_v30  ;;  %v22691_v30 = vld [vmem:[#allocation15_spill] sm:$0xff] }
 0xd74   :  { %16320 = vmatprep.mubr.bf16.mxu1 %v22687_v4  ;;  %16381 = vmatpush3.bf16.msra.mxu1 %v18139_v16  ;;  %v22692_v4 = vld [vmem:[#allocation36_spill] sm:$0xff]  ;;  %v22693_v16 = vld [vmem:[#allocation38_spill] sm:$0xff] }
 0xd75   :  { %16382 = vmatprep.subr.bf16.mxu1 %v18140_v35 }
 0xd78   :  { %16383 = vmatpush3.bf16.msra.mxu1 %v18140_v35  ;;  %v22694_v35 = vld [vmem:[#allocation40_spill] sm:$0xff] }
 0xd79   :  { %16384 = vmatprep.subr.bf16.mxu1 %v18141_v6 }
 0xd7b   :  { %16321 = vmatmul.mubr.bf16.gmra.mrb[36].mxu1 %v22688_v15  ;;  %v22696_v15 = vld [vmem:[#allocation43_spill] sm:$0xff] }
 0xd7c   :  { %16324 = vmatprep.mubr.bf16.mxu1 %v22689_v31  ;;  %16385 = vmatpush3.bf16.msra.mxu1 %v18141_v6  ;;  %v22697_v31 = vld [vmem:[#allocation17_spill] sm:$0xff]  ;;  %v22698_v6 = vld [vmem:[#allocation19_spill] sm:$0xff] }
 0xd7d   :  { %16386 = vmatprep.subr.bf16.mxu1 %v18142_v46 }
 0xd80   :  { %16387 = vmatpush3.bf16.msra.mxu1 %v18142_v46  ;;  %v22699_v46 = vld [vmem:[#allocation20_spill] sm:$0xff] }
 0xd81   :  { %16452 = vmatprep.subr.bf16.mxu1 %v18143_v32 }
 0xd83   :  { %16325 = vmatmul.mubr.bf16.gmra.mrb[40].mxu1 %v22690_v42  ;;  %v22701_v42 = vld [vmem:[#allocation24_spill] sm:$0xff] }
 0xd84   :  { %16328 = vmatprep.mubr.bf16.mxu1 %v22691_v30  ;;  %v22702_v30 = vld [vmem:[#allocation48_spill] sm:$0xff] }
 0xd8b   :  { %16329 = vmatmul.mubr.bf16.gmra.mrb[44].mxu1 %v22692_v4  ;;  %v22703_v4 = vld [vmem:[#allocation50_spill] sm:$0xff] }
 0xd8c   :  { %16332 = vmatprep.mubr.bf16.mxu1 %v22693_v16  ;;  %v22704_v16 = vld [vmem:[#allocation54_spill] sm:$0xff] }
 0xd93   :  { %16333 = vmatmul.mubr.bf16.gmra.mrb[48].mxu1 %v22694_v35  ;;  %v22705_v35 = vld [vmem:[#allocation55_spill] sm:$0xff] }
 0xd94   :  { %16336 = vmatprep.mubr.bf16.mxu1 %v22695_v12  ;;  %v22706_v12 = vld [vmem:[#allocation58_spill] sm:$0xff] }
 0xd9b   :  { %16337 = vmatmul.mubr.bf16.gmra.mrb[52].mxu1 %v22696_v15  ;;  %v22707_v15 = vld [vmem:[#allocation59_spill] sm:$0xff] }
 0xd9c   :  { %16340 = vmatprep.mubr.bf16.mxu1 %v22697_v31 }
 0xda3   :  { %16341 = vmatmul.mubr.bf16.gmra.mrb[56].mxu1 %v22698_v6  ;;  %v22708_v6 = vld [vmem:[#allocation62_spill] sm:$0xff] }
 0xda4   :  { %16344 = vmatprep.mubr.bf16.mxu1 %v22699_v46 }
 0xdab   :  { %16345 = vmatmul.mubr.bf16.gmra.mrb[60].mxu1 %v22700_v53  ;;  %v21757_v53 = vsel %vm1779_vm7, 0, %v21714_v0 }
 0xdac   :  { %16348 = vmatprep.mubr.bf16.mxu1 %v22701_v42  ;;  %v22709_v42 = vld [vmem:[#allocation63_spill] sm:$0xff] }
 0xdb3   :  { %16349 = vmatmul.mubr.bf16.gmra.mrb[64].mxu1 %v22702_v30  ;;  %v11238_v30 = vrot.slane %v21757_v53, 1 }
 0xdb4   :  { %16352 = vmatprep.mubr.bf16.mxu1 %v22703_v4  ;;  %v11239_v4 = vrot.slane %v21723_v63, 1 }
 0xdbb   :  { %16353 = vmatmul.mubr.bf16.gmra.mrb[68].mxu1 %v22704_v16 }
 0xdbc   :  { %16356 = vmatprep.mubr.bf16.mxu1 %v22705_v35  ;;  %v21763_v35 = vsel %vm1826_vm8, %v11238_v30, %v11239_v4  ;;  %v18145_v30 = vld [vmem:[#allocation9 + $0x190] sm:$0xff]  }
 0xdc3   :  { %16357 = vmatmul.mubr.bf16.gmra.mrb[72].mxu1 %v22706_v12  ;;  %v21766_v12 = vsel %vm1779_vm7, %v9355_v59, 0  ;;  %v18146_v59 = vld [vmem:[#allocation9 + $0x198] sm:$0xff]  }
 0xdc4   :  { %16360 = vmatprep.mubr.bf16.mxu1 %v22707_v15  ;;  %v18144_v15 = vld [vmem:[#allocation9 + $0x188] sm:$0xff]  }
 0xdcb   :  { %16361 = vmatmul.mubr.bf16.gmra.mrb[76].mxu1 %v21346_v1 }
 0xdcc   :  { %16364 = vmatprep.mubr.bf16.mxu1 %v22708_v6  ;;  %v11241_v6 = vrot.slane %v21766_v12, 1 }
 0xdce   :  { %v21771_v1 = vsel %vm1826_vm8, %v11239_v4, %v11241_v6  ;;  %v18147_v4 = vld [vmem:[#allocation9 + $0x1a0] sm:$0xff]  }
 0xdcf   :  { %v22710_v6 = vld [vmem:[#allocation65_spill] sm:$0xff] }
 0xdd3   :  { %16365 = vmatmul.mubr.bf16.gmra.mrb[80].mxu1 %v22709_v42 }
 0xdd4   :  { %16368 = vmatprep.mubr.bf16.mxu1 %v21763_v35 }
 0xddb   :  { %16369 = vmatmul.mubr.bf16.gmra.mrb[84].mxu1 %v21771_v1 }
 0xddc   :  { %16388 = vmatprep.mubr.bf16.mxu1 %v21367_v37  ;;  %v18148_v37 = vld [vmem:[#allocation9 + $0x1a8] sm:$0xff]  }
 0xde3   :  { %16389 = vmatmul.mubr.bf16.vlgmr.msra.gmra.mrb[24].mxu1 %v21375_v9  ;;  %v18149_v9 = vld [vmem:[#allocation9 + $0x1b0] sm:$0xff]  }
 0xde4   :  { %16453 = vmatpush3.bf16.msra.mxu1 %v18143_v32  ;;  %16392 = vmatprep.mubr.bf16.mxu1 %v21379_v44  ;;  %v18151_v32 = vld [vmem:[#allocation9 + $0x1c0] sm:$0xff]  }
 0xde5   :  { %16454 = vmatprep.subr.bf16.mxu1 %v18144_v15 }
 0xde8   :  { %16455 = vmatpush3.bf16.msra.mxu1 %v18144_v15  ;;  %v18150_v15 = vld [vmem:[#allocation9 + $0x1b8] sm:$0xff]  }
 0xde9   :  { %16456 = vmatprep.subr.bf16.mxu1 %v18145_v30 }
 0xdeb   :  { %16393 = vmatmul.mubr.bf16.gmra.mrb[28].mxu1 %v21386_v27 }
 0xdec   :  { %16396 = vmatprep.mubr.bf16.mxu1 %v21390_v33  ;;  %16457 = vmatpush3.bf16.msra.mxu1 %v18145_v30  ;;  %v11663_v30 = vrot.slane %v21757_v53, 2  ;;  %v18152_v53 = vld [vmem:[#allocation9 + $0x1c8] sm:$0xff]  }
 0xded   :  { %16458 = vmatprep.subr.bf16.mxu1 %v18146_v59 }
 0xdf0   :  { %16459 = vmatpush3.bf16.msra.mxu1 %v18146_v59  ;;  %v11664_v59 = vrot.slane %v21723_v63, 2 }
 0xdf1   :  { %16460 = vmatprep.subr.bf16.mxu1 %v18147_v4 }
 0xdf3   :  { %16397 = vmatmul.mubr.bf16.gmra.mrb[32].mxu1 %v21397_v43 }
 0xdf4   :  { %16400 = vmatprep.mubr.bf16.mxu1 %v21401_v13  ;;  %16461 = vmatpush3.bf16.msra.mxu1 %v18147_v4  ;;  %v21807_v4 = vsel %vm1361_vm6, %v11663_v30, %v11664_v59  ;;  %v22724_v30 = vld [vmem:[#allocation30_spill] sm:$0xff] }
 0xdf5   :  { %16462 = vmatprep.subr.bf16.mxu1 %v18148_v37 }
 0xdf8   :  { %16463 = vmatpush3.bf16.msra.mxu1 %v18148_v37  ;;  %v11666_v37 = vrot.slane %v21766_v12, 2  ;;  %v18154_v12 = vld [vmem:[#allocation9 + $0x1d8] sm:$0xff]  }
 0xdf9   :  { %16464 = vmatprep.subr.bf16.mxu1 %v18149_v9 }
 0xdfb   :  { %16401 = vmatmul.mubr.bf16.gmra.mrb[36].mxu1 %v21411_v10 }
 0xdfc   :  { %16404 = vmatprep.mubr.bf16.mxu1 %v21415_v47  ;;  %16465 = vmatpush3.bf16.msra.mxu1 %v18149_v9  ;;  %v21812_v9 = vsel %vm1361_vm6, %v11664_v59, %v11666_v37  ;;  %v18161_v59 = vld [vmem:[#allocation9 + $0x210] sm:$0xff]   ;;  %v18163_v37 = vld [vmem:[#allocation9 + $0x220] sm:$0xff]  }
 0xdfd   :  { %16466 = vmatprep.subr.bf16.mxu1 %v18150_v15 }
 0xe00   :  { %16467 = vmatpush3.bf16.msra.mxu1 %v18150_v15  ;;  %v18153_v15 = vld [vmem:[#allocation9 + $0x1d0] sm:$0xff]  }
 0xe01   :  { %16532 = vmatprep.subr.bf16.mxu1 %v18151_v32 }
 0xe03   :  { %16405 = vmatmul.mubr.bf16.gmra.mrb[40].mxu1 %v21422_v38 }
 0xe04   :  { %16408 = vmatprep.mubr.bf16.mxu1 %v21426_v52 }
 0xe0b   :  { %16409 = vmatmul.mubr.bf16.gmra.mrb[44].mxu1 %v21433_v20 }
 0xe0c   :  { %16412 = vmatprep.mubr.bf16.mxu1 %v21437_v39 }
 0xe13   :  { %16413 = vmatmul.mubr.bf16.gmra.mrb[48].mxu1 %v21444_v57 }
 0xe14   :  { %16416 = vmatprep.mubr.bf16.mxu1 %v21448_v61 }
 0xe1b   :  { %16417 = vmatmul.mubr.bf16.gmra.mrb[52].mxu1 %v21455_v5 }
 0xe1c   :  { %16420 = vmatprep.mubr.bf16.mxu1 %v21459_v23 }
 0xe23   :  { %16421 = vmatmul.mubr.bf16.gmra.mrb[56].mxu1 %v21466_v19 }
 0xe24   :  { %16424 = vmatprep.mubr.bf16.mxu1 %v21470_v2 }
 0xe2b   :  { %16425 = vmatmul.mubr.bf16.gmra.mrb[60].mxu1 %v21477_v48 }
 0xe2c   :  { %16428 = vmatprep.mubr.bf16.mxu1 %v21481_v7 }
 0xe33   :  { %16429 = vmatmul.mubr.bf16.gmra.mrb[64].mxu1 %v21488_v29 }
 0xe34   :  { %16432 = vmatprep.mubr.bf16.mxu1 %v21492_v34 }
 0xe3b   :  { %16433 = vmatmul.mubr.bf16.gmra.mrb[68].mxu1 %v22710_v6 }
 0xe3c   :  { %16436 = vmatprep.mubr.bf16.mxu1 %v21507_v17 }
 0xe43   :  { %16437 = vmatmul.mubr.bf16.gmra.mrb[72].mxu1 %v21520_v49 }
 0xe44   :  { %16440 = vmatprep.mubr.bf16.mxu1 %v21526_v36 }
 0xe4b   :  { %16441 = vmatmul.mubr.bf16.gmra.mrb[76].mxu1 %v21539_v62 }
 0xe4c   :  { %16444 = vmatprep.mubr.bf16.mxu1 %v21545_v28 }
 0xe53   :  { %16445 = vmatmul.mubr.bf16.gmra.mrb[80].mxu1 %v21556_v60 }
 0xe54   :  { %16448 = vmatprep.mubr.bf16.mxu1 %v21807_v4 }
 0xe5b   :  { %16449 = vmatmul.mubr.bf16.gmra.mrb[84].mxu1 %v21812_v9 }
 0xe5c   :  { %16468 = vmatprep.mubr.msk.bf16.mxu1 %vm18810_vm9, %v20850_v22  ;;  %v18155_v22 = vld [vmem:[#allocation9 + $0x1e0] sm:$0xff]  }
 0xe63   :  { %16469 = vmatmul.mubr.bf16.vlgmr.msra.gmra.mrb[24].mxu1 %v20868_v41  ;;  %v18156_v41 = vld [vmem:[#allocation9 + $0x1e8] sm:$0xff]  }
 0xe64   :  { %16533 = vmatpush3.bf16.msra.mxu1 %v18151_v32  ;;  %16472 = vmatprep.mubr.msk.bf16.mxu1 %vm18810_vm9, %v20894_v18  ;;  %v18157_v18 = vld [vmem:[#allocation9 + $0x1f0] sm:$0xff]   ;;  %v22723_v32 = vld [vmem:[#allocation29_spill] sm:$0xff] }
 0xe65   :  { %16534 = vmatprep.subr.bf16.mxu1 %v18152_v53 }
 0xe68   :  { %16535 = vmatpush3.bf16.msra.mxu1 %v18152_v53  ;;  %v18164_v53 = vld [vmem:[#allocation9 + $0x228] sm:$0xff]  }
 0xe69   :  { %16536 = vmatprep.subr.bf16.mxu1 %v18153_v15 }
 0xe6b   :  { %16473 = vmatmul.mubr.bf16.gmra.mrb[28].mxu1 %v20920_v14  ;;  %v18158_v14 = vld [vmem:[#allocation9 + $0x1f8] sm:$0xff]  }
 0xe6c   :  { %16476 = vmatprep.mubr.msk.bf16.mxu1 %vm18810_vm9, %v22638_v50  ;;  %16537 = vmatpush3.bf16.msra.mxu1 %v18153_v15  ;;  %v18159_v50 = vld [vmem:[#allocation9 + $0x200] sm:$0xff]   ;;  %v22727_v15 = vld [vmem:[#allocation14_spill] sm:$0xff] }
 0xe6d   :  { %16538 = vmatprep.subr.bf16.mxu1 %v18154_v12 }
 0xe70   :  { %16539 = vmatpush3.bf16.msra.mxu1 %v18154_v12  ;;  %v22728_v12 = vld [vmem:[#allocation34_spill] sm:$0xff] }
 0xe71   :  { %16540 = vmatprep.subr.bf16.mxu1 %v18155_v22 }
 0xe73   :  { %16477 = vmatmul.mubr.bf16.gmra.mrb[32].mxu1 %v20960_v25  ;;  %v22713_v25 = vld [vmem:[#allocation22_spill] sm:$0xff] }
 0xe74   :  { %16480 = vmatprep.mubr.msk.bf16.mxu1 %vm18810_vm9, %v22643_v54  ;;  %16541 = vmatpush3.bf16.msra.mxu1 %v18155_v22  ;;  %v22722_v54 = vld [vmem:[#allocation27_spill] sm:$0xff] }
 0xe75   :  { %16542 = vmatprep.subr.bf16.mxu1 %v18156_v41  ;;  %v18165_v22 = vld [vmem:[#allocation9 + $0x230] sm:$0xff]  }
 0xe78   :  { %16543 = vmatpush3.bf16.msra.mxu1 %v18156_v41  ;;  %v18166_v41 = vld [vmem:[#allocation9 + $0x238] sm:$0xff]  }
 0xe79   :  { %16544 = vmatprep.subr.bf16.mxu1 %v18157_v18 }
 0xe7b   :  { %16481 = vmatmul.mubr.bf16.gmra.mrb[36].mxu1 %v21000_v58  ;;  %v22714_v58 = vld [vmem:[#allocation44_spill] sm:$0xff] }
 0xe7c   :  { %16484 = vmatprep.mubr.msk.bf16.mxu1 %vm18810_vm9, %v21018_v56  ;;  %16545 = vmatpush3.bf16.msra.mxu1 %v18157_v18  ;;  %v22711_v56 = vld [vmem:[#allocation18_spill] sm:$0xff]  ;;  %v22729_v18 = vld [vmem:[#allocation35_spill] sm:$0xff] }
 0xe7d   :  { %16546 = vmatprep.subr.bf16.mxu1 %v18158_v14 }
 0xe80   :  { %16547 = vmatpush3.bf16.msra.mxu1 %v18158_v14  ;;  %v22730_v14 = vld [vmem:[#allocation15_spill] sm:$0xff] }
 0xe81   :  { %16612 = vmatprep.subr.bf16.mxu1 %v18159_v50 }
 0xe83   :  { %16485 = vmatmul.mubr.bf16.gmra.mrb[40].mxu1 %v21040_v55  ;;  %v22715_v55 = vld [vmem:[#allocation45_spill] sm:$0xff] }
 0xe84   :  { %16488 = vmatprep.mubr.msk.bf16.mxu1 %vm18810_vm9, %v21058_v8  ;;  %v22712_v8 = vld [vmem:[#allocation21_spill] sm:$0xff] }
 0xe8b   :  { %16489 = vmatmul.mubr.bf16.gmra.mrb[44].mxu1 %v21080_v40  ;;  %v22717_v40 = vld [vmem:[#allocation53_spill] sm:$0xff] }
 0xe8c   :  { %16492 = vmatprep.mubr.msk.bf16.mxu1 %vm18810_vm9, %v21094_v21  ;;  %v22716_v21 = vld [vmem:[#allocation52_spill] sm:$0xff] }
 0xe93   :  { %16493 = vmatmul.mubr.bf16.gmra.mrb[48].mxu1 %v21116_v26  ;;  %v22718_v26 = vld [vmem:[#allocation56_spill] sm:$0xff] }
 0xe94   :  { %16496 = vmatprep.mubr.msk.bf16.mxu1 %vm18810_vm9, %v21126_v11  ;;  %v22719_v11 = vld [vmem:[#allocation57_spill] sm:$0xff] }
 0xe9b   :  { %16497 = vmatmul.mubr.bf16.gmra.mrb[52].mxu1 %v21144_v24  ;;  %v22720_v24 = vld [vmem:[#allocation60_spill] sm:$0xff] }
 0xe9c   :  { %16500 = vmatprep.mubr.msk.bf16.mxu1 %vm18810_vm9, %v22664_v51  ;;  %v18160_v51 = vld [vmem:[#allocation9 + $0x208] sm:$0xff]  }
 0xea3   :  { %16501 = vmatmul.mubr.bf16.gmra.mrb[56].mxu1 %v21174_v3  ;;  %v22721_v3 = vmov 0  }
 0xea4   :  { %16504 = vmatprep.mubr.msk.bf16.mxu1 %vm18810_vm9, %v22711_v56  ;;  %v22732_v56 = vld [vmem:[#allocation38_spill] sm:$0xff] }
 0xeab   :  { %16505 = vmatmul.mubr.bf16.gmra.mrb[60].mxu1 %v22712_v8  ;;  %v22733_v8 = vld [vmem:[#allocation40_spill] sm:$0xff] }
 0xeac   :  { %16508 = vmatprep.mubr.msk.bf16.mxu1 %vm18810_vm9, %v22713_v25  ;;  %v22734_v25 = vld [vmem:[#allocation41_spill] sm:$0xff] }
 0xeb3   :  { %16509 = vmatmul.mubr.bf16.gmra.mrb[64].mxu1 %v22714_v58  ;;  %v22735_v58 = vld [vmem:[#allocation43_spill] sm:$0xff] }
 0xeb4   :  { %16512 = vmatprep.mubr.msk.bf16.mxu1 %vm18810_vm9, %v22715_v55  ;;  %v22736_v55 = vld [vmem:[#allocation19_spill] sm:$0xff] }
 0xebb   :  { %16513 = vmatmul.mubr.bf16.gmra.mrb[68].mxu1 %v22716_v21  ;;  %v22737_v21 = vld [vmem:[#allocation23_spill] sm:$0xff] }
 0xebc   :  { %16516 = vmatprep.mubr.msk.bf16.mxu1 %vm18810_vm9, %v22717_v40  ;;  %v22738_v40 = vld [vmem:[#allocation24_spill] sm:$0xff] }
 0xec3   :  { %16517 = vmatmul.mubr.bf16.gmra.mrb[72].mxu1 %v22718_v26  ;;  %v22739_v26 = vld [vmem:[#allocation48_spill] sm:$0xff] }
 0xec4   :  { %16520 = vmatprep.mubr.msk.bf16.mxu1 %vm18810_vm9, %v22719_v11  ;;  %v22740_v11 = vld [vmem:[#allocation50_spill] sm:$0xff] }
 0xecb   :  { %16521 = vmatmul.mubr.bf16.gmra.mrb[76].mxu1 %v22720_v24  ;;  %v22741_v24 = vld [vmem:[#allocation55_spill] sm:$0xff] }
 0xecc   :  { %16524 = vmatprep.mubr.msk.bf16.mxu1 %vm18810_vm9, %v21714_v0  ;;  %v22725_v0 = vld [vmem:[#allocation32_spill] sm:$0xff] }
 0xed3   :  { %16525 = vmatmul.mubr.bf16.gmra.mrb[80].mxu1 %v21723_v63  ;;  %v22726_v63 = vld [vmem:[#allocation33_spill] sm:$0xff] }
 0xed4   :  { %16528 = vmatprep.mubr.bf16.mxu1 %v22721_v3 }
 0xedb   :  { %16529 = vmatmul.mubr.bf16.gmra.mrb[84].mxu1 %v22721_v3  ;;  %v22742_v3 = vld [vmem:[#allocation58_spill] sm:$0xff] }
 0xedc   :  { %16548 = vmatprep.mubr.bf16.mxu1 %v22722_v54  ;;  %v22743_v54 = vld [vmem:[#allocation59_spill] sm:$0xff] }
 0xee3   :  { %16549 = vmatmul.mubr.bf16.vlgmr.msra.gmra.mrb[24].mxu1 %v22723_v32 }
 0xee4   :  { %16613 = vmatpush3.bf16.msra.mxu1 %v18159_v50  ;;  %16552 = vmatprep.mubr.bf16.mxu1 %v22724_v30  ;;  %v22731_v50 = vld [vmem:[#allocation36_spill] sm:$0xff] }
 0xee5   :  { %16614 = vmatprep.subr.bf16.mxu1 %v18160_v51 }
 0xee8   :  { %16615 = vmatpush3.bf16.msra.mxu1 %v18160_v51  ;;  %v22745_v51 = vld [vmem:[#allocation62_spill] sm:$0xff] }
 0xee9   :  { %16616 = vmatprep.subr.bf16.mxu1 %v18161_v59 }
 0xeeb   :  { %16553 = vmatmul.mubr.bf16.gmra.mrb[28].mxu1 %v22725_v0  ;;  %v22756_v0 = vld [vmem:[#allocation69_spill] sm:$0xff] }
 0xeec   :  { %16556 = vmatprep.mubr.bf16.mxu1 %v22726_v63  ;;  %16617 = vmatpush3.bf16.msra.mxu1 %v18161_v59 }
 0xeed   :  { %16618 = vmatprep.subr.bf16.mxu1 %v18162_v45 }
 0xef0   :  { %16619 = vmatpush3.bf16.msra.mxu1 %v18162_v45 }
 0xef1   :  { %16620 = vmatprep.subr.bf16.mxu1 %v18163_v37 }
 0xef3   :  { %16557 = vmatmul.mubr.bf16.gmra.mrb[32].mxu1 %v22727_v15  ;;  %v22757_v15 = vld [vmem:[#allocation70_spill] sm:$0xff] }
 0xef4   :  { %16560 = vmatprep.mubr.bf16.mxu1 %v22728_v12  ;;  %16621 = vmatpush3.bf16.msra.mxu1 %v18163_v37 }
 0xef5   :  { %16622 = vmatprep.subr.bf16.mxu1 %v18164_v53 }
 0xef8   :  { %16623 = vmatpush3.bf16.msra.mxu1 %v18164_v53 }
 0xef9   :  { %16624 = vmatprep.subr.bf16.mxu1 %v18165_v22 }
 0xefb   :  { %16561 = vmatmul.mubr.bf16.gmra.mrb[36].mxu1 %v22729_v18  ;;  %v22758_v18 = vld [vmem:[#allocation71_spill] sm:$0xff] }
 0xefc   :  { %16564 = vmatprep.mubr.bf16.mxu1 %v22730_v14  ;;  %16625 = vmatpush3.bf16.msra.mxu1 %v18165_v22 }
 0xefd   :  { %16626 = vmatprep.subr.bf16.mxu1 %v18166_v41 }
 0xf00   :  { %16627 = vmatpush3.bf16.msra.mxu1 %v18166_v41 }
 0xf03   :  { %16565 = vmatmul.mubr.bf16.gmra.mrb[40].mxu1 %v22731_v50 }
 0xf04   :  { %16568 = vmatprep.mubr.bf16.mxu1 %v22732_v56 }
 0xf0b   :  { %16569 = vmatmul.mubr.bf16.gmra.mrb[44].mxu1 %v22733_v8  ;;  %v22759_v8 = vld [vmem:[#allocation72_spill] sm:$0xff] }
 0xf0c   :  { %16572 = vmatprep.mubr.bf16.mxu1 %v22734_v25 }
 0xf13   :  { %16573 = vmatmul.mubr.bf16.gmra.mrb[48].mxu1 %v22735_v58 }
 0xf14   :  { %16576 = vmatprep.mubr.bf16.mxu1 %v22697_v31  ;;  %v22744_v31 = vld [vmem:[#allocation61_spill] sm:$0xff] }
 0xf1b   :  { %16577 = vmatmul.mubr.bf16.gmra.mrb[52].mxu1 %v22736_v55 }
 0xf1c   :  { %16580 = vmatprep.mubr.bf16.mxu1 %v22699_v46  ;;  %v22746_v46 = vld [vmem:[#allocation13_spill] sm:$0xff] }
 0xf23   :  { %16581 = vmatmul.mubr.bf16.gmra.mrb[56].mxu1 %v22737_v21 }
 0xf24   :  { %16584 = vmatprep.mubr.bf16.mxu1 %v22738_v40 }
 0xf2b   :  { %16585 = vmatmul.mubr.bf16.gmra.mrb[60].mxu1 %v22739_v26 }
 0xf2c   :  { %16588 = vmatprep.mubr.bf16.mxu1 %v22740_v11 }
 0xf33   :  { %16589 = vmatmul.mubr.bf16.gmra.mrb[64].mxu1 %v22704_v16 }
 0xf34   :  { %16592 = vmatprep.mubr.bf16.mxu1 %v22741_v24  ;;  %v22760_v24 = vld [vmem:[#allocation73_spill] sm:$0xff] }
 0xf3b   :  { %16593 = vmatmul.mubr.bf16.gmra.mrb[68].mxu1 %v22742_v3 }
 0xf3c   :  { %16596 = vmatprep.mubr.bf16.mxu1 %v22743_v54 }
 0xf43   :  { %16597 = vmatmul.mubr.bf16.gmra.mrb[72].mxu1 %v22744_v31 }
 0xf44   :  { %16600 = vmatprep.mubr.bf16.mxu1 %v22745_v51  ;;  %v22761_v51 = vld [vmem:[#allocation74_spill] sm:$0xff] }
 0xf4b   :  { %16601 = vmatmul.mubr.bf16.gmra.mrb[76].mxu1 %v22709_v42 }
 0xf4c   :  { %16604 = vmatprep.mubr.bf16.mxu1 %v21763_v35  ;;  %v22755_v35 = vld [vmem:[#allocation68_spill] sm:$0xff] }
 0xf53   :  { %16605 = vmatmul.mubr.bf16.gmra.mrb[80].mxu1 %v21771_v1  ;;  %v22747_v1 = vld [vmem:[#allocation16_spill] sm:$0xff] }
 0xf54   :  { %16608 = vmatprep.mubr.bf16.mxu1 %v22746_v46 }
 0xf5b   :  { %16609 = vmatmul.mubr.bf16.gmra.mrb[84].mxu1 %v22746_v46 }
 0xf5c   :  { %16628 = vmatprep.mubr.bf16.mxu1 %v21379_v44 }
 0xf63   :  { %16629 = vmatmul.mubr.bf16.vlgmr.msra.gmra.mrb[24].mxu1 %v21386_v27  ;;  %v21944_v27 = vld [vmem:[%s22346_s16] ss:$0 sm:$0xff] }
 0xf64   :  { %16632 = vmatprep.mubr.bf16.mxu1 %v21390_v33  ;;  %v22748_v33 = vld [vmem:[#allocation46_spill] sm:$0xff] }
 0xf6b   :  { %16633 = vmatmul.mubr.bf16.gmra.mrb[28].mxu1 %v21397_v43 }
 0xf6c   :  { %16636 = vmatprep.mubr.bf16.mxu1 %v21401_v13 }
 0xf73   :  { %16637 = vmatmul.mubr.bf16.gmra.mrb[32].mxu1 %v21411_v10  ;;  %v22749_v10 = vld [vmem:[#allocation47_spill] sm:$0xff] }
 0xf74   :  { %16640 = vmatprep.mubr.bf16.mxu1 %v21415_v47 }
 0xf7b   :  { %16641 = vmatmul.mubr.bf16.gmra.mrb[36].mxu1 %v21422_v38 }
 0xf7c   :  { %16644 = vmatprep.mubr.bf16.mxu1 %v21426_v52 }
 0xf83   :  { %16645 = vmatmul.mubr.bf16.gmra.mrb[40].mxu1 %v21433_v20  ;;  %v22750_v20 = vld [vmem:[#allocation49_spill] sm:$0xff] }
 0xf84   :  { %16648 = vmatprep.mubr.bf16.mxu1 %v21437_v39 }
 0xf8b   :  { %16649 = vmatmul.mubr.bf16.gmra.mrb[44].mxu1 %v21444_v57 }
 0xf8c   :  { %16652 = vmatprep.mubr.bf16.mxu1 %v21448_v61 }
 0xf93   :  { %16653 = vmatmul.mubr.bf16.gmra.mrb[48].mxu1 %v21455_v5  ;;  %v22751_v5 = vld [vmem:[#allocation51_spill] sm:$0xff] }
 0xf94   :  { %16656 = vmatprep.mubr.bf16.mxu1 %v21459_v23 }
 0xf9b   :  { %16657 = vmatmul.mubr.bf16.gmra.mrb[52].mxu1 %v21466_v19 }
 0xf9c   :  { %16660 = vmatprep.mubr.bf16.mxu1 %v21470_v2 }
 0xfa3   :  { %16661 = vmatmul.mubr.bf16.gmra.mrb[56].mxu1 %v21477_v48 }
 0xfa4   :  { %16664 = vmatprep.mubr.bf16.mxu1 %v21481_v7  ;;  %v22752_v7 = vld [vmem:[#allocation64_spill] sm:$0xff] }
 0xfab   :  { %16665 = vmatmul.mubr.bf16.gmra.mrb[60].mxu1 %v21488_v29 }
 0xfac   :  { %16668 = vmatprep.mubr.bf16.mxu1 %v21492_v34 }
 0xfb3   :  { %16669 = vmatmul.mubr.bf16.gmra.mrb[64].mxu1 %v22710_v6 }
 0xfb4   :  { %16672 = vmatprep.mubr.bf16.mxu1 %v21507_v17 }
 0xfbb   :  { %16673 = vmatmul.mubr.bf16.gmra.mrb[68].mxu1 %v21520_v49 }
 0xfbc   :  { %16676 = vmatprep.mubr.bf16.mxu1 %v21526_v36 }
 0xfc3   :  { %16677 = vmatmul.mubr.bf16.gmra.mrb[72].mxu1 %v21539_v62  ;;  %v22753_v62 = vld [vmem:[#allocation66_spill] sm:$0xff] }
 0xfc4   :  { %16680 = vmatprep.mubr.bf16.mxu1 %v21545_v28  ;;  %v22754_v28 = vld [vmem:[#allocation67_spill] sm:$0xff] }
 0xfcb   :  { %16681 = vmatmul.mubr.bf16.gmra.mrb[76].mxu1 %v21556_v60 }
 0xfcc   :  { %16684 = vmatprep.mubr.bf16.mxu1 %v21807_v4 }
 0xfd3   :  { %16685 = vmatmul.mubr.bf16.gmra.mrb[80].mxu1 %v21812_v9 }
 0xfd4   :  { %16688 = vmatprep.mubr.bf16.mxu1 %v22747_v1 }
 0xfdb   :  { %16689 = vmatmul.mubr.bf16.gmra.mrb[84].mxu1 %v22747_v1 }
0x1036   :  { %v16630_v44 = vpop.f32.mrb[24].mxu1 }
0x1037   :  { %v16774_v43 = vadd.f32 %v16630_v44, %v22748_v33  ;;  %v13023_v13 = vpop.f32.mrb[25].mxu1  ;;  %v22762_v33 = vld [vmem:[#allocation75_spill] sm:$0xff] }
0x1038   :  { %v16775_v47 = vadd.f32 %v13023_v13, %v22749_v10  ;;  %v16631_v38 = vpop.f32.mrb[26].mxu1 }
0x1039   :  { %v13351_v52 = vadd.f32 %v16774_v43, %v21944_v27  ;;  %v16776_v39 = vadd.f32 %v16631_v38, %v22750_v20  ;;  %v13026_v57 = vpop.f32.mrb[27].mxu1 }
0x103a   :  { %v13349_v61 = vadd.f32 %v16775_v47, %v21944_v27  ;;  %v16777_v23 = vadd.f32 %v13026_v57, %v22751_v5  ;;  %v22763_v47 = vld [vmem:[#allocation76_spill] sm:$0xff] }
0x103b   :  { %18173 = vtanh.f32 %v13351_v52  ;;  %v13352_v19 = vadd.f32 %v16776_v39, %v21944_v27 }
0x103c   :  { %18175 = vtanh.f32 %v13349_v61  ;;  %v13350_v2 = vadd.f32 %v16777_v23, %v21944_v27  ;;  %v22764_v23 = vld [vmem:[#allocation77_spill] sm:$0xff] }
0x103d   :  { %18177 = vtanh.f32 %v13352_v19 }
0x103e   :  { %18179 = vtanh.f32 %v13350_v2  ;;  %v16634_v48 = vpop.f32.mrb[28].mxu1 }
0x103f   :  { %v16778_v29 = vadd.f32 %v16634_v48, %v22752_v7  ;;  %v13039_v34 = vpop.f32.mrb[29].mxu1  ;;  %v22765_v7 = vld [vmem:[#allocation78_spill] sm:$0xff] }
0x1040   :  { %v16779_v49 = vadd.f32 %v13039_v34, %v22753_v62  ;;  %v16635_v17 = vpop.f32.mrb[30].mxu1 }
0x1041   :  { %v13355_v36 = vadd.f32 %v16778_v29, %v21944_v27  ;;  %v16780_v60 = vadd.f32 %v16635_v17, %v22754_v28  ;;  %v13042_v42 = vpop.f32.mrb[31].mxu1 }
0x1042   :  { %v13353_v16 = vadd.f32 %v16779_v49, %v21944_v27  ;;  %v16781_v6 = vadd.f32 %v13042_v42, %v22755_v35  ;;  %v22766_v49 = vld [vmem:[#allocation79_spill] sm:$0xff] }
0x1043   :  { %18181 = vtanh.f32 %v13355_v36  ;;  %v13356_v4 = vadd.f32 %v16780_v60, %v21944_v27  ;;  %v22767_v60 = vld [vmem:[#allocation80_spill] sm:$0xff] }
0x1044   :  { %18183 = vtanh.f32 %v13353_v16  ;;  %v13354_v9 = vadd.f32 %v16781_v6, %v21944_v27 }
0x1045   :  { %v18174_v32 = vpop.eup %18173  ;;  %18185 = vtanh.f32 %v13356_v4 }
0x1046   :  { %v18176_v30 = vpop.eup %18175  ;;  %13480 = vst.msk [vmem:[%s22347_s17 + $0x10] sm:$0xff] %vm13477_vm10, %v18174_v32  ;;  %18187 = vtanh.f32 %v13354_v9  ;;  %v16638_v59 = vpop.f32.mrb[32].mxu1 }
0x1047   :  { %v18178_v45 = vpop.eup %18177  ;;  %13478 = vst.msk [vmem:[%s22347_s17] sm:$0xff] %vm13477_vm10, %v18176_v30  ;;  %v16782_v63 = vadd.f32 %v16638_v59, %v22756_v0  ;;  %v13055_v37 = vpop.f32.mrb[33].mxu1  ;;  %v22768_v30 = vld [vmem:[#allocation81_spill] sm:$0xff] }
0x1048   :  { %v18180_v53 = vpop.eup %18179  ;;  %13481 = vst.msk [vmem:[%s22347_s17 + $0x18] sm:$0xff] %vm13477_vm10, %v18178_v45  ;;  %v16783_v12 = vadd.f32 %v13055_v37, %v22757_v15  ;;  %v16639_v22 = vpop.f32.mrb[34].mxu1 }
0x1049   :  { %13479 = vst.msk [vmem:[%s22347_s17 + $0x8] sm:$0xff] %vm13477_vm10, %v18180_v53  ;;  %v13359_v41 = vadd.f32 %v16782_v63, %v21944_v27  ;;  %v16784_v14 = vadd.f32 %v16639_v22, %v22758_v18  ;;  %v13058_v50 = vpop.f32.mrb[35].mxu1  ;;  %v22769_v63 = vld [vmem:[#allocation82_spill] sm:$0xff] }
0x104a   :  { %v13357_v56 = vadd.f32 %v16783_v12, %v21944_v27  ;;  %v16785_v25 = vadd.f32 %v13058_v50, %v22759_v8  ;;  %v22770_v12 = vld [vmem:[#allocation83_spill] sm:$0xff] }
0x104b   :  { %18189 = vtanh.f32 %v13359_v41  ;;  %v13360_v58 = vadd.f32 %v16784_v14, %v21944_v27  ;;  %v22771_v14 = vld [vmem:[#allocation84_spill] sm:$0xff] }
0x104c   :  { %18191 = vtanh.f32 %v13357_v56  ;;  %v13358_v55 = vadd.f32 %v16785_v25, %v21944_v27 }
0x104d   :  { %v18182_v21 = vpop.eup %18181  ;;  %18193 = vtanh.f32 %v13360_v58 }
0x104e   :  { %v18184_v40 = vpop.eup %18183  ;;  %13484 = vst.msk [vmem:[%s22347_s17 + $0x30] sm:$0xff] %vm13477_vm10, %v18182_v21  ;;  %18195 = vtanh.f32 %v13358_v55  ;;  %v16642_v26 = vpop.f32.mrb[36].mxu1 }
0x104f   :  { %v18186_v11 = vpop.eup %18185  ;;  %13482 = vst.msk [vmem:[%s22347_s17 + $0x20] sm:$0xff] %vm13477_vm10, %v18184_v40  ;;  %v16786_v3 = vadd.f32 %v16642_v26, %v22760_v24  ;;  %v13071_v54 = vpop.f32.mrb[37].mxu1  ;;  %v22772_v40 = vld [vmem:[#allocation85_spill] sm:$0xff] }
0x1050   :  { %v18188_v31 = vpop.eup %18187  ;;  %13485 = vst.msk [vmem:[%s22347_s17 + $0x38] sm:$0xff] %vm13477_vm10, %v18186_v11  ;;  %v16787_v46 = vadd.f32 %v13071_v54, %v22761_v51  ;;  %v16643_v1 = vpop.f32.mrb[38].mxu1 }
0x1051   :  { %13483 = vst.msk [vmem:[%s22347_s17 + $0x28] sm:$0xff] %vm13477_vm10, %v18188_v31  ;;  %v13363_v44 = vadd.f32 %v16786_v3, %v21944_v27  ;;  %v16788_v43 = vadd.f32 %v16643_v1, %v22762_v33  ;;  %v13074_v13 = vpop.f32.mrb[39].mxu1  ;;  %v22773_v3 = vld [vmem:[#allocation86_spill] sm:$0xff] }
0x1052   :  { %v13361_v10 = vadd.f32 %v16787_v46, %v21944_v27  ;;  %v16789_v38 = vadd.f32 %v13074_v13, %v22763_v47  ;;  %v22774_v46 = vld [vmem:[#allocation87_spill] sm:$0xff] }
0x1053   :  { %18197 = vtanh.f32 %v13363_v44  ;;  %v13364_v52 = vadd.f32 %v16788_v43, %v21944_v27  ;;  %v22775_v43 = vld [vmem:[#allocation88_spill] sm:$0xff] }
0x1054   :  { %18199 = vtanh.f32 %v13361_v10  ;;  %v13362_v20 = vadd.f32 %v16789_v38, %v21944_v27 }
0x1055   :  { %v18190_v39 = vpop.eup %18189  ;;  %18201 = vtanh.f32 %v13364_v52 }
0x1056   :  { %v18192_v57 = vpop.eup %18191  ;;  %13488 = vst.msk [vmem:[%s22347_s17 + $0x50] sm:$0xff] %vm13477_vm10, %v18190_v39  ;;  %18203 = vtanh.f32 %v13362_v20  ;;  %v16646_v61 = vpop.f32.mrb[40].mxu1 }
0x1057   :  { %v18194_v5 = vpop.eup %18193  ;;  %13486 = vst.msk [vmem:[%s22347_s17 + $0x40] sm:$0xff] %vm13477_vm10, %v18192_v57  ;;  %v16790_v19 = vadd.f32 %v16646_v61, %v22764_v23  ;;  %v13087_v2 = vpop.f32.mrb[41].mxu1  ;;  %v22776_v57 = vld [vmem:[#allocation89_spill] sm:$0xff] }
0x1058   :  { %v18196_v48 = vpop.eup %18195  ;;  %13489 = vst.msk [vmem:[%s22347_s17 + $0x58] sm:$0xff] %vm13477_vm10, %v18194_v5  ;;  %v16791_v29 = vadd.f32 %v13087_v2, %v22765_v7  ;;  %v16647_v34 = vpop.f32.mrb[42].mxu1 }
0x1059   :  { %13487 = vst.msk [vmem:[%s22347_s17 + $0x48] sm:$0xff] %vm13477_vm10, %v18196_v48  ;;  %v13367_v62 = vadd.f32 %v16790_v19, %v21944_v27  ;;  %v16792_v17 = vadd.f32 %v16647_v34, %v22766_v49  ;;  %v13090_v36 = vpop.f32.mrb[43].mxu1  ;;  %v22777_v19 = vld [vmem:[#allocation90_spill] sm:$0xff] }
0x105a   :  { %v13365_v28 = vadd.f32 %v16791_v29, %v21944_v27  ;;  %v16793_v42 = vadd.f32 %v13090_v36, %v22767_v60  ;;  %v22778_v29 = vld [vmem:[#allocation91_spill] sm:$0xff] }
0x105b   :  { %18205 = vtanh.f32 %v13367_v62  ;;  %v13368_v16 = vadd.f32 %v16792_v17, %v21944_v27  ;;  %v22779_v17 = vld [vmem:[#allocation28_spill] sm:$0xff] }
0x105c   :  { %18207 = vtanh.f32 %v13365_v28  ;;  %v13366_v35 = vadd.f32 %v16793_v42, %v21944_v27 }
0x105d   :  { %v18198_v6 = vpop.eup %18197  ;;  %18209 = vtanh.f32 %v13368_v16 }
0x105e   :  { %v18200_v4 = vpop.eup %18199  ;;  %13492 = vst.msk [vmem:[%s22347_s17 + $0x70] sm:$0xff] %vm13477_vm10, %v18198_v6  ;;  %18211 = vtanh.f32 %v13366_v35  ;;  %v16650_v9 = vpop.f32.mrb[44].mxu1 }
0x105f   :  { %v18202_v32 = vpop.eup %18201  ;;  %13490 = vst.msk [vmem:[%s22347_s17 + $0x60] sm:$0xff] %vm13477_vm10, %v18200_v4  ;;  %v16794_v59 = vadd.f32 %v16650_v9, %v22768_v30  ;;  %v13103_v45 = vpop.f32.mrb[45].mxu1  ;;  %v22780_v4 = vld [vmem:[#allocation92_spill] sm:$0xff] }
0x1060   :  { %v18204_v0 = vpop.eup %18203  ;;  %13493 = vst.msk [vmem:[%s22347_s17 + $0x78] sm:$0xff] %vm13477_vm10, %v18202_v32  ;;  %v16795_v37 = vadd.f32 %v13103_v45, %v22769_v63  ;;  %v16651_v53 = vpop.f32.mrb[46].mxu1 }
0x1061   :  { %13491 = vst.msk [vmem:[%s22347_s17 + $0x68] sm:$0xff] %vm13477_vm10, %v18204_v0  ;;  %v13371_v15 = vadd.f32 %v16794_v59, %v21944_v27  ;;  %v16796_v22 = vadd.f32 %v16651_v53, %v22770_v12  ;;  %v13106_v41 = vpop.f32.mrb[47].mxu1  ;;  %v22781_v59 = vld [vmem:[#allocation93_spill] sm:$0xff] }
0x1062   :  { %v13369_v18 = vadd.f32 %v16795_v37, %v21944_v27  ;;  %v16797_v50 = vadd.f32 %v13106_v41, %v22771_v14  ;;  %v22782_v37 = vld [vmem:[#allocation94_spill] sm:$0xff] }
0x1063   :  { %18213 = vtanh.f32 %v13371_v15  ;;  %v13372_v56 = vadd.f32 %v16796_v22, %v21944_v27  ;;  %v22783_v22 = vld [vmem:[#allocation31_spill] sm:$0xff] }
0x1064   :  { %18215 = vtanh.f32 %v13369_v18  ;;  %v13370_v8 = vadd.f32 %v16797_v50, %v21944_v27 }
0x1065   :  { %v18206_v25 = vpop.eup %18205  ;;  %18217 = vtanh.f32 %v13372_v56 }
0x1066   :  { %v18208_v58 = vpop.eup %18207  ;;  %13496 = vst.msk [vmem:[%s22347_s17 + $0x90] sm:$0xff] %vm13477_vm10, %v18206_v25  ;;  %18219 = vtanh.f32 %v13370_v8  ;;  %v16654_v55 = vpop.f32.mrb[48].mxu1 }
0x1067   :  { %v18210_v21 = vpop.eup %18209  ;;  %13494 = vst.msk [vmem:[%s22347_s17 + $0x80] sm:$0xff] %vm13477_vm10, %v18208_v58  ;;  %v16798_v26 = vadd.f32 %v16654_v55, %v22772_v40  ;;  %v13119_v11 = vpop.f32.mrb[49].mxu1  ;;  %v22784_v58 = vld [vmem:[#allocation95_spill] sm:$0xff] }
0x1068   :  { %v18212_v24 = vpop.eup %18211  ;;  %13497 = vst.msk [vmem:[%s22347_s17 + $0x98] sm:$0xff] %vm13477_vm10, %v18210_v21  ;;  %v16799_v54 = vadd.f32 %v13119_v11, %v22773_v3  ;;  %v16655_v31 = vpop.f32.mrb[50].mxu1 }
0x1069   :  { %13495 = vst.msk [vmem:[%s22347_s17 + $0x88] sm:$0xff] %vm13477_vm10, %v18212_v24  ;;  %v13375_v51 = vadd.f32 %v16798_v26, %v21944_v27  ;;  %v16800_v1 = vadd.f32 %v16655_v31, %v22774_v46  ;;  %v13122_v44 = vpop.f32.mrb[51].mxu1  ;;  %v22785_v26 = vld [vmem:[#allocation96_spill] sm:$0xff] }
0x106a   :  { %v13373_v33 = vadd.f32 %v16799_v54, %v21944_v27  ;;  %v16801_v13 = vadd.f32 %v13122_v44, %v22775_v43  ;;  %v22786_v54 = vld [vmem:[#allocation97_spill] sm:$0xff] }
0x106b   :  { %18221 = vtanh.f32 %v13375_v51  ;;  %v13376_v10 = vadd.f32 %v16800_v1, %v21944_v27  ;;  %v22787_v1 = vld [vmem:[#allocation98_spill] sm:$0xff] }
0x106c   :  { %18223 = vtanh.f32 %v13373_v33  ;;  %v13374_v47 = vadd.f32 %v16801_v13, %v21944_v27 }
0x106d   :  { %v18214_v38 = vpop.eup %18213  ;;  %18225 = vtanh.f32 %v13376_v10 }
0x106e   :  { %v18216_v52 = vpop.eup %18215  ;;  %13500 = vst.msk [vmem:[%s22347_s17 + $0xb0] sm:$0xff] %vm13477_vm10, %v18214_v38  ;;  %18227 = vtanh.f32 %v13374_v47  ;;  %v16658_v20 = vpop.f32.mrb[52].mxu1 }
0x106f   :  { %v18218_v39 = vpop.eup %18217  ;;  %13498 = vst.msk [vmem:[%s22347_s17 + $0xa0] sm:$0xff] %vm13477_vm10, %v18216_v52  ;;  %v16802_v61 = vadd.f32 %v16658_v20, %v22776_v57  ;;  %v13135_v5 = vpop.f32.mrb[53].mxu1  ;;  %v22788_v52 = vld [vmem:[#allocation99_spill] sm:$0xff] }
0x1070   :  { %v18220_v23 = vpop.eup %18219  ;;  %13501 = vst.msk [vmem:[%s22347_s17 + $0xb8] sm:$0xff] %vm13477_vm10, %v18218_v39  ;;  %v16803_v2 = vadd.f32 %v13135_v5, %v22777_v19  ;;  %v16659_v48 = vpop.f32.mrb[54].mxu1 }
0x1071   :  { %13499 = vst.msk [vmem:[%s22347_s17 + $0xa8] sm:$0xff] %vm13477_vm10, %v18220_v23  ;;  %v13379_v7 = vadd.f32 %v16802_v61, %v21944_v27  ;;  %v16804_v34 = vadd.f32 %v16659_v48, %v22778_v29  ;;  %v13138_v62 = vpop.f32.mrb[55].mxu1  ;;  %v22789_v61 = vld [vmem:[#allocation100_spill] sm:$0xff] }
0x1072   :  { %v13377_v49 = vadd.f32 %v16803_v2, %v21944_v27  ;;  %v16805_v36 = vadd.f32 %v13138_v62, %v22779_v17  ;;  %v22790_v2 = vld [vmem:[#allocation101_spill] sm:$0xff] }
0x1073   :  { %18229 = vtanh.f32 %v13379_v7  ;;  %v13380_v28 = vadd.f32 %v16804_v34, %v21944_v27  ;;  %v22791_v34 = vld [vmem:[#allocation102_spill] sm:$0xff] }
0x1074   :  { %18231 = vtanh.f32 %v13377_v49  ;;  %v13378_v60 = vadd.f32 %v16805_v36, %v21944_v27 }
0x1075   :  { %v18222_v42 = vpop.eup %18221  ;;  %18233 = vtanh.f32 %v13380_v28 }
0x1076   :  { %v18224_v16 = vpop.eup %18223  ;;  %13504 = vst.msk [vmem:[%s22347_s17 + $0xd0] sm:$0xff] %vm13477_vm10, %v18222_v42  ;;  %18235 = vtanh.f32 %v13378_v60  ;;  %v16662_v35 = vpop.f32.mrb[56].mxu1 }
0x1077   :  { %v18226_v6 = vpop.eup %18225  ;;  %13502 = vst.msk [vmem:[%s22347_s17 + $0xc0] sm:$0xff] %vm13477_vm10, %v18224_v16  ;;  %v16806_v9 = vadd.f32 %v16662_v35, %v22780_v4  ;;  %v13151_v32 = vpop.f32.mrb[57].mxu1  ;;  %v22792_v16 = vld [vmem:[#allocation103_spill] sm:$0xff] }
0x1078   :  { %v18228_v30 = vpop.eup %18227  ;;  %13505 = vst.msk [vmem:[%s22347_s17 + $0xd8] sm:$0xff] %vm13477_vm10, %v18226_v6  ;;  %v16807_v45 = vadd.f32 %v13151_v32, %v22781_v59  ;;  %v16663_v0 = vpop.f32.mrb[58].mxu1 }
0x1079   :  { %13503 = vst.msk [vmem:[%s22347_s17 + $0xc8] sm:$0xff] %vm13477_vm10, %v18228_v30  ;;  %v13383_v63 = vadd.f32 %v16806_v9, %v21944_v27  ;;  %v16808_v53 = vadd.f32 %v16663_v0, %v22782_v37  ;;  %v13154_v15 = vpop.f32.mrb[59].mxu1  ;;  %v22793_v9 = vld [vmem:[#allocation104_spill] sm:$0xff] }
0x107a   :  { %v13381_v12 = vadd.f32 %v16807_v45, %v21944_v27  ;;  %v16809_v41 = vadd.f32 %v13154_v15, %v22783_v22  ;;  %v22794_v45 = vld [vmem:[#allocation105_spill] sm:$0xff] }
0x107b   :  { %18237 = vtanh.f32 %v13383_v63  ;;  %v13384_v18 = vadd.f32 %v16808_v53, %v21944_v27  ;;  %v22795_v53 = vld [vmem:[#allocation106_spill] sm:$0xff] }
0x107c   :  { %18239 = vtanh.f32 %v13381_v12  ;;  %v13382_v14 = vadd.f32 %v16809_v41, %v21944_v27 }
0x107d   :  { %v18230_v50 = vpop.eup %18229  ;;  %18241 = vtanh.f32 %v13384_v18 }
0x107e   :  { %v18232_v56 = vpop.eup %18231  ;;  %13508 = vst.msk [vmem:[%s22347_s17 + $0xf0] sm:$0xff] %vm13477_vm10, %v18230_v50  ;;  %18243 = vtanh.f32 %v13382_v14  ;;  %v16666_v8 = vpop.f32.mrb[60].mxu1 }
0x107f   :  { %v18234_v25 = vpop.eup %18233  ;;  %13506 = vst.msk [vmem:[%s22347_s17 + $0xe0] sm:$0xff] %vm13477_vm10, %v18232_v56  ;;  %v16810_v55 = vadd.f32 %v16666_v8, %v22784_v58  ;;  %v13167_v21 = vpop.f32.mrb[61].mxu1  ;;  %v22796_v56 = vld [vmem:[#allocation107_spill] sm:$0xff] }
0x1080   :  { %v18236_v40 = vpop.eup %18235  ;;  %13509 = vst.msk [vmem:[%s22347_s17 + $0xf8] sm:$0xff] %vm13477_vm10, %v18234_v25  ;;  %v16811_v11 = vadd.f32 %v13167_v21, %v22785_v26  ;;  %v16667_v24 = vpop.f32.mrb[62].mxu1 }
0x1081   :  { %13507 = vst.msk [vmem:[%s22347_s17 + $0xe8] sm:$0xff] %vm13477_vm10, %v18236_v40  ;;  %v13387_v3 = vadd.f32 %v16810_v55, %v21944_v27  ;;  %v16812_v31 = vadd.f32 %v16667_v24, %v22786_v54  ;;  %v13170_v51 = vpop.f32.mrb[63].mxu1  ;;  %v22797_v55 = vld [vmem:[#allocation108_spill] sm:$0xff] }
0x1082   :  { %v13385_v46 = vadd.f32 %v16811_v11, %v21944_v27  ;;  %v16813_v44 = vadd.f32 %v13170_v51, %v22787_v1  ;;  %v22798_v11 = vld [vmem:[#allocation109_spill] sm:$0xff] }
0x1083   :  { %18245 = vtanh.f32 %v13387_v3  ;;  %v13388_v33 = vadd.f32 %v16812_v31, %v21944_v27  ;;  %v22799_v31 = vld [vmem:[#allocation110_spill] sm:$0xff] }
0x1084   :  { %18247 = vtanh.f32 %v13385_v46  ;;  %v13386_v43 = vadd.f32 %v16813_v44, %v21944_v27 }
0x1085   :  { %v18238_v13 = vpop.eup %18237  ;;  %18249 = vtanh.f32 %v13388_v33 }
0x1086   :  { %v18240_v10 = vpop.eup %18239  ;;  %13512 = vst.msk [vmem:[%s22347_s17 + $0x110] sm:$0xff] %vm13477_vm10, %v18238_v13  ;;  %18251 = vtanh.f32 %v13386_v43  ;;  %v16670_v47 = vpop.f32.mrb[64].mxu1 }
0x1087   :  { %v18242_v38 = vpop.eup %18241  ;;  %13510 = vst.msk [vmem:[%s22347_s17 + $0x100] sm:$0xff] %vm13477_vm10, %v18240_v10  ;;  %v16814_v20 = vadd.f32 %v16670_v47, %v22788_v52  ;;  %v13183_v39 = vpop.f32.mrb[65].mxu1  ;;  %v22800_v10 = vld [vmem:[#allocation111_spill] sm:$0xff] }
0x1088   :  { %v18244_v57 = vpop.eup %18243  ;;  %13513 = vst.msk [vmem:[%s22347_s17 + $0x118] sm:$0xff] %vm13477_vm10, %v18242_v38  ;;  %v16815_v5 = vadd.f32 %v13183_v39, %v22789_v61  ;;  %v16671_v23 = vpop.f32.mrb[66].mxu1 }
0x1089   :  { %13511 = vst.msk [vmem:[%s22347_s17 + $0x108] sm:$0xff] %vm13477_vm10, %v18244_v57  ;;  %v13391_v19 = vadd.f32 %v16814_v20, %v21944_v27  ;;  %v16816_v48 = vadd.f32 %v16671_v23, %v22790_v2  ;;  %v13186_v7 = vpop.f32.mrb[67].mxu1  ;;  %v22801_v20 = vld [vmem:[#allocation112_spill] sm:$0xff] }
0x108a   :  { %v13389_v29 = vadd.f32 %v16815_v5, %v21944_v27  ;;  %v16817_v62 = vadd.f32 %v13186_v7, %v22791_v34  ;;  %v22802_v5 = vld [vmem:[#allocation113_spill] sm:$0xff] }
0x108b   :  { %18253 = vtanh.f32 %v13391_v19  ;;  %v13392_v49 = vadd.f32 %v16816_v48, %v21944_v27  ;;  %v22803_v48 = vld [vmem:[#allocation42_spill] sm:$0xff] }
0x108c   :  { %18255 = vtanh.f32 %v13389_v29  ;;  %v13390_v17 = vadd.f32 %v16817_v62, %v21944_v27 }
0x108d   :  { %v18246_v36 = vpop.eup %18245  ;;  %18257 = vtanh.f32 %v13392_v49 }
0x108e   :  { %v18248_v28 = vpop.eup %18247  ;;  %13516 = vst.msk [vmem:[%s22347_s17 + $0x130] sm:$0xff] %vm13477_vm10, %v18246_v36  ;;  %18259 = vtanh.f32 %v13390_v17  ;;  %v16674_v60 = vpop.f32.mrb[68].mxu1 }
0x108f   :  { %v18250_v42 = vpop.eup %18249  ;;  %13514 = vst.msk [vmem:[%s22347_s17 + $0x120] sm:$0xff] %vm13477_vm10, %v18248_v28  ;;  %v16818_v35 = vadd.f32 %v16674_v60, %v22792_v16  ;;  %v13199_v6 = vpop.f32.mrb[69].mxu1  ;;  %v22804_v28 = vld [vmem:[#allocation114_spill] sm:$0xff] }
0x1090   :  { %v18252_v4 = vpop.eup %18251  ;;  %13517 = vst.msk [vmem:[%s22347_s17 + $0x138] sm:$0xff] %vm13477_vm10, %v18250_v42  ;;  %v16819_v32 = vadd.f32 %v13199_v6, %v22793_v9  ;;  %v16675_v30 = vpop.f32.mrb[70].mxu1 }
0x1091   :  { %13515 = vst.msk [vmem:[%s22347_s17 + $0x128] sm:$0xff] %vm13477_vm10, %v18252_v4  ;;  %v13395_v59 = vadd.f32 %v16818_v35, %v21944_v27  ;;  %v16820_v0 = vadd.f32 %v16675_v30, %v22794_v45  ;;  %v13202_v63 = vpop.f32.mrb[71].mxu1  ;;  %v22805_v35 = vld [vmem:[#allocation115_spill] sm:$0xff] }
0x1092   :  { %v13393_v37 = vadd.f32 %v16819_v32, %v21944_v27  ;;  %v16821_v15 = vadd.f32 %v13202_v63, %v22795_v53  ;;  %v22806_v32 = vld [vmem:[#allocation116_spill] sm:$0xff] }
0x1093   :  { %18261 = vtanh.f32 %v13395_v59  ;;  %v13396_v12 = vadd.f32 %v16820_v0, %v21944_v27  ;;  %v22807_v0 = vld [vmem:[#allocation117_spill] sm:$0xff] }
0x1094   :  { %18263 = vtanh.f32 %v13393_v37  ;;  %v13394_v22 = vadd.f32 %v16821_v15, %v21944_v27 }
0x1095   :  { %v18254_v41 = vpop.eup %18253  ;;  %18265 = vtanh.f32 %v13396_v12 }
0x1096   :  { %v18256_v18 = vpop.eup %18255  ;;  %13520 = vst.msk [vmem:[%s22347_s17 + $0x150] sm:$0xff] %vm13477_vm10, %v18254_v41  ;;  %18267 = vtanh.f32 %v13394_v22  ;;  %v16678_v14 = vpop.f32.mrb[72].mxu1 }
0x1097   :  { %v18258_v50 = vpop.eup %18257  ;;  %13518 = vst.msk [vmem:[%s22347_s17 + $0x140] sm:$0xff] %vm13477_vm10, %v18256_v18  ;;  %v16822_v8 = vadd.f32 %v16678_v14, %v22796_v56  ;;  %v13215_v25 = vpop.f32.mrb[73].mxu1  ;;  %v22808_v18 = vld [vmem:[#allocation118_spill] sm:$0xff] }
0x1098   :  { %v18260_v58 = vpop.eup %18259  ;;  %13521 = vst.msk [vmem:[%s22347_s17 + $0x158] sm:$0xff] %vm13477_vm10, %v18258_v50  ;;  %v16823_v21 = vadd.f32 %v13215_v25, %v22797_v55  ;;  %v16679_v40 = vpop.f32.mrb[74].mxu1 }
0x1099   :  { %13519 = vst.msk [vmem:[%s22347_s17 + $0x148] sm:$0xff] %vm13477_vm10, %v18260_v58  ;;  %v13399_v26 = vadd.f32 %v16822_v8, %v21944_v27  ;;  %v16824_v24 = vadd.f32 %v16679_v40, %v22798_v11  ;;  %v13218_v3 = vpop.f32.mrb[75].mxu1  ;;  %v22809_v8 = vld [vmem:[#allocation119_spill] sm:$0xff] }
0x109a   :  { %v13397_v54 = vadd.f32 %v16823_v21, %v21944_v27  ;;  %v16825_v51 = vadd.f32 %v13218_v3, %v22799_v31  ;;  %v22810_v21 = vld [vmem:[#allocation120_spill] sm:$0xff] }
0x109b   :  { %18269 = vtanh.f32 %v13399_v26  ;;  %v13400_v46 = vadd.f32 %v16824_v24, %v21944_v27  ;;  %v22811_v24 = vld [vmem:[#allocation121_spill] sm:$0xff] }
0x109c   :  { %18271 = vtanh.f32 %v13397_v54  ;;  %v13398_v1 = vadd.f32 %v16825_v51, %v21944_v27 }
0x109d   :  { %v18262_v44 = vpop.eup %18261  ;;  %18273 = vtanh.f32 %v13400_v46 }
0x109e   :  { %v18264_v33 = vpop.eup %18263  ;;  %13524 = vst.msk [vmem:[%s22347_s17 + $0x170] sm:$0xff] %vm13477_vm10, %v18262_v44  ;;  %18275 = vtanh.f32 %v13398_v1  ;;  %v16682_v43 = vpop.f32.mrb[76].mxu1 }
0x109f   :  { %v18266_v13 = vpop.eup %18265  ;;  %13522 = vst.msk [vmem:[%s22347_s17 + $0x160] sm:$0xff] %vm13477_vm10, %v18264_v33  ;;  %v16826_v47 = vadd.f32 %v16682_v43, %v22800_v10  ;;  %v13231_v38 = vpop.f32.mrb[77].mxu1 }
0x10a0   :  { %v18268_v52 = vpop.eup %18267  ;;  %13525 = vst.msk [vmem:[%s22347_s17 + $0x178] sm:$0xff] %vm13477_vm10, %v18266_v13  ;;  %v16827_v39 = vadd.f32 %v13231_v38, %v22801_v20  ;;  %v16683_v57 = vpop.f32.mrb[78].mxu1 }
0x10a1   :  { %13523 = vst.msk [vmem:[%s22347_s17 + $0x168] sm:$0xff] %vm13477_vm10, %v18268_v52  ;;  %v13403_v61 = vadd.f32 %v16826_v47, %v21944_v27  ;;  %v16828_v23 = vadd.f32 %v16683_v57, %v22802_v5  ;;  %v13234_v19 = vpop.f32.mrb[79].mxu1 }
0x10a2   :  { %v13401_v2 = vadd.f32 %v16827_v39, %v21944_v27  ;;  %v16829_v7 = vadd.f32 %v13234_v19, %v22803_v48 }
0x10a3   :  { %18277 = vtanh.f32 %v13403_v61  ;;  %v13404_v29 = vadd.f32 %v16828_v23, %v21944_v27 }
0x10a4   :  { %18279 = vtanh.f32 %v13401_v2  ;;  %v13402_v34 = vadd.f32 %v16829_v7, %v21944_v27 }
0x10a5   :  { %v18270_v62 = vpop.eup %18269  ;;  %18281 = vtanh.f32 %v13404_v29 }
0x10a6   :  { %v18272_v49 = vpop.eup %18271  ;;  %13528 = vst.msk [vmem:[%s22347_s17 + $0x190] sm:$0xff] %vm13477_vm10, %v18270_v62  ;;  %18283 = vtanh.f32 %v13402_v34  ;;  %v16686_v17 = vpop.f32.mrb[80].mxu1 }
0x10a7   :  { %v18274_v36 = vpop.eup %18273  ;;  %13526 = vst.msk [vmem:[%s22347_s17 + $0x180] sm:$0xff] %vm13477_vm10, %v18272_v49  ;;  %v16830_v60 = vadd.f32 %v16686_v17, %v22804_v28  ;;  %v13247_v42 = vpop.f32.mrb[81].mxu1 }
0x10a8   :  { %v18276_v16 = vpop.eup %18275  ;;  %13529 = vst.msk [vmem:[%s22347_s17 + $0x198] sm:$0xff] %vm13477_vm10, %v18274_v36  ;;  %v16831_v6 = vadd.f32 %v13247_v42, %v22805_v35  ;;  %v16687_v4 = vpop.f32.mrb[82].mxu1 }
0x10a9   :  { %13527 = vst.msk [vmem:[%s22347_s17 + $0x188] sm:$0xff] %vm13477_vm10, %v18276_v16  ;;  %v13407_v9 = vadd.f32 %v16830_v60, %v21944_v27  ;;  %v16832_v30 = vadd.f32 %v16687_v4, %v22806_v32  ;;  %v13250_v59 = vpop.f32.mrb[83].mxu1 }
0x10aa   :  { %v13405_v45 = vadd.f32 %v16831_v6, %v21944_v27  ;;  %v16833_v63 = vadd.f32 %v13250_v59, %v22807_v0 }
0x10ab   :  { %18285 = vtanh.f32 %v13407_v9  ;;  %v13408_v37 = vadd.f32 %v16832_v30, %v21944_v27 }
0x10ac   :  { %18287 = vtanh.f32 %v13405_v45  ;;  %v13406_v53 = vadd.f32 %v16833_v63, %v21944_v27 }
0x10ad   :  { %v18278_v15 = vpop.eup %18277  ;;  %18289 = vtanh.f32 %v13408_v37 }
0x10ae   :  { %v18280_v12 = vpop.eup %18279  ;;  %13532 = vst.msk [vmem:[%s22347_s17 + $0x1b0] sm:$0xff] %vm13477_vm10, %v18278_v15  ;;  %18291 = vtanh.f32 %v13406_v53  ;;  %v16690_v22 = vpop.f32.mrb[84].mxu1 }
0x10af   :  { %v18282_v41 = vpop.eup %18281  ;;  %13530 = vst.msk [vmem:[%s22347_s17 + $0x1a0] sm:$0xff] %vm13477_vm10, %v18280_v12  ;;  %v16834_v14 = vadd.f32 %v16690_v22, %v22808_v18  ;;  %v13263_v50 = vpop.f32.mrb[85].mxu1 }
0x10b0   :  { %v18284_v56 = vpop.eup %18283  ;;  %13533 = vst.msk [vmem:[%s22347_s17 + $0x1b8] sm:$0xff] %vm13477_vm10, %v18282_v41  ;;  %v16835_v25 = vadd.f32 %v13263_v50, %v22809_v8  ;;  %v16691_v58 = vpop.f32.mrb[86].mxu1 }
0x10b1   :  { %13531 = vst.msk [vmem:[%s22347_s17 + $0x1a8] sm:$0xff] %vm13477_vm10, %v18284_v56  ;;  %v13411_v55 = vadd.f32 %v16834_v14, %v21944_v27  ;;  %v16836_v40 = vadd.f32 %v16691_v58, %v22810_v21  ;;  %v13266_v26 = vpop.f32.mrb[87].mxu1 }
0x10b2   :  { %v13409_v11 = vadd.f32 %v16835_v25, %v21944_v27  ;;  %v16837_v3 = vadd.f32 %v13266_v26, %v22811_v24 }
0x10b3   :  { %18293 = vtanh.f32 %v13411_v55  ;;  %v13412_v54 = vadd.f32 %v16836_v40, %v21944_v27 }
0x10b4   :  { %18295 = vtanh.f32 %v13409_v11  ;;  %v13410_v31 = vadd.f32 %v16837_v3, %v21944_v27 }
0x10b5   :  { %v18286_v51 = vpop.eup %18285  ;;  %18297 = vtanh.f32 %v13412_v54 }
0x10b6   :  { %v18288_v46 = vpop.eup %18287  ;;  %13536 = vst.msk [vmem:[%s22347_s17 + $0x1d0] sm:$0xff] %vm13477_vm10, %v18286_v51  ;;  %18299 = vtanh.f32 %v13410_v31 }
0x10b7   :  { %v18290_v1 = vpop.eup %18289  ;;  %13534 = vst.msk [vmem:[%s22347_s17 + $0x1c0] sm:$0xff] %vm13477_vm10, %v18288_v46 }
0x10b8   :  { %v18292_v44 = vpop.eup %18291  ;;  %13537 = vst.msk [vmem:[%s22347_s17 + $0x1d8] sm:$0xff] %vm13477_vm10, %v18290_v1 }
0x10b9   :  { %13535 = vst.msk [vmem:[%s22347_s17 + $0x1c8] sm:$0xff] %vm13477_vm10, %v18292_v44 }
0x10bd   :  { %v18294_v27 = vpop.eup %18293 }
0x10be   :  { %v18296_v33 = vpop.eup %18295  ;;  %13540 = vst.msk [vmem:[%s22347_s17 + $0x1f0] sm:$0xff] %vm13477_vm10, %v18294_v27 }
0x10bf   :  { %v18298_v43 = vpop.eup %18297  ;;  %13538 = vst.msk [vmem:[%s22347_s17 + $0x1e0] sm:$0xff] %vm13477_vm10, %v18296_v33 }
0x10c0   :  { %v18300_v13 = vpop.eup %18299  ;;  %13541 = vst.msk [vmem:[%s22347_s17 + $0x1f8] sm:$0xff] %vm13477_vm10, %v18298_v43 }
0x10c1   :  { %13539 = vst.msk [vmem:[%s22347_s17 + $0x1e8] sm:$0xff] %vm13477_vm10, %v18300_v13 }
0x10c2   :  { %13546 = vsyncpa [#allocation3], 1 }
0x10c3   :  { %13547 = vsyncpa [#allocation5], 1 }
0x10c4   :  { %13548 = vsyncpa [#allocation8], 1 }

</bundles_post_ra>
